<compile_context>
chip_gen: v7x
topology: tpu7x:2x2x1
jax: 0.10.0
libtpu: 0.0.40
codegen_flags: <defaults>
</compile_context>

<pallas_src>
import functools
import math

import jax
import jax.numpy as jnp
from jax import lax
from jax.experimental import pallas as pl
from jax.experimental.pallas import tpu as pltpu

GCT_EPS = 1e-5   # GCT default epsilon
GN_EPS = 1e-5    # nn.GroupNorm default eps


def _round_up(x, m):
    return ((x + m - 1) // m) * m


# --------------------------------------------------------------------------------------
# Fused kernel: [conv3x3 + GCT + GroupNorm + ReLU] x2  + MaxPool2x2, one batch element/step
# --------------------------------------------------------------------------------------
def _encoder_block_kernel(cout, ng, xpad_ref, w1_ref, p1_ref, w2_ref, p2_ref,
                          gavg_ref, y_ref, pool_ref, h1_ref):
    # xpad_ref: (1, H+2, W+2, Cp)   w*_ref: (9*Cp, Cp)   p*_ref: (8, Cp) packed per-channel params
    # gavg_ref: (Cp, Cp) group-averaging matrix   y_ref: (1, H*W, Cp)   pool_ref: (1, H*W/4, Cp)
    # h1_ref:   VMEM scratch (H+2, W+2, Cp) holding the halo-padded stage-1 activation
    Hp, Wp, Cp = xpad_ref.shape[1], xpad_ref.shape[2], xpad_ref.shape[3]
    H, W = Hp - 2, Wp - 2
    HW = H * W

    def conv_gct_gn_relu(tap, w_ref, p_ref):
        # ---- conv3x3 (halo already present in the source) as ONE im2col matmul on the MXU ----
        patch = jnp.concatenate(
            [tap(kh, kw) for kh in range(3) for kw in range(3)], axis=-1)      # (HW, 9*Cp)
        x = jnp.dot(patch, w_ref[...], preferred_element_type=jnp.float32)     # (HW, Cp)
        x = x + p_ref[0:1, :]                                                  # conv bias

        # ---- GCT (mode='l2'); padded channels have alpha=beta=0 -> embedding 0, gate 1 ----
        ssq = jnp.sum(x * x, axis=0, keepdims=True)                            # (1, Cp)
        emb = jnp.sqrt(ssq + GCT_EPS) * p_ref[1:2, :]
        mean_e2 = jnp.sum(emb * emb, axis=1, keepdims=True) * (1.0 / cout)     # mean over real C
        norm = p_ref[2:3, :] * lax.rsqrt(mean_e2 + GCT_EPS)
        x = x * (1.0 + jnp.tanh(emb * norm + p_ref[3:4, :]))

        # ---- GroupNorm(ng): group stats via the (Cp,Cp) averaging matmul, centered variance ----
        mean_c = jnp.dot(jnp.sum(x, axis=0, keepdims=True), gavg_ref[...],
                         preferred_element_type=jnp.float32)                   # per-channel group mean
        d = x - mean_c
        var_c = jnp.dot(jnp.sum(d * d, axis=0, keepdims=True), gavg_ref[...],
                        preferred_element_type=jnp.float32)                    # per-channel group var
        xn = d * (lax.rsqrt(var_c + GN_EPS) * p_ref[4:5, :]) + p_ref[5:6, :]

        # ---- ReLU ----
        return jnp.maximum(xn, 0.0)                                            # (HW, Cp)

    # Stage 1: taps come straight from the pipelined, pre-padded input block.
    a1 = conv_gct_gn_relu(
        lambda kh, kw: xpad_ref[0, kh:kh + H, kw:kw + W, :].reshape(HW, Cp),
        w1_ref, p1_ref)

    # Stage 2: keep the stage-1 activation in VMEM and build its halo there (no HBM round trip).
    h1_ref[...] = jnp.zeros_like(h1_ref)
    h1_ref[1:H + 1, 1:W + 1, :] = a1.reshape(H, W, Cp)
    a2 = conv_gct_gn_relu(
        lambda kh, kw: h1_ref[kh:kh + H, kw:kw + W, :].reshape(HW, Cp),
        w2_ref, p2_ref)

    # Lane-dense stores (last dim = Cp, a multiple of 128) of the skip output ...
    y_ref[0] = a2

    # ... and the fused MaxPool2d((2,2)) computed on the VMEM-resident activation.
    Hh, Wh = H // 2, W // 2
    t = jnp.max(a2.reshape(HW // 2, 2, Cp), axis=1)                            # pool along W
    pool_ref[0] = jnp.max(t.reshape(Hh, 2, Wh, Cp), axis=1).reshape(Hh * Wh, Cp)  # pool along H


# --------------------------------------------------------------------------------------
# encoder_block forward (NCHW in / NCHW out, like the PyTorch module)
# --------------------------------------------------------------------------------------
def encoder_block_forward(x_nchw, params, ng):
    B, Cin, H, W = x_nchw.shape
    Cout = params["stage1"]["w"].shape[-1]
    assert H % 2 == 0 and W % 2 == 0, "MaxPool2d((2,2)) expects even H, W"
    assert Cout % ng == 0, "GroupNorm expects out_c % ng == 0"
    cpg = Cout // ng
    Cp = _round_up(max(Cin, Cout), 128)            # lane-dense channel padding

    x = jnp.transpose(x_nchw, (0, 2, 3, 1)).astype(jnp.float32)            # NCHW -> NHWC
    # single pad: spatial halo for conv1 + channel zero-pad to the 128-lane boundary
    xpad = jnp.pad(x, ((0, 0), (1, 1), (1, 1), (0, Cp - Cin)))

    def pad_c(v):
        return jnp.pad(v.astype(jnp.float32),
                       [(0, 0)] * (v.ndim - 1) + [(0, Cp - v.shape[-1])])

    def pack_w(w):                                  # (3,3,Ci,Cout) -> (9*Cp, Cp), zero padded
        ci = w.shape[2]
        wf = jnp.pad(w.astype(jnp.float32),
                     ((0, 0), (0, 0), (0, Cp - ci), (0, Cp - Cout)))
        return wf.reshape(9 * Cp, Cp)

    def pack_p(p):                                  # six per-channel vectors -> one (8, Cp) tile
        rows = [p["b"], p["alpha"], p["gamma"], p["beta"], p["gn_w"], p["gn_b"]]
        return jnp.stack([pad_c(r) for r in rows]
                         + [jnp.zeros((Cp,), jnp.float32)] * 2, axis=0)

    # (Cp, Cp) group-averaging matrix:  row_vec @ gavg  ==  per-channel GroupNorm-group mean.
    ch = jnp.arange(Cp)
    same_group = (ch[:, None] // cpg) == (ch[None, :] // cpg)
    real = (ch[:, None] < Cout) & (ch[None, :] < Cout)
    gavg = jnp.where(same_group & real, 1.0 / (H * W * cpg), 0.0).astype(jnp.float32)

    w1, p1 = pack_w(params["stage1"]["w"]), pack_p(params["stage1"])
    w2, p2 = pack_w(params["stage2"]["w"]), pack_p(params["stage2"])

    Hh, Wh = H // 2, W // 2
    kernel = functools.partial(_encoder_block_kernel, Cout, ng)
    const = lambda shape: pl.BlockSpec(shape, lambda b, _s=shape: (0,) * len(_s))

    y_flat, pool_flat = pl.pallas_call(
        kernel,
        out_shape=(jax.ShapeDtypeStruct((B, H * W, Cp), jnp.float32),
                   jax.ShapeDtypeStruct((B, Hh * Wh, Cp), jnp.float32)),
        grid_spec=pltpu.PrefetchScalarGridSpec(
            num_scalar_prefetch=0,
            grid=(B,),
            in_specs=[
                pl.BlockSpec((1, H + 2, W + 2, Cp), lambda b: (b, 0, 0, 0)),   # padded input
                const((9 * Cp, Cp)), const((8, Cp)),                           # stage-1 w / params
                const((9 * Cp, Cp)), const((8, Cp)),                           # stage-2 w / params
                const((Cp, Cp)),                                               # group-averaging mat
            ],
            out_specs=[
                pl.BlockSpec((1, H * W, Cp), lambda b: (b, 0, 0)),             # skip (lane-dense)
                pl.BlockSpec((1, Hh * Wh, Cp), lambda b: (b, 0, 0)),           # pooled (lane-dense)
            ],
            scratch_shapes=[pltpu.VMEM((H + 2, W + 2, Cp), jnp.float32)],
        ),
        compiler_params=pltpu.CompilerParams(
            dimension_semantics=("parallel",),       # v7x: shard batch across both TensorCores
        ),
    )(xpad, w1, p1, w2, p2, gavg)

    y = y_flat.reshape(B, H, W, Cp)[..., :Cout]
    p = pool_flat.reshape(B, Hh, Wh, Cp)[..., :Cout]
    # TODO(synk): nn.Dropout(0.25) is identity in eval mode; training-mode random mask not reproduced.
    return jnp.transpose(y, (0, 3, 1, 2)), jnp.transpose(p, (0, 3, 1, 2))      # back to NCHW


# --------------------------------------------------------------------------------------
# Deterministic parameter init (shapes from the module __init__) + pure-JAX reference
# --------------------------------------------------------------------------------------
def init_params(key, in_c, out_c):
    ks = jax.random.split(key, 14)

    def stage(keys, cin):
        scale = 1.0 / math.sqrt(9.0 * cin)
        return dict(
            w=scale * jax.random.normal(keys[0], (3, 3, cin, out_c), jnp.float32),  # HWIO
            b=0.1 * jax.random.normal(keys[1], (out_c,), jnp.float32),
            alpha=1.0 + 0.1 * jax.random.normal(keys[2], (out_c,), jnp.float32),
            gamma=0.5 * jax.random.normal(keys[3], (out_c,), jnp.float32),
            beta=0.1 * jax.random.normal(keys[4], (out_c,), jnp.float32),
            gn_w=1.0 + 0.1 * jax.random.normal(keys[5], (out_c,), jnp.float32),
            gn_b=0.1 * jax.random.normal(keys[6], (out_c,), jnp.float32),
        )

    return dict(stage1=stage(ks[:7], in_c), stage2=stage(ks[7:], out_c))


def _ref_stage(x, p, ng):
    y = lax.conv_general_dilated(x, p["w"], (1, 1), "SAME",
                                 dimension_numbers=("NHWC", "HWIO", "NHWC"))
    y = y + p["b"].reshape(1, 1, 1, -1)
    emb = jnp.sqrt(jnp.sum(y * y, axis=(1, 2), keepdims=True) + GCT_EPS) * p["alpha"].reshape(1, 1, 1, -1)
    norm = p["gamma"].reshape(1, 1, 1, -1) / jnp.sqrt(
        jnp.mean(emb * emb, axis=3, keepdims=True) + GCT_EPS)
    y = y * (1.0 + jnp.tanh(emb * norm + p["beta"].reshape(1, 1, 1, -1)))
    B, H, W, C = y.shape
    cpg = C // ng
    yg = y.reshape(B, H, W, ng, cpg)
    mean = jnp.mean(yg, axis=(1, 2, 4), keepdims=True)
    var = jnp.mean((yg - mean) ** 2, axis=(1, 2, 4), keepdims=True)
    yn = ((yg - mean) / jnp.sqrt(var + GN_EPS)).reshape(B, H, W, C)
    yn = yn * p["gn_w"].reshape(1, 1, 1, -1) + p["gn_b"].reshape(1, 1, 1, -1)
    return jnp.maximum(yn, 0.0)


def ref_encoder_block(x_nchw, params, ng):
    x = jnp.transpose(x_nchw, (0, 2, 3, 1)).astype(jnp.float32)
    for stage in ("stage1", "stage2"):
        x = _ref_stage(x, params[stage], ng)
    B, H, W, C = x.shape
    pool = jnp.max(x.reshape(B, H // 2, 2, W // 2, 2, C), axis=(2, 4))
    return jnp.transpose(x, (0, 3, 1, 2)), jnp.transpose(pool, (0, 3, 1, 2))


if __name__ == "__main__":
    B, in_c, out_c, ng, H, W = 2, 4, 8, 2, 16, 16
    key = jax.random.PRNGKey(0)
    k_x, k_p = jax.random.split(key)
    x = jax.random.normal(k_x, (B, in_c, H, W), jnp.float32)
    params = init_params(k_p, in_c, out_c)

    skip, pooled = encoder_block_forward(x, params, ng)
    skip = jax.block_until_ready(skip)
    pooled = jax.block_until_ready(pooled)

    assert skip.shape == (B, out_c, H, W)
    assert pooled.shape == (B, out_c, H // 2, W // 2)

    # sanity check against a pure-JAX reference
    skip_ref, pooled_ref = ref_encoder_block(x, params, ng)
    assert jnp.allclose(skip, skip_ref, atol=2e-3, rtol=2e-3), "skip mismatch"
    assert jnp.allclose(pooled, pooled_ref, atol=2e-3, rtol=2e-3), "pool mismatch"

    print("KERNEL_OK")
</pallas_src>

<mosaic_0001>
module attributes {stable_mosaic.version = 11 : i64} {
  func.func @_encoder_block_kernel(%arg0: i32, %arg1: memref<1x18x18x128xf32, #tpu.memory_space<vmem>>, %arg2: memref<1152x128xf32, #tpu.memory_space<vmem>>, %arg3: memref<8x128xf32, #tpu.memory_space<vmem>>, %arg4: memref<1152x128xf32, #tpu.memory_space<vmem>>, %arg5: memref<8x128xf32, #tpu.memory_space<vmem>>, %arg6: memref<128x128xf32, #tpu.memory_space<vmem>>, %arg7: memref<1x256x128xf32, #tpu.memory_space<vmem>>, %arg8: memref<1x64x128xf32, #tpu.memory_space<vmem>>, %arg9: memref<18x18x128xf32, #tpu.memory_space<vmem>>) attributes {dimension_semantics = [#tpu.dimension_semantics<parallel>], iteration_bounds = array<i64: 2>, scalar_prefetch = 0 : i64, scratch_operands = 1 : i64, tpu.core_type = #tpu.core_type<tc>, window_params = [{transform_indices = @transform_0, window_bounds = array<i64: 1, 18, 18, 128>}, {pipeline_mode = #tpu.pipeline_mode<synchronous>, transform_indices = @transform_1, window_bounds = array<i64: 1152, 128>}, {pipeline_mode = #tpu.pipeline_mode<synchronous>, transform_indices = @transform_2, window_bounds = array<i64: 8, 128>}, {pipeline_mode = #tpu.pipeline_mode<synchronous>, transform_indices = @transform_3, window_bounds = array<i64: 1152, 128>}, {pipeline_mode = #tpu.pipeline_mode<synchronous>, transform_indices = @transform_4, window_bounds = array<i64: 8, 128>}, {pipeline_mode = #tpu.pipeline_mode<synchronous>, transform_indices = @transform_5, window_bounds = array<i64: 128, 128>}, {transform_indices = @transform_6, window_bounds = array<i64: 1, 256, 128>}, {transform_indices = @transform_7, window_bounds = array<i64: 1, 64, 128>}]} {
    %c0 = arith.constant 0 : index
    %c0_0 = arith.constant 0 : index
    %c0_1 = arith.constant 0 : index
    %c0_2 = arith.constant 0 : index
    %0 = vector.load %arg1[%c0, %c0_0, %c0_1, %c0_2] : memref<1x18x18x128xf32, #tpu.memory_space<vmem>>, vector<1x16x16x128xf32>
    %1 = vector.shape_cast %0 : vector<1x16x16x128xf32> to vector<16x16x128xf32>
    %2 = vector.shape_cast %1 : vector<16x16x128xf32> to vector<256x128xf32>
    %c0_3 = arith.constant 0 : index
    %c0_4 = arith.constant 0 : index
    %c1 = arith.constant 1 : index
    %c0_5 = arith.constant 0 : index
    %3 = vector.load %arg1[%c0_3, %c0_4, %c1, %c0_5] : memref<1x18x18x128xf32, #tpu.memory_space<vmem>>, vector<1x16x16x128xf32>
    %4 = vector.shape_cast %3 : vector<1x16x16x128xf32> to vector<16x16x128xf32>
    %5 = vector.shape_cast %4 : vector<16x16x128xf32> to vector<256x128xf32>
    %c0_6 = arith.constant 0 : index
    %c0_7 = arith.constant 0 : index
    %c2 = arith.constant 2 : index
    %c0_8 = arith.constant 0 : index
    %6 = vector.load %arg1[%c0_6, %c0_7, %c2, %c0_8] : memref<1x18x18x128xf32, #tpu.memory_space<vmem>>, vector<1x16x16x128xf32>
    %7 = vector.shape_cast %6 : vector<1x16x16x128xf32> to vector<16x16x128xf32>
    %8 = vector.shape_cast %7 : vector<16x16x128xf32> to vector<256x128xf32>
    %c0_9 = arith.constant 0 : index
    %c1_10 = arith.constant 1 : index
    %c0_11 = arith.constant 0 : index
    %c0_12 = arith.constant 0 : index
    %9 = vector.load %arg1[%c0_9, %c1_10, %c0_11, %c0_12] : memref<1x18x18x128xf32, #tpu.memory_space<vmem>>, vector<1x16x16x128xf32>
    %10 = vector.shape_cast %9 : vector<1x16x16x128xf32> to vector<16x16x128xf32>
    %11 = vector.shape_cast %10 : vector<16x16x128xf32> to vector<256x128xf32>
    %c0_13 = arith.constant 0 : index
    %c1_14 = arith.constant 1 : index
    %c1_15 = arith.constant 1 : index
    %c0_16 = arith.constant 0 : index
    %12 = vector.load %arg1[%c0_13, %c1_14, %c1_15, %c0_16] : memref<1x18x18x128xf32, #tpu.memory_space<vmem>>, vector<1x16x16x128xf32>
    %13 = vector.shape_cast %12 : vector<1x16x16x128xf32> to vector<16x16x128xf32>
    %14 = vector.shape_cast %13 : vector<16x16x128xf32> to vector<256x128xf32>
    %c0_17 = arith.constant 0 : index
    %c1_18 = arith.constant 1 : index
    %c2_19 = arith.constant 2 : index
    %c0_20 = arith.constant 0 : index
    %15 = vector.load %arg1[%c0_17, %c1_18, %c2_19, %c0_20] : memref<1x18x18x128xf32, #tpu.memory_space<vmem>>, vector<1x16x16x128xf32>
    %16 = vector.shape_cast %15 : vector<1x16x16x128xf32> to vector<16x16x128xf32>
    %17 = vector.shape_cast %16 : vector<16x16x128xf32> to vector<256x128xf32>
    %c0_21 = arith.constant 0 : index
    %c2_22 = arith.constant 2 : index
    %c0_23 = arith.constant 0 : index
    %c0_24 = arith.constant 0 : index
    %18 = vector.load %arg1[%c0_21, %c2_22, %c0_23, %c0_24] : memref<1x18x18x128xf32, #tpu.memory_space<vmem>>, vector<1x16x16x128xf32>
    %19 = vector.shape_cast %18 : vector<1x16x16x128xf32> to vector<16x16x128xf32>
    %20 = vector.shape_cast %19 : vector<16x16x128xf32> to vector<256x128xf32>
    %c0_25 = arith.constant 0 : index
    %c2_26 = arith.constant 2 : index
    %c1_27 = arith.constant 1 : index
    %c0_28 = arith.constant 0 : index
    %21 = vector.load %arg1[%c0_25, %c2_26, %c1_27, %c0_28] : memref<1x18x18x128xf32, #tpu.memory_space<vmem>>, vector<1x16x16x128xf32>
    %22 = vector.shape_cast %21 : vector<1x16x16x128xf32> to vector<16x16x128xf32>
    %23 = vector.shape_cast %22 : vector<16x16x128xf32> to vector<256x128xf32>
    %c0_29 = arith.constant 0 : index
    %c2_30 = arith.constant 2 : index
    %c2_31 = arith.constant 2 : index
    %c0_32 = arith.constant 0 : index
    %24 = vector.load %arg1[%c0_29, %c2_30, %c2_31, %c0_32] : memref<1x18x18x128xf32, #tpu.memory_space<vmem>>, vector<1x16x16x128xf32>
    %25 = vector.shape_cast %24 : vector<1x16x16x128xf32> to vector<16x16x128xf32>
    %26 = vector.shape_cast %25 : vector<16x16x128xf32> to vector<256x128xf32>
    %27 = tpu.concatenate %2, %5, %8, %11, %14, %17, %20, %23, %26 in 1 : vector<256x128xf32>, vector<256x128xf32>, vector<256x128xf32>, vector<256x128xf32>, vector<256x128xf32>, vector<256x128xf32>, vector<256x128xf32>, vector<256x128xf32>, vector<256x128xf32> -> vector<256x1152xf32>
    %c0_33 = arith.constant 0 : index
    %c0_34 = arith.constant 0 : index
    %28 = vector.load %arg2[%c0_33, %c0_34] : memref<1152x128xf32, #tpu.memory_space<vmem>>, vector<1152x128xf32>
    %cst = arith.constant dense<0.000000e+00> : vector<256x128xf32>
    %29 = tpu.matmul %27, %28, %cst {dimension_numbers = #tpu.dot_dimension_numbers<[1], [0], [0], [1], [0, 0, 1, 1], [], []>} : vector<256x1152xf32>, vector<1152x128xf32>, vector<256x128xf32> -> vector<256x128xf32>
    %c0_35 = arith.constant 0 : index
    %c0_36 = arith.constant 0 : index
    %30 = vector.load %arg3[%c0_35, %c0_36] : memref<8x128xf32, #tpu.memory_space<vmem>>, vector<1x128xf32>
    %31 = vector.broadcast %30 : vector<1x128xf32> to vector<256x128xf32>
    %32 = arith.addf %29, %31 : vector<256x128xf32>
    %33 = arith.mulf %32, %32 : vector<256x128xf32>
    %cst_37 = arith.constant dense<0.000000e+00> : vector<128xf32>
    %34 = vector.multi_reduction <add>, %33, %cst_37 [0] : vector<256x128xf32> to vector<128xf32>
    %35 = vector.shape_cast %34 : vector<128xf32> to vector<1x128xf32>
    %cst_38 = arith.constant 9.99999974E-6 : f32
    %36 = vector.broadcast %cst_38 : f32 to vector<1x128xf32>
    %37 = arith.addf %35, %36 : vector<1x128xf32>
    %38 = math.sqrt %37 : vector<1x128xf32>
    %c1_39 = arith.constant 1 : index
    %c0_40 = arith.constant 0 : index
    %39 = vector.load %arg3[%c1_39, %c0_40] : memref<8x128xf32, #tpu.memory_space<vmem>>, vector<1x128xf32>
    %40 = arith.mulf %38, %39 : vector<1x128xf32>
    %41 = arith.mulf %40, %40 : vector<1x128xf32>
    %cst_41 = arith.constant dense<0.000000e+00> : vector<1xf32>
    %42 = vector.multi_reduction <add>, %41, %cst_41 [1] : vector<1x128xf32> to vector<1xf32>
    %43 = vector.shape_cast %42 : vector<1xf32> to vector<1x1xf32>
    %cst_42 = arith.constant 1.250000e-01 : f32
    %44 = vector.broadcast %cst_42 : f32 to vector<1x1xf32>
    %45 = arith.mulf %43, %44 : vector<1x1xf32>
    %c2_43 = arith.constant 2 : index
    %c0_44 = arith.constant 0 : index
    %46 = vector.load %arg3[%c2_43, %c0_44] : memref<8x128xf32, #tpu.memory_space<vmem>>, vector<1x128xf32>
    %cst_45 = arith.constant 9.99999974E-6 : f32
    %47 = vector.broadcast %cst_45 : f32 to vector<1x1xf32>
    %48 = arith.addf %45, %47 : vector<1x1xf32>
    %49 = math.rsqrt %48 : vector<1x1xf32>
    %50 = vector.broadcast %49 : vector<1x1xf32> to vector<1x128xf32>
    %51 = arith.mulf %46, %50 : vector<1x128xf32>
    %52 = arith.mulf %40, %51 : vector<1x128xf32>
    %c3 = arith.constant 3 : index
    %c0_46 = arith.constant 0 : index
    %53 = vector.load %arg3[%c3, %c0_46] : memref<8x128xf32, #tpu.memory_space<vmem>>, vector<1x128xf32>
    %54 = arith.addf %52, %53 : vector<1x128xf32>
    %55 = math.tanh %54 : vector<1x128xf32>
    %cst_47 = arith.constant 1.000000e+00 : f32
    %56 = vector.broadcast %cst_47 : f32 to vector<1x128xf32>
    %57 = arith.addf %56, %55 : vector<1x128xf32>
    %58 = vector.broadcast %57 : vector<1x128xf32> to vector<256x128xf32>
    %59 = arith.mulf %32, %58 : vector<256x128xf32>
    %cst_48 = arith.constant dense<0.000000e+00> : vector<128xf32>
    %60 = vector.multi_reduction <add>, %59, %cst_48 [0] : vector<256x128xf32> to vector<128xf32>
    %61 = vector.shape_cast %60 : vector<128xf32> to vector<1x128xf32>
    %c0_49 = arith.constant 0 : index
    %c0_50 = arith.constant 0 : index
    %62 = vector.load %arg6[%c0_49, %c0_50] : memref<128x128xf32, #tpu.memory_space<vmem>>, vector<128x128xf32>
    %cst_51 = arith.constant dense<0.000000e+00> : vector<1x128xf32>
    %63 = tpu.matmul %61, %62, %cst_51 {dimension_numbers = #tpu.dot_dimension_numbers<[1], [0], [0], [1], [0, 0, 1, 1], [], []>} : vector<1x128xf32>, vector<128x128xf32>, vector<1x128xf32> -> vector<1x128xf32>
    %64 = vector.broadcast %63 : vector<1x128xf32> to vector<256x128xf32>
    %65 = arith.subf %59, %64 : vector<256x128xf32>
    %66 = arith.mulf %65, %65 : vector<256x128xf32>
    %cst_52 = arith.constant dense<0.000000e+00> : vector<128xf32>
    %67 = vector.multi_reduction <add>, %66, %cst_52 [0] : vector<256x128xf32> to vector<128xf32>
    %68 = vector.shape_cast %67 : vector<128xf32> to vector<1x128xf32>
    %c0_53 = arith.constant 0 : index
    %c0_54 = arith.constant 0 : index
    %69 = vector.load %arg6[%c0_53, %c0_54] : memref<128x128xf32, #tpu.memory_space<vmem>>, vector<128x128xf32>
    %cst_55 = arith.constant dense<0.000000e+00> : vector<1x128xf32>
    %70 = tpu.matmul %68, %69, %cst_55 {dimension_numbers = #tpu.dot_dimension_numbers<[1], [0], [0], [1], [0, 0, 1, 1], [], []>} : vector<1x128xf32>, vector<128x128xf32>, vector<1x128xf32> -> vector<1x128xf32>
    %cst_56 = arith.constant 9.99999974E-6 : f32
    %71 = vector.broadcast %cst_56 : f32 to vector<1x128xf32>
    %72 = arith.addf %70, %71 : vector<1x128xf32>
    %73 = math.rsqrt %72 : vector<1x128xf32>
    %c4 = arith.constant 4 : index
    %c0_57 = arith.constant 0 : index
    %74 = vector.load %arg3[%c4, %c0_57] : memref<8x128xf32, #tpu.memory_space<vmem>>, vector<1x128xf32>
    %75 = arith.mulf %73, %74 : vector<1x128xf32>
    %76 = vector.broadcast %75 : vector<1x128xf32> to vector<256x128xf32>
    %77 = arith.mulf %65, %76 : vector<256x128xf32>
    %c5 = arith.constant 5 : index
    %c0_58 = arith.constant 0 : index
    %78 = vector.load %arg3[%c5, %c0_58] : memref<8x128xf32, #tpu.memory_space<vmem>>, vector<1x128xf32>
    %79 = vector.broadcast %78 : vector<1x128xf32> to vector<256x128xf32>
    %80 = arith.addf %77, %79 : vector<256x128xf32>
    %cst_59 = arith.constant 0.000000e+00 : f32
    %81 = vector.broadcast %cst_59 : f32 to vector<256x128xf32>
    %82 = arith.maximumf %80, %81 : vector<256x128xf32>
    %cst_60 = arith.constant 0.000000e+00 : f32
    %83 = vector.broadcast %cst_60 : f32 to vector<18x18x128xf32>
    %c0_61 = arith.constant 0 : index
    %c0_62 = arith.constant 0 : index
    %c0_63 = arith.constant 0 : index
    %84 = vector.load %arg9[%c0_61, %c0_62, %c0_63] : memref<18x18x128xf32, #tpu.memory_space<vmem>>, vector<18x18x128xf32>
    tpu.vector_store %arg9[%c0_61, %c0_62, %c0_63], %83 {strides = array<i32>} : memref<18x18x128xf32, #tpu.memory_space<vmem>>, vector<18x18x128xf32>,
    %85 = vector.shape_cast %82 : vector<256x128xf32> to vector<16x16x128xf32>
    %c1_64 = arith.constant 1 : index
    %c1_65 = arith.constant 1 : index
    %c0_66 = arith.constant 0 : index
    %86 = vector.load %arg9[%c1_64, %c1_65, %c0_66] : memref<18x18x128xf32, #tpu.memory_space<vmem>>, vector<16x16x128xf32>
    tpu.vector_store %arg9[%c1_64, %c1_65, %c0_66], %85 {strides = array<i32>} : memref<18x18x128xf32, #tpu.memory_space<vmem>>, vector<16x16x128xf32>,
    %c0_67 = arith.constant 0 : index
    %c0_68 = arith.constant 0 : index
    %c0_69 = arith.constant 0 : index
    %87 = vector.load %arg9[%c0_67, %c0_68, %c0_69] : memref<18x18x128xf32, #tpu.memory_space<vmem>>, vector<16x16x128xf32>
    %88 = vector.shape_cast %87 : vector<16x16x128xf32> to vector<256x128xf32>
    %c0_70 = arith.constant 0 : index
    %c1_71 = arith.constant 1 : index
    %c0_72 = arith.constant 0 : index
    %89 = vector.load %arg9[%c0_70, %c1_71, %c0_72] : memref<18x18x128xf32, #tpu.memory_space<vmem>>, vector<16x16x128xf32>
    %90 = vector.shape_cast %89 : vector<16x16x128xf32> to vector<256x128xf32>
    %c0_73 = arith.constant 0 : index
    %c2_74 = arith.constant 2 : index
    %c0_75 = arith.constant 0 : index
    %91 = vector.load %arg9[%c0_73, %c2_74, %c0_75] : memref<18x18x128xf32, #tpu.memory_space<vmem>>, vector<16x16x128xf32>
    %92 = vector.shape_cast %91 : vector<16x16x128xf32> to vector<256x128xf32>
    %c1_76 = arith.constant 1 : index
    %c0_77 = arith.constant 0 : index
    %c0_78 = arith.constant 0 : index
    %93 = vector.load %arg9[%c1_76, %c0_77, %c0_78] : memref<18x18x128xf32, #tpu.memory_space<vmem>>, vector<16x16x128xf32>
    %94 = vector.shape_cast %93 : vector<16x16x128xf32> to vector<256x128xf32>
    %c1_79 = arith.constant 1 : index
    %c1_80 = arith.constant 1 : index
    %c0_81 = arith.constant 0 : index
    %95 = vector.load %arg9[%c1_79, %c1_80, %c0_81] : memref<18x18x128xf32, #tpu.memory_space<vmem>>, vector<16x16x128xf32>
    %96 = vector.shape_cast %95 : vector<16x16x128xf32> to vector<256x128xf32>
    %c1_82 = arith.constant 1 : index
    %c2_83 = arith.constant 2 : index
    %c0_84 = arith.constant 0 : index
    %97 = vector.load %arg9[%c1_82, %c2_83, %c0_84] : memref<18x18x128xf32, #tpu.memory_space<vmem>>, vector<16x16x128xf32>
    %98 = vector.shape_cast %97 : vector<16x16x128xf32> to vector<256x128xf32>
    %c2_85 = arith.constant 2 : index
    %c0_86 = arith.constant 0 : index
    %c0_87 = arith.constant 0 : index
    %99 = vector.load %arg9[%c2_85, %c0_86, %c0_87] : memref<18x18x128xf32, #tpu.memory_space<vmem>>, vector<16x16x128xf32>
    %100 = vector.shape_cast %99 : vector<16x16x128xf32> to vector<256x128xf32>
    %c2_88 = arith.constant 2 : index
    %c1_89 = arith.constant 1 : index
    %c0_90 = arith.constant 0 : index
    %101 = vector.load %arg9[%c2_88, %c1_89, %c0_90] : memref<18x18x128xf32, #tpu.memory_space<vmem>>, vector<16x16x128xf32>
    %102 = vector.shape_cast %101 : vector<16x16x128xf32> to vector<256x128xf32>
    %c2_91 = arith.constant 2 : index
    %c2_92 = arith.constant 2 : index
    %c0_93 = arith.constant 0 : index
    %103 = vector.load %arg9[%c2_91, %c2_92, %c0_93] : memref<18x18x128xf32, #tpu.memory_space<vmem>>, vector<16x16x128xf32>
    %104 = vector.shape_cast %103 : vector<16x16x128xf32> to vector<256x128xf32>
    %105 = tpu.concatenate %88, %90, %92, %94, %96, %98, %100, %102, %104 in 1 : vector<256x128xf32>, vector<256x128xf32>, vector<256x128xf32>, vector<256x128xf32>, vector<256x128xf32>, vector<256x128xf32>, vector<256x128xf32>, vector<256x128xf32>, vector<256x128xf32> -> vector<256x1152xf32>
    %c0_94 = arith.constant 0 : index
    %c0_95 = arith.constant 0 : index
    %106 = vector.load %arg4[%c0_94, %c0_95] : memref<1152x128xf32, #tpu.memory_space<vmem>>, vector<1152x128xf32>
    %cst_96 = arith.constant dense<0.000000e+00> : vector<256x128xf32>
    %107 = tpu.matmul %105, %106, %cst_96 {dimension_numbers = #tpu.dot_dimension_numbers<[1], [0], [0], [1], [0, 0, 1, 1], [], []>} : vector<256x1152xf32>, vector<1152x128xf32>, vector<256x128xf32> -> vector<256x128xf32>
    %c0_97 = arith.constant 0 : index
    %c0_98 = arith.constant 0 : index
    %108 = vector.load %arg5[%c0_97, %c0_98] : memref<8x128xf32, #tpu.memory_space<vmem>>, vector<1x128xf32>
    %109 = vector.broadcast %108 : vector<1x128xf32> to vector<256x128xf32>
    %110 = arith.addf %107, %109 : vector<256x128xf32>
    %111 = arith.mulf %110, %110 : vector<256x128xf32>
    %cst_99 = arith.constant dense<0.000000e+00> : vector<128xf32>
    %112 = vector.multi_reduction <add>, %111, %cst_99 [0] : vector<256x128xf32> to vector<128xf32>
    %113 = vector.shape_cast %112 : vector<128xf32> to vector<1x128xf32>
    %cst_100 = arith.constant 9.99999974E-6 : f32
    %114 = vector.broadcast %cst_100 : f32 to vector<1x128xf32>
    %115 = arith.addf %113, %114 : vector<1x128xf32>
    %116 = math.sqrt %115 : vector<1x128xf32>
    %c1_101 = arith.constant 1 : index
    %c0_102 = arith.constant 0 : index
    %117 = vector.load %arg5[%c1_101, %c0_102] : memref<8x128xf32, #tpu.memory_space<vmem>>, vector<1x128xf32>
    %118 = arith.mulf %116, %117 : vector<1x128xf32>
    %119 = arith.mulf %118, %118 : vector<1x128xf32>
    %cst_103 = arith.constant dense<0.000000e+00> : vector<1xf32>
    %120 = vector.multi_reduction <add>, %119, %cst_103 [1] : vector<1x128xf32> to vector<1xf32>
    %121 = vector.shape_cast %120 : vector<1xf32> to vector<1x1xf32>
    %cst_104 = arith.constant 1.250000e-01 : f32
    %122 = vector.broadcast %cst_104 : f32 to vector<1x1xf32>
    %123 = arith.mulf %121, %122 : vector<1x1xf32>
    %c2_105 = arith.constant 2 : index
    %c0_106 = arith.constant 0 : index
    %124 = vector.load %arg5[%c2_105, %c0_106] : memref<8x128xf32, #tpu.memory_space<vmem>>, vector<1x128xf32>
    %cst_107 = arith.constant 9.99999974E-6 : f32
    %125 = vector.broadcast %cst_107 : f32 to vector<1x1xf32>
    %126 = arith.addf %123, %125 : vector<1x1xf32>
    %127 = math.rsqrt %126 : vector<1x1xf32>
    %128 = vector.broadcast %127 : vector<1x1xf32> to vector<1x128xf32>
    %129 = arith.mulf %124, %128 : vector<1x128xf32>
    %130 = arith.mulf %118, %129 : vector<1x128xf32>
    %c3_108 = arith.constant 3 : index
    %c0_109 = arith.constant 0 : index
    %131 = vector.load %arg5[%c3_108, %c0_109] : memref<8x128xf32, #tpu.memory_space<vmem>>, vector<1x128xf32>
    %132 = arith.addf %130, %131 : vector<1x128xf32>
    %133 = math.tanh %132 : vector<1x128xf32>
    %cst_110 = arith.constant 1.000000e+00 : f32
    %134 = vector.broadcast %cst_110 : f32 to vector<1x128xf32>
    %135 = arith.addf %134, %133 : vector<1x128xf32>
    %136 = vector.broadcast %135 : vector<1x128xf32> to vector<256x128xf32>
    %137 = arith.mulf %110, %136 : vector<256x128xf32>
    %cst_111 = arith.constant dense<0.000000e+00> : vector<128xf32>
    %138 = vector.multi_reduction <add>, %137, %cst_111 [0] : vector<256x128xf32> to vector<128xf32>
    %139 = vector.shape_cast %138 : vector<128xf32> to vector<1x128xf32>
    %c0_112 = arith.constant 0 : index
    %c0_113 = arith.constant 0 : index
    %140 = vector.load %arg6[%c0_112, %c0_113] : memref<128x128xf32, #tpu.memory_space<vmem>>, vector<128x128xf32>
    %cst_114 = arith.constant dense<0.000000e+00> : vector<1x128xf32>
    %141 = tpu.matmul %139, %140, %cst_114 {dimension_numbers = #tpu.dot_dimension_numbers<[1], [0], [0], [1], [0, 0, 1, 1], [], []>} : vector<1x128xf32>, vector<128x128xf32>, vector<1x128xf32> -> vector<1x128xf32>
    %142 = vector.broadcast %141 : vector<1x128xf32> to vector<256x128xf32>
    %143 = arith.subf %137, %142 : vector<256x128xf32>
    %144 = arith.mulf %143, %143 : vector<256x128xf32>
    %cst_115 = arith.constant dense<0.000000e+00> : vector<128xf32>
    %145 = vector.multi_reduction <add>, %144, %cst_115 [0] : vector<256x128xf32> to vector<128xf32>
    %146 = vector.shape_cast %145 : vector<128xf32> to vector<1x128xf32>
    %c0_116 = arith.constant 0 : index
    %c0_117 = arith.constant 0 : index
    %147 = vector.load %arg6[%c0_116, %c0_117] : memref<128x128xf32, #tpu.memory_space<vmem>>, vector<128x128xf32>
    %cst_118 = arith.constant dense<0.000000e+00> : vector<1x128xf32>
    %148 = tpu.matmul %146, %147, %cst_118 {dimension_numbers = #tpu.dot_dimension_numbers<[1], [0], [0], [1], [0, 0, 1, 1], [], []>} : vector<1x128xf32>, vector<128x128xf32>, vector<1x128xf32> -> vector<1x128xf32>
    %cst_119 = arith.constant 9.99999974E-6 : f32
    %149 = vector.broadcast %cst_119 : f32 to vector<1x128xf32>
    %150 = arith.addf %148, %149 : vector<1x128xf32>
    %151 = math.rsqrt %150 : vector<1x128xf32>
    %c4_120 = arith.constant 4 : index
    %c0_121 = arith.constant 0 : index
    %152 = vector.load %arg5[%c4_120, %c0_121] : memref<8x128xf32, #tpu.memory_space<vmem>>, vector<1x128xf32>
    %153 = arith.mulf %151, %152 : vector<1x128xf32>
    %154 = vector.broadcast %153 : vector<1x128xf32> to vector<256x128xf32>
    %155 = arith.mulf %143, %154 : vector<256x128xf32>
    %c5_122 = arith.constant 5 : index
    %c0_123 = arith.constant 0 : index
    %156 = vector.load %arg5[%c5_122, %c0_123] : memref<8x128xf32, #tpu.memory_space<vmem>>, vector<1x128xf32>
    %157 = vector.broadcast %156 : vector<1x128xf32> to vector<256x128xf32>
    %158 = arith.addf %155, %157 : vector<256x128xf32>
    %cst_124 = arith.constant 0.000000e+00 : f32
    %159 = vector.broadcast %cst_124 : f32 to vector<256x128xf32>
    %160 = arith.maximumf %158, %159 : vector<256x128xf32>
    %c0_125 = arith.constant 0 : index
    %c0_126 = arith.constant 0 : index
    %c0_127 = arith.constant 0 : index
    %161 = vector.load %arg7[%c0_125, %c0_126, %c0_127] : memref<1x256x128xf32, #tpu.memory_space<vmem>>, vector<1x256x128xf32>
    %162 = vector.shape_cast %161 : vector<1x256x128xf32> to vector<256x128xf32>
    %163 = vector.shape_cast %160 : vector<256x128xf32> to vector<1x256x128xf32>
    tpu.vector_store %arg7[%c0_125, %c0_126, %c0_127], %163 {strides = array<i32>} : memref<1x256x128xf32, #tpu.memory_space<vmem>>, vector<1x256x128xf32>,
    %164 = vector.shape_cast %160 : vector<256x128xf32> to vector<128x2x128xf32>
    %cst_128 = arith.constant dense<0xFF800000> : vector<128x128xf32>
    %165 = vector.multi_reduction <maximumf>, %164, %cst_128 [1] : vector<128x2x128xf32> to vector<128x128xf32>
    %166 = vector.shape_cast %165 : vector<128x128xf32> to vector<8x2x8x128xf32>
    %cst_129 = arith.constant dense<0xFF800000> : vector<8x8x128xf32>
    %167 = vector.multi_reduction <maximumf>, %166, %cst_129 [1] : vector<8x2x8x128xf32> to vector<8x8x128xf32>
    %168 = vector.shape_cast %167 : vector<8x8x128xf32> to vector<64x128xf32>
    %c0_130 = arith.constant 0 : index
    %c0_131 = arith.constant 0 : index
    %c0_132 = arith.constant 0 : index
    %169 = vector.load %arg8[%c0_130, %c0_131, %c0_132] : memref<1x64x128xf32, #tpu.memory_space<vmem>>, vector<1x64x128xf32>
    %170 = vector.shape_cast %169 : vector<1x64x128xf32> to vector<64x128xf32>
    %171 = vector.shape_cast %168 : vector<64x128xf32> to vector<1x64x128xf32>
    tpu.vector_store %arg8[%c0_130, %c0_131, %c0_132], %171 {strides = array<i32>} : memref<1x64x128xf32, #tpu.memory_space<vmem>>, vector<1x64x128xf32>,
    return
  }
  func.func @transform_0(%arg0: i32) -> (i32, i32, i32, i32) {
    %c0_i32 = arith.constant 0 : i32
    %c0_i32_0 = arith.constant 0 : i32
    %c0_i32_1 = arith.constant 0 : i32
    %c0_i32_2 = arith.constant 0 : i32
    return %arg0, %c0_i32, %c0_i32_0, %c0_i32_1 : i32, i32, i32, i32
  }
  func.func @transform_1(%arg0: i32) -> (i32, i32) {
    %c0_i32 = arith.constant 0 : i32
    %c0_i32_0 = arith.constant 0 : i32
    %c0_i32_1 = arith.constant 0 : i32
    return %c0_i32, %c0_i32_0 : i32, i32
  }
  func.func @transform_2(%arg0: i32) -> (i32, i32) {
    %c0_i32 = arith.constant 0 : i32
    %c0_i32_0 = arith.constant 0 : i32
    %c0_i32_1 = arith.constant 0 : i32
    return %c0_i32, %c0_i32_0 : i32, i32
  }
  func.func @transform_3(%arg0: i32) -> (i32, i32) {
    %c0_i32 = arith.constant 0 : i32
    %c0_i32_0 = arith.constant 0 : i32
    %c0_i32_1 = arith.constant 0 : i32
    return %c0_i32, %c0_i32_0 : i32, i32
  }
  func.func @transform_4(%arg0: i32) -> (i32, i32) {
    %c0_i32 = arith.constant 0 : i32
    %c0_i32_0 = arith.constant 0 : i32
    %c0_i32_1 = arith.constant 0 : i32
    return %c0_i32, %c0_i32_0 : i32, i32
  }
  func.func @transform_5(%arg0: i32) -> (i32, i32) {
    %c0_i32 = arith.constant 0 : i32
    %c0_i32_0 = arith.constant 0 : i32
    %c0_i32_1 = arith.constant 0 : i32
    return %c0_i32, %c0_i32_0 : i32, i32
  }
  func.func @transform_6(%arg0: i32) -> (i32, i32, i32) {
    %c0_i32 = arith.constant 0 : i32
    %c0_i32_0 = arith.constant 0 : i32
    %c0_i32_1 = arith.constant 0 : i32
    return %arg0, %c0_i32, %c0_i32_0 : i32, i32, i32
  }
  func.func @transform_7(%arg0: i32) -> (i32, i32, i32) {
    %c0_i32 = arith.constant 0 : i32
    %c0_i32_0 = arith.constant 0 : i32
    %c0_i32_1 = arith.constant 0 : i32
    return %arg0, %c0_i32, %c0_i32_0 : i32, i32, i32
  }
}

</mosaic_0001>

<bundles_post_ra>
// kernel: tpu_custom_call.1
= control target key start
LH: loop header
LB: loop body
LE: loop exit
PB: predicated region body
PF: predicated region fallthrough
CT: control target
= control target key end

     0   :  { %13 = vsyncpa [#allocation4], 0  ;;  %s13428_s0 = inlined_call_operand.vmem [shape: f32[2,18,18,128], index: 0, kind: input, shape index: {}]   ;;  %s13429_s1 = inlined_call_operand.vmem [shape: f32[1152,128], index: 1, kind: input, shape index: {}]   ;;  %s13430_s2 = inlined_call_operand.vmem [shape: f32[8,128], index: 2, kind: input, shape index: {}]   ;;  %s13431_s3 = inlined_call_operand.hbm [shape: f32[1152,128], index: 3, kind: input, shape index: {}]   ;;  %s13432_s4 = inlined_call_operand.vmem [shape: f32[8,128], index: 4, kind: input, shape index: {}]   ;;  %s13433_s5 = inlined_call_operand.vmem [shape: f32[128,128], index: 5, kind: input, shape index: {}]   ;;  %s13434_s6 = inlined_call_operand.hbm [shape: f32[2,256,128], index: 6, kind: output, shape index: {0}]   ;;  %s13435_s7 = inlined_call_operand.hbm [shape: f32[2,64,128], index: 7, kind: output, shape index: {1}]  }
   0x1   :  { %14 = vsyncpa [#allocation5], 0 }
   0x2   :  { %16 = vsyncpa [#allocation5 + $0x1], 0 }
   0x3   :  { %17 = vsyncpa [#allocation8], 0 }
   0x4   :  { %19 = vsyncpa [#allocation8 + $0x1], 0  ;;  %s8501_s24 = smov 0   ;;  %s8503_s25 = smov 0  }
   0x5   :  { %s8505_s26 = smov 0   ;;  %s8507_s27 = smov 0  }
   0x6 LB: > { %s8522_s28 = sadd.s32 4294967295, %s8448_s27   ;;  %s6569_s29 = sadd.s32 4294967294, %s8448_s27   ;;  %s8448_s27 = sphi %s8507_s27, %s14047_s27   ;;  %s8444_s26 = sphi %s8505_s26, %s14046_s26   ;;  %s8440_s25 = sphi %s8503_s25, %s14045_s25   ;;  %s8436_s24 = sphi %s8501_s24, %s14044_s24  }
   0x7   : > { %s8526_s30 = sadd.s32 1, %s8448_s27   ;;  %s163_s8 = sadd.s32 1, %s8444_s26 }
   0x8   : > { %s160_s9 = ssub.s32 %s8448_s27, %s8526_s30  ;;  %p173_p0 = scmp.ne.s32.totalorder %s8444_s26, %s8440_s25 }
   0x9   : > { %p161_p1 = scmp.eq.s32.totalorder %s160_s9, 0  ;;  %p174_p2 = scmp.eq.s32.totalorder %s8522_s28, 1 }
   0xa   : > { %p179_p3 = scmp.ne.s32.totalorder %s8440_s25, %s8436_s24  ;;  %p180_p4 = scmp.eq.s32.totalorder %s6569_s29, 1 }
   0xb   : > { %s8537_s10 = scalar_select %p161_p1, %s8444_s26, %s163_s8  }
   0xc   : > { %p8539_p5 = por %p174_p2, %p173_p0  ;;  %p8543_p6 = por %p180_p4, %p179_p3 }
   0xd   : > { %p6570_p7 = scmp.ge.s32.totalorder %s8448_s27, 1  ;;  %p213_p8 = scmp.lt.s32.totalorder %s8448_s27, 3 }
   0xe   : > { %s13592_s11 = scalar_select %p8539_p5, 1, 0 }
   0xf   : > { %s13593_s12 = scalar_select %p8543_p6, 1, 0 }
  0x10   : > { %p13436_p9 = scmp.eq.s32.totalorder %s8522_s28, 0  ;;  %p8550_p10 = pnand %p6570_p7, %p213_p8 }
  0x11   : > { %s8450_s14 = smov [#allocation3]   ;;  %s8322_s19 = scalar_lea.hbm %s13431_s3, 18432 }
  0x12   : > { %s13594_s13 = scalar_select %p8550_p10, 1, 0 }
  0x13   : > { %s231_s15 = sshll.u32 %s8450_s14, 4  ;;  %p8249_p11 = pneg %p8550_p10  ;;  %s232_s15 = int_to_ptr.vmem [resolvable:$true] %s231_s15 }
  0x14   : > { %p8323_p13 = scmp.ne.s32.totalorder %s13431_s3, %s8322_s19  ;;  %p8329_p3 = scmp.lt.u32.totalorder %s8322_s19, %s13431_s3 }
  0x15   : > { %p8558_p12 = pnand %p13436_p9, %p8249_p11 }
  0x17   : > { %p8324_p0 = pneg %p8558_p12 }
  0x19   : > { %p8325_p1 = pnand %p8324_p0, %p8323_p13 }
  0x1b   : > { %p8326_p2 = pneg %p8325_p1 }
  0x1d   : > { %p8331_p4 = pnand %p8329_p3, %p8326_p2 }
  0x1f   : > { %8334 = shalt.err (!%p8331_p4)
}
  0x20   : > { %s8335_s29 = scalar_lea.vmem %s232_s15, 18432  ;;  %p8343_p9 = scmp.lt.s32.totalorder %s232_s15, %s232_s15 }
  0x21   : > { %p8336_p7 = scmp.ne.s32.totalorder %s232_s15, %s8335_s29  ;;  %p8344_p6 = scmp.lt.s32.totalorder %s8335_s29, %s8335_s29 }
  0x23   : > { %p8338_p8 = pnand %p8336_p7, %p8324_p0  ;;  %p8345_p5 = por %p8344_p6, %p8343_p9 }
  0x25   : > { %p8339_p11 = pneg %p8338_p8 }
  0x27   : > { %p8346_p10 = pnand %p8345_p5, %p8339_p11 }
  0x29   : > { %8349 = shalt.err (!%p8346_p10)
}
  0x2a   : > { %s8451_s8 = smov 128   ;;  %s8452_s9 = smov 8  }
  0x2b   : > { %8252 = dma.hbm_to_vmem [thread:$0]  (!%p8558_p12), %s13431_s3, 18432, %s232_s15, [#allocation4], %s8451_s8, %s8451_s8, %s8452_s9  }
  0x2c   : > { %p13596_p13 = scmp.ne.s32.totalorder %s13594_s13, 0 }
  0x2e   : > { %261 = sbr.rel (%p13596_p13) target bundleno = 3575 (0xdf7), region = 44 }
  0x35   : > { %p13597_p1 = scmp.eq.s32.totalorder %s8522_s28, 0 }
  0x37   : > { %8423 = dma.done.wait (%p13597_p1), [#allocation4], 18432   ;;  %p13598_p0 = pmov %p13597_p1 }
  0x38   : > { %v13439_v0 = vmov 0.0|0.0   ;;  %p298_p5 = scmp.lt.s32.totalorder %s8522_s28, 1  ;;  %v593_v1 = vld [vmem:[%s13429_s1] sm:$0xff]  ;;  %v594_v2 = vld [vmem:[%s13429_s1 + $0x8] sm:$0xff]  ;;  %v595_v3 = vld [vmem:[%s13429_s1 + $0x10] sm:$0xff]  ;;  %vm1947_vm2 = vcmask 1040384  }
  0x39   : > { %8425 = vsyncadd (%p13598_p0), [#allocation4], 4294948864  ;;  %7248 = vmatprep.subr.bf16.mxu0 %v13439_v0  ;;  %v7249_v4 = vpack.c.bf16 %v594_v2, %v593_v1  ;;  %v596_v5 = vld [vmem:[%s13429_s1 + $0x18] sm:$0xff]  ;;  %v597_v7 = vld [vmem:[%s13429_s1 + $0x20] sm:$0xff]  ;;  %vm8455_vm3 = vmmov 0   ;;  %vm5324_vm6 = vcmask 1041408  }
  0x3a   : > { %s299_s16 = scalar_select %p298_p5, %s8522_s28, 1  ;;  %v7252_v6 = vpack.c.bf16 %v596_v5, %v595_v3  ;;  %v598_v8 = vld [vmem:[%s13429_s1 + $0x28] sm:$0xff]  ;;  %v599_v10 = vld [vmem:[%s13429_s1 + $0x30] sm:$0xff]  ;;  %v600_v11 = vld [vmem:[%s13429_s1 + $0x38] sm:$0xff] }
  0x3b   : > { %7250 = vmatpush1.bf16.msra.mxu0 %v7249_v4  ;;  %v7255_v9 = vpack.c.bf16 %v598_v8, %v597_v7  ;;  %v7258_v13 = vpack.c.bf16 %v600_v11, %v599_v10  ;;  %v601_v14 = vld [vmem:[%s13429_s1 + $0x40] sm:$0xff]  ;;  %v602_v15 = vld [vmem:[%s13429_s1 + $0x48] sm:$0xff]  ;;  %v603_v17 = vld [vmem:[%s13429_s1 + $0x50] sm:$0xff]  ;;  %s6782_s14 = sshll.u32 %s8522_s28, 12  ;;  %p13763_p9 = scmp.ne.s32.totalorder %s13592_s11, 0 }
  0x3c   : > { %s8240_s29 = smul.u32 432, %s299_s16  ;;  %7251 = vmatprep.subr.bf16.mxu0 %v13439_v0  ;;  %v7261_v16 = vpack.c.bf16 %v602_v15, %v601_v14  ;;  %v604_v18 = vld [vmem:[%s13429_s1 + $0x58] sm:$0xff]  ;;  %v605_v20 = vld [vmem:[%s13429_s1 + $0x60] sm:$0xff]  ;;  %v606_v21 = vld [vmem:[%s13429_s1 + $0x68] sm:$0xff]  ;;  %s12747_s16 = scalar_lea.hbm %s13434_s6, %s6782_s14 }
  0x3d   : > { %v7264_v19 = vpack.c.bf16 %v604_v18, %v603_v17  ;;  %v7267_v22 = vpack.c.bf16 %v606_v21, %v605_v20  ;;  %v607_v23 = vld [vmem:[%s13429_s1 + $0x70] sm:$0xff]  ;;  %v608_v24 = vld [vmem:[%s13429_s1 + $0x78] sm:$0xff]  ;;  %v609_v26 = vld [vmem:[%s13429_s1 + $0x80] sm:$0xff] }
  0x3e   : > { %s8609_s15 = scalar_lea.vmem %s13428_s0, %s8240_s29  ;;  %v7270_v25 = vpack.c.bf16 %v608_v24, %v607_v23  ;;  %v610_v27 = vld [vmem:[%s13429_s1 + $0x88] sm:$0xff]  ;;  %v611_v29 = vld [vmem:[%s13429_s1 + $0x90] sm:$0xff]  ;;  %v612_v30 = vld [vmem:[%s13429_s1 + $0x98] sm:$0xff]  ;;  %s11829_s29 = sand.u32 1, %s8440_s25  }
  0x3f   : > { %7253 = vmatpush1.bf16.msra.mxu0 %v7252_v6  ;;  %v335_v12 = vld [vmem:[%s8609_s15 + $0x1] sm:$0xff]  ;;  %v7273_v28 = vpack.c.bf16 %v610_v27, %v609_v26  ;;  %v7276_v31 = vpack.c.bf16 %v612_v30, %v611_v29  ;;  %v615_v35 = vld [vmem:[%s13429_s1 + $0xb0] sm:$0xff]  ;;  %v616_v36 = vld [vmem:[%s13429_s1 + $0xb8] sm:$0xff]  ;;  %s6575_s8 = sshll.u32 %s11829_s29, 8  ;;  %s6429_s13 = scalar_lea.sflag [#allocation5], %s11829_s29 }
  0x40   : > { %7254 = vmatprep.subr.bf16.mxu0 %v13439_v0  ;;  %806 = vmatprep.mubr.f32.mxu0 %v335_v12  ;;  %v613_v32 = vld [vmem:[%s13429_s1 + $0xa0] sm:$0xff]  ;;  %v614_v33 = vld [vmem:[%s13429_s1 + $0xa8] sm:$0xff]  ;;  %v7282_v37 = vpack.c.bf16 %v616_v36, %v615_v35  ;;  %v619_v41 = vld [vmem:[%s13429_s1 + $0xd0] sm:$0xff]  ;;  %s11856_s9 = scalar_lea.vmem [#allocation6], %s6575_s8 }
  0x41   : > { %v7279_v34 = vpack.c.bf16 %v614_v33, %v613_v32  ;;  %v617_v38 = vld [vmem:[%s13429_s1 + $0xc0] sm:$0xff]  ;;  %v618_v39 = vld [vmem:[%s13429_s1 + $0xc8] sm:$0xff]  ;;  %v620_v42 = vld [vmem:[%s13429_s1 + $0xd8] sm:$0xff]  ;;  %s6447_s17 = sshll.u32 %s11856_s9, 4  ;;  %s12749_s17 = int_to_ptr.vmem [resolvable:$true] %s6447_s17 }
  0x42   : > { %v7285_v40 = vpack.c.bf16 %v618_v39, %v617_v38  ;;  %v7288_v43 = vpack.c.bf16 %v620_v42, %v619_v41  ;;  %v621_v44 = vld [vmem:[%s13429_s1 + $0xe0] sm:$0xff]  ;;  %v622_v45 = vld [vmem:[%s13429_s1 + $0xe8] sm:$0xff]  ;;  %v623_v47 = vld [vmem:[%s13429_s1 + $0xf0] sm:$0xff]  ;;  %s8350_s20 = scalar_lea.vmem %s12749_s17, 4096 }
  0x43   : > { %7256 = vmatpush1.bf16.msra.mxu0 %v7255_v9  ;;  %v7291_v46 = vpack.c.bf16 %v622_v45, %v621_v44  ;;  %v624_v48 = vld [vmem:[%s13429_s1 + $0xf8] sm:$0xff]  ;;  %v625_v50 = vld [vmem:[%s13429_s1 + $0x100] sm:$0xff]  ;;  %v626_v51 = vld [vmem:[%s13429_s1 + $0x108] sm:$0xff]  ;;  %p8351_p6 = scmp.ne.s32.totalorder %s12749_s17, %s8350_s20 }
  0x44   : > { %7257 = vmatprep.subr.bf16.mxu0 %v13439_v0  ;;  %v7294_v49 = vpack.c.bf16 %v624_v48, %v623_v47  ;;  %v303_v52 = vld [vmem:[%s8609_s15] sm:$0xff]  ;;  %v7297_v53 = vpack.c.bf16 %v626_v51, %v625_v50  ;;  %v336_v54 = vld [vmem:[%s8609_s15 + $0x9] sm:$0xff]  ;;  %v628_v56 = vld [vmem:[%s13429_s1 + $0x118] sm:$0xff] }
  0x45   : > { %v627_v55 = vld [vmem:[%s13429_s1 + $0x110] sm:$0xff]  ;;  %v304_v57 = vld [vmem:[%s8609_s15 + $0x8] sm:$0xff]  ;;  %v8721_v59 = vld [vmem:[%s8609_s15 + $0x19] sm:$0xff]  ;;  %p8352_p10 = pnand %p8351_p6, %p13763_p9 }
  0x46   : > { %v7300_v58 = vpack.c.bf16 %v628_v56, %v627_v55  ;;  %v629_v60 = vld [vmem:[%s13429_s1 + $0x120] sm:$0xff]  ;;  %v630_v61 = vld [vmem:[%s13429_s1 + $0x128] sm:$0xff]  ;;  %v8732_v62 = vld [vmem:[%s8609_s15 + $0x18] sm:$0xff] }
  0x47   : > { %7259 = vmatpush1.bf16.msra.mxu0 %v7258_v13  ;;  %v7303_v63 = vpack.c.bf16 %v630_v61, %v629_v60  ;;  %v8735_v1 = vld [vmem:[%s8609_s15 + $0x21] sm:$0xff]  ;;  %v631_v2 = vld [vmem:[%s13429_s1 + $0x130] sm:$0xff]  ;;  %v632_v3 = vld [vmem:[%s13429_s1 + $0x138] sm:$0xff]  ;;  %p8353_p12 = pneg %p8352_p10 }
  0x48   : > { %7260 = vmatprep.subr.bf16.mxu0 %v13439_v0  ;;  %v8747_v4 = vld [vmem:[%s8609_s15 + $0x20] sm:$0xff]  ;;  %v7306_v5 = vpack.c.bf16 %v632_v3, %v631_v2  ;;  %v8750_v6 = vld [vmem:[%s8609_s15 + $0x31] sm:$0xff]  ;;  %v634_v8 = vld [vmem:[%s13429_s1 + $0x148] sm:$0xff] }
  0x49   : > { %v633_v7 = vld [vmem:[%s13429_s1 + $0x140] sm:$0xff]  ;;  %v8762_v9 = vld [vmem:[%s8609_s15 + $0x30] sm:$0xff]  ;;  %v636_v14 = vld [vmem:[%s13429_s1 + $0x158] sm:$0xff] }
  0x4a   : > { %v7309_v10 = vpack.c.bf16 %v634_v8, %v633_v7  ;;  %v8765_v11 = vld [vmem:[%s8609_s15 + $0x32] sm:$0xff]  ;;  %v8784_v17 = vld [vmem:[%s8609_s15 + $0x49] sm:$0xff]  ;;  %v637_v18 = vld [vmem:[%s13429_s1 + $0x160] sm:$0xff] }
  0x4b   : > { %7262 = vmatpush1.bf16.msra.mxu0 %v7261_v16  ;;  %v8768_v12 = vld [vmem:[%s8609_s15 + $0x39] sm:$0xff]  ;;  %v635_v13 = vld [vmem:[%s13429_s1 + $0x150] sm:$0xff]  ;;  %6980 = vmatprep.mubr.f32.mxu1 %v8765_v11  ;;  %v8796_v20 = vld [vmem:[%s8609_s15 + $0x48] sm:$0xff] }
  0x4c   : > { %7263 = vmatprep.subr.bf16.mxu0 %v13439_v0  ;;  %v8781_v15 = vld [vmem:[%s8609_s15 + $0x38] sm:$0xff]  ;;  %v7312_v16 = vpack.c.bf16 %v636_v14, %v635_v13  ;;  %v639_v23 = vld [vmem:[%s13429_s1 + $0x170] sm:$0xff]  ;;  %v8814_v27 = vld [vmem:[%s8609_s15 + $0x61] sm:$0xff] }
  0x4d   : > { %v640_v24 = vld [vmem:[%s13429_s1 + $0x178] sm:$0xff]  ;;  %v642_v29 = vld [vmem:[%s13429_s1 + $0x188] sm:$0xff]  ;;  %v8826_v30 = vld [vmem:[%s8609_s15 + $0x60] sm:$0xff] }
  0x4e   : > { %v7318_v26 = vpack.c.bf16 %v640_v24, %v639_v23  ;;  %v8829_v32 = vld [vmem:[%s8609_s15 + $0x69] sm:$0xff]  ;;  %v645_v38 = vld [vmem:[%s13429_s1 + $0x1a0] sm:$0xff]  ;;  %v648_v44 = vld [vmem:[%s13429_s1 + $0x1b8] sm:$0xff] }
  0x4f   : > { %7265 = vmatpush1.bf16.msra.mxu0 %v7264_v19  ;;  %v638_v19 = vld [vmem:[%s13429_s1 + $0x168] sm:$0xff]  ;;  %v643_v33 = vld [vmem:[%s13429_s1 + $0x190] sm:$0xff]  ;;  %v8871_v45 = vld [vmem:[%s8609_s15 + $0x80] sm:$0xff] }
  0x50   : > { %7266 = vmatprep.subr.bf16.mxu0 %v13439_v0  ;;  %v7315_v21 = vpack.c.bf16 %v638_v19, %v637_v18  ;;  %v8841_v35 = vld [vmem:[%s8609_s15 + $0x68] sm:$0xff]  ;;  %v8874_v47 = vld [vmem:[%s8609_s15 + $0x91] sm:$0xff]  ;;  %v649_v48 = vld [vmem:[%s13429_s1 + $0x1c0] sm:$0xff] }
  0x51   : > { %v646_v39 = vld [vmem:[%s13429_s1 + $0x1a8] sm:$0xff]  ;;  %v8886_v50 = vld [vmem:[%s8609_s15 + $0x90] sm:$0xff]  ;;  %v8901_v55 = vld [vmem:[%s8609_s15 + $0x98] sm:$0xff] }
  0x52   : > { %v7327_v41 = vpack.c.bf16 %v646_v39, %v645_v38  ;;  %v8859_v42 = vld [vmem:[%s8609_s15 + $0x81] sm:$0xff]  ;;  %v8919_v2 = vld [vmem:[%s8609_s15 + $0xb1] sm:$0xff]  ;;  %v8943_v14 = vld [vmem:[%s8609_s15 + $0xc9] sm:$0xff] }
  0x53   : > { %7268 = vmatpush1.bf16.msra.mxu0 %v7267_v22  ;;  %v8799_v22 = vld [vmem:[%s8609_s15 + $0x51] sm:$0xff]  ;;  %v654_v60 = vld [vmem:[%s13429_s1 + $0x1e8] sm:$0xff]  ;;  %v8940_v13 = vld [vmem:[%s8609_s15 + $0xc0] sm:$0xff] }
  0x54   : > { %7269 = vmatprep.subr.bf16.mxu0 %v13439_v0  ;;  %v8916_v61 = vld [vmem:[%s8609_s15 + $0xa8] sm:$0xff]  ;;  %v655_v3 = vld [vmem:[%s13429_s1 + $0x1f0] sm:$0xff]  ;;  %v8952_v18 = vld [vmem:[%s8609_s15 + $0xd9] sm:$0xff] }
  0x55   : > { %v8931_v7 = vld [vmem:[%s8609_s15 + $0xb0] sm:$0xff]  ;;  %v8957_v19 = vld [vmem:[%s8609_s15 + $0xd8] sm:$0xff]  ;;  %v8965_v23 = vld [vmem:[%s8609_s15 + $0xe0] sm:$0xff] }
  0x56   : > { %v8968_v24 = vld [vmem:[%s8609_s15 + $0xf1] sm:$0xff]  ;;  %v9000_v38 = vld [vmem:[%s8609_s15 + $0x121] sm:$0xff] }
  0x57   : > { %7271 = vmatpush1.bf16.msra.mxu0 %v7270_v25  ;;  %v8811_v25 = vld [vmem:[%s8609_s15 + $0x50] sm:$0xff]  ;;  %v9005_v39 = vld [vmem:[%s8609_s15 + $0x120] sm:$0xff] }
  0x58   : > { %7272 = vmatprep.subr.bf16.mxu0 %v13439_v0 }
  0x5b   : > { %7274 = vmatpush1.bf16.msra.mxu0 %v7273_v28  ;;  %v641_v28 = vld [vmem:[%s13429_s1 + $0x180] sm:$0xff] }
  0x5c   : > { %7275 = vmatprep.subr.bf16.mxu0 %v13439_v0 }
  0x5f   : > { %7277 = vmatpush1.bf16.msra.mxu0 %v7276_v31  ;;  %v7321_v31 = vpack.c.bf16 %v642_v29, %v641_v28  ;;  %v8976_v28 = vld [vmem:[%s8609_s15 + $0xf9] sm:$0xff] }
  0x60   : > { %7278 = vmatprep.subr.bf16.mxu0 %v13439_v0  ;;  %v8981_v29 = vld [vmem:[%s8609_s15 + $0xf8] sm:$0xff] }
  0x63   : > { %7280 = vmatpush1.bf16.msra.mxu0 %v7279_v34  ;;  %v644_v34 = vld [vmem:[%s13429_s1 + $0x198] sm:$0xff] }
  0x64   : > { %7281 = vmatprep.subr.bf16.mxu0 %v13439_v0  ;;  %v7324_v36 = vpack.c.bf16 %v644_v34, %v643_v33  ;;  %v8989_v33 = vld [vmem:[%s8609_s15 + $0x108] sm:$0xff]  ;;  %v8992_v34 = vld [vmem:[%s8609_s15 + $0x111] sm:$0xff] }
  0x67   : > { %7283 = vmatpush1.bf16.msra.mxu0 %v7282_v37  ;;  %v8844_v37 = vld [vmem:[%s8609_s15 + $0x79] sm:$0xff] }
  0x68   : > { %7284 = vmatprep.subr.bf16.mxu0 %v13439_v0 }
  0x6b   : > { %7286 = vmatpush1.bf16.msra.mxu0 %v7285_v40  ;;  %v8856_v40 = vld [vmem:[%s8609_s15 + $0x78] sm:$0xff] }
  0x6c   : > { %7287 = vmatprep.subr.bf16.mxu0 %v13439_v0 }
  0x6f   : > { %7289 = vmatpush1.bf16.msra.mxu0 %v7288_v43  ;;  %v647_v43 = vld [vmem:[%s13429_s1 + $0x1b0] sm:$0xff] }
  0x70   : > { %7290 = vmatprep.subr.bf16.mxu0 %v13439_v0 }
  0x73   : > { %7292 = vmatpush1.bf16.msra.mxu0 %v7291_v46  ;;  %v7330_v46 = vpack.c.bf16 %v648_v44, %v647_v43  ;;  %v9013_v43 = vld [vmem:[%s8609_s15 + $0x128] sm:$0xff]  ;;  %v9016_v44 = vld [vmem:[%s8609_s15 + $0x139] sm:$0xff] }
  0x74   : > { %7293 = vmatprep.subr.bf16.mxu0 %v13439_v0  ;;  %13599 = vst [vmem:[#allocation12_spill] sm:$0xff] %v9016_v44 }
  0x77   : > { %7295 = vmatpush1.bf16.msra.mxu0 %v7294_v49  ;;  %v650_v49 = vld [vmem:[%s13429_s1 + $0x1c8] sm:$0xff] }
  0x78   : > { %7296 = vmatprep.subr.bf16.mxu0 %v13439_v0  ;;  %v7333_v51 = vpack.c.bf16 %v650_v49, %v649_v48  ;;  %v9024_v48 = vld [vmem:[%s8609_s15 + $0x141] sm:$0xff] }
  0x79   : > { %13600 = vst [vmem:[#allocation13_spill] sm:$0xff] %v9024_v48  ;;  %v9029_v49 = vld [vmem:[%s8609_s15 + $0x140] sm:$0xff] }
  0x7a   : > { %807 = vmatmul.mubr.f32.vlgmr.msra.gmra.mrb[0].mxu0 %v303_v52  ;;  %v8889_v52 = vld [vmem:[%s8609_s15 + $0x99] sm:$0xff] }
  0x7b   : > { %7298 = vmatpush1.bf16.msra.mxu0 %v7297_v53  ;;  %811 = vmatprep.mubr.f32.mxu0 %v336_v54  ;;  %v651_v53 = vld [vmem:[%s13429_s1 + $0x1d0] sm:$0xff]  ;;  %v652_v54 = vld [vmem:[%s13429_s1 + $0x1d8] sm:$0xff] }
  0x7c   : > { %7299 = vmatprep.subr.bf16.mxu0 %v13439_v0  ;;  %v7336_v56 = vpack.c.bf16 %v652_v54, %v651_v53  ;;  %v9037_v53 = vld [vmem:[%s8609_s15 + $0x150] sm:$0xff]  ;;  %v9040_v54 = vld [vmem:[%s8609_s15 + $0x159] sm:$0xff] }
  0x7d   : > { %13602 = vst [vmem:[#allocation15_spill] sm:$0xff] %v9040_v54 }
  0x7e   : > { %812 = vmatmul.mubr.f32.gmra.mrb[2].mxu0 %v304_v57  ;;  %v8904_v57 = vld [vmem:[%s8609_s15 + $0xa9] sm:$0xff] }
  0x7f   : > { %816 = vmatprep.mubr.f32.mxu0 %v8721_v59  ;;  %7301 = vmatpush1.bf16.msra.mxu0 %v7300_v58  ;;  %v653_v58 = vld [vmem:[%s13429_s1 + $0x1e0] sm:$0xff] }
  0x80   : > { %7302 = vmatprep.subr.bf16.mxu0 %v13439_v0 }
  0x82   : > { %817 = vmatmul.mubr.f32.gmra.mrb[4].mxu0 %v8732_v62 }
  0x83   : > { %821 = vmatprep.mubr.f32.mxu0 %v8735_v1  ;;  %7304 = vmatpush1.bf16.msra.mxu0 %v7303_v63  ;;  %v7339_v63 = vpack.c.bf16 %v654_v60, %v653_v58  ;;  %v9048_v58 = vld [vmem:[%s8609_s15 + $0x169] sm:$0xff] }
  0x84   : > { %7305 = vmatprep.subr.bf16.mxu0 %v13439_v0  ;;  %13603 = vst [vmem:[#allocation16_spill] sm:$0xff] %v9048_v58  ;;  %v9053_v60 = vld [vmem:[%s8609_s15 + $0x168] sm:$0xff] }
  0x86   : > { %822 = vmatmul.mubr.f32.gmra.mrb[6].mxu0 %v8747_v4 }
  0x87   : > { %826 = vmatprep.mubr.f32.mxu0 %v8750_v6  ;;  %7307 = vmatpush1.bf16.msra.mxu0 %v7306_v5  ;;  %v656_v5 = vld [vmem:[%s13429_s1 + $0x1f8] sm:$0xff] }
  0x88   : > { %7308 = vmatprep.subr.bf16.mxu0 %v13439_v0  ;;  %v7342_v8 = vpack.c.bf16 %v656_v5, %v655_v3  ;;  %v9061_v3 = vld [vmem:[%s8609_s15 + $0x170] sm:$0xff]  ;;  %v657_v5 = vld [vmem:[%s13429_s1 + $0x200] sm:$0xff] }
  0x8a   : > { %827 = vmatmul.mubr.f32.gmra.mrb[8].mxu0 %v8762_v9 }
  0x8b   : > { %831 = vmatprep.mubr.f32.mxu0 %v8768_v12  ;;  %7310 = vmatpush1.bf16.msra.mxu0 %v7309_v10  ;;  %v8934_v10 = vld [vmem:[%s8609_s15 + $0xc1] sm:$0xff] }
  0x8c   : > { %7311 = vmatprep.subr.bf16.mxu0 %v13439_v0 }
  0x8e   : > { %832 = vmatmul.mubr.f32.gmra.mrb[10].mxu0 %v8781_v15 }
  0x8f   : > { %836 = vmatprep.mubr.f32.mxu0 %v8784_v17  ;;  %7313 = vmatpush1.bf16.msra.mxu0 %v7312_v16  ;;  %v8949_v16 = vld [vmem:[%s8609_s15 + $0xc8] sm:$0xff] }
  0x90   : > { %7314 = vmatprep.subr.bf16.mxu0 %v13439_v0 }
  0x92   : > { %837 = vmatmul.mubr.f32.gmra.mrb[12].mxu0 %v8796_v20 }
  0x93   : > { %841 = vmatprep.mubr.f32.mxu0 %v8799_v22  ;;  %7316 = vmatpush1.bf16.msra.mxu0 %v7315_v21  ;;  %v8960_v21 = vld [vmem:[%s8609_s15 + $0xe1] sm:$0xff] }
  0x94   : > { %7317 = vmatprep.subr.bf16.mxu0 %v13439_v0 }
  0x96   : > { %842 = vmatmul.mubr.f32.gmra.mrb[14].mxu0 %v8811_v25 }
  0x97   : > { %846 = vmatprep.mubr.f32.mxu0 %v8814_v27  ;;  %7319 = vmatpush1.bf16.msra.mxu0 %v7318_v26  ;;  %v8973_v26 = vld [vmem:[%s8609_s15 + $0xf0] sm:$0xff] }
  0x98   : > { %7320 = vmatprep.subr.bf16.mxu0 %v13439_v0 }
  0x9a   : > { %847 = vmatmul.mubr.f32.gmra.mrb[16].mxu0 %v8826_v30 }
  0x9b   : > { %851 = vmatprep.mubr.f32.mxu0 %v8829_v32  ;;  %7322 = vmatpush1.bf16.msra.mxu0 %v7321_v31  ;;  %v8984_v31 = vld [vmem:[%s8609_s15 + $0x109] sm:$0xff] }
  0x9c   : > { %7323 = vmatprep.subr.bf16.mxu0 %v13439_v0 }
  0x9e   : > { %852 = vmatmul.mubr.f32.gmra.mrb[18].mxu0 %v8841_v35 }
  0x9f   : > { %856 = vmatprep.mubr.f32.mxu0 %v8844_v37  ;;  %7325 = vmatpush1.bf16.msra.mxu0 %v7324_v36  ;;  %v8997_v36 = vld [vmem:[%s8609_s15 + $0x110] sm:$0xff] }
  0xa0   : > { %7326 = vmatprep.subr.bf16.mxu0 %v13439_v0 }
  0xa2   : > { %857 = vmatmul.mubr.f32.gmra.mrb[20].mxu0 %v8856_v40 }
  0xa3   : > { %861 = vmatprep.mubr.f32.mxu0 %v8859_v42  ;;  %7328 = vmatpush1.bf16.msra.mxu0 %v7327_v41  ;;  %v9008_v41 = vld [vmem:[%s8609_s15 + $0x129] sm:$0xff] }
  0xa4   : > { %7329 = vmatprep.subr.bf16.mxu0 %v13439_v0 }
  0xa6   : > { %862 = vmatmul.mubr.f32.gmra.mrb[22].mxu0 %v8871_v45 }
  0xa7   : > { %866 = vmatprep.mubr.f32.mxu0 %v8874_v47  ;;  %7331 = vmatpush1.bf16.msra.mxu0 %v7330_v46  ;;  %v9021_v46 = vld [vmem:[%s8609_s15 + $0x138] sm:$0xff] }
  0xa8   : > { %7332 = vmatprep.subr.bf16.mxu0 %v13439_v0 }
  0xaa   : > { %867 = vmatmul.mubr.f32.gmra.mrb[24].mxu0 %v8886_v50 }
  0xab   : > { %871 = vmatprep.mubr.f32.mxu0 %v8889_v52  ;;  %7334 = vmatpush1.bf16.msra.mxu0 %v7333_v51  ;;  %v9032_v51 = vld [vmem:[%s8609_s15 + $0x151] sm:$0xff] }
  0xac   : > { %7335 = vmatprep.subr.bf16.mxu0 %v13439_v0  ;;  %13601 = vst [vmem:[#allocation14_spill] sm:$0xff] %v9032_v51 }
  0xae   : > { %872 = vmatmul.mubr.f32.gmra.mrb[26].mxu0 %v8901_v55 }
  0xaf   : > { %876 = vmatprep.mubr.f32.mxu0 %v8904_v57  ;;  %7337 = vmatpush1.bf16.msra.mxu0 %v7336_v56  ;;  %v9045_v56 = vld [vmem:[%s8609_s15 + $0x158] sm:$0xff] }
  0xb0   : > { %7338 = vmatprep.subr.bf16.mxu0 %v13439_v0 }
  0xb2   : > { %877 = vmatmul.mubr.f32.gmra.mrb[28].mxu0 %v8916_v61 }
  0xb3   : > { %881 = vmatprep.mubr.f32.mxu0 %v8919_v2  ;;  %7340 = vmatpush1.bf16.msra.mxu0 %v7339_v63  ;;  %v9056_v63 = vld [vmem:[%s8609_s15 + $0x171] sm:$0xff] }
  0xb4   : > { %7341 = vmatprep.subr.bf16.mxu0 %v13439_v0  ;;  %13604 = vst [vmem:[#allocation17_spill] sm:$0xff] %v9056_v63 }
  0xb6   : > { %882 = vmatmul.mubr.f32.gmra.mrb[30].mxu0 %v8931_v7 }
  0xb7   : > { %886 = vmatprep.mubr.f32.mxu0 %v8934_v10  ;;  %7343 = vmatpush1.bf16.msra.mxu0 %v7342_v8  ;;  %v658_v8 = vld [vmem:[%s13429_s1 + $0x208] sm:$0xff] }
  0xb8   : > { %7344 = vmatprep.subr.bf16.mxu0 %v13439_v0  ;;  %v367_v0 = vld [vmem:[%s8609_s15 + $0x2] sm:$0xff] }
  0xba   : > { %887 = vmatmul.mubr.f32.gmra.mrb[32].mxu0 %v8940_v13 }
  0xbb   : > { %891 = vmatprep.mubr.f32.mxu0 %v8943_v14 }
  0xbe   : > { %892 = vmatmul.mubr.f32.gmra.mrb[34].mxu0 %v8949_v16 }
  0xbf   : > { %896 = vmatprep.mubr.f32.mxu0 %v8952_v18 }
  0xc2   : > { %897 = vmatmul.mubr.f32.gmra.mrb[36].mxu0 %v8957_v19 }
  0xc3   : > { %901 = vmatprep.mubr.f32.mxu0 %v8960_v21 }
  0xc6   : > { %902 = vmatmul.mubr.f32.gmra.mrb[38].mxu0 %v8965_v23 }
  0xc7   : > { %906 = vmatprep.mubr.f32.mxu0 %v8968_v24 }
  0xca   : > { %907 = vmatmul.mubr.f32.gmra.mrb[40].mxu0 %v8973_v26 }
  0xcb   : > { %911 = vmatprep.mubr.f32.mxu0 %v8976_v28 }
  0xce   : > { %912 = vmatmul.mubr.f32.gmra.mrb[42].mxu0 %v8981_v29 }
  0xcf   : > { %916 = vmatprep.mubr.f32.mxu0 %v8984_v31 }
  0xd2   : > { %917 = vmatmul.mubr.f32.gmra.mrb[44].mxu0 %v8989_v33 }
  0xd3   : > { %921 = vmatprep.mubr.f32.mxu0 %v8992_v34 }
  0xd6   : > { %922 = vmatmul.mubr.f32.gmra.mrb[46].mxu0 %v8997_v36 }
  0xd7   : > { %926 = vmatprep.mubr.f32.mxu0 %v9000_v38 }
  0xda   : > { %927 = vmatmul.mubr.f32.gmra.mrb[48].mxu0 %v9005_v39 }
  0xdb   : > { %931 = vmatprep.mubr.f32.mxu0 %v9008_v41 }
  0xde   : > { %932 = vmatmul.mubr.f32.gmra.mrb[50].mxu0 %v9013_v43 }
  0xdf   : > { %936 = vmatprep.mubr.f32.mxu0 %v9016_v44  ;;  %v13605_v44 = vmov 0.0|0.0  }
  0xe2   : > { %937 = vmatmul.mubr.f32.gmra.mrb[52].mxu0 %v9021_v46 }
  0xe3   : > { %941 = vmatprep.mubr.f32.mxu0 %v9024_v48 }
  0xe6   : > { %942 = vmatmul.mubr.f32.gmra.mrb[54].mxu0 %v9029_v49 }
  0xe7   : > { %946 = vmatprep.mubr.f32.mxu0 %v9032_v51  ;;  %v368_v51 = vld [vmem:[%s8609_s15 + $0xa] sm:$0xff] }
  0xea   : > { %947 = vmatmul.mubr.f32.gmra.mrb[56].mxu0 %v9037_v53 }
  0xeb   : > { %951 = vmatprep.mubr.f32.mxu0 %v9040_v54  ;;  %v660_v54 = vld [vmem:[%s13429_s1 + $0x218] sm:$0xff] }
  0xee   : > { %952 = vmatmul.mubr.f32.gmra.mrb[58].mxu0 %v9045_v56 }
  0xef   : > { %956 = vmatprep.mubr.f32.mxu0 %v9048_v58  ;;  %v7345_v58 = vpack.c.bf16 %v658_v8, %v657_v5  ;;  %v662_v5 = vld [vmem:[%s13429_s1 + $0x228] sm:$0xff]  ;;  %v667_v8 = vld [vmem:[%s13429_s1 + $0x250] sm:$0xff] }
  0xf2   : > { %957 = vmatmul.mubr.f32.gmra.mrb[60].mxu0 %v9053_v60 }
  0xf3   : > { %961 = vmatprep.mubr.f32.mxu0 %v9056_v63  ;;  %v659_v63 = vld [vmem:[%s13429_s1 + $0x210] sm:$0xff] }
  0xf4   : > { %v7348_v48 = vpack.c.bf16 %v660_v54, %v659_v63  ;;  %v663_v54 = vld [vmem:[%s13429_s1 + $0x230] sm:$0xff]  ;;  %v666_v63 = vld [vmem:[%s13429_s1 + $0x248] sm:$0xff] }
  0xf6   : > { %962 = vmatmul.mubr.f32.gmra.mrb[62].mxu0 %v9061_v3 }
  0xf7   : > { %1031 = vmatprep.mubr.f32.mxu0 %v8732_v62  ;;  %v661_v62 = vld [vmem:[%s13429_s1 + $0x220] sm:$0xff] }
  0xfa   : > { %1032 = vmatmul.mubr.f32.vlgmr.msra.gmra.mrb[0].mxu0 %v367_v0  ;;  %v9089_v0 = vld [vmem:[%s8609_s15 + $0x1a] sm:$0xff] }
  0xfb   : > { %7346 = vmatpush1.bf16.msra.mxu0 %v7345_v58  ;;  %1036 = vmatprep.mubr.f32.mxu0 %v8747_v4  ;;  %v7351_v4 = vpack.c.bf16 %v662_v5, %v661_v62  ;;  %v664_v58 = vld [vmem:[%s13429_s1 + $0x238] sm:$0xff] }
  0xfc   : > { %7347 = vmatprep.subr.bf16.mxu0 %v13605_v44  ;;  %v668_v62 = vld [vmem:[%s13429_s1 + $0x258] sm:$0xff] }
  0xfd   : > { %v9122_v5 = vld [vmem:[%s8609_s15 + $0x3a] sm:$0xff] }
  0xfe   : > { %1037 = vmatmul.mubr.f32.gmra.mrb[2].mxu0 %v368_v51  ;;  %v665_v51 = vld [vmem:[%s13429_s1 + $0x240] sm:$0xff] }
  0xff   : > { %1041 = vmatprep.mubr.f32.mxu0 %v8762_v9  ;;  %7349 = vmatpush1.bf16.msra.mxu0 %v7348_v48  ;;  %v9101_v9 = vld [vmem:[%s8609_s15 + $0x22] sm:$0xff]  ;;  %v7354_v48 = vpack.c.bf16 %v664_v58, %v663_v54 }
 0x100   : > { %7350 = vmatprep.subr.bf16.mxu0 %v13605_v44  ;;  %v670_v54 = vld [vmem:[%s13429_s1 + $0x268] sm:$0xff] }
 0x102   : > { %1042 = vmatmul.mubr.f32.gmra.mrb[4].mxu0 %v9089_v0 }
 0x103   : > { %1046 = vmatprep.mubr.f32.mxu0 %v8781_v15  ;;  %7352 = vmatpush1.bf16.msra.mxu0 %v7351_v4  ;;  %v7357_v15 = vpack.c.bf16 %v666_v63, %v665_v51  ;;  %v669_v4 = vld [vmem:[%s13429_s1 + $0x260] sm:$0xff]  ;;  %v672_v51 = vld [vmem:[%s13429_s1 + $0x278] sm:$0xff] }
 0x104   : > { %7353 = vmatprep.subr.bf16.mxu0 %v13605_v44  ;;  %v7363_v58 = vpack.c.bf16 %v670_v54, %v669_v4  ;;  %v676_v4 = vld [vmem:[%s13429_s1 + $0x298] sm:$0xff] }
 0x106   : > { %1047 = vmatmul.mubr.f32.gmra.mrb[6].mxu0 %v9101_v9 }
 0x107   : > { %1051 = vmatprep.mubr.f32.mxu0 %v8796_v20  ;;  %7355 = vmatpush1.bf16.msra.mxu0 %v7354_v48  ;;  %v7360_v20 = vpack.c.bf16 %v668_v62, %v667_v8  ;;  %v671_v48 = vld [vmem:[%s13429_s1 + $0x270] sm:$0xff]  ;;  %v674_v8 = vld [vmem:[%s13429_s1 + $0x288] sm:$0xff] }
 0x108   : > { %7356 = vmatprep.subr.bf16.mxu0 %v13605_v44  ;;  %v7366_v63 = vpack.c.bf16 %v672_v51, %v671_v48  ;;  %v678_v48 = vld [vmem:[%s13429_s1 + $0x2a8] sm:$0xff] }
 0x10a   : > { %1052 = vmatmul.mubr.f32.gmra.mrb[8].mxu0 %v8765_v11 }
 0x10b   : > { %1056 = vmatprep.mubr.f32.mxu0 %v8811_v25  ;;  %7358 = vmatpush1.bf16.msra.mxu0 %v7357_v15  ;;  %v9134_v25 = vld [vmem:[%s8609_s15 + $0x4a] sm:$0xff]  ;;  %v673_v15 = vld [vmem:[%s13429_s1 + $0x280] sm:$0xff] }
 0x10c   : > { %7359 = vmatprep.subr.bf16.mxu0 %v13605_v44  ;;  %v7369_v62 = vpack.c.bf16 %v674_v8, %v673_v15  ;;  %v680_v15 = vld [vmem:[%s13429_s1 + $0x2b8] sm:$0xff] }
 0x10e   : > { %1057 = vmatmul.mubr.f32.gmra.mrb[10].mxu0 %v9122_v5 }
 0x10f   : > { %1061 = vmatprep.mubr.f32.mxu0 %v8826_v30  ;;  %7361 = vmatpush1.bf16.msra.mxu0 %v7360_v20  ;;  %v9146_v30 = vld [vmem:[%s8609_s15 + $0x52] sm:$0xff] }
 0x110   : > { %7362 = vmatprep.subr.bf16.mxu0 %v13605_v44  ;;  %v675_v20 = vld [vmem:[%s13429_s1 + $0x290] sm:$0xff] }
 0x111   : > { %v7372_v54 = vpack.c.bf16 %v676_v4, %v675_v20  ;;  %v682_v20 = vld [vmem:[%s13429_s1 + $0x2c8] sm:$0xff] }
 0x112   : > { %1062 = vmatmul.mubr.f32.gmra.mrb[12].mxu0 %v9134_v25 }
 0x113   : > { %1066 = vmatprep.mubr.f32.mxu0 %v8841_v35  ;;  %7364 = vmatpush1.bf16.msra.mxu0 %v7363_v58  ;;  %v9158_v35 = vld [vmem:[%s8609_s15 + $0x62] sm:$0xff] }
 0x114   : > { %7365 = vmatprep.subr.bf16.mxu0 %v13605_v44  ;;  %v677_v58 = vld [vmem:[%s13429_s1 + $0x2a0] sm:$0xff] }
 0x115   : > { %v7375_v51 = vpack.c.bf16 %v678_v48, %v677_v58  ;;  %v684_v58 = vld [vmem:[%s13429_s1 + $0x2d8] sm:$0xff] }
 0x116   : > { %1067 = vmatmul.mubr.f32.gmra.mrb[14].mxu0 %v9146_v30 }
 0x117   : > { %1071 = vmatprep.mubr.f32.mxu0 %v8856_v40  ;;  %7367 = vmatpush1.bf16.msra.mxu0 %v7366_v63  ;;  %v9170_v40 = vld [vmem:[%s8609_s15 + $0x6a] sm:$0xff] }
 0x118   : > { %7368 = vmatprep.subr.bf16.mxu0 %v13605_v44  ;;  %v679_v63 = vld [vmem:[%s13429_s1 + $0x2b0] sm:$0xff] }
 0x119   : > { %v7378_v8 = vpack.c.bf16 %v680_v15, %v679_v63  ;;  %v686_v63 = vld [vmem:[%s13429_s1 + $0x2e8] sm:$0xff] }
 0x11a   : > { %1072 = vmatmul.mubr.f32.gmra.mrb[16].mxu0 %v9158_v35 }
 0x11b   : > { %1076 = vmatprep.mubr.f32.mxu0 %v8871_v45  ;;  %7370 = vmatpush1.bf16.msra.mxu0 %v7369_v62  ;;  %v9182_v45 = vld [vmem:[%s8609_s15 + $0x7a] sm:$0xff] }
 0x11c   : > { %7371 = vmatprep.subr.bf16.mxu0 %v13605_v44  ;;  %v681_v62 = vld [vmem:[%s13429_s1 + $0x2c0] sm:$0xff] }
 0x11d   : > { %v7381_v4 = vpack.c.bf16 %v682_v20, %v681_v62  ;;  %v688_v62 = vld [vmem:[%s13429_s1 + $0x2f8] sm:$0xff] }
 0x11e   : > { %1077 = vmatmul.mubr.f32.gmra.mrb[18].mxu0 %v9170_v40 }
 0x11f   : > { %1081 = vmatprep.mubr.f32.mxu0 %v8886_v50  ;;  %7373 = vmatpush1.bf16.msra.mxu0 %v7372_v54  ;;  %v9194_v50 = vld [vmem:[%s8609_s15 + $0x82] sm:$0xff]  ;;  %v683_v54 = vld [vmem:[%s13429_s1 + $0x2d0] sm:$0xff] }
 0x120   : > { %7374 = vmatprep.subr.bf16.mxu0 %v13605_v44  ;;  %v7384_v48 = vpack.c.bf16 %v684_v58, %v683_v54  ;;  %v9259_v54 = vld [vmem:[%s8609_s15 + $0xda] sm:$0xff] }
 0x121   : > { %v721_v58 = vld [vmem:[%s13429_s1 + $0x400] sm:$0xff] }
 0x122   : > { %1082 = vmatmul.mubr.f32.gmra.mrb[20].mxu0 %v9182_v45 }
 0x123   : > { %1086 = vmatprep.mubr.f32.mxu0 %v8901_v55  ;;  %7376 = vmatpush1.bf16.msra.mxu0 %v7375_v51  ;;  %v9206_v55 = vld [vmem:[%s8609_s15 + $0x92] sm:$0xff]  ;;  %v685_v51 = vld [vmem:[%s13429_s1 + $0x2e0] sm:$0xff] }
 0x124   : > { %7377 = vmatprep.subr.bf16.mxu0 %v13605_v44  ;;  %v7387_v15 = vpack.c.bf16 %v686_v63, %v685_v51  ;;  %v724_v51 = vld [vmem:[%s13429_s1 + $0x418] sm:$0xff] }
 0x126   : > { %1087 = vmatmul.mubr.f32.gmra.mrb[22].mxu0 %v9194_v50 }
 0x127   : > { %1091 = vmatprep.mubr.f32.mxu0 %v8916_v61  ;;  %7379 = vmatpush1.bf16.msra.mxu0 %v7378_v8  ;;  %v9218_v61 = vld [vmem:[%s8609_s15 + $0x9a] sm:$0xff]  ;;  %v687_v8 = vld [vmem:[%s13429_s1 + $0x2f0] sm:$0xff] }
 0x128   : > { %7380 = vmatprep.subr.bf16.mxu0 %v13605_v44  ;;  %v7390_v20 = vpack.c.bf16 %v688_v62, %v687_v8  ;;  %v726_v8 = vld [vmem:[%s13429_s1 + $0x428] sm:$0xff] }
 0x12a   : > { %1092 = vmatmul.mubr.f32.gmra.mrb[24].mxu0 %v9206_v55 }
 0x12b   : > { %1096 = vmatprep.mubr.f32.mxu0 %v8931_v7  ;;  %7382 = vmatpush1.bf16.msra.mxu0 %v7381_v4  ;;  %v9230_v7 = vld [vmem:[%s8609_s15 + $0xaa] sm:$0xff]  ;;  %v9248_v4 = vld [vmem:[%s8609_s15 + $0xc2] sm:$0xff] }
 0x12c   : > { %7383 = vmatprep.subr.bf16.mxu0 %v13605_v44 }
 0x12e   : > { %1097 = vmatmul.mubr.f32.gmra.mrb[26].mxu0 %v9218_v61 }
 0x12f   : > { %1101 = vmatprep.mubr.f32.mxu0 %v8940_v13  ;;  %7385 = vmatpush1.bf16.msra.mxu0 %v7384_v48  ;;  %v9242_v13 = vld [vmem:[%s8609_s15 + $0xb2] sm:$0xff] }
 0x130   : > { %7386 = vmatprep.subr.bf16.mxu0 %v13605_v44 }
 0x132   : > { %1102 = vmatmul.mubr.f32.gmra.mrb[28].mxu0 %v9230_v7 }
 0x133   : > { %1106 = vmatprep.mubr.f32.mxu0 %v8949_v16  ;;  %7388 = vmatpush1.bf16.msra.mxu0 %v7387_v15  ;;  %v9254_v16 = vld [vmem:[%s8609_s15 + $0xca] sm:$0xff]  ;;  %v9311_v15 = vld [vmem:[%s8609_s15 + $0x13a] sm:$0xff] }
 0x134   : > { %7389 = vmatprep.subr.bf16.mxu0 %v13605_v44 }
 0x136   : > { %1107 = vmatmul.mubr.f32.gmra.mrb[30].mxu0 %v9242_v13 }
 0x137   : > { %1111 = vmatprep.mubr.f32.mxu0 %v8957_v19  ;;  %7391 = vmatpush1.bf16.msra.mxu0 %v7390_v20  ;;  %v9264_v19 = vld [vmem:[%s8609_s15 + $0xe2] sm:$0xff] }
 0x138   : > { %7392 = vmatprep.subr.bf16.mxu0 %v13605_v44  ;;  %v9322_v20 = vld [vmem:[%s8609_s15 + $0x142] sm:$0xff] }
 0x13a   : > { %1112 = vmatmul.mubr.f32.gmra.mrb[32].mxu0 %v9248_v4 }
 0x13b   : > { %1116 = vmatprep.mubr.f32.mxu0 %v8965_v23  ;;  %v9269_v23 = vld [vmem:[%s8609_s15 + $0xf2] sm:$0xff] }
 0x13e   : > { %1117 = vmatmul.mubr.f32.gmra.mrb[34].mxu0 %v9254_v16 }
 0x13f   : > { %1121 = vmatprep.mubr.f32.mxu0 %v8973_v26  ;;  %v9274_v26 = vld [vmem:[%s8609_s15 + $0xfa] sm:$0xff] }
 0x142   : > { %1122 = vmatmul.mubr.f32.gmra.mrb[36].mxu0 %v9259_v54 }
 0x143   : > { %1126 = vmatprep.mubr.f32.mxu0 %v8981_v29  ;;  %v9279_v29 = vld [vmem:[%s8609_s15 + $0x10a] sm:$0xff] }
 0x146   : > { %1127 = vmatmul.mubr.f32.gmra.mrb[38].mxu0 %v9264_v19 }
 0x147   : > { %1131 = vmatprep.mubr.f32.mxu0 %v8989_v33  ;;  %v9284_v33 = vld [vmem:[%s8609_s15 + $0x112] sm:$0xff] }
 0x14a   : > { %1132 = vmatmul.mubr.f32.gmra.mrb[40].mxu0 %v9269_v23 }
 0x14b   : > { %1136 = vmatprep.mubr.f32.mxu0 %v8997_v36  ;;  %v9289_v36 = vld [vmem:[%s8609_s15 + $0x122] sm:$0xff] }
 0x14e   : > { %1137 = vmatmul.mubr.f32.gmra.mrb[42].mxu0 %v9274_v26 }
 0x14f   : > { %1141 = vmatprep.mubr.f32.mxu0 %v9005_v39  ;;  %v722_v39 = vld [vmem:[%s13429_s1 + $0x408] sm:$0xff] }
 0x150   : > { %v7440_v48 = vpack.c.bf16 %v722_v39, %v721_v58  ;;  %v728_v58 = vld [vmem:[%s13429_s1 + $0x438] sm:$0xff] }
 0x152   : > { %1142 = vmatmul.mubr.f32.gmra.mrb[44].mxu0 %v9279_v29  ;;  %7441 = vmatprep.subr.bf16.mxu1 %v7440_v48 }
 0x153   : > { %1146 = vmatprep.mubr.f32.mxu0 %v9013_v43  ;;  %v9300_v43 = vld [vmem:[%s8609_s15 + $0x12a] sm:$0xff]  ;;  %7443 = vmatpush3.bf16.msra.mxu1 %v7440_v48  ;;  %v729_v48 = vld [vmem:[%s13429_s1 + $0x440] sm:$0xff] }
 0x156   : > { %1147 = vmatmul.mubr.f32.gmra.mrb[46].mxu0 %v9284_v33 }
 0x157   : > { %1151 = vmatprep.mubr.f32.mxu0 %v9021_v46  ;;  %v723_v46 = vld [vmem:[%s13429_s1 + $0x410] sm:$0xff] }
 0x158   : > { %v7444_v63 = vpack.c.bf16 %v724_v51, %v723_v46  ;;  %v730_v46 = vld [vmem:[%s13429_s1 + $0x448] sm:$0xff] }
 0x159   : > { %v7456_v51 = vpack.c.bf16 %v730_v46, %v729_v48  ;;  %v9372_v46 = vld [vmem:[%s8609_s15 + $0x172] sm:$0xff] }
 0x15a   : > { %1152 = vmatmul.mubr.f32.gmra.mrb[48].mxu0 %v9289_v36  ;;  %7445 = vmatprep.subr.bf16.mxu1 %v7444_v63 }
 0x15b   : > { %1156 = vmatprep.mubr.f32.mxu0 %v9029_v49  ;;  %7447 = vmatpush3.bf16.msra.mxu1 %v7444_v63  ;;  %v725_v49 = vld [vmem:[%s13429_s1 + $0x420] sm:$0xff] }
 0x15c   : > { %v7448_v62 = vpack.c.bf16 %v726_v8, %v725_v49  ;;  %v9347_v63 = vld [vmem:[%s8609_s15 + $0x180] sm:$0xff]  ;;  %v731_v49 = vld [vmem:[%s13429_s1 + $0x450] sm:$0xff]  ;;  %v732_v8 = vld [vmem:[%s13429_s1 + $0x458] sm:$0xff] }
 0x15e   : > { %1157 = vmatmul.mubr.f32.gmra.mrb[50].mxu0 %v9300_v43  ;;  %7449 = vmatprep.subr.bf16.mxu1 %v7448_v62 }
 0x15f   : > { %1161 = vmatprep.mubr.f32.mxu0 %v9037_v53  ;;  %7451 = vmatpush3.bf16.msra.mxu1 %v7448_v62  ;;  %v727_v53 = vld [vmem:[%s13429_s1 + $0x430] sm:$0xff]  ;;  %v7460_v62 = vpack.c.bf16 %v732_v8, %v731_v49  ;;  %v690_v49 = vld [vmem:[%s13429_s1 + $0x308] sm:$0xff] }
 0x160   : > { %v7452_v39 = vpack.c.bf16 %v728_v58, %v727_v53  ;;  %v9361_v53 = vld [vmem:[%s8609_s15 + $0x188] sm:$0xff]  ;;  %v733_v58 = vld [vmem:[%s13429_s1 + $0x460] sm:$0xff]  ;;  %v735_v8 = vld [vmem:[%s13429_s1 + $0x470] sm:$0xff] }
 0x161   : > { %13606 = vst [vmem:[#allocation18_spill] sm:$0xff] %v9361_v53 }
 0x162   : > { %1162 = vmatmul.mubr.f32.gmra.mrb[52].mxu0 %v9311_v15  ;;  %7453 = vmatprep.subr.bf16.mxu1 %v7452_v39 }
 0x163   : > { %1166 = vmatprep.mubr.f32.mxu0 %v9045_v56  ;;  %v9333_v56 = vld [vmem:[%s8609_s15 + $0x152] sm:$0xff]  ;;  %7455 = vmatpush3.bf16.msra.mxu1 %v7452_v39  ;;  %v734_v39 = vld [vmem:[%s13429_s1 + $0x468] sm:$0xff] }
 0x164   : > { %7457 = vmatprep.subr.bf16.mxu1 %v7456_v51  ;;  %v7464_v48 = vpack.c.bf16 %v734_v39, %v733_v58 }
 0x166   : > { %1167 = vmatmul.mubr.f32.gmra.mrb[54].mxu0 %v9322_v20 }
 0x167   : > { %1171 = vmatprep.mubr.f32.mxu0 %v9053_v60  ;;  %v9344_v60 = vld [vmem:[%s8609_s15 + $0x15a] sm:$0xff]  ;;  %7459 = vmatpush3.bf16.msra.mxu1 %v7456_v51 }
 0x168   : > { %7461 = vmatprep.subr.bf16.mxu1 %v7460_v62  ;;  %v689_v51 = vld [vmem:[%s13429_s1 + $0x300] sm:$0xff] }
 0x169   : > { %v7393_v39 = vpack.c.bf16 %v690_v49, %v689_v51  ;;  %v694_v51 = vld [vmem:[%s13429_s1 + $0x328] sm:$0xff] }
 0x16a   : > { %1172 = vmatmul.mubr.f32.gmra.mrb[56].mxu0 %v9333_v56  ;;  %v698_v49 = vld [vmem:[%s13429_s1 + $0x348] sm:$0xff] }
 0x16b   : > { %1176 = vmatprep.mubr.f32.mxu0 %v9061_v3  ;;  %v9358_v3 = vld [vmem:[%s8609_s15 + $0x16a] sm:$0xff]  ;;  %7463 = vmatpush3.bf16.msra.mxu1 %v7460_v62  ;;  %v736_v62 = vld [vmem:[%s13429_s1 + $0x478] sm:$0xff] }
 0x16c   : > { %7465 = vmatprep.subr.bf16.mxu1 %v7464_v48  ;;  %v7468_v58 = vpack.c.bf16 %v736_v62, %v735_v8  ;;  %v700_v62 = vld [vmem:[%s13429_s1 + $0x358] sm:$0xff] }
 0x16e   : > { %1177 = vmatmul.mubr.f32.gmra.mrb[58].mxu0 %v9344_v60 }
 0x16f   : > { %1181 = vmatprep.mubr.f32.mxu0 %v9347_v63  ;;  %7467 = vmatpush3.bf16.msra.mxu1 %v7464_v48  ;;  %v692_v48 = vld [vmem:[%s13429_s1 + $0x318] sm:$0xff] }
 0x170   : > { %7469 = vmatprep.subr.bf16.mxu1 %v7468_v58 }
 0x172   : > { %1182 = vmatmul.mubr.f32.gmra.mrb[60].mxu0 %v9358_v3 }
 0x173   : > { %1186 = vmatprep.mubr.f32.mxu0 %v9361_v53  ;;  %v691_v53 = vld [vmem:[%s13429_s1 + $0x310] sm:$0xff]  ;;  %7471 = vmatpush3.bf16.msra.mxu1 %v7468_v58  ;;  %v702_v58 = vld [vmem:[%s13429_s1 + $0x368] sm:$0xff] }
 0x174   : > { %7472 = vmatprep.subr.bf16.mxu1 %v13605_v44  ;;  %v7396_v8 = vpack.c.bf16 %v692_v48, %v691_v53  ;;  %v696_v53 = vld [vmem:[%s13429_s1 + $0x338] sm:$0xff]  ;;  %v706_v48 = vld [vmem:[%s13429_s1 + $0x388] sm:$0xff] }
 0x176   : > { %1187 = vmatmul.mubr.f32.gmra.mrb[62].mxu0 %v9372_v46  ;;  %6981 = vmatmul.mubr.f32.vlgmr.msra.gmra.mrb[0].mxu1 %v9122_v5 }
 0x177   : > { %1256 = vmatprep.mubr.f32.mxu0 %v9089_v0  ;;  %v693_v0 = vld [vmem:[%s13429_s1 + $0x320] sm:$0xff]  ;;  %6983 = vmatprep.mubr.f32.mxu1 %v9134_v25 }
 0x17a   : > { %1257 = vmatmul.mubr.f32.vlgmr.msra.gmra.mrb[0].mxu0 %v8721_v59  ;;  %v7399_v59 = vpack.c.bf16 %v694_v51, %v693_v0  ;;  %6984 = vmatmul.mubr.f32.gmra.mrb[2].mxu1 %v9146_v30  ;;  %v710_v0 = vld [vmem:[%s13429_s1 + $0x3a8] sm:$0xff]  ;;  %v712_v51 = vld [vmem:[%s13429_s1 + $0x3b8] sm:$0xff] }
 0x17b   : > { %7394 = vmatpush1.bf16.msra.mxu0 %v7393_v39  ;;  %1261 = vmatprep.mubr.f32.mxu0 %v9101_v9  ;;  %v695_v9 = vld [vmem:[%s13429_s1 + $0x330] sm:$0xff]  ;;  %v704_v39 = vld [vmem:[%s13429_s1 + $0x378] sm:$0xff] }
 0x17c   : > { %7395 = vmatprep.subr.bf16.mxu0 %v13605_v44  ;;  %6986 = vmatprep.mubr.f32.mxu1 %v9158_v35 }
 0x17e   : > { %1262 = vmatmul.mubr.f32.gmra.mrb[2].mxu0 %v8735_v1  ;;  %v7402_v1 = vpack.c.bf16 %v696_v53, %v695_v9  ;;  %6987 = vmatmul.mubr.f32.gmra.mrb[4].mxu1 %v9170_v40  ;;  %v716_v9 = vld [vmem:[%s13429_s1 + $0x3d8] sm:$0xff]  ;;  %v718_v53 = vld [vmem:[%s13429_s1 + $0x3e8] sm:$0xff] }
 0x17f   : > { %1266 = vmatprep.mubr.f32.mxu0 %v8765_v11  ;;  %7397 = vmatpush1.bf16.msra.mxu0 %v7396_v8  ;;  %v697_v11 = vld [vmem:[%s13429_s1 + $0x340] sm:$0xff]  ;;  %v708_v8 = vld [vmem:[%s13429_s1 + $0x398] sm:$0xff] }
 0x180   : > { %7398 = vmatprep.subr.bf16.mxu0 %v13605_v44  ;;  %6989 = vmatprep.mubr.f32.mxu1 %v9182_v45 }
 0x182   : > { %1267 = vmatmul.mubr.f32.gmra.mrb[4].mxu0 %v8750_v6  ;;  %v7405_v6 = vpack.c.bf16 %v698_v49, %v697_v11  ;;  %6990 = vmatmul.mubr.f32.gmra.mrb[6].mxu1 %v9194_v50  ;;  %v720_v11 = vld [vmem:[%s13429_s1 + $0x3f8] sm:$0xff]  ;;  %v6681_v49 = vld [vmem:[%s8609_s15 + $0x80] sm:$0xff] }
 0x183   : > { %1271 = vmatprep.mubr.f32.mxu0 %v9122_v5  ;;  %7400 = vmatpush1.bf16.msra.mxu0 %v7399_v59  ;;  %v699_v5 = vld [vmem:[%s13429_s1 + $0x350] sm:$0xff]  ;;  %v714_v59 = vld [vmem:[%s13429_s1 + $0x3c8] sm:$0xff] }
 0x184   : > { %7401 = vmatprep.subr.bf16.mxu0 %v13605_v44  ;;  %6992 = vmatprep.mubr.f32.mxu1 %v9206_v55 }
 0x186   : > { %1272 = vmatmul.mubr.f32.gmra.mrb[6].mxu0 %v8768_v12  ;;  %v7408_v12 = vpack.c.bf16 %v700_v62, %v699_v5  ;;  %6993 = vmatmul.mubr.f32.gmra.mrb[8].mxu1 %v9218_v61  ;;  %v6682_v5 = vld [vmem:[%s8609_s15 + $0x90] sm:$0xff]  ;;  %v6715_v62 = vld [vmem:[%s8609_s15 + $0x99] sm:$0xff] }
 0x187   : > { %1276 = vmatprep.mubr.f32.mxu0 %v9134_v25  ;;  %7403 = vmatpush1.bf16.msra.mxu0 %v7402_v1  ;;  %v701_v25 = vld [vmem:[%s13429_s1 + $0x360] sm:$0xff]  ;;  %v719_v1 = vld [vmem:[%s13429_s1 + $0x3f0] sm:$0xff] }
 0x188   : > { %7404 = vmatprep.subr.bf16.mxu0 %v13605_v44  ;;  %6995 = vmatprep.mubr.f32.mxu1 %v9230_v7 }
 0x18a   : > { %1277 = vmatmul.mubr.f32.gmra.mrb[8].mxu0 %v8784_v17  ;;  %v7411_v17 = vpack.c.bf16 %v702_v58, %v701_v25  ;;  %6996 = vmatmul.mubr.f32.gmra.mrb[10].mxu1 %v9242_v13  ;;  %v6716_v25 = vld [vmem:[%s8609_s15 + $0xa9] sm:$0xff] }
 0x18b   : > { %1281 = vmatprep.mubr.f32.mxu0 %v9146_v30  ;;  %7406 = vmatpush1.bf16.msra.mxu0 %v7405_v6  ;;  %v703_v30 = vld [vmem:[%s13429_s1 + $0x370] sm:$0xff]  ;;  %v6684_v58 = vld [vmem:[%s8609_s15 + $0xa8] sm:$0xff] }
 0x18c   : > { %7407 = vmatprep.subr.bf16.mxu0 %v13605_v44  ;;  %6998 = vmatprep.mubr.f32.mxu1 %v9248_v4  ;;  %v6714_v6 = vld [vmem:[%s8609_s15 + $0x91] sm:$0xff] }
 0x18e   : > { %1282 = vmatmul.mubr.f32.gmra.mrb[10].mxu0 %v8799_v22  ;;  %v7414_v22 = vpack.c.bf16 %v704_v39, %v703_v30  ;;  %6999 = vmatmul.mubr.f32.gmra.mrb[12].mxu1 %v9254_v16  ;;  %v6685_v30 = vld [vmem:[%s8609_s15 + $0xb0] sm:$0xff]  ;;  %v6718_v39 = vld [vmem:[%s8609_s15 + $0xc1] sm:$0xff] }
 0x18f   : > { %1286 = vmatprep.mubr.f32.mxu0 %v9158_v35  ;;  %7409 = vmatpush1.bf16.msra.mxu0 %v7408_v12  ;;  %v705_v35 = vld [vmem:[%s13429_s1 + $0x380] sm:$0xff]  ;;  %v6683_v12 = vld [vmem:[%s8609_s15 + $0x98] sm:$0xff] }
 0x190   : > { %7410 = vmatprep.subr.bf16.mxu0 %v13605_v44  ;;  %7001 = vmatprep.mubr.f32.mxu1 %v9259_v54 }
 0x192   : > { %1287 = vmatmul.mubr.f32.gmra.mrb[12].mxu0 %v8814_v27  ;;  %v7417_v27 = vpack.c.bf16 %v706_v48, %v705_v35  ;;  %7002 = vmatmul.mubr.f32.gmra.mrb[14].mxu1 %v9264_v19  ;;  %v6719_v35 = vld [vmem:[%s8609_s15 + $0xc9] sm:$0xff] }
 0x193   : > { %1291 = vmatprep.mubr.f32.mxu0 %v9170_v40  ;;  %7412 = vmatpush1.bf16.msra.mxu0 %v7411_v17  ;;  %v707_v40 = vld [vmem:[%s13429_s1 + $0x390] sm:$0xff]  ;;  %v6687_v48 = vld [vmem:[%s8609_s15 + $0xc8] sm:$0xff] }
 0x194   : > { %7413 = vmatprep.subr.bf16.mxu0 %v13605_v44  ;;  %7004 = vmatprep.mubr.f32.mxu1 %v9269_v23  ;;  %v6717_v17 = vld [vmem:[%s8609_s15 + $0xb1] sm:$0xff] }
 0x196   : > { %1292 = vmatmul.mubr.f32.gmra.mrb[14].mxu0 %v8829_v32  ;;  %v7420_v32 = vpack.c.bf16 %v708_v8, %v707_v40  ;;  %7005 = vmatmul.mubr.f32.gmra.mrb[16].mxu1 %v9274_v26  ;;  %v6688_v40 = vld [vmem:[%s8609_s15 + $0xd8] sm:$0xff]  ;;  %v6721_v8 = vld [vmem:[%s8609_s15 + $0xe1] sm:$0xff] }
 0x197   : > { %1296 = vmatprep.mubr.f32.mxu0 %v9182_v45  ;;  %7415 = vmatpush1.bf16.msra.mxu0 %v7414_v22  ;;  %v709_v45 = vld [vmem:[%s13429_s1 + $0x3a0] sm:$0xff] }
 0x198   : > { %7416 = vmatprep.subr.bf16.mxu0 %v13605_v44  ;;  %7007 = vmatprep.mubr.f32.mxu1 %v9279_v29  ;;  %v6686_v22 = vld [vmem:[%s8609_s15 + $0xc0] sm:$0xff] }
 0x19a   : > { %1297 = vmatmul.mubr.f32.gmra.mrb[16].mxu0 %v8844_v37  ;;  %v7423_v37 = vpack.c.bf16 %v710_v0, %v709_v45  ;;  %7008 = vmatmul.mubr.f32.gmra.mrb[18].mxu1 %v9284_v33  ;;  %v6722_v45 = vld [vmem:[%s8609_s15 + $0xf1] sm:$0xff] }
 0x19b   : > { %1301 = vmatprep.mubr.f32.mxu0 %v9194_v50  ;;  %7418 = vmatpush1.bf16.msra.mxu0 %v7417_v27  ;;  %v711_v50 = vld [vmem:[%s13429_s1 + $0x3b0] sm:$0xff]  ;;  %v6720_v27 = vld [vmem:[%s8609_s15 + $0xd9] sm:$0xff] }
 0x19c   : > { %7419 = vmatprep.subr.bf16.mxu0 %v13605_v44  ;;  %7010 = vmatprep.mubr.f32.mxu1 %v9289_v36  ;;  %v6690_v0 = vld [vmem:[%s8609_s15 + $0xf0] sm:$0xff] }
 0x19e   : > { %1302 = vmatmul.mubr.f32.gmra.mrb[18].mxu0 %v8859_v42  ;;  %v7426_v42 = vpack.c.bf16 %v712_v51, %v711_v50  ;;  %7011 = vmatmul.mubr.f32.gmra.mrb[20].mxu1 %v9300_v43  ;;  %v6691_v50 = vld [vmem:[%s8609_s15 + $0xf8] sm:$0xff]  ;;  %v6724_v51 = vld [vmem:[%s8609_s15 + $0x109] sm:$0xff] }
 0x19f   : > { %1306 = vmatprep.mubr.f32.mxu0 %v9206_v55  ;;  %7421 = vmatpush1.bf16.msra.mxu0 %v7420_v32  ;;  %v713_v55 = vld [vmem:[%s13429_s1 + $0x3c0] sm:$0xff] }
 0x1a0   : > { %7422 = vmatprep.subr.bf16.mxu0 %v13605_v44  ;;  %7013 = vmatprep.mubr.f32.mxu1 %v9311_v15  ;;  %v6689_v32 = vld [vmem:[%s8609_s15 + $0xe0] sm:$0xff] }
 0x1a2   : > { %1307 = vmatmul.mubr.f32.gmra.mrb[20].mxu0 %v8874_v47  ;;  %v7429_v47 = vpack.c.bf16 %v714_v59, %v713_v55  ;;  %7014 = vmatmul.mubr.f32.gmra.mrb[22].mxu1 %v9322_v20  ;;  %v6725_v55 = vld [vmem:[%s8609_s15 + $0x111] sm:$0xff] }
 0x1a3   : > { %1311 = vmatprep.mubr.f32.mxu0 %v9218_v61  ;;  %7424 = vmatpush1.bf16.msra.mxu0 %v7423_v37  ;;  %v715_v61 = vld [vmem:[%s13429_s1 + $0x3d0] sm:$0xff]  ;;  %v6723_v37 = vld [vmem:[%s8609_s15 + $0xf9] sm:$0xff] }
 0x1a4   : > { %7425 = vmatprep.subr.bf16.mxu0 %v13605_v44  ;;  %7016 = vmatprep.mubr.f32.mxu1 %v9333_v56  ;;  %v6693_v59 = vld [vmem:[%s8609_s15 + $0x110] sm:$0xff] }
 0x1a6   : > { %1312 = vmatmul.mubr.f32.gmra.mrb[22].mxu0 %v8889_v52  ;;  %v7432_v52 = vpack.c.bf16 %v716_v9, %v715_v61  ;;  %7017 = vmatmul.mubr.f32.gmra.mrb[24].mxu1 %v9344_v60  ;;  %v6694_v61 = vld [vmem:[%s8609_s15 + $0x120] sm:$0xff]  ;;  %v6727_v9 = vld [vmem:[%s8609_s15 + $0x129] sm:$0xff] }
 0x1a7   : > { %1316 = vmatprep.mubr.f32.mxu0 %v9230_v7  ;;  %7427 = vmatpush1.bf16.msra.mxu0 %v7426_v42  ;;  %v717_v7 = vld [vmem:[%s13429_s1 + $0x3e0] sm:$0xff]  ;;  %v6692_v42 = vld [vmem:[%s8609_s15 + $0x108] sm:$0xff] }
 0x1a8   : > { %7428 = vmatprep.subr.bf16.mxu0 %v13605_v44  ;;  %7019 = vmatprep.mubr.f32.mxu1 %v9358_v3 }
 0x1aa   : > { %1317 = vmatmul.mubr.f32.gmra.mrb[24].mxu0 %v8904_v57  ;;  %v7435_v57 = vpack.c.bf16 %v718_v53, %v717_v7  ;;  %7020 = vmatmul.mubr.f32.gmra.mrb[26].mxu1 %v9372_v46  ;;  %v6728_v7 = vld [vmem:[%s8609_s15 + $0x139] sm:$0xff] }
 0x1ab   : > { %1321 = vmatprep.mubr.f32.mxu0 %v9242_v13  ;;  %7430 = vmatpush1.bf16.msra.mxu0 %v7429_v47  ;;  %v6672_v13 = vld [vmem:[%s8609_s15 + $0x182] sm:$0xff]  ;;  %v6696_v53 = vld [vmem:[%s8609_s15 + $0x138] sm:$0xff] }
 0x1ac   : > { %7431 = vmatprep.subr.bf16.mxu0 %v13605_v44  ;;  %7022 = vmatprep.mubr.f32.mxu1 %v6672_v13  ;;  %v6726_v47 = vld [vmem:[%s8609_s15 + $0x121] sm:$0xff] }
 0x1ae   : > { %1322 = vmatmul.mubr.f32.gmra.mrb[26].mxu0 %v8919_v2  ;;  %v7438_v2 = vpack.c.bf16 %v720_v11, %v719_v1  ;;  %v6697_v11 = vld [vmem:[%s8609_s15 + $0x140] sm:$0xff] }
 0x1af   : > { %1326 = vmatprep.mubr.f32.mxu0 %v9248_v4  ;;  %7433 = vmatpush1.bf16.msra.mxu0 %v7432_v52  ;;  %v6673_v4 = vld [vmem:[%s8609_s15 + $0x18a] sm:$0xff] }
 0x1b0   : > { %7434 = vmatprep.subr.bf16.mxu0 %v13605_v44  ;;  %7023 = vmatmul.mubr.f32.gmra.mrb[28].mxu1 %v6673_v4  ;;  %v6695_v52 = vld [vmem:[%s8609_s15 + $0x128] sm:$0xff] }
 0x1b2   : > { %1327 = vmatmul.mubr.f32.gmra.mrb[28].mxu0 %v8934_v10  ;;  %v13607_v10 = vld [vmem:[#allocation12_spill] sm:$0xff] }
 0x1b3   : > { %1331 = vmatprep.mubr.f32.mxu0 %v9254_v16  ;;  %7436 = vmatpush1.bf16.msra.mxu0 %v7435_v57  ;;  %v6706_v16 = vld [vmem:[%s8609_s15 + $0x31] sm:$0xff] }
 0x1b4   : > { %7437 = vmatprep.subr.bf16.mxu0 %v13605_v44 }
 0x1b6   : > { %1332 = vmatmul.mubr.f32.gmra.mrb[30].mxu0 %v8943_v14  ;;  %v13608_v14 = vld [vmem:[#allocation13_spill] sm:$0xff] }
 0x1b7   : > { %1336 = vmatprep.mubr.f32.mxu0 %v9259_v54  ;;  %7439 = vmatpush1.bf16.msra.mxu0 %v7438_v2  ;;  %v6674_v54 = vld [vmem:[%s8609_s15 + $0x30] sm:$0xff]  ;;  %v8454_v2 = vmov 0.0  }
 0x1b8   : > { %2406 = vst [vmem:[#allocation2 + $0x18] sm:$0xff] %v8454_v2  ;;  %2407 = vst [vmem:[#allocation2 + $0x20] sm:$0xff] %v8454_v2 }
 0x1b9   : > { %2403 = vst [vmem:[#allocation2] sm:$0xff] %v8454_v2  ;;  %2404 = vst [vmem:[#allocation2 + $0x8] sm:$0xff] %v8454_v2 }
 0x1ba   : > { %1337 = vmatmul.mubr.f32.gmra.mrb[32].mxu0 %v8952_v18  ;;  %v13609_v18 = vld [vmem:[#allocation14_spill] sm:$0xff]  ;;  %2405 = vst [vmem:[#allocation2 + $0x10] sm:$0x3] %v8454_v2  ;;  %2408 = vst [vmem:[#allocation2 + $0x28] sm:$0x3] %v8454_v2 }
 0x1bb   : > { %1341 = vmatprep.mubr.f32.mxu0 %v9264_v19  ;;  %v6707_v19 = vld [vmem:[%s8609_s15 + $0x39] sm:$0xff]  ;;  %2409 = vst [vmem:[#allocation2 + $0x30] sm:$0xff] %v8454_v2  ;;  %2410 = vst [vmem:[#allocation2 + $0x38] sm:$0xff] %v8454_v2 }
 0x1bc   : > { %2411 = vst [vmem:[#allocation2 + $0x40] sm:$0x3] %v8454_v2  ;;  %2412 = vst [vmem:[#allocation2 + $0x48] sm:$0xff] %v8454_v2 }
 0x1bd   : > { %2413 = vst [vmem:[#allocation2 + $0x50] sm:$0xff] %v8454_v2  ;;  %2414 = vst [vmem:[#allocation2 + $0x58] sm:$0x3] %v8454_v2 }
 0x1be   : > { %1342 = vmatmul.mubr.f32.gmra.mrb[34].mxu0 %v8960_v21  ;;  %v13610_v21 = vld [vmem:[#allocation15_spill] sm:$0xff]  ;;  %2415 = vst [vmem:[#allocation2 + $0x60] sm:$0xff] %v8454_v2  ;;  %2416 = vst [vmem:[#allocation2 + $0x68] sm:$0xff] %v8454_v2 }
 0x1bf   : > { %1346 = vmatprep.mubr.f32.mxu0 %v9269_v23  ;;  %v6675_v23 = vld [vmem:[%s8609_s15 + $0x38] sm:$0xff]  ;;  %2417 = vst [vmem:[#allocation2 + $0x70] sm:$0x3] %v8454_v2  ;;  %2418 = vst [vmem:[#allocation2 + $0x78] sm:$0xff] %v8454_v2 }
 0x1c0   : > { %2419 = vst [vmem:[#allocation2 + $0x80] sm:$0xff] %v8454_v2  ;;  %2420 = vst [vmem:[#allocation2 + $0x88] sm:$0x3] %v8454_v2 }
 0x1c1   : > { %2421 = vst [vmem:[#allocation2 + $0x90] sm:$0xff] %v8454_v2  ;;  %2422 = vst [vmem:[#allocation2 + $0x98] sm:$0xff] %v8454_v2 }
 0x1c2   : > { %1347 = vmatmul.mubr.f32.gmra.mrb[36].mxu0 %v8968_v24  ;;  %v13611_v24 = vld [vmem:[#allocation16_spill] sm:$0xff]  ;;  %2423 = vst [vmem:[#allocation2 + $0xa0] sm:$0x3] %v8454_v2  ;;  %2424 = vst [vmem:[#allocation2 + $0xa8] sm:$0xff] %v8454_v2 }
 0x1c3   : > { %1351 = vmatprep.mubr.f32.mxu0 %v9274_v26  ;;  %v6708_v26 = vld [vmem:[%s8609_s15 + $0x49] sm:$0xff]  ;;  %2425 = vst [vmem:[#allocation2 + $0xb0] sm:$0xff] %v8454_v2  ;;  %2426 = vst [vmem:[#allocation2 + $0xb8] sm:$0x3] %v8454_v2 }
 0x1c4   : > { %2427 = vst [vmem:[#allocation2 + $0xc0] sm:$0xff] %v8454_v2  ;;  %2428 = vst [vmem:[#allocation2 + $0xc8] sm:$0xff] %v8454_v2 }
 0x1c5   : > { %2429 = vst [vmem:[#allocation2 + $0xd0] sm:$0x3] %v8454_v2  ;;  %2430 = vst [vmem:[#allocation2 + $0xd8] sm:$0xff] %v8454_v2 }
 0x1c6   : > { %1352 = vmatmul.mubr.f32.gmra.mrb[38].mxu0 %v8976_v28  ;;  %v13612_v28 = vld [vmem:[#allocation17_spill] sm:$0xff]  ;;  %2431 = vst [vmem:[#allocation2 + $0xe0] sm:$0xff] %v8454_v2  ;;  %2432 = vst [vmem:[#allocation2 + $0xe8] sm:$0x3] %v8454_v2 }
 0x1c7   : > { %1356 = vmatprep.mubr.f32.mxu0 %v9279_v29  ;;  %v6676_v29 = vld [vmem:[%s8609_s15 + $0x48] sm:$0xff]  ;;  %2433 = vst [vmem:[#allocation2 + $0xf0] sm:$0xff] %v8454_v2  ;;  %2434 = vst [vmem:[#allocation2 + $0xf8] sm:$0xff] %v8454_v2 }
 0x1c8   : > { %2435 = vst [vmem:[#allocation2 + $0x100] sm:$0x3] %v8454_v2  ;;  %2436 = vst [vmem:[#allocation2 + $0x108] sm:$0xff] %v8454_v2 }
 0x1c9   : > { %2437 = vst [vmem:[#allocation2 + $0x110] sm:$0xff] %v8454_v2  ;;  %2438 = vst [vmem:[#allocation2 + $0x118] sm:$0x3] %v8454_v2 }
 0x1ca   : > { %1357 = vmatmul.mubr.f32.gmra.mrb[40].mxu0 %v8984_v31  ;;  %v9583_v31 = vld [vmem:[%s8609_s15 + $0x181] sm:$0xff]  ;;  %2439 = vst [vmem:[#allocation2 + $0x120] sm:$0xff] %v8454_v2  ;;  %2440 = vst [vmem:[#allocation2 + $0x128] sm:$0xff] %v8454_v2 }
 0x1cb   : > { %1361 = vmatprep.mubr.f32.mxu0 %v9284_v33  ;;  %v6709_v33 = vld [vmem:[%s8609_s15 + $0x51] sm:$0xff]  ;;  %2441 = vst [vmem:[#allocation2 + $0x130] sm:$0x3] %v8454_v2  ;;  %2442 = vst [vmem:[#allocation2 + $0x138] sm:$0xff] %v8454_v2 }
 0x1cc   : > { %2443 = vst [vmem:[#allocation2 + $0x140] sm:$0xff] %v8454_v2  ;;  %2444 = vst [vmem:[#allocation2 + $0x148] sm:$0x3] %v8454_v2 }
 0x1cd   : > { %2445 = vst [vmem:[#allocation2 + $0x150] sm:$0xff] %v8454_v2  ;;  %2446 = vst [vmem:[#allocation2 + $0x158] sm:$0xff] %v8454_v2 }
 0x1ce   : > { %1362 = vmatmul.mubr.f32.gmra.mrb[42].mxu0 %v8992_v34  ;;  %v6768_v34 = vld [vmem:[%s8609_s15 + $0x19a] sm:$0xff]  ;;  %2447 = vst [vmem:[#allocation2 + $0x160] sm:$0x3] %v8454_v2  ;;  %2448 = vst [vmem:[#allocation2 + $0x168] sm:$0xff] %v8454_v2 }
 0x1cf   : > { %1366 = vmatprep.mubr.f32.mxu0 %v9289_v36  ;;  %7025 = vmatprep.mubr.f32.mxu1 %v6768_v34  ;;  %v6677_v36 = vld [vmem:[%s8609_s15 + $0x50] sm:$0xff]  ;;  %2449 = vst [vmem:[#allocation2 + $0x170] sm:$0xff] %v8454_v2  ;;  %2450 = vst [vmem:[#allocation2 + $0x178] sm:$0x3] %v8454_v2 }
 0x1d0   : > { %2451 = vst [vmem:[#allocation2 + $0x180] sm:$0xff] %v8454_v2  ;;  %2452 = vst [vmem:[#allocation2 + $0x188] sm:$0xff] %v8454_v2 }
 0x1d1   : > { %2453 = vst [vmem:[#allocation2 + $0x190] sm:$0x3] %v8454_v2  ;;  %2454 = vst [vmem:[#allocation2 + $0x198] sm:$0xff] %v8454_v2 }
 0x1d2   : > { %1367 = vmatmul.mubr.f32.gmra.mrb[44].mxu0 %v9000_v38  ;;  %v6769_v38 = vld [vmem:[%s8609_s15 + $0x1a2] sm:$0xff]  ;;  %2455 = vst [vmem:[#allocation2 + $0x1a0] sm:$0xff] %v8454_v2  ;;  %2456 = vst [vmem:[#allocation2 + $0x1a8] sm:$0x3] %v8454_v2 }
 0x1d3   : > { %1371 = vmatprep.mubr.f32.mxu0 %v9300_v43  ;;  %7026 = vmatmul.mubr.f32.gmra.mrb[30].mxu1 %v6769_v38  ;;  %v6710_v43 = vld [vmem:[%s8609_s15 + $0x61] sm:$0xff] }
 0x1d4   : > { %v6700_v38 = vld [vmem:[%s8609_s15 + $0x168] sm:$0xff]  ;;  %7060 = vmatprep.mubr.msk.f32.mxu1 %vm8455_vm3, %v8454_v2 }
 0x1d6   : > { %1372 = vmatmul.mubr.f32.gmra.mrb[46].mxu0 %v9008_v41  ;;  %v9589_v41 = vld [vmem:[%s8609_s15 + $0x189] sm:$0xff] }
 0x1d7   : > { %1376 = vmatprep.mubr.f32.mxu0 %v9311_v15  ;;  %v6678_v15 = vld [vmem:[%s8609_s15 + $0x60] sm:$0xff] }
 0x1da   : > { %1377 = vmatmul.mubr.f32.gmra.mrb[48].mxu0 %v13607_v10 }
 0x1db   : > { %1381 = vmatprep.mubr.f32.mxu0 %v9322_v20  ;;  %v6711_v20 = vld [vmem:[%s8609_s15 + $0x69] sm:$0xff] }
 0x1de   : > { %1382 = vmatmul.mubr.f32.gmra.mrb[50].mxu0 %v13608_v14  ;;  %v6698_v14 = vld [vmem:[%s8609_s15 + $0x150] sm:$0xff] }
 0x1df   : > { %1386 = vmatprep.mubr.f32.mxu0 %v9333_v56  ;;  %v6679_v56 = vld [vmem:[%s8609_s15 + $0x68] sm:$0xff] }
 0x1e2   : > { %1387 = vmatmul.mubr.f32.gmra.mrb[52].mxu0 %v13609_v18 }
 0x1e3   : > { %1391 = vmatprep.mubr.f32.mxu0 %v9344_v60  ;;  %v6712_v60 = vld [vmem:[%s8609_s15 + $0x79] sm:$0xff] }
 0x1e6   : > { %1392 = vmatmul.mubr.f32.gmra.mrb[54].mxu0 %v13610_v21  ;;  %v6731_v21 = vld [vmem:[%s8609_s15 + $0x159] sm:$0xff] }
 0x1e7   : > { %1396 = vmatprep.mubr.f32.mxu0 %v9358_v3  ;;  %v6680_v3 = vld [vmem:[%s8609_s15 + $0x78] sm:$0xff] }
 0x1ea   : > { %1397 = vmatmul.mubr.f32.gmra.mrb[56].mxu0 %v13611_v24  ;;  %v6699_v24 = vld [vmem:[%s8609_s15 + $0x158] sm:$0xff] }
 0x1eb   : > { %1401 = vmatprep.mubr.f32.mxu0 %v9372_v46  ;;  %v6713_v46 = vld [vmem:[%s8609_s15 + $0x81] sm:$0xff] }
 0x1ee   : > { %1402 = vmatmul.mubr.f32.gmra.mrb[58].mxu0 %v13612_v28  ;;  %v6732_v28 = vld [vmem:[%s8609_s15 + $0x169] sm:$0xff] }
 0x1ef   : > { %1406 = vmatprep.mubr.f32.mxu0 %v6672_v13  ;;  %v6729_v13 = vld [vmem:[%s8609_s15 + $0x141] sm:$0xff] }
 0x1f2   : > { %1407 = vmatmul.mubr.f32.gmra.mrb[60].mxu0 %v9583_v31 }
 0x1f3   : > { %1411 = vmatprep.mubr.f32.mxu0 %v6673_v4  ;;  %v6730_v4 = vld [vmem:[%s8609_s15 + $0x151] sm:$0xff] }
 0x1f6   : > { %1412 = vmatmul.mubr.f32.gmra.mrb[62].mxu0 %v9589_v41 }
 0x1f7   : > { %1481 = vmatprep.mubr.f32.mxu0 %v6706_v16 }
 0x1fa   : > { %1482 = vmatmul.mubr.f32.vlgmr.msra.gmra.mrb[0].mxu0 %v6674_v54  ;;  %v6733_v54 = vld [vmem:[%s8609_s15 + $0x171] sm:$0xff] }
 0x1fb   : > { %1486 = vmatprep.mubr.f32.mxu0 %v6707_v19  ;;  %v6701_v19 = vld [vmem:[%s8609_s15 + $0x170] sm:$0xff] }
 0x1fe   : > { %1487 = vmatmul.mubr.f32.gmra.mrb[2].mxu0 %v6675_v23 }
 0x1ff   : > { %1491 = vmatprep.mubr.f32.mxu0 %v6708_v26 }
 0x202   : > { %1492 = vmatmul.mubr.f32.gmra.mrb[4].mxu0 %v6676_v29  ;;  %v6736_v29 = vld [vmem:[%s8609_s15 + $0x199] sm:$0xff] }
 0x203   : > { %1496 = vmatprep.mubr.f32.mxu0 %v6709_v33  ;;  %v13613_v33 = vld [vmem:[#allocation18_spill] sm:$0xff] }
 0x206   : > { %1497 = vmatmul.mubr.f32.gmra.mrb[6].mxu0 %v6677_v36 }
 0x207   : > { %1501 = vmatprep.mubr.f32.mxu0 %v6710_v43  ;;  %v6704_v43 = vld [vmem:[%s8609_s15 + $0x198] sm:$0xff] }
 0x20a   : > { %1502 = vmatmul.mubr.f32.gmra.mrb[8].mxu0 %v6678_v15 }
 0x20b   : > { %1506 = vmatprep.mubr.f32.mxu0 %v6711_v20  ;;  %v6737_v20 = vld [vmem:[%s8609_s15 + $0x1a1] sm:$0xff] }
 0x20e   : > { %1507 = vmatmul.mubr.f32.gmra.mrb[10].mxu0 %v6679_v56  ;;  %v6705_v56 = vld [vmem:[%s8609_s15 + $0x1a0] sm:$0xff]  ;;  %s8457_s15 = smov [#allocation6]  }
 0x20f   : > { %1511 = vmatprep.mubr.f32.mxu0 %v6712_v60  ;;  %s8354_s21 = sshll.u32 %s8457_s15, 4  ;;  %s8355_s21 = int_to_ptr.vmem [resolvable:$false] %s8354_s21 }
 0x210   : > { %s8356_s22 = scalar_lea.vmem %s8355_s21, 8192  ;;  %p8357_p2 = scmp.lt.s32.totalorder %s12749_s17, %s8355_s21 }
 0x211   : > { %p8358_p3 = scmp.lt.s32.totalorder %s8356_s22, %s8350_s20 }
 0x212   : > { %1512 = vmatmul.mubr.f32.gmra.mrb[12].mxu0 %v6680_v3 }
 0x213   : > { %1516 = vmatprep.mubr.f32.mxu0 %v6713_v46  ;;  %p8359_p4 = por %p8358_p3, %p8357_p2 }
 0x215   : > { %p8360_p7 = pnand %p8359_p4, %p8353_p12 }
 0x216   : > { %1517 = vmatmul.mubr.f32.gmra.mrb[14].mxu0 %v6681_v49 }
 0x217   : > { %1521 = vmatprep.mubr.f32.mxu0 %v6714_v6 }
 0x21a   : > { %1522 = vmatmul.mubr.f32.gmra.mrb[16].mxu0 %v6682_v5 }
 0x21b   : > { %1526 = vmatprep.mubr.f32.mxu0 %v6715_v62 }
 0x21e   : > { %1527 = vmatmul.mubr.f32.gmra.mrb[18].mxu0 %v6683_v12 }
 0x21f   : > { %1531 = vmatprep.mubr.f32.mxu0 %v6716_v25 }
 0x222   : > { %1532 = vmatmul.mubr.f32.gmra.mrb[20].mxu0 %v6684_v58 }
 0x223   : > { %1536 = vmatprep.mubr.f32.mxu0 %v6717_v17 }
 0x226   : > { %1537 = vmatmul.mubr.f32.gmra.mrb[22].mxu0 %v6685_v30 }
 0x227   : > { %1541 = vmatprep.mubr.f32.mxu0 %v6718_v39 }
 0x22a   : > { %1542 = vmatmul.mubr.f32.gmra.mrb[24].mxu0 %v6686_v22 }
 0x22b   : > { %1546 = vmatprep.mubr.f32.mxu0 %v6719_v35 }
 0x22e   : > { %1547 = vmatmul.mubr.f32.gmra.mrb[26].mxu0 %v6687_v48 }
 0x22f   : > { %1551 = vmatprep.mubr.f32.mxu0 %v6720_v27 }
 0x232   : > { %1552 = vmatmul.mubr.f32.gmra.mrb[28].mxu0 %v6688_v40 }
 0x233   : > { %1556 = vmatprep.mubr.f32.mxu0 %v6721_v8 }
 0x236   : > { %1557 = vmatmul.mubr.f32.gmra.mrb[30].mxu0 %v6689_v32  ;;  %v9777_v32 = vld [vmem:[%s13430_s2] ss:$0 sm:$0xff] }
 0x237   : > { %1561 = vmatprep.mubr.f32.mxu0 %v6722_v45 }
 0x23a   : > { %1562 = vmatmul.mubr.f32.gmra.mrb[32].mxu0 %v6690_v0 }
 0x23b   : > { %1566 = vmatprep.mubr.f32.mxu0 %v6723_v37 }
 0x23e   : > { %1567 = vmatmul.mubr.f32.gmra.mrb[34].mxu0 %v6691_v50 }
 0x23f   : > { %1571 = vmatprep.mubr.f32.mxu0 %v6724_v51 }
 0x242   : > { %1572 = vmatmul.mubr.f32.gmra.mrb[36].mxu0 %v6692_v42 }
 0x243   : > { %1576 = vmatprep.mubr.f32.mxu0 %v6725_v55 }
 0x246   : > { %1577 = vmatmul.mubr.f32.gmra.mrb[38].mxu0 %v6693_v59 }
 0x247   : > { %1581 = vmatprep.mubr.f32.mxu0 %v6726_v47 }
 0x249   : > { %v9638_v57 = vpop.f32.mrb[0].mxu1 }
 0x24a   : > { %1582 = vmatmul.mubr.f32.gmra.mrb[40].mxu0 %v6694_v61  ;;  %v9641_v1 = vpop.f32.mrb[1].mxu1 }
 0x24b   : > { %1586 = vmatprep.mubr.f32.mxu0 %v6727_v9 }
 0x24d   : > { %v9699_v10 = vpop.f32.mrb[2].mxu1 }
 0x24e   : > { %1587 = vmatmul.mubr.f32.gmra.mrb[42].mxu0 %v6695_v52  ;;  %v9702_v18 = vpop.f32.mrb[3].mxu1 }
 0x24f   : > { %1591 = vmatprep.mubr.f32.mxu0 %v6728_v7 }
 0x251   : > { %v9707_v34 = vpop.f32.mrb[4].mxu1 }
 0x252   : > { %1592 = vmatmul.mubr.f32.gmra.mrb[44].mxu0 %v6696_v53  ;;  %v9710_v16 = vpop.f32.mrb[5].mxu1 }
 0x253   : > { %1596 = vmatprep.mubr.f32.mxu0 %v6729_v13 }
 0x255   : > { %v9714_v23 = vpop.f32.mrb[6].mxu1 }
 0x256   : > { %1597 = vmatmul.mubr.f32.gmra.mrb[46].mxu0 %v6697_v11  ;;  %v9717_v26 = vpop.f32.mrb[7].mxu1 }
 0x257   : > { %1601 = vmatprep.mubr.f32.mxu0 %v6730_v4 }
 0x259   : > { %v9723_v36 = vpop.f32.mrb[8].mxu1 }
 0x25a   : > { %1602 = vmatmul.mubr.f32.gmra.mrb[48].mxu0 %v6698_v14  ;;  %v9726_v15 = vpop.f32.mrb[9].mxu1 }
 0x25b   : > { %1606 = vmatprep.mubr.f32.mxu0 %v6731_v21 }
 0x25e   : > { %1607 = vmatmul.mubr.f32.gmra.mrb[50].mxu0 %v6699_v24 }
 0x25f   : > { %1611 = vmatprep.mubr.f32.mxu0 %v6732_v28 }
 0x262   : > { %1612 = vmatmul.mubr.f32.gmra.mrb[52].mxu0 %v6700_v38 }
 0x263   : > { %1616 = vmatprep.mubr.f32.mxu0 %v6733_v54 }
 0x266   : > { %1617 = vmatmul.mubr.f32.gmra.mrb[54].mxu0 %v6701_v19 }
 0x267   : > { %1621 = vmatprep.mubr.f32.mxu0 %v9583_v31  ;;  %v9730_v31 = vpop.f32.mrb[10].mxu1 }
 0x268   : > { %v9732_v60 = vpop.f32.mrb[11].mxu1 }
 0x26a   : > { %1622 = vmatmul.mubr.f32.gmra.mrb[56].mxu0 %v9347_v63  ;;  %v9734_v63 = vpop.f32.mrb[12].mxu1 }
 0x26b   : > { %1626 = vmatprep.mubr.f32.mxu0 %v9589_v41  ;;  %v9736_v41 = vpop.f32.mrb[13].mxu1 }
 0x26c   : > { %v9738_v3 = vpop.f32.mrb[14].mxu1 }
 0x26d   : > { %v9740_v46 = vpop.f32.mrb[15].mxu1 }
 0x26e   : > { %1627 = vmatmul.mubr.f32.gmra.mrb[58].mxu0 %v13613_v33  ;;  %v9742_v49 = vpop.f32.mrb[16].mxu1 }
 0x26f   : > { %1631 = vmatprep.mubr.f32.mxu0 %v6736_v29  ;;  %v9744_v6 = vpop.f32.mrb[17].mxu1 }
 0x270   : > { %v9746_v5 = vpop.f32.mrb[18].mxu1 }
 0x271   : > { %v9748_v62 = vpop.f32.mrb[19].mxu1 }
 0x272   : > { %1632 = vmatmul.mubr.f32.gmra.mrb[60].mxu0 %v6704_v43  ;;  %v9750_v12 = vpop.f32.mrb[20].mxu1 }
 0x273   : > { %1636 = vmatprep.mubr.f32.mxu0 %v6737_v20  ;;  %v9752_v25 = vpop.f32.mrb[21].mxu1 }
 0x275   : > { %v9754_v58 = vpop.f32.mrb[22].mxu1 }
 0x276   : > { %1637 = vmatmul.mubr.f32.gmra.mrb[62].mxu0 %v6705_v56  ;;  %v9756_v17 = vpop.f32.mrb[23].mxu1 }
 0x279   : > { %v9758_v30 = vpop.f32.mrb[24].mxu1 }
 0x27a   : > { %v9760_v39 = vpop.f32.mrb[25].mxu1 }
 0x27d   : > { %v9762_v22 = vpop.f32.mrb[26].mxu1 }
 0x27e   : > { %v9764_v35 = vpop.f32.mrb[27].mxu1 }
 0x283   : > { %v9766_v48 = vpop.f32.mrb[28].mxu1 }
 0x284   : > { %v9768_v27 = vpop.f32.mrb[29].mxu1 }
 0x2a6   : > { %v9770_v40 = vpop.f32.mrb[30].mxu1 }
 0x2a7   : > { %v9772_v8 = vpop.f32.mrb[31].mxu1 }
 0x2cd   : > { %v1483_v45 = vpop.f32.mrb[0].mxu0 }
 0x2ce   : > { %v7792_v0 = vadd.f32 %v9777_v32, %v1483_v45  ;;  %v1485_v37 = vpop.f32.mrb[1].mxu0 }
 0x2d0   : > { %v9781_v50 = vadd.f32 %v7792_v0, %v9641_v1 }
 0x2d1   : > { %v1488_v51 = vpop.f32.mrb[2].mxu0 }
 0x2d2   : > { %v7793_v42 = vadd.f32 %v9777_v32, %v1488_v51  ;;  %v1490_v55 = vpop.f32.mrb[3].mxu0 }
 0x2d4   : > { %v9785_v59 = vadd.f32 %v7793_v42, %v9638_v57 }
 0x2d5   : > { %v1493_v47 = vpop.f32.mrb[4].mxu0 }
 0x2d6   : > { %v7794_v61 = vadd.f32 %v9777_v32, %v1493_v47  ;;  %v1495_v9 = vpop.f32.mrb[5].mxu0 }
 0x2d8   : > { %v9789_v52 = vadd.f32 %v7794_v61, %v9702_v18 }
 0x2d9   : > { %v1498_v7 = vpop.f32.mrb[6].mxu0 }
 0x2da   : > { %v7795_v53 = vadd.f32 %v9777_v32, %v1498_v7  ;;  %v1500_v13 = vpop.f32.mrb[7].mxu0 }
 0x2dc   : > { %v9793_v1 = vadd.f32 %v7795_v53, %v9699_v10 }
 0x2dd   : > { %v1503_v11 = vpop.f32.mrb[8].mxu0 }
 0x2de   : > { %v7796_v4 = vadd.f32 %v9777_v32, %v1503_v11  ;;  %v1505_v14 = vpop.f32.mrb[9].mxu0 }
 0x2e0   : > { %v9797_v57 = vadd.f32 %v7796_v4, %v9710_v16 }
 0x2e1   : > { %v1508_v21 = vpop.f32.mrb[10].mxu0 }
 0x2e2   : > { %v7797_v24 = vadd.f32 %v9777_v32, %v1508_v21  ;;  %v1510_v28 = vpop.f32.mrb[11].mxu0 }
 0x2e4   : > { %v9801_v18 = vadd.f32 %v7797_v24, %v9707_v34 }
 0x2e5   : > { %v1513_v38 = vpop.f32.mrb[12].mxu0 }
 0x2e6   : > { %v7798_v54 = vadd.f32 %v9777_v32, %v1513_v38  ;;  %v1515_v19 = vpop.f32.mrb[13].mxu0 }
 0x2e8   : > { %v9805_v10 = vadd.f32 %v7798_v54, %v9717_v26 }
 0x2e9   : > { %v1518_v29 = vpop.f32.mrb[14].mxu0 }
 0x2ea   : > { %v7799_v33 = vadd.f32 %v9777_v32, %v1518_v29  ;;  %v1520_v43 = vpop.f32.mrb[15].mxu0 }
 0x2ec   : > { %v9809_v16 = vadd.f32 %v7799_v33, %v9714_v23 }
 0x2ed   : > { %v1523_v20 = vpop.f32.mrb[16].mxu0 }
 0x2ee   : > { %v7800_v56 = vadd.f32 %v9777_v32, %v1523_v20  ;;  %v1525_v45 = vpop.f32.mrb[17].mxu0 }
 0x2f0   : > { %v9813_v34 = vadd.f32 %v7800_v56, %v9726_v15 }
 0x2f1   : > { %v1528_v0 = vpop.f32.mrb[18].mxu0 }
 0x2f2   : > { %v7801_v37 = vadd.f32 %v9777_v32, %v1528_v0  ;;  %v1530_v51 = vpop.f32.mrb[19].mxu0  ;;  %v1869_v0 = vmul.f32 %v9789_v52, %v9789_v52 }
 0x2f4   : > { %v9817_v26 = vadd.f32 %v7801_v37, %v9723_v36 }
 0x2f5   : > { %v1533_v42 = vpop.f32.mrb[20].mxu0 }
 0x2f6   : > { %v7802_v55 = vadd.f32 %v9777_v32, %v1533_v42  ;;  %v1535_v47 = vpop.f32.mrb[21].mxu0  ;;  %v1870_v42 = vmul.f32 %v9793_v1, %v9793_v1 }
 0x2f8   : > { %v9821_v23 = vadd.f32 %v7802_v55, %v9732_v60 }
 0x2f9   : > { %v1538_v61 = vpop.f32.mrb[22].mxu0 }
 0x2fa   : > { %v7803_v9 = vadd.f32 %v9777_v32, %v1538_v61  ;;  %v1540_v7 = vpop.f32.mrb[23].mxu0  ;;  %v1871_v61 = vmul.f32 %v9797_v57, %v9797_v57 }
 0x2fc   : > { %v9825_v15 = vadd.f32 %v7803_v9, %v9730_v31 }
 0x2fd   : > { %v1543_v53 = vpop.f32.mrb[24].mxu0 }
 0x2fe   : > { %v7804_v13 = vadd.f32 %v9777_v32, %v1543_v53  ;;  %v1545_v11 = vpop.f32.mrb[25].mxu0 }
 0x300   : > { %v9829_v36 = vadd.f32 %v7804_v13, %v9736_v41  ;;  %v1872_v13 = vmul.f32 %v9801_v18, %v9801_v18 }
 0x301   : > { %v1548_v4 = vpop.f32.mrb[26].mxu0 }
 0x302   : > { %v7805_v14 = vadd.f32 %v9777_v32, %v1548_v4  ;;  %v1550_v21 = vpop.f32.mrb[27].mxu0 }
 0x304   : > { %v9833_v60 = vadd.f32 %v7805_v14, %v9734_v63  ;;  %v1868_v63 = vmul.f32 %v9785_v59, %v9785_v59 }
 0x305   : > { %v1553_v24 = vpop.f32.mrb[28].mxu0 }
 0x306   : > { %v7806_v28 = vadd.f32 %v9777_v32, %v1553_v24  ;;  %v1555_v38 = vpop.f32.mrb[29].mxu0 }
 0x307   : > { %v1874_v38 = vmul.f32 %v9809_v16, %v9809_v16 }
 0x308   : > { %v9837_v31 = vadd.f32 %v7806_v28, %v9740_v46  ;;  %v1867_v46 = vmul.f32 %v9781_v50, %v9781_v50 }
 0x309   : > { %v1558_v54 = vpop.f32.mrb[30].mxu0 }
 0x30a   : > { %v7807_v19 = vadd.f32 %v9777_v32, %v1558_v54  ;;  %v1560_v29 = vpop.f32.mrb[31].mxu0  ;;  %v1899_v51 = vadd.f32 %v1868_v63, %v1867_v46  ;;  %v1876_v63 = vmul.f32 %v9817_v26, %v9817_v26 }
 0x30c   : > { %v9841_v41 = vadd.f32 %v7807_v19, %v9738_v3 }
 0x30d   : > { %v1563_v33 = vpop.f32.mrb[32].mxu0 }
 0x30e   : > { %v7808_v43 = vadd.f32 %v9777_v32, %v1563_v33  ;;  %v1565_v20 = vpop.f32.mrb[33].mxu0 }
 0x310   : > { %v9847_v56 = vadd.f32 %v7808_v43, %v9744_v6  ;;  %v1900_v6 = vadd.f32 %v1899_v51, %v1869_v0 }
 0x311   : > { %v1568_v45 = vpop.f32.mrb[34].mxu0 }
 0x312   : > { %v7809_v3 = vadd.f32 %v9777_v32, %v1568_v45  ;;  %v1570_v37 = vpop.f32.mrb[35].mxu0  ;;  %v1901_v53 = vadd.f32 %v1900_v6, %v1870_v42  ;;  %v1878_v42 = vmul.f32 %v9825_v15, %v9825_v15 }
 0x314   : > { %v9857_v55 = vadd.f32 %v7809_v3, %v9742_v49  ;;  %v1902_v14 = vadd.f32 %v1901_v53, %v1871_v61  ;;  %v1873_v49 = vmul.f32 %v9805_v10, %v9805_v10 }
 0x315   : > { %v1573_v47 = vpop.f32.mrb[36].mxu0 }
 0x316   : > { %v7810_v9 = vadd.f32 %v9777_v32, %v1573_v47  ;;  %v1575_v7 = vpop.f32.mrb[37].mxu0  ;;  %v1903_v28 = vadd.f32 %v1902_v14, %v1872_v13  ;;  %v1880_v13 = vmul.f32 %v9833_v60, %v9833_v60 }
 0x318   : > { %v9865_v11 = vadd.f32 %v7810_v9, %v9748_v62  ;;  %v1904_v29 = vadd.f32 %v1903_v28, %v1873_v49  ;;  %v1875_v62 = vmul.f32 %v9813_v34, %v9813_v34 }
 0x319   : > { %v1578_v4 = vpop.f32.mrb[38].mxu0 }
 0x31a   : > { %v7811_v21 = vadd.f32 %v9777_v32, %v1578_v4  ;;  %v1580_v24 = vpop.f32.mrb[39].mxu0  ;;  %v1905_v20 = vadd.f32 %v1904_v29, %v1874_v38  ;;  %v1882_v38 = vmul.f32 %v9841_v41, %v9841_v41 }
 0x31c   : > { %v9873_v54 = vadd.f32 %v7811_v21, %v9746_v5  ;;  %v1906_v0 = vadd.f32 %v1905_v20, %v1875_v62  ;;  %v1877_v5 = vmul.f32 %v9821_v23, %v9821_v23 }
 0x31d   : > { %v1583_v19 = vpop.f32.mrb[40].mxu0 }
 0x31e   : > { %v7812_v33 = vadd.f32 %v9777_v32, %v1583_v19  ;;  %v1585_v43 = vpop.f32.mrb[41].mxu0  ;;  %v1907_v51 = vadd.f32 %v1906_v0, %v1876_v63  ;;  %v1884_v63 = vmul.f32 %v9857_v55, %v9857_v55 }
 0x320   : > { %v9881_v45 = vadd.f32 %v7812_v33, %v9752_v25  ;;  %v1908_v61 = vadd.f32 %v1907_v51, %v1877_v5  ;;  %v1879_v25 = vmul.f32 %v9829_v36, %v9829_v36 }
 0x321   : > { %v1588_v46 = vpop.f32.mrb[42].mxu0 }
 0x322   : > { %v7813_v3 = vadd.f32 %v9777_v32, %v1588_v46  ;;  %v1590_v37 = vpop.f32.mrb[43].mxu0  ;;  %v1909_v53 = vadd.f32 %v1908_v61, %v1878_v42  ;;  %v1886_v42 = vmul.f32 %v9873_v54, %v9873_v54 }
 0x324   : > { %v9889_v47 = vadd.f32 %v7813_v3, %v9750_v12  ;;  %v1910_v49 = vadd.f32 %v1909_v53, %v1879_v25  ;;  %v1881_v12 = vmul.f32 %v9837_v31, %v9837_v31 }
 0x325   : > { %v1593_v6 = vpop.f32.mrb[44].mxu0 }
 0x326   : > { %v7814_v9 = vadd.f32 %v9777_v32, %v1593_v6  ;;  %v1595_v7 = vpop.f32.mrb[45].mxu0  ;;  %v1911_v28 = vadd.f32 %v1910_v49, %v1880_v13  ;;  %v1888_v13 = vmul.f32 %v9889_v47, %v9889_v47 }
 0x328   : > { %v9897_v4 = vadd.f32 %v7814_v9, %v9756_v17  ;;  %v1912_v62 = vadd.f32 %v1911_v28, %v1881_v12  ;;  %v1883_v17 = vmul.f32 %v9847_v56, %v9847_v56 }
 0x329   : > { %v1598_v14 = vpop.f32.mrb[46].mxu0 }
 0x32a   : > { %v7815_v21 = vadd.f32 %v9777_v32, %v1598_v14  ;;  %v1600_v24 = vpop.f32.mrb[47].mxu0  ;;  %v1913_v20 = vadd.f32 %v1912_v62, %v1882_v38 }
 0x32c   : > { %v9905_v19 = vadd.f32 %v7815_v21, %v9754_v58  ;;  %v1914_v5 = vadd.f32 %v1913_v20, %v1883_v17  ;;  %v1885_v58 = vmul.f32 %v9865_v11, %v9865_v11 }
 0x32d   : > { %v1603_v29 = vpop.f32.mrb[48].mxu0 }
 0x32e   : > { %v7816_v33 = vadd.f32 %v9777_v32, %v1603_v29  ;;  %v1605_v43 = vpop.f32.mrb[49].mxu0  ;;  %v1915_v51 = vadd.f32 %v1914_v5, %v1884_v63  ;;  %v1890_v38 = vmul.f32 %v9905_v19, %v9905_v19 }
 0x330   : > { %v9913_v46 = vadd.f32 %v7816_v33, %v9760_v39  ;;  %v1916_v25 = vadd.f32 %v1915_v51, %v1885_v58  ;;  %v1887_v39 = vmul.f32 %v9881_v45, %v9881_v45 }
 0x331   : > { %v1608_v0 = vpop.f32.mrb[50].mxu0 }
 0x332   : > { %v7817_v3 = vadd.f32 %v9777_v32, %v1608_v0  ;;  %v1610_v37 = vpop.f32.mrb[51].mxu0  ;;  %v1917_v53 = vadd.f32 %v1916_v25, %v1886_v42 }
 0x334   : > { %v9921_v6 = vadd.f32 %v7817_v3, %v9758_v30  ;;  %v1918_v12 = vadd.f32 %v1917_v53, %v1887_v39  ;;  %v1889_v30 = vmul.f32 %v9897_v4, %v9897_v4 }
 0x335   : > { %v1613_v61 = vpop.f32.mrb[52].mxu0 }
 0x336   : > { %v7818_v9 = vadd.f32 %v9777_v32, %v1613_v61  ;;  %v1615_v7 = vpop.f32.mrb[53].mxu0  ;;  %v1919_v28 = vadd.f32 %v1918_v12, %v1888_v13  ;;  %v1892_v63 = vmul.f32 %v9921_v6, %v9921_v6 }
 0x338   : > { %v9929_v14 = vadd.f32 %v7818_v9, %v9764_v35  ;;  %v1920_v17 = vadd.f32 %v1919_v28, %v1889_v30  ;;  %v1891_v35 = vmul.f32 %v9913_v46, %v9913_v46 }
 0x339   : > { %v1618_v49 = vpop.f32.mrb[54].mxu0 }
 0x33a   : > { %v7819_v21 = vadd.f32 %v9777_v32, %v1618_v49  ;;  %v1620_v24 = vpop.f32.mrb[55].mxu0  ;;  %v1921_v20 = vadd.f32 %v1920_v17, %v1890_v38 }
 0x33c   : > { %v9937_v29 = vadd.f32 %v7819_v21, %v9762_v22  ;;  %v1922_v58 = vadd.f32 %v1921_v20, %v1891_v35  ;;  %v1893_v22 = vmul.f32 %v9929_v14, %v9929_v14 }
 0x33d   : > { %v1623_v62 = vpop.f32.mrb[56].mxu0 }
 0x33e   : > { %v7820_v33 = vadd.f32 %v9777_v32, %v1623_v62  ;;  %v1625_v43 = vpop.f32.mrb[57].mxu0  ;;  %v1923_v51 = vadd.f32 %v1922_v58, %v1892_v63  ;;  %v1894_v42 = vmul.f32 %v9937_v29, %v9937_v29 }
 0x340   : > { %v9945_v0 = vadd.f32 %v7820_v33, %v9768_v27  ;;  %v1924_v39 = vadd.f32 %v1923_v51, %v1893_v22 }
 0x341   : > { %v1628_v5 = vpop.f32.mrb[58].mxu0 }
 0x342   : > { %v7821_v3 = vadd.f32 %v9777_v32, %v1628_v5  ;;  %v1630_v37 = vpop.f32.mrb[59].mxu0  ;;  %v1895_v27 = vmul.f32 %v9945_v0, %v9945_v0  ;;  %v1925_v53 = vadd.f32 %v1924_v39, %v1894_v42 }
 0x344   : > { %v9953_v61 = vadd.f32 %v7821_v3, %v9766_v48  ;;  %v1926_v30 = vadd.f32 %v1925_v53, %v1895_v27  ;;  %v2034_v27 = vld [vmem:[%s13433_s5] sm:$0xff]  ;;  %v2036_v53 = vld [vmem:[%s13433_s5 + $0x10] sm:$0xff] }
 0x345   : > { %v1633_v25 = vpop.f32.mrb[60].mxu0 }
 0x346   : > { %v7822_v9 = vadd.f32 %v9777_v32, %v1633_v25  ;;  %v1635_v7 = vpop.f32.mrb[61].mxu0  ;;  %v1896_v13 = vmul.f32 %v9953_v61, %v9953_v61 }
 0x348   : > { %v9961_v49 = vadd.f32 %v7822_v9, %v9772_v8  ;;  %v1927_v28 = vadd.f32 %v1926_v30, %v1896_v13  ;;  %v2035_v9 = vld [vmem:[%s13433_s5 + $0x8] sm:$0xff]  ;;  %v2037_v13 = vld [vmem:[%s13433_s5 + $0x18] sm:$0xff]  ;;  %v2038_v30 = vld [vmem:[%s13433_s5 + $0x20] sm:$0xff] }
 0x349   : > { %v1638_v12 = vpop.f32.mrb[62].mxu0  ;;  %v9981_v7 = vpack.c.bf16 %v2035_v9, %v2034_v27  ;;  %v1957_v9 = vld [vmem:[%s13430_s2 + $0x3] sm:$0x1] }
 0x34a   : > { %v1897_v48 = vmul.f32 %v9961_v49, %v9961_v49  ;;  %v7823_v21 = vadd.f32 %v9777_v32, %v1638_v12  ;;  %v1640_v24 = vpop.f32.mrb[63].mxu0  ;;  %v9991_v12 = vpack.c.bf16 %v2037_v13, %v2036_v53 }
 0x34b   : > { %7474 = vmatpush3.bf16.msra.mxu1 %v9981_v7  ;;  %v2040_v24 = vld [vmem:[%s13433_s5 + $0x30] sm:$0xff] }
 0x34c   : > { %v9967_v38 = vadd.f32 %v7823_v21, %v9770_v40  ;;  %v1928_v62 = vadd.f32 %v1927_v28, %v1897_v48  ;;  %v1944_v40 = vld [vmem:[%s13430_s2 + $0x1] sm:$0x1]  ;;  %7475 = vmatprep.subr.bf16.mxu1 %v13605_v44  ;;  %v2039_v48 = vld [vmem:[%s13433_s5 + $0x28] sm:$0xff]  ;;  %v2041_v28 = vld [vmem:[%s13433_s5 + $0x38] sm:$0xff] }
 0x34d   : > { %v10001_v21 = vpack.c.bf16 %v2039_v48, %v2038_v30  ;;  %v1961_v30 = vlaneseq }
 0x34e   : > { %v1898_v17 = vmul.f32 %v9967_v38, %v9967_v38 }
 0x34f   : > { %7477 = vmatpush3.bf16.msra.mxu1 %v9991_v12  ;;  %v10063_v48 = vshrl.u32 %v1961_v30, 7 }
 0x350   : > { %v1929_v35 = vadd.f32 %v1928_v62, %v1898_v17  ;;  %7478 = vmatprep.subr.bf16.mxu1 %v13605_v44  ;;  %v10011_v62 = vpack.c.bf16 %v2041_v28, %v2040_v24  ;;  %v2042_v17 = vld [vmem:[%s13433_s5 + $0x40] sm:$0xff] }
 0x351   : > { %13614 = vst [vmem:[#allocation12_spill] sm:$0xff] %v10063_v48  ;;  %v10066_v28 = vsub.s32 0, %v10063_v48 }
 0x352   : > { %v1930_v33 = vrot.slane %v1929_v35, 4 }
 0x353   : > { %7480 = vmatpush3.bf16.msra.mxu1 %v10001_v21  ;;  %13615 = vst [vmem:[#allocation13_spill] sm:$0xff] %v10066_v28 }
 0x354   : > { %v1931_v8 = vadd.f32 %v1930_v33, %v1929_v35  ;;  %7481 = vmatprep.subr.bf16.mxu1 %v13605_v44  ;;  %v2043_v35 = vld [vmem:[%s13433_s5 + $0x48] sm:$0xff] }
 0x355   : > { %v10021_v33 = vpack.c.bf16 %v2043_v35, %v2042_v17 }
 0x356   : > { %v1932_v43 = vrot.slane %v1931_v8, 2 }
 0x357   : > { %7483 = vmatpush3.bf16.msra.mxu1 %v10011_v62 }
 0x358   : > { %v1933_v20 = vadd.f32 %v1932_v43, %v1931_v8  ;;  %7484 = vmatprep.subr.bf16.mxu1 %v13605_v44  ;;  %v2044_v8 = vld [vmem:[%s13433_s5 + $0x50] sm:$0xff]  ;;  %v2045_v43 = vld [vmem:[%s13433_s5 + $0x58] sm:$0xff] }
 0x35a   : > { %v1934_v63 = vrot.slane %v1933_v20, 1 }
 0x35b   : > { %7486 = vmatpush3.bf16.msra.mxu1 %v10021_v33 }
 0x35c   : > { %v1935_v5 = vadd.f32 %v1934_v63, %v1933_v20  ;;  %7487 = vmatprep.subr.bf16.mxu1 %v13605_v44  ;;  %v10031_v20 = vpack.c.bf16 %v2045_v43, %v2044_v8  ;;  %v2046_v63 = vld [vmem:[%s13433_s5 + $0x60] sm:$0xff] }
 0x35e   : > { %v1936_v58 = vadd.f32 1e-05, %v1935_v5  ;;  %v2047_v5 = vld [vmem:[%s13433_s5 + $0x68] sm:$0xff] }
 0x35f   : > { %7489 = vmatpush3.bf16.msra.mxu1 %v10031_v20 }
 0x360   : > { %8304 = vrsqrt.f32 %v1936_v58  ;;  %vm1939_vm0 = vcmp.eq.f32.partialorder %v1936_v58, inf  ;;  %v1942_v3 = vand.u32 2147483648, %v1936_v58  ;;  %vm1941_vm1 = vcmp.eq.f32.partialorder %v1936_v58, 0.0  ;;  %7490 = vmatprep.subr.bf16.mxu1 %v13605_v44 }
 0x36a   : > { %v8305_v22 = vpop.eup %8304 }
 0x36b   : > { %v1938_v32 = vmul.f32 %v8305_v22, %v1936_v58  ;;  %v2048_v22 = vld [vmem:[%s13433_s5 + $0x70] sm:$0xff] }
 0x36d   : > { %v1940_v37 = vsel %vm1939_vm0, %v1936_v58, %v1938_v32  ;;  %v10041_v58 = vpack.c.bf16 %v2047_v5, %v2046_v63  ;;  %v2049_v32 = vld [vmem:[%s13433_s5 + $0x78] sm:$0xff] }
 0x36e   : > { %v1943_v51 = vsel %vm1941_vm1, %v1942_v3, %v1940_v37  ;;  %v10051_v3 = vpack.c.bf16 %v2049_v32, %v2048_v22 }
 0x36f   : > { %v1945_v42 = vmul.f32 %v1944_v40, %v1943_v51  ;;  %7492 = vmatpush3.bf16.msra.mxu1 %v10041_v58 }
 0x370   : > { %7493 = vmatprep.subr.bf16.mxu1 %v13605_v44 }
 0x371   : > { %v1946_v25 = vmul.f32 %v1945_v42, %v1945_v42 }
 0x373   : > { %v1948_v39 = vsel %vm1947_vm2, %v1946_v25, 0.0  ;;  %7495 = vmatpush3.bf16.msra.mxu1 %v10051_v3  ;;  %v1952_v25 = vld [vmem:[%s13430_s2 + $0x2] sm:$0x1] }
 0x374   : > { %1949 = vadd.xlane.f32.xlu0 %v1948_v39  ;;  %7496 = vmatprep.subr.bf16.mxu1 %v13605_v44 }
 0x401   : > { %v1950_v40 = vpop.xlane.xlu0 %1949 }
 0x402   : > { %v1951_v37 = vmul.f32 0.125, %v1950_v40 }
 0x404   : > { %v1953_v51 = vadd.f32 1e-05, %v1951_v37 }
 0x406   : > { %8306 = vrsqrt.f32 %v1953_v51 }
 0x410   : > { %v8307_v39 = vpop.eup %8306 }
 0x411   : > { %v1955_v27 = vmul.f32 %v8307_v39, %v1952_v25 }
 0x413   : > { %v1956_v53 = vmul.f32 %v1955_v27, %v1945_v42 }
 0x415   : > { %v1958_v13 = vadd.f32 %v1957_v9, %v1956_v53 }
 0x417   : > { %8308 = vtanh.f32 %v1958_v13 }
 0x421   : > { %v8309_v24 = vpop.eup %8308 }
 0x422   : > { %v1960_v17 = vadd.f32 1.0, %v8309_v24 }
 0x424   : > { %v1964_v35 = vrot.slane %v1960_v17, %v10066_v28 }
 0x426   : > { %v10070_v8 = vmul.f32 %v1964_v35, %v9781_v50  ;;  %v10073_v43 = vmul.f32 %v1964_v35, %v9785_v59  ;;  %v10076_v42 = vmul.f32 %v1964_v35, %v9789_v52  ;;  %v10081_v5 = vmul.f32 %v1964_v35, %v9793_v1 }
 0x427   : > { %v10085_v32 = vmul.f32 %v1964_v35, %v9797_v57  ;;  %v10089_v40 = vmul.f32 %v1964_v35, %v9801_v18  ;;  %v10093_v52 = vmul.f32 %v1964_v35, %v9805_v10  ;;  %v10097_v1 = vmul.f32 %v1964_v35, %v9809_v16 }
 0x428   : > { %v1997_v63 = vadd.f32 %v10073_v43, %v10070_v8  ;;  %v10101_v57 = vmul.f32 %v1964_v35, %v9813_v34  ;;  %v10105_v18 = vmul.f32 %v1964_v35, %v9817_v26  ;;  %v10109_v10 = vmul.f32 %v1964_v35, %v9821_v23 }
 0x429   : > { %v10113_v16 = vmul.f32 %v1964_v35, %v9825_v15  ;;  %v10117_v34 = vmul.f32 %v1964_v35, %v9829_v36  ;;  %v10121_v26 = vmul.f32 %v1964_v35, %v9833_v60  ;;  %v10125_v23 = vmul.f32 %v1964_v35, %v9837_v31 }
 0x42a   : > { %v1998_v22 = vadd.f32 %v1997_v63, %v10076_v42  ;;  %v10129_v15 = vmul.f32 %v1964_v35, %v9841_v41  ;;  %v10133_v36 = vmul.f32 %v1964_v35, %v9847_v56  ;;  %v10137_v60 = vmul.f32 %v1964_v35, %v9857_v55 }
 0x42b   : > { %v10141_v31 = vmul.f32 %v1964_v35, %v9865_v11  ;;  %v10145_v41 = vmul.f32 %v1964_v35, %v9873_v54  ;;  %v10149_v56 = vmul.f32 %v1964_v35, %v9881_v45  ;;  %v10153_v55 = vmul.f32 %v1964_v35, %v9889_v47 }
 0x42c   : > { %v1999_v50 = vadd.f32 %v1998_v22, %v10081_v5  ;;  %v10157_v11 = vmul.f32 %v1964_v35, %v9897_v4  ;;  %v10161_v54 = vmul.f32 %v1964_v35, %v9905_v19  ;;  %v10165_v45 = vmul.f32 %v1964_v35, %v9913_v46 }
 0x42d   : > { %v10169_v47 = vmul.f32 %v1964_v35, %v9921_v6  ;;  %v10173_v4 = vmul.f32 %v1964_v35, %v9929_v14  ;;  %v10177_v19 = vmul.f32 %v1964_v35, %v9937_v29  ;;  %v10181_v46 = vmul.f32 %v1964_v35, %v9945_v0 }
 0x42e   : > { %v2000_v59 = vadd.f32 %v1999_v50, %v10085_v32  ;;  %v10185_v6 = vmul.f32 %v1964_v35, %v9953_v61  ;;  %v10189_v14 = vmul.f32 %v1964_v35, %v9961_v49  ;;  %v10193_v29 = vmul.f32 %v1964_v35, %v9967_v38 }
 0x430   : > { %v2001_v37 = vadd.f32 %v2000_v59, %v10089_v40 }
 0x432   : > { %v2002_v51 = vadd.f32 %v2001_v37, %v10093_v52 }
 0x434   : > { %v2003_v25 = vadd.f32 %v2002_v51, %v10097_v1 }
 0x436   : > { %v2004_v39 = vadd.f32 %v2003_v25, %v10101_v57 }
 0x438   : > { %v2005_v27 = vadd.f32 %v2004_v39, %v10105_v18 }
 0x43a   : > { %v2006_v9 = vadd.f32 %v2005_v27, %v10109_v10 }
 0x43c   : > { %v2007_v53 = vadd.f32 %v2006_v9, %v10113_v16 }
 0x43e   : > { %v2008_v13 = vadd.f32 %v2007_v53, %v10117_v34 }
 0x440   : > { %v2009_v30 = vadd.f32 %v2008_v13, %v10121_v26 }
 0x442   : > { %v2010_v24 = vadd.f32 %v2009_v30, %v10125_v23 }
 0x444   : > { %v2011_v17 = vadd.f32 %v2010_v24, %v10129_v15 }
 0x446   : > { %v2012_v63 = vadd.f32 %v2011_v17, %v10133_v36 }
 0x448   : > { %v2013_v22 = vadd.f32 %v2012_v63, %v10137_v60 }
 0x44a   : > { %v2014_v50 = vadd.f32 %v2013_v22, %v10141_v31 }
 0x44c   : > { %v2015_v59 = vadd.f32 %v2014_v50, %v10145_v41 }
 0x44e   : > { %v2016_v37 = vadd.f32 %v2015_v59, %v10149_v56 }
 0x450   : > { %v2017_v51 = vadd.f32 %v2016_v37, %v10153_v55 }
 0x452   : > { %v2018_v25 = vadd.f32 %v2017_v51, %v10157_v11 }
 0x454   : > { %v2019_v39 = vadd.f32 %v2018_v25, %v10161_v54 }
 0x456   : > { %v2020_v27 = vadd.f32 %v2019_v39, %v10165_v45 }
 0x458   : > { %v2021_v9 = vadd.f32 %v2020_v27, %v10169_v47 }
 0x45a   : > { %v2022_v53 = vadd.f32 %v2021_v9, %v10173_v4 }
 0x45c   : > { %v2023_v13 = vadd.f32 %v2022_v53, %v10177_v19 }
 0x45e   : > { %v2024_v30 = vadd.f32 %v2023_v13, %v10181_v46 }
 0x460   : > { %v2025_v24 = vadd.f32 %v2024_v30, %v10185_v6 }
 0x462   : > { %v2026_v17 = vadd.f32 %v2025_v24, %v10189_v14 }
 0x464   : > { %v2027_v0 = vadd.f32 %v2026_v17, %v10193_v29 }
 0x466   : > { %v2028_v63 = vrot.slane %v2027_v0, 4 }
 0x468   : > { %v2029_v22 = vadd.f32 %v2028_v63, %v2027_v0 }
 0x46a   : > { %v2030_v50 = vrot.slane %v2029_v22, 2 }
 0x46c   : > { %v2031_v59 = vadd.f32 %v2030_v50, %v2029_v22 }
 0x46e   : > { %v2032_v61 = vrot.slane %v2031_v59, 1 }
 0x470   : > { %v2033_v37 = vadd.f32 %v2032_v61, %v2031_v59 }
 0x472   : > { %7061 = vmatmul.mubr.f32.vlgmr.msra.gmra.mrb[32].mxu1 %v2033_v37 }
 0x473   : > { %7498 = vmatpush3.bf16.msra.mxu1 %v9981_v7  ;;  %7095 = vmatprep.mubr.msk.f32.mxu1 %vm8455_vm3, %v8454_v2 }
 0x474   : > { %7499 = vmatprep.subr.bf16.mxu1 %v13605_v44 }
 0x477   : > { %7501 = vmatpush3.bf16.msra.mxu1 %v9991_v12 }
 0x478   : > { %7502 = vmatprep.subr.bf16.mxu1 %v13605_v44 }
 0x47b   : > { %7504 = vmatpush3.bf16.msra.mxu1 %v10001_v21 }
 0x47c   : > { %7505 = vmatprep.subr.bf16.mxu1 %v13605_v44 }
 0x47f   : > { %7507 = vmatpush3.bf16.msra.mxu1 %v10011_v62 }
 0x480   : > { %7508 = vmatprep.subr.bf16.mxu1 %v13605_v44 }
 0x483   : > { %7510 = vmatpush3.bf16.msra.mxu1 %v10021_v33 }
 0x484   : > { %7511 = vmatprep.subr.bf16.mxu1 %v13605_v44 }
 0x487   : > { %7513 = vmatpush3.bf16.msra.mxu1 %v10031_v20 }
 0x488   : > { %7514 = vmatprep.subr.bf16.mxu1 %v13605_v44 }
 0x48b   : > { %7516 = vmatpush3.bf16.msra.mxu1 %v10041_v58 }
 0x48c   : > { %7517 = vmatprep.subr.bf16.mxu1 %v13605_v44 }
 0x48f   : > { %7519 = vmatpush3.bf16.msra.mxu1 %v10051_v3 }
 0x490   : > { %7520 = vmatprep.subr.bf16.mxu1 %v13605_v44 }
 0x545   : > { %v2116_v2 = vpop.f32.mrb[32].mxu1 }
 0x546   : > { %v7062_v49 = vpop.f32.mrb[33].mxu1  ;;  %v10216_v38 = vrot.slane %v2116_v2, %v10066_v28 }
 0x548   : > { %v10220_v7 = vsub.f32 %v10070_v8, %v10216_v38  ;;  %v10224_v12 = vsub.f32 %v10073_v43, %v10216_v38  ;;  %v10228_v21 = vsub.f32 %v10076_v42, %v10216_v38  ;;  %v10236_v20 = vsub.f32 %v10081_v5, %v10216_v38 }
 0x549   : > { %v10240_v58 = vsub.f32 %v10085_v32, %v10216_v38  ;;  %v10246_v8 = vsub.f32 %v10089_v40, %v10216_v38  ;;  %v10252_v5 = vsub.f32 %v10093_v52, %v10216_v38  ;;  %v10258_v25 = vsub.f32 %v10097_v1, %v10216_v38 }
 0x54a   : > { %v2156_v62 = vmul.f32 %v10220_v7, %v10220_v7  ;;  %v2157_v33 = vmul.f32 %v10224_v12, %v10224_v12  ;;  %v2158_v3 = vmul.f32 %v10228_v21, %v10228_v21  ;;  %v2159_v43 = vmul.f32 %v10236_v20, %v10236_v20 }
 0x54b   : > { %v2160_v32 = vmul.f32 %v10240_v58, %v10240_v58  ;;  %v2161_v40 = vmul.f32 %v10246_v8, %v10246_v8  ;;  %v10264_v27 = vsub.f32 %v10101_v57, %v10216_v38  ;;  %v2162_v52 = vmul.f32 %v10252_v5, %v10252_v5 }
 0x54c   : > { %v2188_v35 = vadd.f32 %v2157_v33, %v2156_v62  ;;  %v10270_v53 = vsub.f32 %v10105_v18, %v10216_v38  ;;  %v2163_v1 = vmul.f32 %v10258_v25, %v10258_v25  ;;  %v10276_v30 = vsub.f32 %v10109_v10, %v10216_v38 }
 0x54d   : > { %v2164_v57 = vmul.f32 %v10264_v27, %v10264_v27  ;;  %v10282_v17 = vsub.f32 %v10113_v16, %v10216_v38  ;;  %v10288_v63 = vsub.f32 %v10117_v34, %v10216_v38  ;;  %v10294_v50 = vsub.f32 %v10121_v26, %v10216_v38 }
 0x54e   : > { %v2189_v42 = vadd.f32 %v2188_v35, %v2158_v3  ;;  %v2165_v18 = vmul.f32 %v10270_v53, %v10270_v53  ;;  %v2166_v10 = vmul.f32 %v10276_v30, %v10276_v30  ;;  %v10300_v61 = vsub.f32 %v10125_v23, %v10216_v38 }
 0x54f   : > { %v2167_v16 = vmul.f32 %v10282_v17, %v10282_v17  ;;  %v2168_v34 = vmul.f32 %v10288_v63, %v10288_v63  ;;  %v10306_v2 = vsub.f32 %v10129_v15, %v10216_v38  ;;  %v2169_v26 = vmul.f32 %v10294_v50, %v10294_v50 }
 0x550   : > { %v2190_v51 = vadd.f32 %v2189_v42, %v2159_v43  ;;  %v10312_v62 = vsub.f32 %v10133_v36, %v10216_v38  ;;  %v2170_v23 = vmul.f32 %v10300_v61, %v10300_v61  ;;  %v10318_v3 = vsub.f32 %v10137_v60, %v10216_v38 }
 0x551   : > { %v2171_v15 = vmul.f32 %v10306_v2, %v10306_v2  ;;  %v10324_v43 = vsub.f32 %v10141_v31, %v10216_v38 }
 0x552   : > { %v2191_v39 = vadd.f32 %v2190_v51, %v2160_v32  ;;  %v2172_v36 = vmul.f32 %v10312_v62, %v10312_v62  ;;  %v10330_v32 = vsub.f32 %v10145_v41, %v10216_v38  ;;  %v2173_v60 = vmul.f32 %v10318_v3, %v10318_v3 }
 0x553   : > { %v2174_v31 = vmul.f32 %v10324_v43, %v10324_v43 }
 0x554   : > { %v2192_v9 = vadd.f32 %v2191_v39, %v2161_v40  ;;  %v10336_v40 = vsub.f32 %v10149_v56, %v10216_v38  ;;  %v2175_v41 = vmul.f32 %v10330_v32, %v10330_v32 }
 0x556   : > { %v2193_v13 = vadd.f32 %v2192_v9, %v2162_v52  ;;  %v10342_v52 = vsub.f32 %v10153_v55, %v10216_v38  ;;  %v2176_v56 = vmul.f32 %v10336_v40, %v10336_v40 }
 0x558   : > { %v2194_v24 = vadd.f32 %v2193_v13, %v2163_v1  ;;  %v10348_v1 = vsub.f32 %v10157_v11, %v10216_v38  ;;  %v2177_v55 = vmul.f32 %v10342_v52, %v10342_v52 }
 0x55a   : > { %v2195_v0 = vadd.f32 %v2194_v24, %v2164_v57  ;;  %v10354_v57 = vsub.f32 %v10161_v54, %v10216_v38  ;;  %v2178_v11 = vmul.f32 %v10348_v1, %v10348_v1 }
 0x55c   : > { %v2196_v22 = vadd.f32 %v2195_v0, %v2165_v18  ;;  %v10360_v18 = vsub.f32 %v10165_v45, %v10216_v38  ;;  %v2179_v54 = vmul.f32 %v10354_v57, %v10354_v57 }
 0x55e   : > { %v2197_v59 = vadd.f32 %v2196_v22, %v2166_v10  ;;  %v10366_v10 = vsub.f32 %v10169_v47, %v10216_v38  ;;  %v2180_v45 = vmul.f32 %v10360_v18, %v10360_v18 }
 0x560   : > { %v2198_v37 = vadd.f32 %v2197_v59, %v2167_v16  ;;  %v10372_v16 = vsub.f32 %v10173_v4, %v10216_v38  ;;  %v2181_v47 = vmul.f32 %v10366_v10, %v10366_v10 }
 0x562   : > { %v2199_v49 = vadd.f32 %v2198_v37, %v2168_v34  ;;  %v10378_v34 = vsub.f32 %v10177_v19, %v10216_v38  ;;  %v2182_v4 = vmul.f32 %v10372_v16, %v10372_v16 }
 0x564   : > { %v2200_v33 = vadd.f32 %v2199_v49, %v2169_v26  ;;  %v10384_v26 = vsub.f32 %v10181_v46, %v10216_v38  ;;  %v2183_v19 = vmul.f32 %v10378_v34, %v10378_v34 }
 0x566   : > { %v2201_v35 = vadd.f32 %v2200_v33, %v2170_v23  ;;  %v10390_v23 = vsub.f32 %v10185_v6, %v10216_v38  ;;  %v2184_v46 = vmul.f32 %v10384_v26, %v10384_v26 }
 0x568   : > { %v2202_v42 = vadd.f32 %v2201_v35, %v2171_v15  ;;  %v10396_v15 = vsub.f32 %v10189_v14, %v10216_v38  ;;  %v2185_v6 = vmul.f32 %v10390_v23, %v10390_v23 }
 0x56a   : > { %v2203_v51 = vadd.f32 %v2202_v42, %v2172_v36  ;;  %v10402_v36 = vsub.f32 %v10193_v29, %v10216_v38  ;;  %v2780_v29 = vld [vmem:[#allocation3 + $0x8] sm:$0xff] }
 0x56c   : > { %v2204_v39 = vadd.f32 %v2203_v51, %v2173_v60  ;;  %v2186_v60 = vmul.f32 %v10396_v15, %v10396_v15  ;;  %v2187_v14 = vmul.f32 %v10402_v36, %v10402_v36 }
 0x56e   : > { %v2205_v9 = vadd.f32 %v2204_v39, %v2174_v31 }
 0x570   : > { %v2206_v13 = vadd.f32 %v2205_v9, %v2175_v41 }
 0x572   : > { %v2207_v24 = vadd.f32 %v2206_v13, %v2176_v56 }
 0x574   : > { %v2208_v0 = vadd.f32 %v2207_v24, %v2177_v55  ;;  %v2779_v55 = vld [vmem:[#allocation3] sm:$0xff] }
 0x575   : > { %v7521_v24 = vpack.c.bf16 %v2780_v29, %v2779_v55  ;;  %v2797_v55 = vld [vmem:[#allocation3 + $0x90] sm:$0xff]  ;;  %v2798_v29 = vld [vmem:[#allocation3 + $0x98] sm:$0xff] }
 0x576   : > { %v2209_v22 = vadd.f32 %v2208_v0, %v2178_v11  ;;  %v2781_v0 = vld [vmem:[#allocation3 + $0x10] sm:$0xff] }
 0x578   : > { %v2210_v59 = vadd.f32 %v2209_v22, %v2179_v54  ;;  %v2782_v54 = vld [vmem:[#allocation3 + $0x18] sm:$0xff] }
 0x579   : > { %v7524_v22 = vpack.c.bf16 %v2782_v54, %v2781_v0  ;;  %v2801_v54 = vld [vmem:[#allocation3 + $0xb0] sm:$0xff] }
 0x57a   : > { %v2211_v37 = vadd.f32 %v2210_v59, %v2180_v45  ;;  %v2783_v45 = vld [vmem:[#allocation3 + $0x20] sm:$0xff]  ;;  %v2784_v59 = vld [vmem:[#allocation3 + $0x28] sm:$0xff] }
 0x57c   : > { %v2212_v49 = vadd.f32 %v2211_v37, %v2181_v47  ;;  %v7527_v47 = vpack.c.bf16 %v2784_v59, %v2783_v45  ;;  %v2785_v37 = vld [vmem:[#allocation3 + $0x30] sm:$0xff]  ;;  %v2907_v45 = vld [vmem:[#allocation3 + $0x400] sm:$0xff]  ;;  %v2908_v59 = vld [vmem:[#allocation3 + $0x408] sm:$0xff] }
 0x57e   : > { %v2213_v33 = vadd.f32 %v2212_v49, %v2182_v4  ;;  %v2786_v4 = vld [vmem:[#allocation3 + $0x38] sm:$0xff] }
 0x57f   : > { %v7530_v49 = vpack.c.bf16 %v2786_v4, %v2785_v37  ;;  %v7712_v37 = vpack.c.bf16 %v2908_v59, %v2907_v45  ;;  %v2803_v4 = vld [vmem:[#allocation3 + $0xc0] sm:$0xff]  ;;  %v2917_v45 = vld [vmem:[#allocation3 + $0x450] sm:$0xff]  ;;  %v2918_v59 = vld [vmem:[#allocation3 + $0x458] sm:$0xff] }
 0x580   : > { %v2214_v35 = vadd.f32 %v2213_v33, %v2183_v19  ;;  %v2787_v19 = vld [vmem:[#allocation3 + $0x40] sm:$0xff]  ;;  %v2788_v33 = vld [vmem:[#allocation3 + $0x48] sm:$0xff] }
 0x581   : > { %7713 = vmatprep.subr.bf16.mxu0 %v7712_v37 }
 0x582   : > { %v2215_v42 = vadd.f32 %v2214_v35, %v2184_v46  ;;  %v7533_v46 = vpack.c.bf16 %v2788_v33, %v2787_v19  ;;  %v2789_v35 = vld [vmem:[#allocation3 + $0x50] sm:$0xff]  ;;  %7715 = vmatpush3.bf16.msra.mxu0 %v7712_v37  ;;  %v2910_v33 = vld [vmem:[#allocation3 + $0x418] sm:$0xff]  ;;  %v8320_v37 = vld [vmem:[#allocation2 + $0x18] sm:$0xff] }
 0x583   : > { %v2909_v19 = vld [vmem:[#allocation3 + $0x410] sm:$0xff] }
 0x584   : > { %v2216_v51 = vadd.f32 %v2215_v42, %v2185_v6  ;;  %v2790_v6 = vld [vmem:[#allocation3 + $0x58] sm:$0xff] }
 0x585   : > { %v7536_v42 = vpack.c.bf16 %v2790_v6, %v2789_v35  ;;  %v7716_v35 = vpack.c.bf16 %v2910_v33, %v2909_v19  ;;  %v2805_v6 = vld [vmem:[#allocation3 + $0xd0] sm:$0xff]  ;;  %v2920_v19 = vld [vmem:[#allocation3 + $0x468] sm:$0xff] }
 0x586   : > { %v2217_v31 = vadd.f32 %v2216_v51, %v2186_v60  ;;  %v2791_v60 = vld [vmem:[#allocation3 + $0x60] sm:$0xff]  ;;  %v2792_v51 = vld [vmem:[#allocation3 + $0x68] sm:$0xff] }
 0x587   : > { %7717 = vmatprep.subr.bf16.mxu0 %v7716_v35 }
 0x588   : > { %v2218_v39 = vadd.f32 %v2217_v31, %v2187_v14  ;;  %v7539_v14 = vpack.c.bf16 %v2792_v51, %v2791_v60  ;;  %v2793_v31 = vld [vmem:[#allocation3 + $0x70] sm:$0xff]  ;;  %7719 = vmatpush3.bf16.msra.mxu0 %v7716_v35  ;;  %v2911_v60 = vld [vmem:[#allocation3 + $0x420] sm:$0xff]  ;;  %v2912_v51 = vld [vmem:[#allocation3 + $0x428] sm:$0xff] }
 0x589   : > { %v2812_v35 = vld [vmem:[#allocation3 + $0x108] sm:$0xff] }
 0x58a   : > { %v2219_v41 = vrot.slane %v2218_v39, 4 }
 0x58c   : > { %v2220_v9 = vadd.f32 %v2219_v41, %v2218_v39  ;;  %v2794_v39 = vld [vmem:[#allocation3 + $0x78] sm:$0xff] }
 0x58d   : > { %v7542_v41 = vpack.c.bf16 %v2794_v39, %v2793_v31  ;;  %v7720_v31 = vpack.c.bf16 %v2912_v51, %v2911_v60  ;;  %v2807_v39 = vld [vmem:[#allocation3 + $0xe0] sm:$0xff]  ;;  %v2922_v60 = vld [vmem:[#allocation3 + $0x478] sm:$0xff] }
 0x58e   : > { %v2221_v56 = vrot.slane %v2220_v9, 2 }
 0x58f   : > { %7721 = vmatprep.subr.bf16.mxu0 %v7720_v31 }
 0x590   : > { %v2222_v13 = vadd.f32 %v2221_v56, %v2220_v9  ;;  %v2795_v9 = vld [vmem:[#allocation3 + $0x80] sm:$0xff]  ;;  %v2796_v56 = vld [vmem:[#allocation3 + $0x88] sm:$0xff]  ;;  %7723 = vmatpush3.bf16.msra.mxu0 %v7720_v31  ;;  %v2814_v31 = vld [vmem:[#allocation3 + $0x118] sm:$0xff] }
 0x592   : > { %v2223_v38 = vrot.slane %v2222_v13, 1 }
 0x594   : > { %v2224_v11 = vadd.f32 %v2223_v38, %v2222_v13  ;;  %v7545_v13 = vpack.c.bf16 %v2796_v56, %v2795_v9  ;;  %v7548_v38 = vpack.c.bf16 %v2798_v29, %v2797_v55  ;;  %v2913_v9 = vld [vmem:[#allocation3 + $0x430] sm:$0xff]  ;;  %v2914_v56 = vld [vmem:[#allocation3 + $0x438] sm:$0xff] }
 0x595   : > { %v7724_v55 = vpack.c.bf16 %v2914_v56, %v2913_v9  ;;  %v2809_v29 = vld [vmem:[#allocation3 + $0xf0] sm:$0xff]  ;;  %v2816_v9 = vld [vmem:[#allocation3 + $0x128] sm:$0xff] }
 0x596   : > { %7096 = vmatmul.mubr.f32.vlgmr.msra.gmra.mrb[34].mxu1 %v2224_v11  ;;  %v2800_v11 = vld [vmem:[#allocation3 + $0xa8] sm:$0xff] }
 0x597   : > { %7522 = vmatpush1.bf16.msra.mxu1 %v7521_v24  ;;  %v2799_v24 = vld [vmem:[#allocation3 + $0xa0] sm:$0xff]  ;;  %7725 = vmatprep.subr.bf16.mxu0 %v7724_v55 }
 0x598   : > { %7523 = vmatprep.subr.bf16.mxu1 %v13605_v44  ;;  %v7551_v0 = vpack.c.bf16 %v2800_v11, %v2799_v24  ;;  %7727 = vmatpush3.bf16.msra.mxu0 %v7724_v55  ;;  %v2915_v24 = vld [vmem:[#allocation3 + $0x440] sm:$0xff]  ;;  %v2916_v11 = vld [vmem:[#allocation3 + $0x448] sm:$0xff]  ;;  %v2818_v55 = vld [vmem:[#allocation3 + $0x138] sm:$0xff] }
 0x59b   : > { %7525 = vmatpush1.bf16.msra.mxu1 %v7524_v22  ;;  %v2802_v22 = vld [vmem:[#allocation3 + $0xb8] sm:$0xff] }
 0x59c   : > { %7526 = vmatprep.subr.bf16.mxu1 %v13605_v44 }
 0x59f   : > { %7528 = vmatpush1.bf16.msra.mxu1 %v7527_v47  ;;  %v7554_v47 = vpack.c.bf16 %v2802_v22, %v2801_v54  ;;  %v7728_v54 = vpack.c.bf16 %v2916_v11, %v2915_v24  ;;  %v2522_v22 = vld [vmem:[#allocation2 + $0x1] sm:$0xff]  ;;  %v2820_v24 = vld [vmem:[#allocation3 + $0x148] sm:$0xff] }
 0x5a0   : > { %7529 = vmatprep.subr.bf16.mxu1 %v13605_v44  ;;  %2992 = vmatprep.mubr.f32.mxu1 %v2522_v22 }
 0x5a1   : > { %7729 = vmatprep.subr.bf16.mxu0 %v7728_v54 }
 0x5a2   : > { %7731 = vmatpush3.bf16.msra.mxu0 %v7728_v54  ;;  %v2822_v54 = vld [vmem:[#allocation3 + $0x158] sm:$0xff] }
 0x5a3   : > { %7531 = vmatpush1.bf16.msra.mxu1 %v7530_v49  ;;  %v2804_v49 = vld [vmem:[#allocation3 + $0xc8] sm:$0xff] }
 0x5a4   : > { %7532 = vmatprep.subr.bf16.mxu1 %v13605_v44 }
 0x5a7   : > { %7534 = vmatpush1.bf16.msra.mxu1 %v7533_v46  ;;  %v7557_v46 = vpack.c.bf16 %v2804_v49, %v2803_v4  ;;  %v2523_v4 = vld [vmem:[#allocation2 + $0x9] sm:$0xff] }
 0x5a8   : > { %7535 = vmatprep.subr.bf16.mxu1 %v13605_v44  ;;  %v2919_v49 = vld [vmem:[#allocation3 + $0x460] sm:$0xff] }
 0x5a9   : > { %v7736_v33 = vpack.c.bf16 %v2920_v19, %v2919_v49  ;;  %v2827_v19 = vld [vmem:[#allocation3 + $0x180] sm:$0xff] }
 0x5ab   : > { %7537 = vmatpush1.bf16.msra.mxu1 %v7536_v42  ;;  %v2806_v42 = vld [vmem:[#allocation3 + $0xd8] sm:$0xff] }
 0x5ac   : > { %7538 = vmatprep.subr.bf16.mxu1 %v13605_v44 }
 0x5af   : > { %7540 = vmatpush1.bf16.msra.mxu1 %v7539_v14  ;;  %v7560_v14 = vpack.c.bf16 %v2806_v42, %v2805_v6  ;;  %v2921_v6 = vld [vmem:[#allocation3 + $0x470] sm:$0xff] }
 0x5b0   : > { %7541 = vmatprep.subr.bf16.mxu1 %v13605_v44  ;;  %v7740_v51 = vpack.c.bf16 %v2922_v60, %v2921_v6  ;;  %v2830_v6 = vld [vmem:[#allocation3 + $0x198] sm:$0xff]  ;;  %v2831_v60 = vld [vmem:[#allocation3 + $0x1a0] sm:$0xff] }
 0x5b3   : > { %7543 = vmatpush1.bf16.msra.mxu1 %v7542_v41  ;;  %v2808_v41 = vld [vmem:[#allocation3 + $0xe8] sm:$0xff] }
 0x5b4   : > { %7544 = vmatprep.subr.bf16.mxu1 %v13605_v44 }
 0x5b7   : > { %7546 = vmatpush1.bf16.msra.mxu1 %v7545_v13  ;;  %v7563_v13 = vpack.c.bf16 %v2808_v41, %v2807_v39  ;;  %v2815_v41 = vld [vmem:[#allocation3 + $0x120] sm:$0xff] }
 0x5b8   : > { %7547 = vmatprep.subr.bf16.mxu1 %v13605_v44  ;;  %v7575_v56 = vpack.c.bf16 %v2816_v9, %v2815_v41 }
 0x5bb   : > { %7549 = vmatpush1.bf16.msra.mxu1 %v7548_v38  ;;  %v2810_v38 = vld [vmem:[#allocation3 + $0xf8] sm:$0xff] }
 0x5bc   : > { %7550 = vmatprep.subr.bf16.mxu1 %v13605_v44 }
 0x5bf   : > { %7552 = vmatpush1.bf16.msra.mxu1 %v7551_v0  ;;  %v7566_v0 = vpack.c.bf16 %v2810_v38, %v2809_v29  ;;  %v2819_v38 = vld [vmem:[#allocation3 + $0x140] sm:$0xff] }
 0x5c0   : > { %7553 = vmatprep.subr.bf16.mxu1 %v13605_v44  ;;  %v7581_v11 = vpack.c.bf16 %v2820_v24, %v2819_v38  ;;  %v2296_v24 = vld [vmem:[%s13430_s2 + $0x4] sm:$0x1] }
 0x5c3   : > { %7555 = vmatpush1.bf16.msra.mxu1 %v7554_v47  ;;  %v7732_v47 = vpack.c.bf16 %v2918_v59, %v2917_v45  ;;  %v2823_v45 = vld [vmem:[#allocation3 + $0x160] sm:$0xff]  ;;  %v2824_v59 = vld [vmem:[#allocation3 + $0x168] sm:$0xff] }
 0x5c4   : > { %7556 = vmatprep.subr.bf16.mxu1 %v13605_v44 }
 0x5c5   : > { %7733 = vmatprep.subr.bf16.mxu0 %v7732_v47 }
 0x5c6   : > { %7735 = vmatpush3.bf16.msra.mxu0 %v7732_v47  ;;  %v7587_v47 = vpack.c.bf16 %v2824_v59, %v2823_v45 }
 0x5c7   : > { %7558 = vmatpush1.bf16.msra.mxu1 %v7557_v46  ;;  %v2811_v46 = vld [vmem:[#allocation3 + $0x100] sm:$0xff]  ;;  %7737 = vmatprep.subr.bf16.mxu0 %v7736_v33 }
 0x5c8   : > { %7559 = vmatprep.subr.bf16.mxu1 %v13605_v44  ;;  %v7569_v42 = vpack.c.bf16 %v2812_v35, %v2811_v46  ;;  %v2829_v35 = vld [vmem:[#allocation3 + $0x190] sm:$0xff] }
 0x5ca   : > { %7739 = vmatpush3.bf16.msra.mxu0 %v7736_v33  ;;  %v2828_v33 = vld [vmem:[#allocation3 + $0x188] sm:$0xff] }
 0x5cb   : > { %7561 = vmatpush1.bf16.msra.mxu1 %v7560_v14  ;;  %v2813_v14 = vld [vmem:[#allocation3 + $0x110] sm:$0xff]  ;;  %7741 = vmatprep.subr.bf16.mxu0 %v7740_v51  ;;  %v7593_v46 = vpack.c.bf16 %v2828_v33, %v2827_v19 }
 0x5cc   : > { %7562 = vmatprep.subr.bf16.mxu1 %v13605_v44  ;;  %v7572_v39 = vpack.c.bf16 %v2814_v31, %v2813_v14  ;;  %v2833_v31 = vld [vmem:[#allocation3 + $0x1b0] sm:$0xff] }
 0x5ce   : > { %7743 = vmatpush3.bf16.msra.mxu0 %v7740_v51  ;;  %v2832_v51 = vld [vmem:[#allocation3 + $0x1a8] sm:$0xff] }
 0x5cf   : > { %7564 = vmatpush1.bf16.msra.mxu1 %v7563_v13  ;;  %7744 = vmatprep.subr.bf16.mxu0 %v13605_v44  ;;  %v2817_v13 = vld [vmem:[#allocation3 + $0x130] sm:$0xff]  ;;  %v7599_v14 = vpack.c.bf16 %v2832_v51, %v2831_v60 }
 0x5d0   : > { %7565 = vmatprep.subr.bf16.mxu1 %v13605_v44  ;;  %v7578_v29 = vpack.c.bf16 %v2818_v55, %v2817_v13  ;;  %v2835_v55 = vld [vmem:[#allocation3 + $0x1c0] sm:$0xff] }
 0x5d3   : > { %7567 = vmatpush1.bf16.msra.mxu1 %v7566_v0  ;;  %v2821_v0 = vld [vmem:[#allocation3 + $0x150] sm:$0xff] }
 0x5d4   : > { %7568 = vmatprep.subr.bf16.mxu1 %v13605_v44  ;;  %v7584_v22 = vpack.c.bf16 %v2822_v54, %v2821_v0  ;;  %v2837_v0 = vld [vmem:[#allocation3 + $0x1d0] sm:$0xff]  ;;  %v2838_v54 = vld [vmem:[#allocation3 + $0x1d8] sm:$0xff] }
 0x5d5   : > { %v7608_v45 = vpack.c.bf16 %v2838_v54, %v2837_v0 }
 0x5d6   : > { %2993 = vmatmul.mubr.f32.vlgmr.msra.gmra.mrb[36].mxu1 %v8320_v37 }
 0x5d7   : > { %2997 = vmatprep.mubr.f32.mxu1 %v2523_v4  ;;  %7570 = vmatpush1.bf16.msra.mxu1 %v7569_v42  ;;  %v2826_v4 = vld [vmem:[#allocation3 + $0x178] sm:$0xff]  ;;  %v7596_v42 = vpack.c.bf16 %v2830_v6, %v2829_v35 }
 0x5d8   : > { %7571 = vmatprep.subr.bf16.mxu1 %v13605_v44 }
 0x5da   : > { %2998 = vmatmul.mubr.f32.gmra.mrb[38].mxu1 %v8320_v37  ;;  %v2825_v37 = vld [vmem:[#allocation3 + $0x170] sm:$0xff] }
 0x5db   : > { %7573 = vmatpush1.bf16.msra.mxu1 %v7572_v39  ;;  %v7590_v49 = vpack.c.bf16 %v2826_v4, %v2825_v37  ;;  %v2834_v39 = vld [vmem:[#allocation3 + $0x1b8] sm:$0xff] }
 0x5dc   : > { %7574 = vmatprep.subr.bf16.mxu1 %v13605_v44  ;;  %v7602_v41 = vpack.c.bf16 %v2834_v39, %v2833_v31 }
 0x5df   : > { %7576 = vmatpush1.bf16.msra.mxu1 %v7575_v56 }
 0x5e0   : > { %7577 = vmatprep.subr.bf16.mxu1 %v13605_v44 }
 0x5e3   : > { %7579 = vmatpush1.bf16.msra.mxu1 %v7578_v29  ;;  %v2836_v29 = vld [vmem:[#allocation3 + $0x1c8] sm:$0xff] }
 0x5e4   : > { %7580 = vmatprep.subr.bf16.mxu1 %v13605_v44  ;;  %v7605_v38 = vpack.c.bf16 %v2836_v29, %v2835_v55 }
 0x5e7   : > { %7582 = vmatpush1.bf16.msra.mxu1 %v7581_v11 }
 0x5e8   : > { %7583 = vmatprep.subr.bf16.mxu1 %v13605_v44 }
 0x5eb   : > { %7585 = vmatpush1.bf16.msra.mxu1 %v7584_v22 }
 0x5ec   : > { %7586 = vmatprep.subr.bf16.mxu1 %v13605_v44 }
 0x5ef   : > { %7588 = vmatpush1.bf16.msra.mxu1 %v7587_v47 }
 0x5f0   : > { %7589 = vmatprep.subr.bf16.mxu1 %v13605_v44 }
 0x5f3   : > { %7591 = vmatpush1.bf16.msra.mxu1 %v7590_v49 }
 0x5f4   : > { %7592 = vmatprep.subr.bf16.mxu1 %v13605_v44 }
 0x5f7   : > { %7594 = vmatpush1.bf16.msra.mxu1 %v7593_v46 }
 0x5f8   : > { %7595 = vmatprep.subr.bf16.mxu1 %v13605_v44 }
 0x5fb   : > { %7597 = vmatpush1.bf16.msra.mxu1 %v7596_v42 }
 0x5fc   : > { %7598 = vmatprep.subr.bf16.mxu1 %v13605_v44 }
 0x5ff   : > { %7600 = vmatpush1.bf16.msra.mxu1 %v7599_v14 }
 0x600   : > { %7601 = vmatprep.subr.bf16.mxu1 %v13605_v44 }
 0x603   : > { %7603 = vmatpush1.bf16.msra.mxu1 %v7602_v41 }
 0x604   : > { %7604 = vmatprep.subr.bf16.mxu1 %v13605_v44 }
 0x607   : > { %7606 = vmatpush1.bf16.msra.mxu1 %v7605_v38 }
 0x608   : > { %7607 = vmatprep.subr.bf16.mxu1 %v13605_v44 }
 0x60b   : > { %7609 = vmatpush1.bf16.msra.mxu1 %v7608_v45 }
 0x60c   : > { %7610 = vmatprep.subr.bf16.mxu1 %v13605_v44 }
 0x669   : > { %v2291_v9 = vpop.f32.mrb[34].mxu1 }
 0x66a   : > { %v2292_v56 = vadd.f32 1e-05, %v2291_v9  ;;  %v7097_v13 = vpop.f32.mrb[35].mxu1 }
 0x66c   : > { %8310 = vrsqrt.f32 %v2292_v56 }
 0x676   : > { %v8311_v11 = vpop.eup %8310 }
 0x677   : > { %v2297_v22 = vmul.f32 %v8311_v11, %v2296_v24 }
 0x679   : > { %v2301_v59 = vrot.slane %v2297_v22, %v10066_v28 }
 0x67b   : > { %v2302_v47 = vmul.f32 %v2301_v59, %v10220_v7  ;;  %v2303_v37 = vmul.f32 %v2301_v59, %v10224_v12  ;;  %v2304_v4 = vmul.f32 %v2301_v59, %v10228_v21  ;;  %v2305_v49 = vmul.f32 %v2301_v59, %v10236_v20 }
 0x67c   : > { %v2306_v19 = vmul.f32 %v2301_v59, %v10240_v58  ;;  %v2307_v33 = vmul.f32 %v2301_v59, %v10246_v8  ;;  %v2308_v46 = vmul.f32 %v2301_v59, %v10252_v5  ;;  %v2309_v35 = vmul.f32 %v2301_v59, %v10258_v25 }
 0x67d   : > { %v2310_v6 = vmul.f32 %v2301_v59, %v10264_v27  ;;  %v2311_v42 = vmul.f32 %v2301_v59, %v10270_v53  ;;  %v2312_v7 = vmul.f32 %v2301_v59, %v10276_v30  ;;  %v2313_v12 = vmul.f32 %v2301_v59, %v10282_v17  ;;  %v6771_v30 = vld [vmem:[%s13430_s2 + $0x5] ss:$0 sm:$0xff] }
 0x67e   : > { %v2314_v21 = vmul.f32 %v2301_v59, %v10288_v63  ;;  %v2315_v20 = vmul.f32 %v2301_v59, %v10294_v50  ;;  %v2316_v58 = vmul.f32 %v2301_v59, %v10300_v61  ;;  %v2317_v8 = vmul.f32 %v2301_v59, %v10306_v2 }
 0x67f   : > { %v2318_v5 = vmul.f32 %v2301_v59, %v10312_v62  ;;  %v2319_v25 = vmul.f32 %v2301_v59, %v10318_v3  ;;  %v2320_v27 = vmul.f32 %v2301_v59, %v10324_v43  ;;  %v2321_v53 = vmul.f32 %v2301_v59, %v10330_v32 }
 0x680   : > { %v2322_v17 = vmul.f32 %v2301_v59, %v10336_v40  ;;  %v2323_v63 = vmul.f32 %v2301_v59, %v10342_v52  ;;  %v2324_v50 = vmul.f32 %v2301_v59, %v10348_v1  ;;  %v2325_v61 = vmul.f32 %v2301_v59, %v10354_v57 }
 0x681   : > { %v2326_v2 = vmul.f32 %v2301_v59, %v10360_v18  ;;  %v2327_v62 = vmul.f32 %v2301_v59, %v10366_v10  ;;  %v2328_v3 = vmul.f32 %v2301_v59, %v10372_v16  ;;  %v2329_v43 = vmul.f32 %v2301_v59, %v10378_v34 }
 0x682   : > { %v2330_v32 = vmul.f32 %v2301_v59, %v10384_v26  ;;  %v2331_v60 = vmul.f32 %v2301_v59, %v10390_v23  ;;  %v2332_v40 = vmul.f32 %v2301_v59, %v10396_v15  ;;  %v2333_v52 = vmul.f32 %v2301_v59, %v10402_v36 }
 0x683   : > { %v2339_v51 = vadd.f32 %v6771_v30, %v2302_v47  ;;  %v10480_v1 = vadd.f32 %v6771_v30, %v2303_v37  ;;  %v10482_v57 = vadd.f32 %v6771_v30, %v2304_v4  ;;  %v10484_v18 = vadd.f32 %v6771_v30, %v2305_v49 }
 0x684   : > { %v10486_v10 = vadd.f32 %v6771_v30, %v2306_v19  ;;  %v10488_v16 = vadd.f32 %v6771_v30, %v2307_v33  ;;  %v10490_v34 = vadd.f32 %v6771_v30, %v2308_v46  ;;  %v10492_v26 = vadd.f32 %v6771_v30, %v2309_v35 }
 0x685   : > { %v10494_v23 = vadd.f32 %v6771_v30, %v2310_v6  ;;  %v10496_v15 = vadd.f32 %v6771_v30, %v2311_v42  ;;  %v10498_v36 = vadd.f32 %v6771_v30, %v2312_v7  ;;  %v10500_v14 = vadd.f32 %v6771_v30, %v2313_v12 }
 0x686   : > { %v10502_v31 = vadd.f32 %v6771_v30, %v2314_v21  ;;  %v10504_v39 = vadd.f32 %v6771_v30, %v2315_v20  ;;  %v10506_v41 = vadd.f32 %v6771_v30, %v2316_v58  ;;  %v10508_v9 = vadd.f32 %v6771_v30, %v2317_v8 }
 0x687   : > { %v10510_v56 = vadd.f32 %v6771_v30, %v2318_v5  ;;  %v10512_v13 = vadd.f32 %v6771_v30, %v2319_v25  ;;  %v10514_v55 = vadd.f32 %v6771_v30, %v2320_v27  ;;  %v10516_v29 = vadd.f32 %v6771_v30, %v2321_v53 }
 0x688   : > { %v10518_v38 = vadd.f32 %v6771_v30, %v2322_v17  ;;  %v10520_v24 = vadd.f32 %v6771_v30, %v2323_v63  ;;  %v10522_v11 = vadd.f32 %v6771_v30, %v2324_v50  ;;  %v10524_v0 = vadd.f32 %v6771_v30, %v2325_v61 }
 0x689   : > { %v10526_v54 = vadd.f32 %v6771_v30, %v2326_v2  ;;  %v10528_v22 = vadd.f32 %v6771_v30, %v2327_v62  ;;  %v10530_v45 = vadd.f32 %v6771_v30, %v2328_v3  ;;  %v10532_v59 = vadd.f32 %v6771_v30, %v2329_v43  ;;  %v2839_v43 = vld [vmem:[#allocation3 + $0x1e0] sm:$0xff] }
 0x68a   : > { %v10534_v47 = vadd.f32 %v6771_v30, %v2330_v32  ;;  %v10536_v37 = vadd.f32 %v6771_v30, %v2331_v60  ;;  %v10538_v4 = vadd.f32 %v6771_v30, %v2332_v40  ;;  %v10540_v49 = vadd.f32 %v6771_v30, %v2333_v52  ;;  %v2840_v32 = vld [vmem:[#allocation3 + $0x1e8] sm:$0xff] }
 0x68b   : > { %v2371_v19 = vmax.f32 %v2339_v51, 0.0  ;;  %v2372_v33 = vmax.f32 %v10480_v1, 0.0  ;;  %v2373_v46 = vmax.f32 %v10482_v57, 0.0  ;;  %v2374_v35 = vmax.f32 %v10484_v18, 0.0 }
 0x68c   : > { %v2375_v6 = vmax.f32 %v10486_v10, 0.0  ;;  %v2376_v42 = vmax.f32 %v10488_v16, 0.0  ;;  %v2377_v7 = vmax.f32 %v10490_v34, 0.0  ;;  %v2378_v12 = vmax.f32 %v10492_v26, 0.0 }
 0x68d   : > { %v2379_v21 = vmax.f32 %v10494_v23, 0.0  ;;  %v2380_v20 = vmax.f32 %v10496_v15, 0.0  ;;  %v2381_v58 = vmax.f32 %v10498_v36, 0.0  ;;  %v2382_v8 = vmax.f32 %v10500_v14, 0.0  ;;  %2458 = vst [vmem:[#allocation2 + $0x19] sm:$0xff] %v2371_v19  ;;  %2459 = vst [vmem:[#allocation2 + $0x21] sm:$0xff] %v2372_v33  ;;  %3002 = vmatprep.mubr.f32.mxu1 %v2371_v19 }
 0x68e   : > { %2460 = vst [vmem:[#allocation2 + $0x31] sm:$0xff] %v2373_v46  ;;  %2461 = vst [vmem:[#allocation2 + $0x39] sm:$0xff] %v2374_v35  ;;  %v2383_v5 = vmax.f32 %v10502_v31, 0.0  ;;  %v13450_v25 = vmax.f32 %v10504_v39, 0.0  ;;  %v13449_v27 = vmax.f32 %v10506_v41, 0.0  ;;  %v13448_v53 = vmax.f32 %v10508_v9, 0.0 }
 0x68f   : > { %2462 = vst [vmem:[#allocation2 + $0x49] sm:$0xff] %v2375_v6  ;;  %2463 = vst [vmem:[#allocation2 + $0x51] sm:$0xff] %v2376_v42  ;;  %v13464_v30 = vmax.f32 %v10510_v56, 0.0  ;;  %v13463_v17 = vmax.f32 %v10512_v13, 0.0  ;;  %v13462_v63 = vmax.f32 %v10514_v55, 0.0  ;;  %v13461_v50 = vmax.f32 %v10516_v29, 0.0 }
 0x690   : > { %2464 = vst [vmem:[#allocation2 + $0x61] sm:$0xff] %v2377_v7  ;;  %2465 = vst [vmem:[#allocation2 + $0x69] sm:$0xff] %v2378_v12  ;;  %v13460_v61 = vmax.f32 %v10518_v38, 0.0  ;;  %v13451_v2 = vmax.f32 %v10520_v24, 0.0  ;;  %v13459_v62 = vmax.f32 %v10522_v11, 0.0  ;;  %v13454_v3 = vmax.f32 %v10524_v0, 0.0 }
 0x691   : > { %2466 = vst [vmem:[#allocation2 + $0x79] sm:$0xff] %v2379_v21  ;;  %2467 = vst [vmem:[#allocation2 + $0x81] sm:$0xff] %v2380_v20  ;;  %v13452_v60 = vmax.f32 %v10526_v54, 0.0  ;;  %v13453_v40 = vmax.f32 %v10528_v22, 0.0  ;;  %v13458_v52 = vmax.f32 %v10530_v45, 0.0  ;;  %v13457_v51 = vmax.f32 %v10532_v59, 0.0 }
 0x692   : > { %2468 = vst [vmem:[#allocation2 + $0x91] sm:$0xff] %v2381_v58  ;;  %2469 = vst [vmem:[#allocation2 + $0x99] sm:$0xff] %v2382_v8  ;;  %v13456_v19 = vmax.f32 %v10534_v47, 0.0 }
 0x693   : > { %2470 = vst [vmem:[#allocation2 + $0xa9] sm:$0xff] %v2383_v5  ;;  %2471 = vst [vmem:[#allocation2 + $0xb1] sm:$0xff] %v13450_v25  ;;  %v2402_v25 = vmax.f32 %v10540_v49, 0.0  ;;  %v2841_v49 = vld [vmem:[#allocation3 + $0x1f0] sm:$0xff] }
 0x694   : > { %2472 = vst [vmem:[#allocation2 + $0xc1] sm:$0xff] %v13449_v27  ;;  %2473 = vst [vmem:[#allocation2 + $0xc9] sm:$0xff] %v13448_v53  ;;  %v13455_v53 = vmax.f32 %v10536_v37, 0.0  ;;  %v2401_v27 = vmax.f32 %v10538_v4, 0.0  ;;  %v7611_v4 = vpack.c.bf16 %v2840_v32, %v2839_v43 }
 0x695   : > { %2474 = vst [vmem:[#allocation2 + $0xd9] sm:$0xff] %v13464_v30  ;;  %2475 = vst [vmem:[#allocation2 + $0xe1] sm:$0xff] %v13463_v17  ;;  %v13621_v30 = vmax.f32 %v10506_v41, 0.0 }
 0x696   : > { %2476 = vst [vmem:[#allocation2 + $0xf1] sm:$0xff] %v13462_v63  ;;  %2477 = vst [vmem:[#allocation2 + $0xf9] sm:$0xff] %v13461_v50  ;;  %v10642_v43 = vld [vmem:[#allocation2 + $0x4a] sm:$0xff]  ;;  %7612 = vmatpush1.bf16.msra.mxu1 %v7611_v4  ;;  %v10649_v32 = vld [vmem:[#allocation2 + $0x52] sm:$0xff]  ;;  %v13618_v63 = vmax.f32 %v10504_v39, 0.0 }
 0x697   : > { %2478 = vst [vmem:[#allocation2 + $0x109] sm:$0xff] %v13460_v61  ;;  %2479 = vst [vmem:[#allocation2 + $0x111] sm:$0xff] %v13451_v2  ;;  %v2842_v2 = vld [vmem:[#allocation3 + $0x1f8] sm:$0xff]  ;;  %7613 = vmatprep.subr.bf16.mxu1 %v13605_v44  ;;  %v10691_v10 = vld [vmem:[#allocation2 + $0x50] sm:$0xff] }
 0x698   : > { %2480 = vst [vmem:[#allocation2 + $0x121] sm:$0xff] %v13459_v62  ;;  %2481 = vst [vmem:[#allocation2 + $0x129] sm:$0xff] %v13454_v3  ;;  %v10635_v3 = vld [vmem:[#allocation2 + $0x3a] sm:$0xff]  ;;  %v10654_v1 = vld [vmem:[#allocation2 + $0x62] sm:$0xff] }
 0x699   : > { %2482 = vst [vmem:[#allocation2 + $0x139] sm:$0xff] %v13452_v60  ;;  %2483 = vst [vmem:[#allocation2 + $0x141] sm:$0xff] %v13453_v40  ;;  %v10631_v60 = vld [vmem:[#allocation2 + $0x32] sm:$0xff]  ;;  %v10666_v57 = vld [vmem:[#allocation2 + $0x7a] sm:$0xff] }
 0x69a   : > { %2484 = vst [vmem:[#allocation2 + $0x151] sm:$0xff] %v13458_v52  ;;  %2485 = vst [vmem:[#allocation2 + $0x159] sm:$0xff] %v13457_v51  ;;  %v10633_v40 = vld [vmem:[#allocation2 + $0x18] sm:$0xff]  ;;  %7130 = vmatprep.mubr.f32.mxu0 %v10631_v60  ;;  %v10672_v4 = vld [vmem:[#allocation2 + $0x82] sm:$0xff] }
 0x69b   : > { %2486 = vst [vmem:[#allocation2 + $0x169] sm:$0xff] %v13456_v19  ;;  %2487 = vst [vmem:[#allocation2 + $0x171] sm:$0xff] %v13455_v53  ;;  %3003 = vmatmul.mubr.f32.gmra.mrb[40].mxu1 %v10633_v40  ;;  %7131 = vmatmul.mubr.f32.vlgmr.msra.gmra.mrb[64].mxu0 %v10635_v3  ;;  %v10680_v18 = vld [vmem:[#allocation2 + $0x48] sm:$0xff]  ;;  %v10702_v16 = vld [vmem:[#allocation2 + $0x60] sm:$0xff] }
 0x69c   : > { %2488 = vst [vmem:[#allocation2 + $0x181] sm:$0xff] %v2401_v27  ;;  %2489 = vst [vmem:[#allocation2 + $0x189] sm:$0xff] %v2402_v25  ;;  %3007 = vmatprep.mubr.f32.mxu1 %v2372_v33  ;;  %7133 = vmatprep.mubr.f32.mxu0 %v10642_v43  ;;  %v7614_v25 = vpack.c.bf16 %v2842_v2, %v2841_v49  ;;  %v10645_v27 = vld [vmem:[#allocation2 + $0x20] sm:$0xff]  ;;  %v10657_v33 = vld [vmem:[#allocation2 + $0x30] sm:$0xff] }
 0x69d   : > { %v10661_v2 = vld [vmem:[#allocation2 + $0x6a] sm:$0xff]  ;;  %v10677_v49 = vld [vmem:[#allocation2 + $0x92] sm:$0xff]  ;;  %v10699_v53 = vld [vmem:[#allocation2 + $0xc2] sm:$0xff] }
 0x69e   : > { %7615 = vmatpush1.bf16.msra.mxu1 %v7614_v25  ;;  %v10688_v25 = vld [vmem:[#allocation2 + $0xaa] sm:$0xff]  ;;  %v10710_v19 = vld [vmem:[#allocation2 + $0xda] sm:$0xff]  ;;  %v10721_v51 = vld [vmem:[#allocation2 + $0xf2] sm:$0xff] }
 0x69f   : > { %3008 = vmatmul.mubr.f32.gmra.mrb[42].mxu1 %v10645_v27  ;;  %7134 = vmatmul.mubr.f32.gmra.mrb[66].mxu0 %v10649_v32  ;;  %v10713_v34 = vld [vmem:[#allocation2 + $0x68] sm:$0xff]  ;;  %v10724_v26 = vld [vmem:[#allocation2 + $0x78] sm:$0xff]  ;;  %v10735_v23 = vld [vmem:[#allocation2 + $0x80] sm:$0xff] }
 0x6a0   : > { %3012 = vmatprep.mubr.f32.mxu1 %v2373_v46  ;;  %7136 = vmatprep.mubr.f32.mxu0 %v10654_v1  ;;  %v10669_v46 = vld [vmem:[#allocation2 + $0x38] sm:$0xff]  ;;  %v10732_v52 = vld [vmem:[#allocation2 + $0x10a] sm:$0xff]  ;;  %v10743_v62 = vld [vmem:[#allocation2 + $0x122] sm:$0xff] }
 0x6a1   : > { %7616 = vmatprep.subr.bf16.mxu1 %v13605_v44  ;;  %v10746_v15 = vld [vmem:[#allocation2 + $0x90] sm:$0xff]  ;;  %v10754_v61 = vld [vmem:[#allocation2 + $0x13a] sm:$0xff]  ;;  %v10768_v14 = vld [vmem:[#allocation2 + $0xa8] sm:$0xff] }
 0x6a2   : > { %v10757_v36 = vld [vmem:[#allocation2 + $0x98] sm:$0xff]  ;;  %v10776_v17 = vld [vmem:[#allocation2 + $0x16a] sm:$0xff]  ;;  %v10787_v28 = vld [vmem:[#allocation2 + $0xc0] sm:$0xff] }
 0x6a3   : > { %3013 = vmatmul.mubr.f32.gmra.mrb[44].mxu1 %v10657_v33  ;;  %7137 = vmatmul.mubr.f32.gmra.mrb[68].mxu0 %v10661_v2  ;;  %v10765_v50 = vld [vmem:[#allocation2 + $0x152] sm:$0xff]  ;;  %13619 = vst [vmem:[#allocation16_spill] sm:$0xff] %v10776_v17  ;;  %v2775_v48 = vld [vmem:[#allocation2 + $0x182] sm:$0xff]  ;;  %v2776_v39 = vld [vmem:[#allocation2 + $0x18a] sm:$0xff] }
 0x6a4   : > { %3017 = vmatprep.mubr.f32.mxu1 %v2374_v35  ;;  %7139 = vmatprep.mubr.f32.mxu0 %v10666_v57  ;;  %v10683_v35 = vld [vmem:[#allocation2 + $0x9a] sm:$0xff]  ;;  %13616 = vst [vmem:[#allocation14_spill] sm:$0xff] %v10765_v50  ;;  %v10779_v31 = vld [vmem:[#allocation2 + $0xb0] sm:$0xff] }
 0x6a5   : > { %v10797_v41 = vld [vmem:[#allocation2 + $0xd8] sm:$0xff] }
 0x6a7   : > { %3018 = vmatmul.mubr.f32.gmra.mrb[46].mxu1 %v10669_v46  ;;  %7140 = vmatmul.mubr.f32.gmra.mrb[70].mxu0 %v10672_v4 }
 0x6a8   : > { %3022 = vmatprep.mubr.f32.mxu1 %v2375_v6  ;;  %7142 = vmatprep.mubr.f32.mxu0 %v10677_v49  ;;  %v10694_v6 = vld [vmem:[#allocation2 + $0xb2] sm:$0xff] }
 0x6ab   : > { %3023 = vmatmul.mubr.f32.gmra.mrb[48].mxu1 %v10680_v18  ;;  %7143 = vmatmul.mubr.f32.gmra.mrb[72].mxu0 %v10683_v35 }
 0x6ac   : > { %3027 = vmatprep.mubr.f32.mxu1 %v2376_v42  ;;  %7145 = vmatprep.mubr.f32.mxu0 %v10688_v25  ;;  %v10705_v42 = vld [vmem:[#allocation2 + $0xca] sm:$0xff] }
 0x6af   : > { %3028 = vmatmul.mubr.f32.gmra.mrb[50].mxu1 %v10691_v10  ;;  %7146 = vmatmul.mubr.f32.gmra.mrb[74].mxu0 %v10694_v6 }
 0x6b0   : > { %3032 = vmatprep.mubr.f32.mxu1 %v2377_v7  ;;  %7148 = vmatprep.mubr.f32.mxu0 %v10699_v53  ;;  %v10716_v7 = vld [vmem:[#allocation2 + $0xe2] sm:$0xff] }
 0x6b3   : > { %3033 = vmatmul.mubr.f32.gmra.mrb[52].mxu1 %v10702_v16  ;;  %7149 = vmatmul.mubr.f32.gmra.mrb[76].mxu0 %v10705_v42 }
 0x6b4   : > { %3037 = vmatprep.mubr.f32.mxu1 %v2378_v12  ;;  %7151 = vmatprep.mubr.f32.mxu0 %v10710_v19  ;;  %v10727_v12 = vld [vmem:[#allocation2 + $0xfa] sm:$0xff] }
 0x6b7   : > { %3038 = vmatmul.mubr.f32.gmra.mrb[54].mxu1 %v10713_v34  ;;  %7152 = vmatmul.mubr.f32.gmra.mrb[78].mxu0 %v10716_v7 }
 0x6b8   : > { %3042 = vmatprep.mubr.f32.mxu1 %v2379_v21  ;;  %7154 = vmatprep.mubr.f32.mxu0 %v10721_v51  ;;  %v10738_v21 = vld [vmem:[#allocation2 + $0x112] sm:$0xff] }
 0x6bb   : > { %3043 = vmatmul.mubr.f32.gmra.mrb[56].mxu1 %v10724_v26  ;;  %7155 = vmatmul.mubr.f32.gmra.mrb[80].mxu0 %v10727_v12 }
 0x6bc   : > { %3047 = vmatprep.mubr.f32.mxu1 %v2380_v20  ;;  %7157 = vmatprep.mubr.f32.mxu0 %v10732_v52  ;;  %v10749_v20 = vld [vmem:[#allocation2 + $0x12a] sm:$0xff] }
 0x6bf   : > { %3048 = vmatmul.mubr.f32.gmra.mrb[58].mxu1 %v10735_v23  ;;  %7158 = vmatmul.mubr.f32.gmra.mrb[82].mxu0 %v10738_v21 }
 0x6c0   : > { %3052 = vmatprep.mubr.f32.mxu1 %v2381_v58  ;;  %7160 = vmatprep.mubr.f32.mxu0 %v10743_v62  ;;  %v10760_v58 = vld [vmem:[#allocation2 + $0x142] sm:$0xff] }
 0x6c3   : > { %3053 = vmatmul.mubr.f32.gmra.mrb[60].mxu1 %v10746_v15  ;;  %7161 = vmatmul.mubr.f32.gmra.mrb[84].mxu0 %v10749_v20 }
 0x6c4   : > { %3057 = vmatprep.mubr.f32.mxu1 %v2382_v8  ;;  %7163 = vmatprep.mubr.f32.mxu0 %v10754_v61  ;;  %v10771_v8 = vld [vmem:[#allocation2 + $0x15a] sm:$0xff] }
 0x6c5   : > { %13617 = vst [vmem:[#allocation15_spill] sm:$0xff] %v10771_v8 }
 0x6c7   : > { %3058 = vmatmul.mubr.f32.gmra.mrb[62].mxu1 %v10757_v36  ;;  %7164 = vmatmul.mubr.f32.gmra.mrb[86].mxu0 %v10760_v58 }
 0x6c8   : > { %3062 = vmatprep.mubr.f32.mxu1 %v2383_v5  ;;  %7166 = vmatprep.mubr.f32.mxu0 %v10765_v50  ;;  %v10782_v5 = vld [vmem:[#allocation2 + $0x172] sm:$0xff]  ;;  %v2845_v50 = vld [vmem:[#allocation3 + $0x210] sm:$0xff] }
 0x6c9   : > { %13620 = vst [vmem:[#allocation17_spill] sm:$0xff] %v10782_v5 }
 0x6cb   : > { %3063 = vmatmul.mubr.f32.gmra.mrb[64].mxu1 %v10768_v14  ;;  %7167 = vmatmul.mubr.f32.gmra.mrb[88].mxu0 %v10771_v8  ;;  %v10862_v8 = vld [vmem:[#allocation2 + $0x170] sm:$0xff] }
 0x6cc   : > { %3067 = vmatprep.mubr.f32.mxu1 %v13618_v63  ;;  %7169 = vmatprep.mubr.f32.mxu0 %v10776_v17  ;;  %v13622_v63 = vmax.f32 %v10508_v9, 0.0  ;;  %v10792_v17 = vld [vmem:[#allocation2 + $0xc8] sm:$0xff]  ;;  %v13625_v9 = vmax.f32 %v10514_v55, 0.0  ;;  %v13628_v55 = vmax.f32 %v10520_v24, 0.0  ;;  %v13631_v24 = vmax.f32 %v10526_v54, 0.0  ;;  %13638 = vst [vmem:[#allocation19_spill] sm:$0xff] %v10862_v8 }
 0x6cd   : > { %v13634_v54 = vmax.f32 %v10532_v59, 0.0  ;;  %v2554_v59 = vld [vmem:[#allocation2 + $0x2] sm:$0xff] }
 0x6cf   : > { %3068 = vmatmul.mubr.f32.gmra.mrb[66].mxu1 %v10779_v31  ;;  %7170 = vmatmul.mubr.f32.gmra.mrb[90].mxu0 %v10782_v5  ;;  %v13623_v5 = vmax.f32 %v10510_v56, 0.0  ;;  %v13626_v56 = vmax.f32 %v10516_v29, 0.0  ;;  %v13629_v29 = vmax.f32 %v10522_v11, 0.0  ;;  %v13632_v11 = vmax.f32 %v10528_v22, 0.0 }
 0x6d0   : > { %3072 = vmatprep.mubr.f32.mxu1 %v13621_v30  ;;  %7172 = vmatprep.mubr.f32.mxu0 %v2775_v48  ;;  %v13624_v48 = vmax.f32 %v10512_v13, 0.0  ;;  %v10802_v30 = vld [vmem:[#allocation2 + $0xe0] sm:$0xff]  ;;  %v13627_v13 = vmax.f32 %v10518_v38, 0.0  ;;  %v13630_v38 = vmax.f32 %v10524_v0, 0.0  ;;  %v13633_v0 = vmax.f32 %v10530_v45, 0.0 }
 0x6d1   : > { %v13635_v22 = vmax.f32 %v10534_v47, 0.0  ;;  %v13637_v45 = vmax.f32 %v10536_v37, 0.0  ;;  %v2846_v47 = vld [vmem:[#allocation3 + $0x218] sm:$0xff]  ;;  %v2847_v37 = vld [vmem:[#allocation3 + $0x220] sm:$0xff] }
 0x6d3   : > { %3073 = vmatmul.mubr.f32.gmra.mrb[68].mxu1 %v10787_v28  ;;  %7173 = vmatmul.mubr.f32.gmra.mrb[92].mxu0 %v2776_v39  ;;  %v10807_v39 = vld [vmem:[#allocation2 + $0xf0] sm:$0xff] }
 0x6d4   : > { %3077 = vmatprep.mubr.f32.mxu1 %v13622_v63  ;;  %v10817_v63 = vld [vmem:[#allocation2 + $0x108] sm:$0xff] }
 0x6d7   : > { %3078 = vmatmul.mubr.f32.gmra.mrb[70].mxu1 %v10792_v17 }
 0x6d8   : > { %3082 = vmatprep.mubr.f32.mxu1 %v13623_v5  ;;  %v10812_v5 = vld [vmem:[#allocation2 + $0xf8] sm:$0xff] }
 0x6db   : > { %3083 = vmatmul.mubr.f32.gmra.mrb[72].mxu1 %v10797_v41 }
 0x6dc   : > { %3087 = vmatprep.mubr.f32.mxu1 %v13624_v48  ;;  %v10822_v48 = vld [vmem:[#allocation2 + $0x110] sm:$0xff] }
 0x6df   : > { %3088 = vmatmul.mubr.f32.gmra.mrb[74].mxu1 %v10802_v30 }
 0x6e0   : > { %3092 = vmatprep.mubr.f32.mxu1 %v13625_v9  ;;  %v10827_v9 = vld [vmem:[#allocation2 + $0x120] sm:$0xff] }
 0x6e3   : > { %3093 = vmatmul.mubr.f32.gmra.mrb[76].mxu1 %v10807_v39 }
 0x6e4   : > { %3097 = vmatprep.mubr.f32.mxu1 %v13626_v56  ;;  %v10832_v56 = vld [vmem:[#allocation2 + $0x128] sm:$0xff] }
 0x6e7   : > { %3098 = vmatmul.mubr.f32.gmra.mrb[78].mxu1 %v10812_v5 }
 0x6e8   : > { %3102 = vmatprep.mubr.f32.mxu1 %v13627_v13  ;;  %v10837_v13 = vld [vmem:[#allocation2 + $0x138] sm:$0xff] }
 0x6eb   : > { %3103 = vmatmul.mubr.f32.gmra.mrb[80].mxu1 %v10817_v63 }
 0x6ec   : > { %3107 = vmatprep.mubr.f32.mxu1 %v13628_v55  ;;  %v10842_v55 = vld [vmem:[#allocation2 + $0x140] sm:$0xff] }
 0x6ef   : > { %3108 = vmatmul.mubr.f32.gmra.mrb[82].mxu1 %v10822_v48 }
 0x6f0   : > { %3112 = vmatprep.mubr.f32.mxu1 %v13629_v29  ;;  %v10847_v29 = vld [vmem:[#allocation2 + $0x150] sm:$0xff] }
 0x6f3   : > { %3113 = vmatmul.mubr.f32.gmra.mrb[84].mxu1 %v10827_v9 }
 0x6f4   : > { %3117 = vmatprep.mubr.f32.mxu1 %v13630_v38  ;;  %v10852_v38 = vld [vmem:[#allocation2 + $0x158] sm:$0xff] }
 0x6f7   : > { %3118 = vmatmul.mubr.f32.gmra.mrb[86].mxu1 %v10832_v56 }
 0x6f8   : > { %3122 = vmatprep.mubr.f32.mxu1 %v13631_v24  ;;  %v10857_v24 = vld [vmem:[#allocation2 + $0x168] sm:$0xff] }
 0x6f9   : > { %13636 = vst [vmem:[#allocation18_spill] sm:$0xff] %v10857_v24 }
 0x6fb   : > { %3123 = vmatmul.mubr.f32.gmra.mrb[88].mxu1 %v10837_v13 }
 0x6fc   : > { %3127 = vmatprep.mubr.f32.mxu1 %v13632_v11  ;;  %v2843_v11 = vld [vmem:[#allocation3 + $0x200] sm:$0xff] }
 0x6ff   : > { %3128 = vmatmul.mubr.f32.gmra.mrb[90].mxu1 %v10842_v55 }
 0x700   : > { %3132 = vmatprep.mubr.f32.mxu1 %v13633_v0  ;;  %v2844_v0 = vld [vmem:[#allocation3 + $0x208] sm:$0xff] }
 0x703   : > { %3133 = vmatmul.mubr.f32.gmra.mrb[92].mxu1 %v10847_v29 }
 0x704   : > { %3137 = vmatprep.mubr.f32.mxu1 %v13634_v54  ;;  %v7617_v54 = vpack.c.bf16 %v2844_v0, %v2843_v11  ;;  %v2850_v11 = vld [vmem:[#allocation3 + $0x238] sm:$0xff]  ;;  %v10870_v0 = vld [vmem:[#allocation2 + $0x1a] sm:$0xff] }
 0x707   : > { %3138 = vmatmul.mubr.f32.gmra.mrb[94].mxu1 %v10852_v38 }
 0x708   : > { %3142 = vmatprep.mubr.f32.mxu1 %v13635_v22  ;;  %v2555_v22 = vld [vmem:[#allocation2 + $0xa] sm:$0xff] }
 0x70b   : > { %3143 = vmatmul.mubr.f32.gmra.mrb[96].mxu1 %v10857_v24  ;;  %v7620_v24 = vpack.c.bf16 %v2846_v47, %v2845_v50  ;;  %v2854_v47 = vld [vmem:[#allocation3 + $0x258] sm:$0xff] }
 0x70c   : > { %3147 = vmatprep.mubr.f32.mxu1 %v13637_v45  ;;  %v2848_v45 = vld [vmem:[#allocation3 + $0x228] sm:$0xff] }
 0x70f   : > { %3148 = vmatmul.mubr.f32.gmra.mrb[98].mxu1 %v10862_v8  ;;  %v7623_v8 = vpack.c.bf16 %v2848_v45, %v2847_v37  ;;  %v2857_v37 = vld [vmem:[#allocation3 + $0x270] sm:$0xff]  ;;  %v2858_v45 = vld [vmem:[#allocation3 + $0x278] sm:$0xff] }
 0x710   : > { %3217 = vmatprep.mubr.f32.mxu1 %v10633_v40  ;;  %v2849_v40 = vld [vmem:[#allocation3 + $0x230] sm:$0xff] }
 0x711   : > { %v7626_v50 = vpack.c.bf16 %v2850_v11, %v2849_v40  ;;  %v2859_v40 = vld [vmem:[#allocation3 + $0x280] sm:$0xff]  ;;  %v2860_v11 = vld [vmem:[#allocation3 + $0x288] sm:$0xff] }
 0x713   : > { %3218 = vmatmul.mubr.f32.vlgmr.msra.gmra.mrb[36].mxu1 %v2554_v59  ;;  %v2852_v59 = vld [vmem:[#allocation3 + $0x248] sm:$0xff] }
 0x714   : > { %3222 = vmatprep.mubr.f32.mxu1 %v10645_v27  ;;  %7618 = vmatpush1.bf16.msra.mxu1 %v7617_v54  ;;  %v2851_v27 = vld [vmem:[#allocation3 + $0x240] sm:$0xff]  ;;  %v10875_v54 = vld [vmem:[#allocation2 + $0x22] sm:$0xff] }
 0x715   : > { %7619 = vmatprep.subr.bf16.mxu1 %v13605_v44 }
 0x717   : > { %3223 = vmatmul.mubr.f32.gmra.mrb[38].mxu1 %v2555_v22  ;;  %v2856_v22 = vld [vmem:[#allocation3 + $0x268] sm:$0xff] }
 0x718   : > { %3227 = vmatprep.mubr.f32.mxu1 %v10657_v33  ;;  %7621 = vmatpush1.bf16.msra.mxu1 %v7620_v24  ;;  %v7629_v33 = vpack.c.bf16 %v2852_v59, %v2851_v27  ;;  %v2853_v24 = vld [vmem:[#allocation3 + $0x250] sm:$0xff]  ;;  %v2862_v27 = vld [vmem:[#allocation3 + $0x298] sm:$0xff]  ;;  %v2863_v59 = vld [vmem:[#allocation3 + $0x2a0] sm:$0xff] }
 0x719   : > { %7622 = vmatprep.subr.bf16.mxu1 %v13605_v44 }
 0x71b   : > { %3228 = vmatmul.mubr.f32.gmra.mrb[40].mxu1 %v10870_v0 }
 0x71c   : > { %3232 = vmatprep.mubr.f32.mxu1 %v10669_v46  ;;  %7624 = vmatpush1.bf16.msra.mxu1 %v7623_v8  ;;  %v7632_v46 = vpack.c.bf16 %v2854_v47, %v2853_v24  ;;  %v2855_v8 = vld [vmem:[#allocation3 + $0x260] sm:$0xff]  ;;  %v2865_v24 = vld [vmem:[#allocation3 + $0x2b0] sm:$0xff]  ;;  %v2866_v47 = vld [vmem:[#allocation3 + $0x2b8] sm:$0xff] }
 0x71d   : > { %7625 = vmatprep.subr.bf16.mxu1 %v13605_v44 }
 0x71f   : > { %3233 = vmatmul.mubr.f32.gmra.mrb[42].mxu1 %v10875_v54 }
 0x720   : > { %3237 = vmatprep.mubr.f32.mxu1 %v10680_v18  ;;  %7627 = vmatpush1.bf16.msra.mxu1 %v7626_v50  ;;  %v7635_v18 = vpack.c.bf16 %v2856_v22, %v2855_v8  ;;  %v2861_v50 = vld [vmem:[#allocation3 + $0x290] sm:$0xff]  ;;  %v2868_v8 = vld [vmem:[#allocation3 + $0x2c8] sm:$0xff] }
 0x721   : > { %7628 = vmatprep.subr.bf16.mxu1 %v13605_v44  ;;  %v2869_v22 = vld [vmem:[#allocation3 + $0x2d0] sm:$0xff] }
 0x723   : > { %3238 = vmatmul.mubr.f32.gmra.mrb[44].mxu1 %v10631_v60 }
 0x724   : > { %3242 = vmatprep.mubr.f32.mxu1 %v10691_v10  ;;  %7630 = vmatpush1.bf16.msra.mxu1 %v7629_v33  ;;  %v7638_v10 = vpack.c.bf16 %v2858_v45, %v2857_v37  ;;  %v2864_v33 = vld [vmem:[#allocation3 + $0x2a8] sm:$0xff]  ;;  %v2871_v37 = vld [vmem:[#allocation3 + $0x2e0] sm:$0xff] }
 0x725   : > { %7631 = vmatprep.subr.bf16.mxu1 %v13605_v44  ;;  %v2872_v45 = vld [vmem:[#allocation3 + $0x2e8] sm:$0xff] }
 0x727   : > { %3243 = vmatmul.mubr.f32.gmra.mrb[46].mxu1 %v10635_v3 }
 0x728   : > { %3247 = vmatprep.mubr.f32.mxu1 %v10702_v16  ;;  %7633 = vmatpush1.bf16.msra.mxu1 %v7632_v46  ;;  %v7641_v16 = vpack.c.bf16 %v2860_v11, %v2859_v40  ;;  %v2867_v46 = vld [vmem:[#allocation3 + $0x2c0] sm:$0xff]  ;;  %v2874_v40 = vld [vmem:[#allocation3 + $0x2f8] sm:$0xff] }
 0x729   : > { %7634 = vmatprep.subr.bf16.mxu1 %v13605_v44  ;;  %v2878_v11 = vld [vmem:[#allocation3 + $0x318] sm:$0xff] }
 0x72b   : > { %3248 = vmatmul.mubr.f32.gmra.mrb[48].mxu1 %v10642_v43 }
 0x72c   : > { %3252 = vmatprep.mubr.f32.mxu1 %v10713_v34  ;;  %7636 = vmatpush1.bf16.msra.mxu1 %v7635_v18  ;;  %v7644_v34 = vpack.c.bf16 %v2862_v27, %v2861_v50  ;;  %v2870_v18 = vld [vmem:[#allocation3 + $0x2d8] sm:$0xff] }
 0x72d   : > { %7637 = vmatprep.subr.bf16.mxu1 %v13605_v44 }
 0x72f   : > { %3253 = vmatmul.mubr.f32.gmra.mrb[50].mxu1 %v10649_v32 }
 0x730   : > { %3257 = vmatprep.mubr.f32.mxu1 %v10724_v26  ;;  %7639 = vmatpush1.bf16.msra.mxu1 %v7638_v10  ;;  %v7647_v26 = vpack.c.bf16 %v2864_v33, %v2863_v59  ;;  %v2873_v10 = vld [vmem:[#allocation3 + $0x2f0] sm:$0xff]  ;;  %v2879_v59 = vld [vmem:[#allocation3 + $0x320] sm:$0xff]  ;;  %v2880_v33 = vld [vmem:[#allocation3 + $0x328] sm:$0xff] }
 0x731   : > { %7640 = vmatprep.subr.bf16.mxu1 %v13605_v44 }
 0x733   : > { %3258 = vmatmul.mubr.f32.gmra.mrb[52].mxu1 %v10654_v1 }
 0x734   : > { %3262 = vmatprep.mubr.f32.mxu1 %v10735_v23  ;;  %7642 = vmatpush1.bf16.msra.mxu1 %v7641_v16  ;;  %v7650_v23 = vpack.c.bf16 %v2866_v47, %v2865_v24  ;;  %v2618_v16 = vld [vmem:[#allocation2 + $0x19] sm:$0xff]  ;;  %v7671_v47 = vpack.c.bf16 %v2880_v33, %v2879_v59  ;;  %v2894_v33 = vld [vmem:[#allocation3 + $0x398] sm:$0xff] }
 0x735   : > { %7643 = vmatprep.subr.bf16.mxu1 %v13605_v44  ;;  %v2893_v59 = vld [vmem:[#allocation3 + $0x390] sm:$0xff] }
 0x737   : > { %3263 = vmatmul.mubr.f32.gmra.mrb[54].mxu1 %v10661_v2 }
 0x738   : > { %3267 = vmatprep.mubr.f32.mxu1 %v10746_v15  ;;  %7645 = vmatpush1.bf16.msra.mxu1 %v7644_v34  ;;  %v7653_v15 = vpack.c.bf16 %v2868_v8, %v2867_v46  ;;  %v11000_v46 = vld [vmem:[#allocation2 + $0x31] sm:$0xff] }
 0x739   : > { %7646 = vmatprep.subr.bf16.mxu1 %v13605_v44 }
 0x73b   : > { %3268 = vmatmul.mubr.f32.gmra.mrb[56].mxu1 %v10666_v57 }
 0x73c   : > { %3272 = vmatprep.mubr.f32.mxu1 %v10757_v36  ;;  %7648 = vmatpush1.bf16.msra.mxu1 %v7647_v26  ;;  %v7656_v36 = vpack.c.bf16 %v2870_v18, %v2869_v22  ;;  %v2619_v26 = vld [vmem:[#allocation2 + $0x21] sm:$0xff]  ;;  %v2884_v18 = vld [vmem:[#allocation3 + $0x348] sm:$0xff] }
 0x73d   : > { %7649 = vmatprep.subr.bf16.mxu1 %v13605_v44 }
 0x73f   : > { %3273 = vmatmul.mubr.f32.gmra.mrb[58].mxu1 %v10672_v4 }
 0x740   : > { %3277 = vmatprep.mubr.f32.mxu1 %v10768_v14  ;;  %7651 = vmatpush1.bf16.msra.mxu1 %v7650_v23  ;;  %v7659_v14 = vpack.c.bf16 %v2872_v45, %v2871_v37  ;;  %v2881_v23 = vld [vmem:[#allocation3 + $0x330] sm:$0xff] }
 0x741   : > { %7652 = vmatprep.subr.bf16.mxu1 %v13605_v44 }
 0x743   : > { %3278 = vmatmul.mubr.f32.gmra.mrb[60].mxu1 %v10677_v49  ;;  %v7662_v49 = vpack.c.bf16 %v2874_v40, %v2873_v10  ;;  %v2886_v10 = vld [vmem:[#allocation3 + $0x358] sm:$0xff] }
 0x744   : > { %3282 = vmatprep.mubr.f32.mxu1 %v10779_v31  ;;  %7654 = vmatpush1.bf16.msra.mxu1 %v7653_v15  ;;  %v13642_v31 = vld [vmem:[#allocation15_spill] sm:$0xff] }
 0x745   : > { %7655 = vmatprep.subr.bf16.mxu1 %v13605_v44  ;;  %v11018_v40 = vld [vmem:[#allocation2 + $0x49] sm:$0xff] }
 0x747   : > { %3283 = vmatmul.mubr.f32.gmra.mrb[62].mxu1 %v10683_v35 }
 0x748   : > { %3287 = vmatprep.mubr.f32.mxu1 %v10787_v28  ;;  %7657 = vmatpush1.bf16.msra.mxu1 %v7656_v36  ;;  %v11009_v36 = vld [vmem:[#allocation2 + $0x39] sm:$0xff] }
 0x749   : > { %7658 = vmatprep.subr.bf16.mxu1 %v13605_v44 }
 0x74b   : > { %3288 = vmatmul.mubr.f32.gmra.mrb[64].mxu1 %v10688_v25 }
 0x74c   : > { %3292 = vmatprep.mubr.f32.mxu1 %v10792_v17  ;;  %7660 = vmatpush1.bf16.msra.mxu1 %v7659_v14 }
 0x74d   : > { %7661 = vmatprep.subr.bf16.mxu1 %v13605_v44 }
 0x74f   : > { %3293 = vmatmul.mubr.f32.gmra.mrb[66].mxu1 %v10694_v6 }
 0x750   : > { %3297 = vmatprep.mubr.f32.mxu1 %v10797_v41  ;;  %7663 = vmatpush1.bf16.msra.mxu1 %v7662_v49  ;;  %v10969_v41 = vld [vmem:[#allocation2 + $0x180] sm:$0xff] }
 0x751   : > { %7664 = vmatprep.subr.bf16.mxu1 %v13605_v44 }
 0x753   : > { %3298 = vmatmul.mubr.f32.gmra.mrb[68].mxu1 %v10699_v53 }
 0x754   : > { %3302 = vmatprep.mubr.f32.mxu1 %v10802_v30 }
 0x757   : > { %3303 = vmatmul.mubr.f32.gmra.mrb[70].mxu1 %v10705_v42  ;;  %v13639_v42 = vld [vmem:[#allocation18_spill] sm:$0xff] }
 0x758   : > { %3307 = vmatprep.mubr.f32.mxu1 %v10807_v39  ;;  %v13643_v39 = vld [vmem:[#allocation16_spill] sm:$0xff] }
 0x75b   : > { %3308 = vmatmul.mubr.f32.gmra.mrb[72].mxu1 %v10710_v19 }
 0x75c   : > { %3312 = vmatprep.mubr.f32.mxu1 %v10812_v5  ;;  %v10977_v5 = vld [vmem:[#allocation2 + $0x188] sm:$0xff] }
 0x75f   : > { %3313 = vmatmul.mubr.f32.gmra.mrb[74].mxu1 %v10716_v7 }
 0x760   : > { %3317 = vmatprep.mubr.f32.mxu1 %v10817_v63 }
 0x763   : > { %3318 = vmatmul.mubr.f32.gmra.mrb[76].mxu1 %v10721_v51 }
 0x764   : > { %3322 = vmatprep.mubr.f32.mxu1 %v10822_v48  ;;  %v2875_v48 = vld [vmem:[#allocation3 + $0x300] sm:$0xff] }
 0x767   : > { %3323 = vmatmul.mubr.f32.gmra.mrb[78].mxu1 %v10727_v12  ;;  %v13640_v12 = vld [vmem:[#allocation14_spill] sm:$0xff] }
 0x768   : > { %3327 = vmatprep.mubr.f32.mxu1 %v10827_v9  ;;  %v2876_v9 = vld [vmem:[#allocation3 + $0x308] sm:$0xff] }
 0x76b   : > { %3328 = vmatmul.mubr.f32.gmra.mrb[80].mxu1 %v10732_v52 }
 0x76c   : > { %3332 = vmatprep.mubr.f32.mxu1 %v10832_v56 }
 0x76e   : > { %v10930_v28 = vpop.f32.mrb[64].mxu0 }
 0x76f   : > { %3333 = vmatmul.mubr.f32.gmra.mrb[82].mxu1 %v10738_v21  ;;  %v10933_v53 = vpop.f32.mrb[65].mxu0 }
 0x770   : > { %3337 = vmatprep.mubr.f32.mxu1 %v10837_v13  ;;  %v13644_v13 = vld [vmem:[#allocation17_spill] sm:$0xff] }
 0x772   : > { %v10936_v17 = vpop.f32.mrb[66].mxu0 }
 0x773   : > { %3338 = vmatmul.mubr.f32.gmra.mrb[84].mxu1 %v10743_v62  ;;  %v10939_v51 = vpop.f32.mrb[67].mxu0 }
 0x774   : > { %3342 = vmatprep.mubr.f32.mxu1 %v10842_v55 }
 0x776   : > { %v10942_v19 = vpop.f32.mrb[68].mxu0 }
 0x777   : > { %3343 = vmatmul.mubr.f32.gmra.mrb[86].mxu1 %v10749_v20  ;;  %v10945_v52 = vpop.f32.mrb[69].mxu0  ;;  %v13641_v20 = vld [vmem:[#allocation19_spill] sm:$0xff] }
 0x778   : > { %3347 = vmatprep.mubr.f32.mxu1 %v10847_v29  ;;  %v7665_v29 = vpack.c.bf16 %v2876_v9, %v2875_v48 }
 0x77a   : > { %v10948_v35 = vpop.f32.mrb[70].mxu0 }
 0x77b   : > { %3348 = vmatmul.mubr.f32.gmra.mrb[88].mxu1 %v10754_v61  ;;  %v10951_v25 = vpop.f32.mrb[71].mxu0 }
 0x77c   : > { %3352 = vmatprep.mubr.f32.mxu1 %v10852_v38  ;;  %v2877_v38 = vld [vmem:[#allocation3 + $0x310] sm:$0xff] }
 0x77d   : > { %v7668_v34 = vpack.c.bf16 %v2878_v11, %v2877_v38  ;;  %v2891_v11 = vld [vmem:[#allocation3 + $0x380] sm:$0xff] }
 0x77e   : > { %v10954_v62 = vpop.f32.mrb[72].mxu0 }
 0x77f   : > { %3353 = vmatmul.mubr.f32.gmra.mrb[90].mxu1 %v10760_v58  ;;  %v10957_v6 = vpop.f32.mrb[73].mxu0 }
 0x780   : > { %3357 = vmatprep.mubr.f32.mxu1 %v13639_v42 }
 0x782   : > { %v10960_v7 = vpop.f32.mrb[74].mxu0 }
 0x783   : > { %3358 = vmatmul.mubr.f32.gmra.mrb[92].mxu1 %v13640_v12  ;;  %v10963_v21 = vpop.f32.mrb[75].mxu0 }
 0x784   : > { %3362 = vmatprep.mubr.f32.mxu1 %v13641_v20  ;;  %v2888_v20 = vld [vmem:[#allocation3 + $0x368] sm:$0xff] }
 0x786   : > { %v10966_v61 = vpop.f32.mrb[76].mxu0 }
 0x787   : > { %3363 = vmatmul.mubr.f32.gmra.mrb[94].mxu1 %v13642_v31  ;;  %v10971_v30 = vpop.f32.mrb[77].mxu0  ;;  %v11027_v31 = vld [vmem:[#allocation2 + $0x51] sm:$0xff] }
 0x788   : > { %3367 = vmatprep.mubr.f32.mxu1 %v10969_v41 }
 0x78a   : > { %v10974_v58 = vpop.f32.mrb[78].mxu0 }
 0x78b   : > { %3368 = vmatmul.mubr.f32.gmra.mrb[96].mxu1 %v13643_v39  ;;  %v10979_v63 = vpop.f32.mrb[79].mxu0 }
 0x78c   : > { %3372 = vmatprep.mubr.f32.mxu1 %v10977_v5 }
 0x78e   : > { %v10982_v56 = vpop.f32.mrb[80].mxu0 }
 0x78f   : > { %3373 = vmatmul.mubr.f32.gmra.mrb[98].mxu1 %v13644_v13  ;;  %v10985_v55 = vpop.f32.mrb[81].mxu0  ;;  %v2890_v13 = vld [vmem:[#allocation3 + $0x378] sm:$0xff] }
 0x790   : > { %3442 = vmatprep.mubr.f32.mxu1 %v10870_v0 }
 0x792   : > { %v10988_v50 = vpop.f32.mrb[82].mxu0 }
 0x793   : > { %3443 = vmatmul.mubr.f32.vlgmr.msra.gmra.mrb[36].mxu1 %v2618_v16  ;;  %v10990_v27 = vpop.f32.mrb[83].mxu0  ;;  %v2892_v16 = vld [vmem:[#allocation3 + $0x388] sm:$0xff] }
 0x794   : > { %3447 = vmatprep.mubr.f32.mxu1 %v10875_v54  ;;  %7666 = vmatpush1.bf16.msra.mxu1 %v7665_v29  ;;  %v2882_v54 = vld [vmem:[#allocation3 + $0x338] sm:$0xff] }
 0x795   : > { %7667 = vmatprep.subr.bf16.mxu1 %v13605_v44  ;;  %v7674_v22 = vpack.c.bf16 %v2882_v54, %v2881_v23  ;;  %v11036_v29 = vld [vmem:[#allocation2 + $0x61] sm:$0xff]  ;;  %v2896_v23 = vld [vmem:[#allocation3 + $0x3a8] sm:$0xff] }
 0x796   : > { %v10994_v24 = vpop.f32.mrb[84].mxu0  ;;  %v11051_v54 = vld [vmem:[#allocation2 + $0x81] sm:$0xff] }
 0x797   : > { %3448 = vmatmul.mubr.f32.gmra.mrb[38].mxu1 %v2619_v26  ;;  %v10996_v0 = vpop.f32.mrb[85].mxu0  ;;  %v11046_v26 = vld [vmem:[#allocation2 + $0x79] sm:$0xff] }
 0x798   : > { %3452 = vmatprep.mubr.f32.mxu1 %v10631_v60  ;;  %7669 = vmatpush1.bf16.msra.mxu1 %v7668_v34  ;;  %v2883_v60 = vld [vmem:[#allocation3 + $0x340] sm:$0xff] }
 0x799   : > { %7670 = vmatprep.subr.bf16.mxu1 %v13605_v44  ;;  %v7677_v14 = vpack.c.bf16 %v2884_v18, %v2883_v60  ;;  %v11041_v34 = vld [vmem:[#allocation2 + $0x69] sm:$0xff]  ;;  %v2897_v60 = vld [vmem:[#allocation3 + $0x3b0] sm:$0xff] }
 0x79a   : > { %v11002_v8 = vpop.f32.mrb[86].mxu0  ;;  %v2898_v18 = vld [vmem:[#allocation3 + $0x3b8] sm:$0xff] }
 0x79b   : > { %3453 = vmatmul.mubr.f32.gmra.mrb[40].mxu1 %v11000_v46  ;;  %v11005_v15 = vpop.f32.mrb[87].mxu0 }
 0x79c   : > { %3457 = vmatprep.mubr.f32.mxu1 %v10635_v3  ;;  %7672 = vmatpush1.bf16.msra.mxu1 %v7671_v47  ;;  %v2885_v3 = vld [vmem:[#allocation3 + $0x350] sm:$0xff]  ;;  %v2895_v47 = vld [vmem:[#allocation3 + $0x3a0] sm:$0xff] }
 0x79d   : > { %7673 = vmatprep.subr.bf16.mxu1 %v13605_v44  ;;  %v7680_v12 = vpack.c.bf16 %v2886_v10, %v2885_v3  ;;  %v7698_v3 = vpack.c.bf16 %v2898_v18, %v2897_v60  ;;  %v2899_v10 = vld [vmem:[#allocation3 + $0x3c0] sm:$0xff] }
 0x79e   : > { %v11011_v37 = vpop.f32.mrb[88].mxu0  ;;  %v2665_v60 = vld [vmem:[#allocation2 + $0xca] sm:$0xff] }
 0x79f   : > { %3458 = vmatmul.mubr.f32.gmra.mrb[42].mxu1 %v11009_v36  ;;  %v11014_v45 = vpop.f32.mrb[89].mxu0 }
 0x7a0   : > { %3462 = vmatprep.mubr.f32.mxu1 %v10642_v43  ;;  %7675 = vmatpush1.bf16.msra.mxu1 %v7674_v22  ;;  %v2887_v43 = vld [vmem:[#allocation3 + $0x360] sm:$0xff]  ;;  %v7695_v22 = vpack.c.bf16 %v2896_v23, %v2895_v47  ;;  %v2905_v23 = vld [vmem:[#allocation3 + $0x3f0] sm:$0xff] }
 0x7a1   : > { %7676 = vmatprep.subr.bf16.mxu1 %v13605_v44  ;;  %v7683_v9 = vpack.c.bf16 %v2888_v20, %v2887_v43  ;;  %v11059_v43 = vld [vmem:[#allocation2 + $0x99] sm:$0xff]  ;;  %v2662_v20 = vld [vmem:[#allocation2 + $0xaa] sm:$0xff] }
 0x7a2   : > { %v11020_v49 = vpop.f32.mrb[90].mxu0 }
 0x7a3   : > { %13645 = vst [vmem:[#allocation18_spill] sm:$0xff] %v11020_v49  ;;  %3463 = vmatmul.mubr.f32.gmra.mrb[44].mxu1 %v11018_v40  ;;  %v11023_v42 = vpop.f32.mrb[91].mxu0  ;;  %v2778_v49 = vld [vmem:[#allocation2 + $0x1a2] sm:$0xff] }
 0x7a4   : > { %13646 = vst [vmem:[#allocation14_spill] sm:$0xff] %v11023_v42  ;;  %3467 = vmatprep.mubr.f32.mxu1 %v10649_v32  ;;  %7678 = vmatpush1.bf16.msra.mxu1 %v7677_v14  ;;  %v2889_v32 = vld [vmem:[#allocation3 + $0x370] sm:$0xff]  ;;  %v11055_v14 = vld [vmem:[#allocation2 + $0x91] sm:$0xff] }
 0x7a5   : > { %7679 = vmatprep.subr.bf16.mxu1 %v13605_v44  ;;  %v7686_v38 = vpack.c.bf16 %v2890_v13, %v2889_v32  ;;  %v2901_v32 = vld [vmem:[#allocation3 + $0x3d0] sm:$0xff]  ;;  %v2902_v13 = vld [vmem:[#allocation3 + $0x3d8] sm:$0xff] }
 0x7a6   : > { %v11029_v39 = vpop.f32.mrb[92].mxu0  ;;  %v11125_v42 = vld [vmem:[#allocation2] sm:$0xff] }
 0x7a7   : > { %13647 = vst [vmem:[#allocation19_spill] sm:$0xff] %v11029_v39  ;;  %3468 = vmatmul.mubr.f32.gmra.mrb[46].mxu1 %v11027_v31  ;;  %v11032_v48 = vpop.f32.mrb[93].mxu0  ;;  %v11120_v39 = vld [vmem:[#allocation2 + $0x181] sm:$0xff] }
 0x7a8   : > { %13648 = vst [vmem:[#allocation15_spill] sm:$0xff] %v11032_v48  ;;  %3472 = vmatprep.mubr.f32.mxu1 %v10654_v1  ;;  %7681 = vmatpush1.bf16.msra.mxu1 %v7680_v12  ;;  %v7689_v1 = vpack.c.bf16 %v2892_v16, %v2891_v11  ;;  %v2900_v12 = vld [vmem:[#allocation3 + $0x3c8] sm:$0xff]  ;;  %v7704_v16 = vpack.c.bf16 %v2902_v13, %v2901_v32 }
 0x7a9   : > { %7682 = vmatprep.subr.bf16.mxu1 %v13605_v44  ;;  %v2663_v11 = vld [vmem:[#allocation2 + $0xb2] sm:$0xff]  ;;  %v2669_v13 = vld [vmem:[#allocation2 + $0xfa] sm:$0xff] }
 0x7aa   : > { %v11084_v32 = vld [vmem:[#allocation2 + $0xf1] sm:$0xff]  ;;  %v2777_v48 = vld [vmem:[#allocation2 + $0x19a] sm:$0xff] }
 0x7ab   : > { %3473 = vmatmul.mubr.f32.gmra.mrb[48].mxu1 %v11036_v29  ;;  %7175 = vmatprep.mubr.f32.mxu0 %v2777_v48  ;;  %v2686_v48 = vld [vmem:[#allocation2 + $0x50] sm:$0xff] }
 0x7ac   : > { %3477 = vmatprep.mubr.f32.mxu1 %v10661_v2  ;;  %7684 = vmatpush1.bf16.msra.mxu1 %v7683_v9  ;;  %v7692_v2 = vpack.c.bf16 %v2894_v33, %v2893_v59  ;;  %v7701_v9 = vpack.c.bf16 %v2900_v12, %v2899_v10  ;;  %v2904_v59 = vld [vmem:[#allocation3 + $0x3e8] sm:$0xff]  ;;  %v2667_v12 = vld [vmem:[#allocation2 + $0xe2] sm:$0xff] }
 0x7ad   : > { %7685 = vmatprep.subr.bf16.mxu1 %v13605_v44  ;;  %v11067_v33 = vld [vmem:[#allocation2 + $0xb1] sm:$0xff]  ;;  %v11078_v10 = vld [vmem:[#allocation2 + $0xd9] sm:$0xff]  ;;  %7176 = vmatmul.mubr.f32.gmra.mrb[94].mxu0 %v2778_v49  ;;  %v2685_v49 = vld [vmem:[#allocation2 + $0x48] sm:$0xff] }
 0x7ae   : > { %7210 = vmatprep.mubr.msk.f32.mxu0 %vm8455_vm3, %v11125_v42 }
 0x7af   : > { %3478 = vmatmul.mubr.f32.gmra.mrb[50].mxu1 %v11041_v34 }
 0x7b0   : > { %3482 = vmatprep.mubr.f32.mxu1 %v10666_v57  ;;  %7687 = vmatpush1.bf16.msra.mxu1 %v7686_v38  ;;  %v2660_v57 = vld [vmem:[#allocation2 + $0x92] sm:$0xff]  ;;  %v11063_v38 = vld [vmem:[#allocation2 + $0xa9] sm:$0xff] }
 0x7b1   : > { %7688 = vmatprep.subr.bf16.mxu1 %v13605_v44 }
 0x7b3   : > { %3483 = vmatmul.mubr.f32.gmra.mrb[52].mxu1 %v11046_v26 }
 0x7b4   : > { %3487 = vmatprep.mubr.f32.mxu1 %v10672_v4  ;;  %7690 = vmatpush1.bf16.msra.mxu1 %v7689_v1  ;;  %v2661_v4 = vld [vmem:[#allocation2 + $0x9a] sm:$0xff]  ;;  %v2903_v1 = vld [vmem:[#allocation3 + $0x3e0] sm:$0xff] }
 0x7b5   : > { %7691 = vmatprep.subr.bf16.mxu1 %v13605_v44  ;;  %v7707_v47 = vpack.c.bf16 %v2904_v59, %v2903_v1  ;;  %v11090_v1 = vld [vmem:[#allocation2 + $0x109] sm:$0xff]  ;;  %v2671_v59 = vld [vmem:[#allocation2 + $0x112] sm:$0xff] }
 0x7b7   : > { %3488 = vmatmul.mubr.f32.gmra.mrb[54].mxu1 %v11051_v54 }
 0x7b8   : > { %3492 = vmatprep.mubr.f32.mxu1 %v2660_v57  ;;  %7693 = vmatpush1.bf16.msra.mxu1 %v7692_v2  ;;  %v2664_v2 = vld [vmem:[#allocation2 + $0xc2] sm:$0xff] }
 0x7b9   : > { %7694 = vmatprep.subr.bf16.mxu1 %v13605_v44  ;;  %v2906_v57 = vld [vmem:[#allocation3 + $0x3f8] sm:$0xff] }
 0x7ba   : > { %v7710_v18 = vpack.c.bf16 %v2906_v57, %v2905_v23  ;;  %v11096_v23 = vld [vmem:[#allocation2 + $0x121] sm:$0xff]  ;;  %v2673_v57 = vld [vmem:[#allocation2 + $0x12a] sm:$0xff] }
 0x7bb   : > { %3493 = vmatmul.mubr.f32.gmra.mrb[56].mxu1 %v11055_v14 }
 0x7bc   : > { %3497 = vmatprep.mubr.f32.mxu1 %v2661_v4  ;;  %7696 = vmatpush1.bf16.msra.mxu1 %v7695_v22  ;;  %v11071_v22 = vld [vmem:[#allocation2 + $0xc1] sm:$0xff]  ;;  %v11075_v4 = vld [vmem:[#allocation2 + $0xc9] sm:$0xff] }
 0x7bd   : > { %7697 = vmatprep.subr.bf16.mxu1 %v13605_v44 }
 0x7bf   : > { %3498 = vmatmul.mubr.f32.gmra.mrb[58].mxu1 %v11059_v43 }
 0x7c0   : > { %3502 = vmatprep.mubr.f32.mxu1 %v2662_v20  ;;  %7699 = vmatpush1.bf16.msra.mxu1 %v7698_v3  ;;  %v2666_v3 = vld [vmem:[#allocation2 + $0xda] sm:$0xff] }
 0x7c1   : > { %7700 = vmatprep.subr.bf16.mxu1 %v13605_v44  ;;  %v11081_v20 = vld [vmem:[#allocation2 + $0xe1] sm:$0xff] }
 0x7c3   : > { %3503 = vmatmul.mubr.f32.gmra.mrb[60].mxu1 %v11063_v38 }
 0x7c4   : > { %3507 = vmatprep.mubr.f32.mxu1 %v2663_v11  ;;  %7702 = vmatpush1.bf16.msra.mxu1 %v7701_v9  ;;  %v2668_v9 = vld [vmem:[#allocation2 + $0xf2] sm:$0xff] }
 0x7c5   : > { %7703 = vmatprep.subr.bf16.mxu1 %v13605_v44  ;;  %v11087_v11 = vld [vmem:[#allocation2 + $0xf9] sm:$0xff] }
 0x7c7   : > { %3508 = vmatmul.mubr.f32.gmra.mrb[62].mxu1 %v11067_v33 }
 0x7c8   : > { %3512 = vmatprep.mubr.f32.mxu1 %v2664_v2  ;;  %7705 = vmatpush1.bf16.msra.mxu1 %v7704_v16  ;;  %v2670_v16 = vld [vmem:[#allocation2 + $0x10a] sm:$0xff] }
 0x7c9   : > { %7706 = vmatprep.subr.bf16.mxu1 %v13605_v44  ;;  %v11093_v2 = vld [vmem:[#allocation2 + $0x111] sm:$0xff] }
 0x7cb   : > { %3513 = vmatmul.mubr.f32.gmra.mrb[64].mxu1 %v11071_v22 }
 0x7cc   : > { %3517 = vmatprep.mubr.f32.mxu1 %v2665_v60  ;;  %7708 = vmatpush1.bf16.msra.mxu1 %v7707_v47  ;;  %v2672_v47 = vld [vmem:[#allocation2 + $0x122] sm:$0xff] }
 0x7cd   : > { %7709 = vmatprep.subr.bf16.mxu1 %v13605_v44  ;;  %v11099_v60 = vld [vmem:[#allocation2 + $0x129] sm:$0xff]  ;;  %v11117_v44 = vld [vmem:[#allocation2 + $0x171] sm:$0xff] }
 0x7cf   : > { %3518 = vmatmul.mubr.f32.gmra.mrb[66].mxu1 %v11075_v4 }
 0x7d0   : > { %3522 = vmatprep.mubr.f32.mxu1 %v2666_v3  ;;  %7711 = vmatpush1.bf16.msra.mxu1 %v7710_v18  ;;  %v2674_v18 = vld [vmem:[#allocation2 + $0x13a] sm:$0xff] }
 0x7d1   : > { %v11102_v3 = vld [vmem:[#allocation2 + $0x139] sm:$0xff] }
 0x7d3   : > { %3523 = vmatmul.mubr.f32.gmra.mrb[68].mxu1 %v11078_v10 }
 0x7d4   : > { %3527 = vmatprep.mubr.f32.mxu1 %v2667_v12  ;;  %v2675_v12 = vld [vmem:[#allocation2 + $0x142] sm:$0xff] }
 0x7d7   : > { %3528 = vmatmul.mubr.f32.gmra.mrb[70].mxu1 %v11081_v20 }
 0x7d8   : > { %3532 = vmatprep.mubr.f32.mxu1 %v2668_v9  ;;  %v11105_v9 = vld [vmem:[#allocation2 + $0x141] sm:$0xff] }
 0x7db   : > { %3533 = vmatmul.mubr.f32.gmra.mrb[72].mxu1 %v11084_v32 }
 0x7dc   : > { %3537 = vmatprep.mubr.f32.mxu1 %v2669_v13  ;;  %v2676_v13 = vld [vmem:[#allocation2 + $0x152] sm:$0xff] }
 0x7df   : > { %3538 = vmatmul.mubr.f32.gmra.mrb[74].mxu1 %v11087_v11 }
 0x7e0   : > { %3542 = vmatprep.mubr.f32.mxu1 %v2670_v16  ;;  %v11108_v16 = vld [vmem:[#allocation2 + $0x151] sm:$0xff] }
 0x7e3   : > { %3543 = vmatmul.mubr.f32.gmra.mrb[76].mxu1 %v11090_v1 }
 0x7e4   : > { %3547 = vmatprep.mubr.f32.mxu1 %v2671_v59  ;;  %v2677_v59 = vld [vmem:[#allocation2 + $0x15a] sm:$0xff] }
 0x7e7   : > { %3548 = vmatmul.mubr.f32.gmra.mrb[78].mxu1 %v11093_v2 }
 0x7e8   : > { %3552 = vmatprep.mubr.f32.mxu1 %v2672_v47  ;;  %v11111_v47 = vld [vmem:[#allocation2 + $0x159] sm:$0xff] }
 0x7eb   : > { %3553 = vmatmul.mubr.f32.gmra.mrb[80].mxu1 %v11096_v23 }
 0x7ec   : > { %3557 = vmatprep.mubr.f32.mxu1 %v2673_v57  ;;  %v2678_v57 = vld [vmem:[#allocation2 + $0x16a] sm:$0xff] }
 0x7ef   : > { %3558 = vmatmul.mubr.f32.gmra.mrb[82].mxu1 %v11099_v60 }
 0x7f0   : > { %3562 = vmatprep.mubr.f32.mxu1 %v2674_v18  ;;  %v11114_v18 = vld [vmem:[#allocation2 + $0x169] sm:$0xff] }
 0x7f3   : > { %3563 = vmatmul.mubr.f32.gmra.mrb[84].mxu1 %v11102_v3 }
 0x7f4   : > { %3567 = vmatprep.mubr.f32.mxu1 %v2675_v12  ;;  %v2679_v12 = vld [vmem:[#allocation2 + $0x172] sm:$0xff] }
 0x7f7   : > { %3568 = vmatmul.mubr.f32.gmra.mrb[86].mxu1 %v11105_v9 }
 0x7f8   : > { %3572 = vmatprep.mubr.f32.mxu1 %v2676_v13  ;;  %v2680_v13 = vld [vmem:[#allocation2 + $0x182] sm:$0xff] }
 0x7fb   : > { %3573 = vmatmul.mubr.f32.gmra.mrb[88].mxu1 %v11108_v16 }
 0x7fc   : > { %3577 = vmatprep.mubr.f32.mxu1 %v2677_v59  ;;  %v2681_v59 = vld [vmem:[#allocation2 + $0x18a] sm:$0xff] }
 0x7ff   : > { %3578 = vmatmul.mubr.f32.gmra.mrb[90].mxu1 %v11111_v47 }
 0x800   : > { %3582 = vmatprep.mubr.f32.mxu1 %v2678_v57  ;;  %v11123_v57 = vld [vmem:[#allocation2 + $0x189] sm:$0xff] }
 0x803   : > { %3583 = vmatmul.mubr.f32.gmra.mrb[92].mxu1 %v11114_v18 }
 0x804   : > { %3587 = vmatprep.mubr.f32.mxu1 %v2679_v12  ;;  %v2683_v12 = vld [vmem:[#allocation2 + $0x30] sm:$0xff] }
 0x807   : > { %3588 = vmatmul.mubr.f32.gmra.mrb[94].mxu1 %v11117_v44 }
 0x808   : > { %3592 = vmatprep.mubr.f32.mxu1 %v2680_v13  ;;  %v2684_v13 = vld [vmem:[#allocation2 + $0x38] sm:$0xff] }
 0x80b   : > { %3593 = vmatmul.mubr.f32.gmra.mrb[96].mxu1 %v11120_v39 }
 0x80c   : > { %3597 = vmatprep.mubr.f32.mxu1 %v2681_v59  ;;  %v2687_v59 = vld [vmem:[#allocation2 + $0x60] sm:$0xff] }
 0x80f   : > { %3598 = vmatmul.mubr.f32.gmra.mrb[98].mxu1 %v11123_v57 }
 0x810   : > { %3667 = vmatprep.mubr.f32.mxu1 %v11000_v46  ;;  %v2688_v46 = vld [vmem:[#allocation2 + $0x68] sm:$0xff] }
 0x813   : > { %3668 = vmatmul.mubr.f32.vlgmr.msra.gmra.mrb[36].mxu1 %v2683_v12 }
 0x814   : > { %3672 = vmatprep.mubr.f32.mxu1 %v11009_v36  ;;  %v2689_v36 = vld [vmem:[#allocation2 + $0x78] sm:$0xff] }
 0x817   : > { %3673 = vmatmul.mubr.f32.gmra.mrb[38].mxu1 %v2684_v13 }
 0x818   : > { %3677 = vmatprep.mubr.f32.mxu1 %v11018_v40  ;;  %v2690_v40 = vld [vmem:[#allocation2 + $0x80] sm:$0xff] }
 0x81b   : > { %3678 = vmatmul.mubr.f32.gmra.mrb[40].mxu1 %v2685_v49 }
 0x81c   : > { %3682 = vmatprep.mubr.f32.mxu1 %v11027_v31  ;;  %v2691_v31 = vld [vmem:[#allocation2 + $0x90] sm:$0xff] }
 0x81f   : > { %3683 = vmatmul.mubr.f32.gmra.mrb[42].mxu1 %v2686_v48 }
 0x820   : > { %3687 = vmatprep.mubr.f32.mxu1 %v11036_v29  ;;  %v2692_v29 = vld [vmem:[#allocation2 + $0x98] sm:$0xff] }
 0x823   : > { %3688 = vmatmul.mubr.f32.gmra.mrb[44].mxu1 %v2687_v59 }
 0x824   : > { %3692 = vmatprep.mubr.f32.mxu1 %v11041_v34  ;;  %v2693_v34 = vld [vmem:[#allocation2 + $0xa8] sm:$0xff] }
 0x827   : > { %3693 = vmatmul.mubr.f32.gmra.mrb[46].mxu1 %v2688_v46 }
 0x828   : > { %3697 = vmatprep.mubr.f32.mxu1 %v11046_v26  ;;  %v2694_v26 = vld [vmem:[#allocation2 + $0xb0] sm:$0xff] }
 0x82b   : > { %3698 = vmatmul.mubr.f32.gmra.mrb[48].mxu1 %v2689_v36 }
 0x82c   : > { %3702 = vmatprep.mubr.f32.mxu1 %v11051_v54  ;;  %v2695_v54 = vld [vmem:[#allocation2 + $0xc0] sm:$0xff] }
 0x82f   : > { %3703 = vmatmul.mubr.f32.gmra.mrb[50].mxu1 %v2690_v40 }
 0x830   : > { %3707 = vmatprep.mubr.f32.mxu1 %v11055_v14  ;;  %v2696_v14 = vld [vmem:[#allocation2 + $0xc8] sm:$0xff] }
 0x833   : > { %3708 = vmatmul.mubr.f32.gmra.mrb[52].mxu1 %v2691_v31 }
 0x834   : > { %3712 = vmatprep.mubr.f32.mxu1 %v11059_v43  ;;  %v2697_v43 = vld [vmem:[#allocation2 + $0xd8] sm:$0xff] }
 0x837   : > { %3713 = vmatmul.mubr.f32.gmra.mrb[54].mxu1 %v2692_v29 }
 0x838   : > { %3717 = vmatprep.mubr.f32.mxu1 %v11063_v38  ;;  %v2698_v38 = vld [vmem:[#allocation2 + $0xe0] sm:$0xff] }
 0x83b   : > { %3718 = vmatmul.mubr.f32.gmra.mrb[56].mxu1 %v2693_v34 }
 0x83c   : > { %3722 = vmatprep.mubr.f32.mxu1 %v11067_v33  ;;  %v2699_v33 = vld [vmem:[#allocation2 + $0xf0] sm:$0xff] }
 0x83f   : > { %3723 = vmatmul.mubr.f32.gmra.mrb[58].mxu1 %v2694_v26 }
 0x840   : > { %3727 = vmatprep.mubr.f32.mxu1 %v11071_v22  ;;  %v2700_v22 = vld [vmem:[#allocation2 + $0xf8] sm:$0xff] }
 0x843   : > { %3728 = vmatmul.mubr.f32.gmra.mrb[60].mxu1 %v2695_v54 }
 0x844   : > { %3732 = vmatprep.mubr.f32.mxu1 %v11075_v4  ;;  %v2701_v4 = vld [vmem:[#allocation2 + $0x108] sm:$0xff] }
 0x847   : > { %3733 = vmatmul.mubr.f32.gmra.mrb[62].mxu1 %v2696_v14 }
 0x848   : > { %3737 = vmatprep.mubr.f32.mxu1 %v11078_v10  ;;  %v2702_v10 = vld [vmem:[#allocation2 + $0x110] sm:$0xff] }
 0x84b   : > { %3738 = vmatmul.mubr.f32.gmra.mrb[64].mxu1 %v2697_v43 }
 0x84c   : > { %3742 = vmatprep.mubr.f32.mxu1 %v11081_v20  ;;  %v2703_v20 = vld [vmem:[#allocation2 + $0x120] sm:$0xff] }
 0x84f   : > { %3743 = vmatmul.mubr.f32.gmra.mrb[66].mxu1 %v2698_v38 }
 0x850   : > { %3747 = vmatprep.mubr.f32.mxu1 %v11084_v32  ;;  %v2704_v32 = vld [vmem:[#allocation2 + $0x128] sm:$0xff] }
 0x853   : > { %3748 = vmatmul.mubr.f32.gmra.mrb[68].mxu1 %v2699_v33 }
 0x854   : > { %3752 = vmatprep.mubr.f32.mxu1 %v11087_v11  ;;  %v2705_v11 = vld [vmem:[#allocation2 + $0x138] sm:$0xff] }
 0x857   : > { %3753 = vmatmul.mubr.f32.gmra.mrb[70].mxu1 %v2700_v22 }
 0x858   : > { %3757 = vmatprep.mubr.f32.mxu1 %v11090_v1  ;;  %v2706_v1 = vld [vmem:[#allocation2 + $0x140] sm:$0xff] }
 0x85b   : > { %3758 = vmatmul.mubr.f32.gmra.mrb[72].mxu1 %v2701_v4 }
 0x85c   : > { %3762 = vmatprep.mubr.f32.mxu1 %v11093_v2  ;;  %v2707_v2 = vld [vmem:[#allocation2 + $0x150] sm:$0xff] }
 0x85f   : > { %3763 = vmatmul.mubr.f32.gmra.mrb[74].mxu1 %v2702_v10 }
 0x860   : > { %3767 = vmatprep.mubr.f32.mxu1 %v11096_v23  ;;  %v2708_v23 = vld [vmem:[#allocation2 + $0x158] sm:$0xff] }
 0x863   : > { %3768 = vmatmul.mubr.f32.gmra.mrb[76].mxu1 %v2703_v20 }
 0x864   : > { %3772 = vmatprep.mubr.f32.mxu1 %v11099_v60  ;;  %v2709_v60 = vld [vmem:[#allocation2 + $0x168] sm:$0xff] }
 0x867   : > { %3773 = vmatmul.mubr.f32.gmra.mrb[78].mxu1 %v2704_v32 }
 0x868   : > { %3777 = vmatprep.mubr.f32.mxu1 %v11102_v3  ;;  %v2710_v3 = vld [vmem:[#allocation2 + $0x170] sm:$0xff] }
 0x86b   : > { %3778 = vmatmul.mubr.f32.gmra.mrb[80].mxu1 %v2705_v11 }
 0x86c   : > { %3782 = vmatprep.mubr.f32.mxu1 %v11105_v9  ;;  %v2745_v9 = vld [vmem:[#allocation2 + $0x199] sm:$0xff] }
 0x86f   : > { %3783 = vmatmul.mubr.f32.gmra.mrb[82].mxu1 %v2706_v1 }
 0x870   : > { %3787 = vmatprep.mubr.f32.mxu1 %v11108_v16  ;;  %v2746_v16 = vld [vmem:[#allocation2 + $0x1a1] sm:$0xff] }
 0x873   : > { %3788 = vmatmul.mubr.f32.gmra.mrb[84].mxu1 %v2707_v2 }
 0x874   : > { %3792 = vmatprep.mubr.f32.mxu1 %v11111_v47 }
 0x877   : > { %3793 = vmatmul.mubr.f32.gmra.mrb[86].mxu1 %v2708_v23 }
 0x878   : > { %3797 = vmatprep.mubr.f32.mxu1 %v11114_v18 }
 0x87b   : > { %3798 = vmatmul.mubr.f32.gmra.mrb[88].mxu1 %v2709_v60 }
 0x87c   : > { %3802 = vmatprep.mubr.f32.mxu1 %v11117_v44 }
 0x87f   : > { %3803 = vmatmul.mubr.f32.gmra.mrb[90].mxu1 %v2710_v3 }
 0x880   : > { %3807 = vmatprep.mubr.f32.mxu1 %v11120_v39  ;;  %v11164_v47 = vpop.f32.mrb[94].mxu0 }
 0x881   : > { %v11166_v44 = vpop.f32.mrb[95].mxu0 }
 0x883   : > { %3808 = vmatmul.mubr.f32.gmra.mrb[92].mxu1 %v10969_v41  ;;  %v11171_v41 = vld [vmem:[%s13432_s4] ss:$0 sm:$0xff] }
 0x884   : > { %3812 = vmatprep.mubr.f32.mxu1 %v11123_v57 }
 0x887   : > { %3813 = vmatmul.mubr.f32.gmra.mrb[94].mxu1 %v10977_v5 }
 0x888   : > { %3817 = vmatprep.mubr.f32.mxu1 %v2745_v9 }
 0x88b   : > { %3818 = vmatmul.mubr.f32.gmra.mrb[96].mxu1 %v11125_v42 }
 0x88c   : > { %3822 = vmatprep.mubr.f32.mxu1 %v2746_v16 }
 0x88f   : > { %3823 = vmatmul.mubr.f32.gmra.mrb[98].mxu1 %v11125_v42 }
 0x8e6   : > { %v3669_v39 = vpop.f32.mrb[36].mxu1 }
 0x8e7   : > { %v7824_v18 = vadd.f32 %v11171_v41, %v3669_v39  ;;  %v3671_v5 = vpop.f32.mrb[37].mxu1 }
 0x8e9   : > { %v11175_v57 = vadd.f32 %v7824_v18, %v10933_v53 }
 0x8ea   : > { %v3674_v12 = vpop.f32.mrb[38].mxu1 }
 0x8eb   : > { %v7825_v13 = vadd.f32 %v11171_v41, %v3674_v12  ;;  %v3676_v49 = vpop.f32.mrb[39].mxu1 }
 0x8ed   : > { %v11179_v48 = vadd.f32 %v7825_v13, %v10930_v28 }
 0x8ee   : > { %v3679_v59 = vpop.f32.mrb[40].mxu1 }
 0x8ef   : > { %v7826_v46 = vadd.f32 %v11171_v41, %v3679_v59  ;;  %v3681_v36 = vpop.f32.mrb[41].mxu1 }
 0x8f1   : > { %v11183_v40 = vadd.f32 %v7826_v46, %v10939_v51 }
 0x8f2   : > { %v3684_v31 = vpop.f32.mrb[42].mxu1 }
 0x8f3   : > { %v7827_v29 = vadd.f32 %v11171_v41, %v3684_v31  ;;  %v3686_v34 = vpop.f32.mrb[43].mxu1 }
 0x8f5   : > { %v11187_v53 = vadd.f32 %v7827_v29, %v10936_v17 }
 0x8f6   : > { %v3689_v26 = vpop.f32.mrb[44].mxu1 }
 0x8f7   : > { %v7828_v54 = vadd.f32 %v11171_v41, %v3689_v26  ;;  %v3691_v14 = vpop.f32.mrb[45].mxu1 }
 0x8f9   : > { %v11191_v28 = vadd.f32 %v7828_v54, %v10945_v52 }
 0x8fa   : > { %v3694_v43 = vpop.f32.mrb[46].mxu1 }
 0x8fb   : > { %v7829_v38 = vadd.f32 %v11171_v41, %v3694_v43  ;;  %v3696_v33 = vpop.f32.mrb[47].mxu1 }
 0x8fd   : > { %v11195_v51 = vadd.f32 %v7829_v38, %v10942_v19 }
 0x8fe   : > { %v3699_v22 = vpop.f32.mrb[48].mxu1 }
 0x8ff   : > { %v7830_v4 = vadd.f32 %v11171_v41, %v3699_v22  ;;  %v3701_v10 = vpop.f32.mrb[49].mxu1 }
 0x901   : > { %v11199_v17 = vadd.f32 %v7830_v4, %v10951_v25 }
 0x902   : > { %v3704_v20 = vpop.f32.mrb[50].mxu1 }
 0x903   : > { %v7831_v32 = vadd.f32 %v11171_v41, %v3704_v20  ;;  %v3706_v11 = vpop.f32.mrb[51].mxu1 }
 0x905   : > { %v11203_v52 = vadd.f32 %v7831_v32, %v10948_v35  ;;  %v4055_v32 = vmul.f32 %v11183_v40, %v11183_v40 }
 0x906   : > { %v3709_v1 = vpop.f32.mrb[52].mxu1 }
 0x907   : > { %v7832_v2 = vadd.f32 %v11171_v41, %v3709_v1  ;;  %v3711_v23 = vpop.f32.mrb[53].mxu1 }
 0x909   : > { %v11207_v19 = vadd.f32 %v7832_v2, %v10957_v6  ;;  %v4056_v2 = vmul.f32 %v11187_v53, %v11187_v53 }
 0x90a   : > { %v3714_v60 = vpop.f32.mrb[54].mxu1 }
 0x90b   : > { %v7833_v3 = vadd.f32 %v11171_v41, %v3714_v60  ;;  %v3716_v9 = vpop.f32.mrb[55].mxu1 }
 0x90d   : > { %v11211_v25 = vadd.f32 %v7833_v3, %v10954_v62  ;;  %v4057_v3 = vmul.f32 %v11191_v28, %v11191_v28 }
 0x90e   : > { %v3719_v16 = vpop.f32.mrb[56].mxu1 }
 0x90f   : > { %v7834_v39 = vadd.f32 %v11171_v41, %v3719_v16  ;;  %v3721_v18 = vpop.f32.mrb[57].mxu1 }
 0x910   : > { %v4058_v18 = vmul.f32 %v11195_v51, %v11195_v51 }
 0x911   : > { %v11215_v35 = vadd.f32 %v7834_v39, %v10963_v21 }
 0x912   : > { %v3724_v5 = vpop.f32.mrb[58].mxu1 }
 0x913   : > { %v7835_v12 = vadd.f32 %v11171_v41, %v3724_v5  ;;  %v3726_v13 = vpop.f32.mrb[59].mxu1 }
 0x915   : > { %v11219_v6 = vadd.f32 %v7835_v12, %v10960_v7 }
 0x916   : > { %v3729_v49 = vpop.f32.mrb[60].mxu1 }
 0x917   : > { %v7836_v59 = vadd.f32 %v11171_v41, %v3729_v49  ;;  %v3731_v46 = vpop.f32.mrb[61].mxu1 }
 0x919   : > { %v11223_v62 = vadd.f32 %v7836_v59, %v10971_v30 }
 0x91a   : > { %v3734_v36 = vpop.f32.mrb[62].mxu1 }
 0x91b   : > { %v7837_v31 = vadd.f32 %v11171_v41, %v3734_v36  ;;  %v3736_v29 = vpop.f32.mrb[63].mxu1  ;;  %v4060_v36 = vmul.f32 %v11203_v52, %v11203_v52 }
 0x91d   : > { %v11227_v21 = vadd.f32 %v7837_v31, %v10966_v61  ;;  %v4054_v61 = vmul.f32 %v11179_v48, %v11179_v48 }
 0x91e   : > { %v3739_v34 = vpop.f32.mrb[64].mxu1 }
 0x91f   : > { %v7838_v26 = vadd.f32 %v11171_v41, %v3739_v34  ;;  %v3741_v54 = vpop.f32.mrb[65].mxu1 }
 0x921   : > { %v11231_v7 = vadd.f32 %v7838_v26, %v10979_v63  ;;  %v4053_v63 = vmul.f32 %v11175_v57, %v11175_v57 }
 0x922   : > { %v3744_v14 = vpop.f32.mrb[66].mxu1 }
 0x923   : > { %v7839_v43 = vadd.f32 %v11171_v41, %v3744_v14  ;;  %v3746_v38 = vpop.f32.mrb[67].mxu1  ;;  %v4085_v1 = vadd.f32 %v4054_v61, %v4053_v63  ;;  %v4064_v63 = vmul.f32 %v11219_v6, %v11219_v6 }
 0x925   : > { %v11235_v30 = vadd.f32 %v7839_v43, %v10974_v58  ;;  %v4062_v43 = vmul.f32 %v11211_v25, %v11211_v25 }
 0x926   : > { %v3749_v33 = vpop.f32.mrb[68].mxu1 }
 0x927   : > { %v7840_v22 = vadd.f32 %v11171_v41, %v3749_v33  ;;  %v3751_v4 = vpop.f32.mrb[69].mxu1 }
 0x929   : > { %v11241_v10 = vadd.f32 %v7840_v22, %v10985_v55  ;;  %v4086_v55 = vadd.f32 %v4085_v1, %v4055_v32 }
 0x92a   : > { %v3754_v20 = vpop.f32.mrb[70].mxu1 }
 0x92b   : > { %v7841_v58 = vadd.f32 %v11171_v41, %v3754_v20  ;;  %v3756_v11 = vpop.f32.mrb[71].mxu1  ;;  %v4087_v39 = vadd.f32 %v4086_v55, %v4056_v2  ;;  %v4066_v55 = vmul.f32 %v11227_v21, %v11227_v21 }
 0x92d   : > { %v11251_v23 = vadd.f32 %v7841_v58, %v10982_v56  ;;  %v4088_v13 = vadd.f32 %v4087_v39, %v4057_v3  ;;  %v4059_v56 = vmul.f32 %v11199_v17, %v11199_v17 }
 0x92e   : > { %v3759_v60 = vpop.f32.mrb[72].mxu1 }
 0x92f   : > { %v7842_v9 = vadd.f32 %v11171_v41, %v3759_v60  ;;  %v3761_v16 = vpop.f32.mrb[73].mxu1  ;;  %v4089_v46 = vadd.f32 %v4088_v13, %v4058_v18  ;;  %v4068_v13 = vmul.f32 %v11235_v30, %v11235_v30 }
 0x931   : > { %v11259_v5 = vadd.f32 %v7842_v9, %v10990_v27  ;;  %v4090_v34 = vadd.f32 %v4089_v46, %v4059_v56  ;;  %v4061_v27 = vmul.f32 %v11207_v19, %v11207_v19 }
 0x932   : > { %v3764_v12 = vpop.f32.mrb[74].mxu1 }
 0x933   : > { %v7843_v49 = vadd.f32 %v11171_v41, %v3764_v12  ;;  %v3766_v59 = vpop.f32.mrb[75].mxu1  ;;  %v4091_v14 = vadd.f32 %v4090_v34, %v4060_v36  ;;  %v4070_v34 = vmul.f32 %v11251_v23, %v11251_v23 }
 0x935   : > { %v11267_v31 = vadd.f32 %v7843_v49, %v10988_v50  ;;  %v4092_v22 = vadd.f32 %v4091_v14, %v4061_v27  ;;  %v4063_v50 = vmul.f32 %v11215_v35, %v11215_v35 }
 0x936   : > { %v3769_v29 = vpop.f32.mrb[76].mxu1 }
 0x937   : > { %v7844_v26 = vadd.f32 %v11171_v41, %v3769_v29  ;;  %v3771_v54 = vpop.f32.mrb[77].mxu1  ;;  %v4093_v20 = vadd.f32 %v4092_v22, %v4062_v43  ;;  %v4072_v22 = vmul.f32 %v11267_v31, %v11267_v31 }
 0x939   : > { %v11275_v38 = vadd.f32 %v7844_v26, %v10996_v0  ;;  %v4094_v11 = vadd.f32 %v4093_v20, %v4063_v50  ;;  %v4065_v0 = vmul.f32 %v11223_v62, %v11223_v62 }
 0x93a   : > { %v3774_v33 = vpop.f32.mrb[78].mxu1 }
 0x93b   : > { %v7845_v4 = vadd.f32 %v11171_v41, %v3774_v33  ;;  %v3776_v61 = vpop.f32.mrb[79].mxu1  ;;  %v4095_v60 = vadd.f32 %v4094_v11, %v4064_v63 }
 0x93d   : > { %v11283_v32 = vadd.f32 %v7845_v4, %v10994_v24  ;;  %v4096_v16 = vadd.f32 %v4095_v60, %v4065_v0  ;;  %v4067_v24 = vmul.f32 %v11231_v7, %v11231_v7  ;;  %v13649_v0 = vld [vmem:[#allocation14_spill] sm:$0xff] }
 0x93e   : > { %v3779_v58 = vpop.f32.mrb[80].mxu1 }
 0x93f   : > { %v7846_v1 = vadd.f32 %v11171_v41, %v3779_v58  ;;  %v3781_v2 = vpop.f32.mrb[81].mxu1  ;;  %v4097_v12 = vadd.f32 %v4096_v16, %v4066_v55  ;;  %v4074_v11 = vmul.f32 %v11283_v32, %v11283_v32 }
 0x941   : > { %v11291_v3 = vadd.f32 %v7846_v1, %v11005_v15  ;;  %v4098_v59 = vadd.f32 %v4097_v12, %v4067_v24  ;;  %v4069_v15 = vmul.f32 %v11241_v10, %v11241_v10 }
 0x942   : > { %v3784_v9 = vpop.f32.mrb[82].mxu1 }
 0x943   : > { %v7847_v39 = vadd.f32 %v11171_v41, %v3784_v9  ;;  %v3786_v18 = vpop.f32.mrb[83].mxu1  ;;  %v4099_v29 = vadd.f32 %v4098_v59, %v4068_v13 }
 0x945   : > { %v11299_v56 = vadd.f32 %v7847_v39, %v11002_v8  ;;  %v4100_v54 = vadd.f32 %v4099_v29, %v4069_v15  ;;  %v4071_v8 = vmul.f32 %v11259_v5, %v11259_v5  ;;  %v13650_v39 = vld [vmem:[#allocation18_spill] sm:$0xff]  ;;  %v13651_v29 = vld [vmem:[#allocation15_spill] sm:$0xff] }
 0x946   : > { %v3789_v49 = vpop.f32.mrb[84].mxu1 }
 0x947   : > { %v7848_v46 = vadd.f32 %v11171_v41, %v3789_v49  ;;  %v3791_v36 = vpop.f32.mrb[85].mxu1  ;;  %v4101_v33 = vadd.f32 %v4100_v54, %v4070_v34  ;;  %v4076_v24 = vmul.f32 %v11299_v56, %v11299_v56 }
 0x949   : > { %v11307_v27 = vadd.f32 %v7848_v46, %v11014_v45  ;;  %v4102_v61 = vadd.f32 %v4101_v33, %v4071_v8  ;;  %v4073_v45 = vmul.f32 %v11275_v38, %v11275_v38 }
 0x94a   : > { %v3794_v26 = vpop.f32.mrb[86].mxu1 }
 0x94b   : > { %v7849_v14 = vadd.f32 %v11171_v41, %v3794_v26  ;;  %v3796_v43 = vpop.f32.mrb[87].mxu1  ;;  %v4103_v58 = vadd.f32 %v4102_v61, %v4072_v22  ;;  %v4077_v49 = vmul.f32 %v11307_v27, %v11307_v27 }
 0x94d   : > { %v11315_v50 = vadd.f32 %v7849_v14, %v11011_v37  ;;  %v4104_v60 = vadd.f32 %v4103_v58, %v4073_v45  ;;  %v4075_v37 = vmul.f32 %v11291_v3, %v11291_v3 }
 0x94e   : > { %v3799_v4 = vpop.f32.mrb[88].mxu1 }
 0x94f   : > { %v7850_v20 = vadd.f32 %v11171_v41, %v3799_v4  ;;  %v3801_v63 = vpop.f32.mrb[89].mxu1  ;;  %v4105_v16 = vadd.f32 %v4104_v60, %v4074_v11  ;;  %v4078_v36 = vmul.f32 %v11315_v50, %v11315_v50  ;;  %v13652_v4 = vld [vmem:[#allocation19_spill] sm:$0xff] }
 0x951   : > { %v11323_v1 = vadd.f32 %v7850_v20, %v13649_v0  ;;  %v4106_v13 = vadd.f32 %v4105_v16, %v4075_v37 }
 0x952   : > { %v3804_v2 = vpop.f32.mrb[90].mxu1 }
 0x953   : > { %v7851_v55 = vadd.f32 %v11171_v41, %v3804_v2  ;;  %v3806_v9 = vpop.f32.mrb[91].mxu1  ;;  %v4107_v46 = vadd.f32 %v4106_v13, %v4076_v24  ;;  %v4079_v8 = vmul.f32 %v11323_v1, %v11323_v1 }
 0x955   : > { %v11331_v18 = vadd.f32 %v7851_v55, %v13650_v39  ;;  %v4108_v54 = vadd.f32 %v4107_v46, %v4077_v49 }
 0x956   : > { %v3809_v12 = vpop.f32.mrb[92].mxu1 }
 0x957   : > { %v7852_v59 = vadd.f32 %v11171_v41, %v3809_v12  ;;  %v3811_v15 = vpop.f32.mrb[93].mxu1  ;;  %v4109_v33 = vadd.f32 %v4108_v54, %v4078_v36  ;;  %v4080_v22 = vmul.f32 %v11331_v18, %v11331_v18 }
 0x959   : > { %v11339_v34 = vadd.f32 %v7852_v59, %v13651_v29  ;;  %v4110_v20 = vadd.f32 %v4109_v33, %v4079_v8 }
 0x95a   : > { %v3814_v26 = vpop.f32.mrb[94].mxu1 }
 0x95b   : > { %v7853_v14 = vadd.f32 %v11171_v41, %v3814_v26  ;;  %v3816_v43 = vpop.f32.mrb[95].mxu1  ;;  %v4081_v63 = vmul.f32 %v11339_v34, %v11339_v34  ;;  %v4111_v0 = vadd.f32 %v4110_v20, %v4080_v22  ;;  %v4219_v20 = vld [vmem:[%s13433_s5] sm:$0xff] }
 0x95d   : > { %v11347_v61 = vadd.f32 %v7853_v14, %v13652_v4  ;;  %v4112_v55 = vadd.f32 %v4111_v0, %v4081_v63  ;;  %v4220_v63 = vld [vmem:[%s13433_s5 + $0x8] sm:$0xff]  ;;  %v4222_v0 = vld [vmem:[%s13433_s5 + $0x18] sm:$0xff] }
 0x95e   : > { %v3819_v45 = vpop.f32.mrb[96].mxu1 }
 0x95f   : > { %v7854_v58 = vadd.f32 %v11171_v41, %v3819_v45  ;;  %v3821_v11 = vpop.f32.mrb[97].mxu1  ;;  %v4082_v2 = vmul.f32 %v11347_v61, %v11347_v61 }
 0x960   : > { %v11378_v11 = vpack.c.bf16 %v4220_v63, %v4219_v20  ;;  %v4142_v63 = vld [vmem:[%s13432_s4 + $0x3] sm:$0x1] }
 0x961   : > { %v11355_v60 = vadd.f32 %v7854_v58, %v11166_v44  ;;  %v4113_v39 = vadd.f32 %v4112_v55, %v4082_v2  ;;  %v4221_v58 = vld [vmem:[%s13433_s5 + $0x10] sm:$0xff]  ;;  %v4223_v55 = vld [vmem:[%s13433_s5 + $0x20] sm:$0xff] }
 0x962   : > { %v3824_v37 = vpop.f32.mrb[98].mxu1  ;;  %7746 = vmatpush3.bf16.msra.mxu0 %v11378_v11  ;;  %v11384_v2 = vpack.c.bf16 %v4222_v0, %v4221_v58 }
 0x963   : > { %v4083_v9 = vmul.f32 %v11355_v60, %v11355_v60  ;;  %v7855_v16 = vadd.f32 %v11171_v41, %v3824_v37  ;;  %v3826_v24 = vpop.f32.mrb[99].mxu1  ;;  %v13653_v37 = vmov 0.0|0.0  }
 0x964   : > { %7747 = vmatprep.subr.bf16.mxu0 %v13653_v37  ;;  %v4225_v24 = vld [vmem:[%s13433_s5 + $0x30] sm:$0xff] }
 0x965   : > { %v11361_v12 = vadd.f32 %v7855_v16, %v11164_v47  ;;  %v4114_v13 = vadd.f32 %v4113_v39, %v4083_v9  ;;  %v4130_v47 = vld [vmem:[%s13432_s4 + $0x1] sm:$0x1]  ;;  %v4224_v9 = vld [vmem:[%s13433_s5 + $0x28] sm:$0xff]  ;;  %v4226_v39 = vld [vmem:[%s13433_s5 + $0x38] sm:$0xff] }
 0x966   : > { %7749 = vmatpush3.bf16.msra.mxu0 %v11384_v2  ;;  %v11394_v16 = vpack.c.bf16 %v4224_v9, %v4223_v55 }
 0x967   : > { %v4084_v49 = vmul.f32 %v11361_v12, %v11361_v12  ;;  %7750 = vmatprep.subr.bf16.mxu0 %v13653_v37 }
 0x969   : > { %v4115_v59 = vadd.f32 %v4114_v13, %v4084_v49  ;;  %v11404_v13 = vpack.c.bf16 %v4226_v39, %v4225_v24  ;;  %v4227_v49 = vld [vmem:[%s13433_s5 + $0x40] sm:$0xff]  ;;  %v13654_v24 = vld [vmem:[#allocation13_spill] sm:$0xff] }
 0x96a   : > { %7752 = vmatpush3.bf16.msra.mxu0 %v11394_v16 }
 0x96b   : > { %v4116_v15 = vrot.slane %v4115_v59, 4  ;;  %7753 = vmatprep.subr.bf16.mxu0 %v13653_v37 }
 0x96d   : > { %v4117_v44 = vadd.f32 %v4116_v15, %v4115_v59  ;;  %v4228_v59 = vld [vmem:[%s13433_s5 + $0x48] sm:$0xff] }
 0x96e   : > { %7755 = vmatpush3.bf16.msra.mxu0 %v11404_v13 }
 0x96f   : > { %v4118_v46 = vrot.slane %v4117_v44, 2  ;;  %7756 = vmatprep.subr.bf16.mxu0 %v13653_v37 }
 0x971   : > { %v4119_v36 = vadd.f32 %v4118_v46, %v4117_v44  ;;  %v11414_v46 = vpack.c.bf16 %v4228_v59, %v4227_v49 }
 0x973   : > { %v4120_v29 = vrot.slane %v4119_v36, 1  ;;  %7758 = vmatpush3.bf16.msra.mxu0 %v11414_v46 }
 0x974   : > { %7759 = vmatprep.subr.bf16.mxu0 %v13653_v37 }
 0x975   : > { %v4121_v26 = vadd.f32 %v4120_v29, %v4119_v36  ;;  %v4229_v29 = vld [vmem:[%s13433_s5 + $0x50] sm:$0xff] }
 0x977   : > { %v4122_v54 = vadd.f32 1e-05, %v4121_v26  ;;  %v4230_v26 = vld [vmem:[%s13433_s5 + $0x58] sm:$0xff] }
 0x979   : > { %8312 = vrsqrt.f32 %v4122_v54  ;;  %vm4125_vm4 = vcmp.eq.f32.partialorder %v4122_v54, inf  ;;  %v4128_v14 = vand.u32 2147483648, %v4122_v54  ;;  %vm4127_vm5 = vcmp.eq.f32.partialorder %v4122_v54, 0.0 }
 0x983   : > { %v8313_v8 = vpop.eup %8312 }
 0x984   : > { %v4124_v41 = vmul.f32 %v8313_v8, %v4122_v54  ;;  %v4231_v8 = vld [vmem:[%s13433_s5 + $0x60] sm:$0xff] }
 0x986   : > { %v4126_v43 = vsel %vm4125_vm4, %v4122_v54, %v4124_v41  ;;  %v11424_v54 = vpack.c.bf16 %v4230_v26, %v4229_v29  ;;  %v4232_v41 = vld [vmem:[%s13433_s5 + $0x68] sm:$0xff] }
 0x987   : > { %v4129_v33 = vsel %vm4127_vm5, %v4128_v14, %v4126_v43  ;;  %v11434_v14 = vpack.c.bf16 %v4232_v41, %v4231_v8  ;;  %v4234_v43 = vld [vmem:[%s13433_s5 + $0x78] sm:$0xff] }
 0x988   : > { %v4131_v22 = vmul.f32 %v4130_v47, %v4129_v33  ;;  %7761 = vmatpush3.bf16.msra.mxu0 %v11424_v54  ;;  %v4233_v47 = vld [vmem:[%s13433_s5 + $0x70] sm:$0xff]  ;;  %v4137_v33 = vld [vmem:[%s13432_s4 + $0x2] sm:$0x1] }
 0x989   : > { %7762 = vmatprep.subr.bf16.mxu0 %v13653_v37 }
 0x98a   : > { %v4132_v4 = vmul.f32 %v4131_v22, %v4131_v22 }
 0x98c   : > { %v4133_v45 = vsel %vm1947_vm2, %v4132_v4, 0.0  ;;  %7764 = vmatpush3.bf16.msra.mxu0 %v11434_v14  ;;  %v11447_v4 = vpack.c.bf16 %v4234_v43, %v4233_v47 }
 0x98d   : > { %4134 = vadd.xlane.f32.xlu0 %v4133_v45  ;;  %7765 = vmatprep.subr.bf16.mxu0 %v13653_v37 }
 0x990   : > { %7767 = vmatpush3.bf16.msra.mxu0 %v11447_v4 }
 0x991   : > { %7768 = vmatprep.subr.bf16.mxu0 %v13653_v37 }
 0xa1a   : > { %v4135_v15 = vpop.xlane.xlu0 %4134 }
 0xa1b   : > { %v4136_v44 = vmul.f32 0.125, %v4135_v15 }
 0xa1d   : > { %v4138_v36 = vadd.f32 1e-05, %v4136_v44 }
 0xa1f   : > { %8314 = vrsqrt.f32 %v4138_v36 }
 0xa29   : > { %v8315_v45 = vpop.eup %8314 }
 0xa2a   : > { %v4140_v20 = vmul.f32 %v8315_v45, %v4137_v33 }
 0xa2c   : > { %v4141_v58 = vmul.f32 %v4140_v20, %v4131_v22 }
 0xa2e   : > { %v4143_v0 = vadd.f32 %v4142_v63, %v4141_v58 }
 0xa30   : > { %8316 = vtanh.f32 %v4143_v0 }
 0xa3a   : > { %v8317_v55 = vpop.eup %8316 }
 0xa3b   : > { %v4145_v9 = vadd.f32 1.0, %v8317_v55 }
 0xa3d   : > { %v4149_v39 = vrot.slane %v4145_v9, %v13654_v24 }
 0xa3f   : > { %v11457_v49 = vmul.f32 %v4149_v39, %v11175_v57  ;;  %v11460_v59 = vmul.f32 %v4149_v39, %v11179_v48  ;;  %v11463_v15 = vmul.f32 %v4149_v39, %v11183_v40  ;;  %v11468_v44 = vmul.f32 %v4149_v39, %v11187_v53 }
 0xa40   : > { %v11472_v29 = vmul.f32 %v4149_v39, %v11191_v28  ;;  %v11476_v26 = vmul.f32 %v4149_v39, %v11195_v51  ;;  %v11480_v40 = vmul.f32 %v4149_v39, %v11199_v17  ;;  %v11484_v53 = vmul.f32 %v4149_v39, %v11203_v52 }
 0xa41   : > { %v4182_v22 = vadd.f32 %v11460_v59, %v11457_v49  ;;  %v11488_v28 = vmul.f32 %v4149_v39, %v11207_v19  ;;  %v11492_v51 = vmul.f32 %v4149_v39, %v11211_v25  ;;  %v11496_v17 = vmul.f32 %v4149_v39, %v11215_v35 }
 0xa42   : > { %v11500_v52 = vmul.f32 %v4149_v39, %v11219_v6  ;;  %v11504_v19 = vmul.f32 %v4149_v39, %v11223_v62  ;;  %v11508_v25 = vmul.f32 %v4149_v39, %v11227_v21  ;;  %v11512_v35 = vmul.f32 %v4149_v39, %v11231_v7 }
 0xa43   : > { %v4183_v36 = vadd.f32 %v4182_v22, %v11463_v15  ;;  %v11516_v6 = vmul.f32 %v4149_v39, %v11235_v30  ;;  %v11520_v62 = vmul.f32 %v4149_v39, %v11241_v10  ;;  %v11524_v21 = vmul.f32 %v4149_v39, %v11251_v23 }
 0xa44   : > { %v11528_v7 = vmul.f32 %v4149_v39, %v11259_v5  ;;  %v11532_v30 = vmul.f32 %v4149_v39, %v11267_v31  ;;  %v11536_v10 = vmul.f32 %v4149_v39, %v11275_v38  ;;  %v11540_v23 = vmul.f32 %v4149_v39, %v11283_v32 }
 0xa45   : > { %v4184_v57 = vadd.f32 %v4183_v36, %v11468_v44  ;;  %v11544_v5 = vmul.f32 %v4149_v39, %v11291_v3  ;;  %v11548_v31 = vmul.f32 %v4149_v39, %v11299_v56  ;;  %v11552_v38 = vmul.f32 %v4149_v39, %v11307_v27 }
 0xa46   : > { %v11556_v32 = vmul.f32 %v4149_v39, %v11315_v50  ;;  %v11560_v3 = vmul.f32 %v4149_v39, %v11323_v1  ;;  %v11564_v56 = vmul.f32 %v4149_v39, %v11331_v18  ;;  %v11568_v27 = vmul.f32 %v4149_v39, %v11339_v34 }
 0xa47   : > { %v4185_v48 = vadd.f32 %v4184_v57, %v11472_v29  ;;  %v11572_v50 = vmul.f32 %v4149_v39, %v11347_v61  ;;  %v11576_v1 = vmul.f32 %v4149_v39, %v11355_v60  ;;  %v11580_v18 = vmul.f32 %v4149_v39, %v11361_v12 }
 0xa49   : > { %v4186_v8 = vadd.f32 %v4185_v48, %v11476_v26 }
 0xa4b   : > { %v4187_v41 = vadd.f32 %v4186_v8, %v11480_v40 }
 0xa4d   : > { %v4188_v47 = vadd.f32 %v4187_v41, %v11484_v53 }
 0xa4f   : > { %v4189_v43 = vadd.f32 %v4188_v47, %v11488_v28 }
 0xa51   : > { %v4190_v33 = vadd.f32 %v4189_v43, %v11492_v51 }
 0xa53   : > { %v4191_v45 = vadd.f32 %v4190_v33, %v11496_v17 }
 0xa55   : > { %v4192_v20 = vadd.f32 %v4191_v45, %v11500_v52 }
 0xa57   : > { %v4193_v63 = vadd.f32 %v4192_v20, %v11504_v19 }
 0xa59   : > { %v4194_v58 = vadd.f32 %v4193_v63, %v11508_v25 }
 0xa5b   : > { %v4195_v0 = vadd.f32 %v4194_v58, %v11512_v35 }
 0xa5d   : > { %v4196_v55 = vadd.f32 %v4195_v0, %v11516_v6 }
 0xa5f   : > { %v4197_v9 = vadd.f32 %v4196_v55, %v11520_v62 }
 0xa61   : > { %v4198_v22 = vadd.f32 %v4197_v9, %v11524_v21 }
 0xa63   : > { %v4199_v36 = vadd.f32 %v4198_v22, %v11528_v7 }
 0xa65   : > { %v4200_v57 = vadd.f32 %v4199_v36, %v11532_v30 }
 0xa67   : > { %v4201_v48 = vadd.f32 %v4200_v57, %v11536_v10 }
 0xa69   : > { %v4202_v8 = vadd.f32 %v4201_v48, %v11540_v23 }
 0xa6b   : > { %v4203_v41 = vadd.f32 %v4202_v8, %v11544_v5 }
 0xa6d   : > { %v4204_v47 = vadd.f32 %v4203_v41, %v11548_v31 }
 0xa6f   : > { %v4205_v43 = vadd.f32 %v4204_v47, %v11552_v38 }
 0xa71   : > { %v4206_v33 = vadd.f32 %v4205_v43, %v11556_v32 }
 0xa73   : > { %v4207_v45 = vadd.f32 %v4206_v33, %v11560_v3 }
 0xa75   : > { %v4208_v20 = vadd.f32 %v4207_v45, %v11564_v56 }
 0xa77   : > { %v4209_v63 = vadd.f32 %v4208_v20, %v11568_v27 }
 0xa79   : > { %v4210_v58 = vadd.f32 %v4209_v63, %v11572_v50 }
 0xa7b   : > { %v4211_v0 = vadd.f32 %v4210_v58, %v11576_v1 }
 0xa7d   : > { %v4212_v34 = vadd.f32 %v4211_v0, %v11580_v18 }
 0xa7f   : > { %v4213_v55 = vrot.slane %v4212_v34, 4 }
 0xa81   : > { %v4214_v9 = vadd.f32 %v4213_v55, %v4212_v34 }
 0xa83   : > { %v4215_v22 = vrot.slane %v4214_v9, 2 }
 0xa85   : > { %v4216_v36 = vadd.f32 %v4215_v22, %v4214_v9 }
 0xa87   : > { %v4217_v61 = vrot.slane %v4216_v36, 1 }
 0xa89   : > { %v4218_v57 = vadd.f32 %v4217_v61, %v4216_v36 }
 0xa8b   : > { %7211 = vmatmul.mubr.f32.vlgmr.msra.gmra.mrb[96].mxu0 %v4218_v57 }
 0xa8c   : > { %7770 = vmatpush3.bf16.msra.mxu0 %v11378_v11  ;;  %7245 = vmatprep.mubr.msk.f32.mxu0 %vm8455_vm3, %v11125_v42 }
 0xa8d   : > { %7771 = vmatprep.subr.bf16.mxu0 %v13653_v37 }
 0xa90   : > { %7773 = vmatpush3.bf16.msra.mxu0 %v11384_v2 }
 0xa91   : > { %7774 = vmatprep.subr.bf16.mxu0 %v13653_v37 }
 0xa94   : > { %7776 = vmatpush3.bf16.msra.mxu0 %v11394_v16 }
 0xa95   : > { %7777 = vmatprep.subr.bf16.mxu0 %v13653_v37 }
 0xa98   : > { %7779 = vmatpush3.bf16.msra.mxu0 %v11404_v13 }
 0xa99   : > { %7780 = vmatprep.subr.bf16.mxu0 %v13653_v37 }
 0xa9c   : > { %7782 = vmatpush3.bf16.msra.mxu0 %v11414_v46 }
 0xa9d   : > { %7783 = vmatprep.subr.bf16.mxu0 %v13653_v37 }
 0xaa0   : > { %7785 = vmatpush3.bf16.msra.mxu0 %v11424_v54 }
 0xaa1   : > { %7786 = vmatprep.subr.bf16.mxu0 %v13653_v37 }
 0xaa4   : > { %7788 = vmatpush3.bf16.msra.mxu0 %v11434_v14 }
 0xaa5   : > { %7789 = vmatprep.subr.bf16.mxu0 %v13653_v37 }
 0xaa8   : > { %7791 = vmatpush3.bf16.msra.mxu0 %v11447_v4 }
 0xb5e   : > { %v4301_v42 = vpop.f32.mrb[96].mxu0 }
 0xb5f   : > { %v7212_v60 = vpop.f32.mrb[97].mxu0  ;;  %v11602_v12 = vrot.slane %v4301_v42, %v13654_v24 }
 0xb61   : > { %v11606_v11 = vsub.f32 %v11457_v49, %v11602_v12  ;;  %v11610_v2 = vsub.f32 %v11460_v59, %v11602_v12  ;;  %v11614_v16 = vsub.f32 %v11463_v15, %v11602_v12  ;;  %v11622_v46 = vsub.f32 %v11468_v44, %v11602_v12 }
 0xb62   : > { %v11626_v54 = vsub.f32 %v11472_v29, %v11602_v12  ;;  %v11632_v39 = vsub.f32 %v11476_v26, %v11602_v12  ;;  %v11638_v15 = vsub.f32 %v11480_v40, %v11602_v12  ;;  %v11644_v48 = vsub.f32 %v11484_v53, %v11602_v12 }
 0xb63   : > { %v4341_v37 = vmul.f32 %v11606_v11, %v11606_v11  ;;  %v4342_v13 = vmul.f32 %v11610_v2, %v11610_v2  ;;  %v4343_v14 = vmul.f32 %v11614_v16, %v11614_v16  ;;  %v4344_v49 = vmul.f32 %v11622_v46, %v11622_v46 }
 0xb64   : > { %v4345_v44 = vmul.f32 %v11626_v54, %v11626_v54  ;;  %v4346_v26 = vmul.f32 %v11632_v39, %v11632_v39  ;;  %v11650_v41 = vsub.f32 %v11488_v28, %v11602_v12  ;;  %v4347_v40 = vmul.f32 %v11638_v15, %v11638_v15 }
 0xb65   : > { %v4373_v4 = vadd.f32 %v4342_v13, %v4341_v37  ;;  %v11656_v43 = vsub.f32 %v11492_v51, %v11602_v12  ;;  %v4348_v53 = vmul.f32 %v11644_v48, %v11644_v48  ;;  %v11662_v45 = vsub.f32 %v11496_v17, %v11602_v12 }
 0xb66   : > { %v4349_v28 = vmul.f32 %v11650_v41, %v11650_v41  ;;  %v11668_v63 = vsub.f32 %v11500_v52, %v11602_v12  ;;  %v11674_v0 = vsub.f32 %v11504_v19, %v11602_v12  ;;  %v11680_v55 = vsub.f32 %v11508_v25, %v11602_v12 }
 0xb67   : > { %v4374_v59 = vadd.f32 %v4373_v4, %v4343_v14  ;;  %v4350_v51 = vmul.f32 %v11656_v43, %v11656_v43  ;;  %v4351_v17 = vmul.f32 %v11662_v45, %v11662_v45  ;;  %v11686_v22 = vsub.f32 %v11512_v35, %v11602_v12 }
 0xb68   : > { %v4352_v52 = vmul.f32 %v11668_v63, %v11668_v63  ;;  %v4353_v19 = vmul.f32 %v11674_v0, %v11674_v0  ;;  %v11692_v61 = vsub.f32 %v11516_v6, %v11602_v12  ;;  %v4354_v25 = vmul.f32 %v11680_v55, %v11680_v55 }
 0xb69   : > { %v4375_v29 = vadd.f32 %v4374_v59, %v4344_v49  ;;  %v11698_v42 = vsub.f32 %v11520_v62, %v11602_v12  ;;  %v4355_v35 = vmul.f32 %v11686_v22, %v11686_v22  ;;  %v11704_v37 = vsub.f32 %v11524_v21, %v11602_v12 }
 0xb6a   : > { %v4356_v6 = vmul.f32 %v11692_v61, %v11692_v61  ;;  %v11710_v14 = vsub.f32 %v11528_v7, %v11602_v12  ;;  %v11716_v49 = vsub.f32 %v11532_v30, %v11602_v12 }
 0xb6b   : > { %v4376_v8 = vadd.f32 %v4375_v29, %v4345_v44  ;;  %v4357_v62 = vmul.f32 %v11698_v42, %v11698_v42  ;;  %v4358_v21 = vmul.f32 %v11704_v37, %v11704_v37  ;;  %v11722_v44 = vsub.f32 %v11536_v10, %v11602_v12 }
 0xb6c   : > { %v4359_v7 = vmul.f32 %v11710_v14, %v11710_v14  ;;  %v4360_v30 = vmul.f32 %v11716_v49, %v11716_v49 }
 0xb6d   : > { %v4377_v47 = vadd.f32 %v4376_v8, %v4346_v26  ;;  %v11728_v26 = vsub.f32 %v11540_v23, %v11602_v12  ;;  %v4361_v10 = vmul.f32 %v11722_v44, %v11722_v44 }
 0xb6f   : > { %v4378_v33 = vadd.f32 %v4377_v47, %v4347_v40  ;;  %v11734_v40 = vsub.f32 %v11544_v5, %v11602_v12  ;;  %v4362_v23 = vmul.f32 %v11728_v26, %v11728_v26 }
 0xb71   : > { %v4379_v20 = vadd.f32 %v4378_v33, %v4348_v53  ;;  %v11740_v53 = vsub.f32 %v11548_v31, %v11602_v12  ;;  %v4363_v5 = vmul.f32 %v11734_v40, %v11734_v40 }
 0xb73   : > { %v4380_v58 = vadd.f32 %v4379_v20, %v4349_v28  ;;  %v11746_v28 = vsub.f32 %v11552_v38, %v11602_v12  ;;  %v4364_v31 = vmul.f32 %v11740_v53, %v11740_v53 }
 0xb75   : > { %v4381_v34 = vadd.f32 %v4380_v58, %v4350_v51  ;;  %v11752_v51 = vsub.f32 %v11556_v32, %v11602_v12  ;;  %v4365_v38 = vmul.f32 %v11746_v28, %v11746_v28 }
 0xb77   : > { %v4382_v9 = vadd.f32 %v4381_v34, %v4351_v17  ;;  %v11758_v17 = vsub.f32 %v11560_v3, %v11602_v12  ;;  %v4366_v32 = vmul.f32 %v11752_v51, %v11752_v51 }
 0xb79   : > { %v4383_v36 = vadd.f32 %v4382_v9, %v4352_v52  ;;  %v11764_v52 = vsub.f32 %v11564_v56, %v11602_v12  ;;  %v4367_v3 = vmul.f32 %v11758_v17, %v11758_v17 }
 0xb7b   : > { %v4384_v57 = vadd.f32 %v4383_v36, %v4353_v19  ;;  %v11770_v19 = vsub.f32 %v11568_v27, %v11602_v12  ;;  %v4368_v56 = vmul.f32 %v11764_v52, %v11764_v52 }
 0xb7d   : > { %v4385_v60 = vadd.f32 %v4384_v57, %v4354_v25  ;;  %v11776_v25 = vsub.f32 %v11572_v50, %v11602_v12 }
 0xb7f   : > { %v4386_v13 = vadd.f32 %v4385_v60, %v4355_v35  ;;  %v4339_v35 = vsub.f32 %v11576_v1, %v11602_v12  ;;  %v4369_v60 = vmul.f32 %v11770_v19, %v11770_v19 }
 0xb81   : > { %v4387_v4 = vadd.f32 %v4386_v13, %v4356_v6  ;;  %v4340_v6 = vsub.f32 %v11580_v18, %v11602_v12  ;;  %v4370_v13 = vmul.f32 %v11776_v25, %v11776_v25  ;;  %v4371_v50 = vmul.f32 %v4339_v35, %v4339_v35 }
 0xb82   : > { %v8456_v18 = vmov 1983009808  }
 0xb83   : > { %v4388_v59 = vadd.f32 %v4387_v4, %v4357_v62  ;;  %v4654_v12 = vunpack.c.l.s4 %v8456_v18 }
 0xb85   : > { %v4389_v29 = vadd.f32 %v4388_v59, %v4358_v21  ;;  %v4372_v21 = vmul.f32 %v4340_v6, %v4340_v6 }
 0xb87   : > { %v4390_v8 = vadd.f32 %v4389_v29, %v4359_v7 }
 0xb89   : > { %v4391_v47 = vadd.f32 %v4390_v8, %v4360_v30 }
 0xb8b   : > { %v4392_v33 = vadd.f32 %v4391_v47, %v4361_v10 }
 0xb8d   : > { %v4393_v20 = vadd.f32 %v4392_v33, %v4362_v23 }
 0xb8f   : > { %v4394_v58 = vadd.f32 %v4393_v20, %v4363_v5  ;;  %v4481_v20 = vld [vmem:[%s13432_s4 + $0x4] sm:$0x1] }
 0xb91   : > { %v4395_v34 = vadd.f32 %v4394_v58, %v4364_v31  ;;  %v4655_v58 = vunpack.c.0.s8 %v4654_v12 }
 0xb93   : > { %v4396_v9 = vadd.f32 %v4395_v34, %v4365_v38 }
 0xb95   : > { %v4397_v36 = vadd.f32 %v4396_v9, %v4366_v32  ;;  %v13655_v32 = vld [vmem:[#allocation12_spill] sm:$0xff] }
 0xb96   : > { %v11793_v9 = vsub.s32 %v4655_v58, %v13655_v32 }
 0xb97   : > { %v4398_v57 = vadd.f32 %v4397_v36, %v4367_v3 }
 0xb99   : > { %v4399_v27 = vadd.f32 %v4398_v57, %v4368_v56 }
 0xb9b   : > { %v4400_v62 = vadd.f32 %v4399_v27, %v4369_v60 }
 0xb9d   : > { %v4401_v4 = vadd.f32 %v4400_v62, %v4370_v13 }
 0xb9f   : > { %v4402_v59 = vadd.f32 %v4401_v4, %v4371_v50 }
 0xba1   : > { %v4403_v7 = vadd.f32 %v4402_v59, %v4372_v21 }
 0xba3   : > { %v4404_v29 = vrot.slane %v4403_v7, 4 }
 0xba5   : > { %v4405_v30 = vadd.f32 %v4404_v29, %v4403_v7 }
 0xba7   : > { %v4406_v8 = vrot.slane %v4405_v30, 2 }
 0xba9   : > { %v4407_v1 = vadd.f32 %v4406_v8, %v4405_v30 }
 0xbab   : > { %v4408_v10 = vrot.slane %v4407_v1, 1 }
 0xbad   : > { %v4409_v47 = vadd.f32 %v4408_v10, %v4407_v1 }
 0xbaf   : > { %7246 = vmatmul.mubr.f32.vlgmr.msra.gmra.mrb[98].mxu0 %v4409_v47 }
 0xc82   : > { %v4476_v23 = vpop.f32.mrb[98].mxu0 }
 0xc83   : > { %v4477_v33 = vadd.f32 1e-05, %v4476_v23  ;;  %v7247_v5 = vpop.f32.mrb[99].mxu0 }
 0xc85   : > { %8318 = vrsqrt.f32 %v4477_v33 }
 0xc8f   : > { %v8319_v31 = vpop.eup %8318 }
 0xc90   : > { %v4482_v38 = vmul.f32 %v8319_v31, %v4481_v20 }
 0xc92   : > { %v4486_v34 = vrot.slane %v4482_v38, %v13654_v24 }
 0xc94   : > { %v4487_v3 = vmul.f32 %v4486_v34, %v11606_v11  ;;  %v4488_v36 = vmul.f32 %v4486_v34, %v11610_v2  ;;  %v4489_v56 = vmul.f32 %v4486_v34, %v11614_v16  ;;  %v4490_v57 = vmul.f32 %v4486_v34, %v11622_v46 }
 0xc95   : > { %v4491_v60 = vmul.f32 %v4486_v34, %v11626_v54  ;;  %v4492_v27 = vmul.f32 %v4486_v34, %v11632_v39  ;;  %v4493_v13 = vmul.f32 %v4486_v34, %v11638_v15  ;;  %v4494_v62 = vmul.f32 %v4486_v34, %v11644_v48 }
 0xc96   : > { %v4495_v24 = vmul.f32 %v4486_v34, %v11650_v41  ;;  %v4496_v50 = vmul.f32 %v4486_v34, %v11656_v43  ;;  %v4497_v11 = vmul.f32 %v4486_v34, %v11662_v45  ;;  %v4498_v2 = vmul.f32 %v4486_v34, %v11668_v63  ;;  %v6773_v45 = vld [vmem:[%s13432_s4 + $0x5] ss:$0 sm:$0xff] }
 0xc97   : > { %v4499_v16 = vmul.f32 %v4486_v34, %v11674_v0  ;;  %v4500_v46 = vmul.f32 %v4486_v34, %v11680_v55  ;;  %v4501_v54 = vmul.f32 %v4486_v34, %v11686_v22  ;;  %v4502_v39 = vmul.f32 %v4486_v34, %v11692_v61 }
 0xc98   : > { %v4503_v15 = vmul.f32 %v4486_v34, %v11698_v42  ;;  %v4504_v48 = vmul.f32 %v4486_v34, %v11704_v37  ;;  %v4505_v41 = vmul.f32 %v4486_v34, %v11710_v14  ;;  %v4506_v43 = vmul.f32 %v4486_v34, %v11716_v49 }
 0xc99   : > { %v4507_v63 = vmul.f32 %v4486_v34, %v11722_v44  ;;  %v4508_v0 = vmul.f32 %v4486_v34, %v11728_v26  ;;  %v4509_v55 = vmul.f32 %v4486_v34, %v11734_v40  ;;  %v4510_v22 = vmul.f32 %v4486_v34, %v11740_v53 }
 0xc9a   : > { %v4511_v61 = vmul.f32 %v4486_v34, %v11746_v28  ;;  %v4512_v42 = vmul.f32 %v4486_v34, %v11752_v51  ;;  %v4513_v37 = vmul.f32 %v4486_v34, %v11758_v17  ;;  %v4514_v14 = vmul.f32 %v4486_v34, %v11764_v52 }
 0xc9b   : > { %v4515_v49 = vmul.f32 %v4486_v34, %v11770_v19  ;;  %v4516_v4 = vmul.f32 %v4486_v34, %v11776_v25  ;;  %v4517_v44 = vmul.f32 %v4486_v34, %v4339_v35  ;;  %v4518_v21 = vmul.f32 %v4486_v34, %v4340_v6 }
 0xc9c   : > { %v4524_v59 = vadd.f32 %v6773_v45, %v4487_v3  ;;  %v4525_v26 = vadd.f32 %v6773_v45, %v4488_v36  ;;  %v4526_v7 = vadd.f32 %v6773_v45, %v4489_v56  ;;  %v4527_v40 = vadd.f32 %v6773_v45, %v4490_v57 }
 0xc9d   : > { %v4528_v53 = vadd.f32 %v6773_v45, %v4491_v60  ;;  %v4529_v28 = vadd.f32 %v6773_v45, %v4492_v27  ;;  %v4530_v51 = vadd.f32 %v6773_v45, %v4493_v13  ;;  %v4531_v29 = vadd.f32 %v6773_v45, %v4494_v62 }
 0xc9e   : > { %v4532_v17 = vadd.f32 %v6773_v45, %v4495_v24  ;;  %v4533_v30 = vadd.f32 %v6773_v45, %v4496_v50  ;;  %v4534_v52 = vadd.f32 %v6773_v45, %v4497_v11  ;;  %v4535_v8 = vadd.f32 %v6773_v45, %v4498_v2 }
 0xc9f   : > { %v4536_v19 = vadd.f32 %v6773_v45, %v4499_v16  ;;  %v4537_v1 = vadd.f32 %v6773_v45, %v4500_v46  ;;  %v4538_v25 = vadd.f32 %v6773_v45, %v4501_v54  ;;  %v4539_v35 = vadd.f32 %v6773_v45, %v4502_v39 }
 0xca0   : > { %v4540_v6 = vadd.f32 %v6773_v45, %v4503_v15  ;;  %v4541_v10 = vadd.f32 %v6773_v45, %v4504_v48  ;;  %v4542_v47 = vadd.f32 %v6773_v45, %v4505_v41  ;;  %v4543_v23 = vadd.f32 %v6773_v45, %v4506_v43 }
 0xca1   : > { %v4544_v33 = vadd.f32 %v6773_v45, %v4507_v63  ;;  %v4545_v5 = vadd.f32 %v6773_v45, %v4508_v0  ;;  %v4546_v18 = vadd.f32 %v6773_v45, %v4509_v55  ;;  %v4547_v12 = vadd.f32 %v6773_v45, %v4510_v22 }
 0xca2   : > { %v4548_v20 = vadd.f32 %v6773_v45, %v4511_v61  ;;  %v4549_v31 = vadd.f32 %v6773_v45, %v4512_v42  ;;  %v4550_v58 = vadd.f32 %v6773_v45, %v4513_v37  ;;  %v4551_v38 = vadd.f32 %v6773_v45, %v4514_v14 }
 0xca3   : > { %v4552_v34 = vadd.f32 %v6773_v45, %v4515_v49  ;;  %v4553_v32 = vadd.f32 %v6773_v45, %v4516_v4  ;;  %v4554_v3 = vadd.f32 %v6773_v45, %v4517_v44  ;;  %v4555_v36 = vadd.f32 %v6773_v45, %v4518_v21 }
 0xca4   : > { %v11832_v56 = vmax.f32 %v4524_v59, 0.0  ;;  %v11834_v57 = vmax.f32 %v4525_v26, 0.0  ;;  %v11836_v60 = vmax.f32 %v4526_v7, 0.0  ;;  %v11838_v27 = vmax.f32 %v4527_v40, 0.0 }
 0xca5   : > { %v11840_v13 = vmax.f32 %v4528_v53, 0.0  ;;  %v11842_v62 = vmax.f32 %v4529_v28, 0.0  ;;  %v11844_v24 = vmax.f32 %v4530_v51, 0.0  ;;  %v11846_v50 = vmax.f32 %v4531_v29, 0.0 }
 0xca6   : > { %v11848_v11 = vmax.f32 %v4532_v17, 0.0  ;;  %v11850_v2 = vmax.f32 %v4533_v30, 0.0  ;;  %v11852_v16 = vmax.f32 %v4534_v52, 0.0  ;;  %v11854_v46 = vmax.f32 %v4535_v8, 0.0  ;;  %4588 = vst [vmem:[%s11856_s9] sm:$0xff] %v11832_v56  ;;  %4589 = vst [vmem:[%s11856_s9 + $0x8] sm:$0xff] %v11834_v57 }
 0xca7   : > { %4590 = vst [vmem:[%s11856_s9 + $0x10] sm:$0xff] %v11836_v60  ;;  %4591 = vst [vmem:[%s11856_s9 + $0x18] sm:$0xff] %v11838_v27  ;;  %v11866_v54 = vmax.f32 %v4536_v19, 0.0  ;;  %v11868_v39 = vmax.f32 %v4537_v1, 0.0  ;;  %v11870_v15 = vmax.f32 %v4538_v25, 0.0  ;;  %v11872_v48 = vmax.f32 %v4539_v35, 0.0 }
 0xca8   : > { %4592 = vst [vmem:[%s11856_s9 + $0x20] sm:$0xff] %v11840_v13  ;;  %4593 = vst [vmem:[%s11856_s9 + $0x28] sm:$0xff] %v11842_v62  ;;  %v11882_v41 = vmax.f32 %v4540_v6, 0.0  ;;  %v11884_v43 = vmax.f32 %v4541_v10, 0.0  ;;  %v11886_v45 = vmax.f32 %v4542_v47, 0.0  ;;  %v11888_v63 = vmax.f32 %v4543_v23, 0.0 }
 0xca9   : > { %4594 = vst [vmem:[%s11856_s9 + $0x30] sm:$0xff] %v11844_v24  ;;  %4595 = vst [vmem:[%s11856_s9 + $0x38] sm:$0xff] %v11846_v50  ;;  %v11898_v0 = vmax.f32 %v4544_v33, 0.0  ;;  %v11900_v55 = vmax.f32 %v4545_v5, 0.0  ;;  %v11902_v22 = vmax.f32 %v4546_v18, 0.0  ;;  %v11904_v61 = vmax.f32 %v4547_v12, 0.0 }
 0xcaa   : > { %4596 = vst [vmem:[%s11856_s9 + $0x40] sm:$0xff] %v11848_v11  ;;  %4597 = vst [vmem:[%s11856_s9 + $0x48] sm:$0xff] %v11850_v2  ;;  %v11914_v42 = vmax.f32 %v4548_v20, 0.0  ;;  %v11916_v37 = vmax.f32 %v4549_v31, 0.0  ;;  %v11918_v14 = vmax.f32 %v4550_v58, 0.0  ;;  %v11920_v49 = vmax.f32 %v4551_v38, 0.0 }
 0xcab   : > { %4598 = vst [vmem:[%s11856_s9 + $0x50] sm:$0xff] %v11852_v16  ;;  %4599 = vst [vmem:[%s11856_s9 + $0x58] sm:$0xff] %v11854_v46  ;;  %v11930_v4 = vmax.f32 %v4552_v34, 0.0  ;;  %v11932_v44 = vmax.f32 %v4553_v32, 0.0  ;;  %v11934_v21 = vmax.f32 %v4554_v3, 0.0  ;;  %v11936_v59 = vmax.f32 %v4555_v36, 0.0 }
 0xcac   : > { %4600 = vst [vmem:[%s11856_s9 + $0x60] sm:$0xff] %v11866_v54  ;;  %4601 = vst [vmem:[%s11856_s9 + $0x68] sm:$0xff] %v11868_v39  ;;  %v4652_v26 = vcombine.high %v11832_v56, %v11832_v56  ;;  %v11958_v7 = vrot.slane %v11832_v56, %v11793_v9  ;;  %v4669_v40 = vcombine.high %v11834_v57, %v11834_v57 }
 0xcad   : > { %4602 = vst [vmem:[%s11856_s9 + $0x70] sm:$0xff] %v11870_v15  ;;  %4603 = vst [vmem:[%s11856_s9 + $0x78] sm:$0xff] %v11872_v48  ;;  %v11964_v53 = vrot.slane %v11834_v57, %v11793_v9  ;;  %v4686_v28 = vcombine.high %v11836_v60, %v11836_v60  ;;  %v11978_v51 = vrot.slane %v11836_v60, %v11793_v9 }
 0xcae   : > { %4604 = vst [vmem:[%s11856_s9 + $0x80] sm:$0xff] %v11882_v41  ;;  %4605 = vst [vmem:[%s11856_s9 + $0x88] sm:$0xff] %v11884_v43  ;;  %v4703_v29 = vcombine.high %v11838_v27, %v11838_v27  ;;  %v11984_v17 = vrot.slane %v11838_v27, %v11793_v9  ;;  %v11987_v30 = vrot.slane %v4652_v26, %v11793_v9 }
 0xcaf   : > { %4606 = vst [vmem:[%s11856_s9 + $0x90] sm:$0xff] %v11886_v45  ;;  %4607 = vst [vmem:[%s11856_s9 + $0x98] sm:$0xff] %v11888_v63  ;;  %v11992_v8 = vrot.slane %v4669_v40, %v11793_v9  ;;  %v11997_v1 = vrot.slane %v4686_v28, %v11793_v9  ;;  %v4720_v23 = vcombine.high %v11840_v13, %v11840_v13 }
 0xcb0   : > { %4608 = vst [vmem:[%s11856_s9 + $0xa0] sm:$0xff] %v11898_v0  ;;  %4609 = vst [vmem:[%s11856_s9 + $0xa8] sm:$0xff] %v11900_v55  ;;  %v12002_v35 = vrot.slane %v4703_v29, %v11793_v9  ;;  %v12014_v33 = vrot.slane %v11840_v13, %v11793_v9  ;;  %v4737_v12 = vcombine.high %v11842_v62, %v11842_v62 }
 0xcb1   : > { %4610 = vst [vmem:[%s11856_s9 + $0xb0] sm:$0xff] %v11902_v22  ;;  %4611 = vst [vmem:[%s11856_s9 + $0xb8] sm:$0xff] %v11904_v61  ;;  %v12024_v20 = vrot.slane %v11842_v62, %v11793_v9  ;;  %v12027_v31 = vrot.slane %v4720_v23, %v11793_v9  ;;  %v4754_v38 = vcombine.high %v11844_v24, %v11844_v24 }
 0xcb2   : > { %4612 = vst [vmem:[%s11856_s9 + $0xc0] sm:$0xff] %v11914_v42  ;;  %4613 = vst [vmem:[%s11856_s9 + $0xc8] sm:$0xff] %v11916_v37  ;;  %v12035_v34 = vrot.slane %v11844_v24, %v11793_v9  ;;  %v12038_v32 = vrot.slane %v4737_v12, %v11793_v9  ;;  %v4771_v36 = vcombine.high %v11846_v50, %v11846_v50 }
 0xcb3   : > { %4614 = vst [vmem:[%s11856_s9 + $0xd0] sm:$0xff] %v11918_v14  ;;  %4615 = vst [vmem:[%s11856_s9 + $0xd8] sm:$0xff] %v11920_v49  ;;  %v12046_v56 = vrot.slane %v11846_v50, %v11793_v9  ;;  %v12051_v60 = vrot.slane %v4754_v38, %v11793_v9  ;;  %v4788_v13 = vcombine.high %v11848_v11, %v11848_v11 }
 0xcb4   : > { %4616 = vst [vmem:[%s11856_s9 + $0xe0] sm:$0xff] %v11930_v4  ;;  %4617 = vst [vmem:[%s11856_s9 + $0xe8] sm:$0xff] %v11932_v44  ;;  %v12060_v24 = vrot.slane %v4771_v36, %v11793_v9  ;;  %v12066_v26 = vrot.slane %v11848_v11, %v11793_v9  ;;  %v4805_v29 = vcombine.high %v11850_v2, %v11850_v2 }
 0xcb5   : > { %4618 = vst [vmem:[%s11856_s9 + $0xf0] sm:$0xff] %v11934_v21  ;;  %4619 = vst [vmem:[%s11856_s9 + $0xf8] sm:$0xff] %v11936_v59  ;;  %v12071_v28 = vrot.slane %v4788_v13, %v11793_v9  ;;  %v12077_v23 = vrot.slane %v11850_v2, %v11793_v9  ;;  %v4822_v38 = vcombine.high %v11852_v16, %v11852_v16 }
 0xcb6   : > { %v12087_v36 = vrot.slane %v11852_v16, %v11793_v9  ;;  %v12092_v50 = vrot.slane %v4805_v29, %v11793_v9  ;;  %v4839_v12 = vcombine.high %v11854_v46, %v11854_v46  ;;  %v12105_v16 = vrot.slane %v11854_v46, %v11793_v9 }
 0xcb7   : > { %v12099_v11 = vrot.slane %v4822_v38, %v11793_v9  ;;  %v4856_v29 = vcombine.high %v11866_v54, %v11866_v54  ;;  %v12116_v38 = vrot.slane %v11866_v54, %v11793_v9  ;;  %v4873_v40 = vcombine.high %v11868_v39, %v11868_v39 }
 0xcb8   : > { %v12112_v2 = vrot.slane %v4839_v12, %v11793_v9  ;;  %v12129_v12 = vrot.slane %v11868_v39, %v11793_v9  ;;  %v4890_v46 = vcombine.high %v11870_v15, %v11870_v15  ;;  %v12146_v39 = vrot.slane %v11870_v15, %v11793_v9 }
 0xcb9   : > { %v12125_v62 = vrot.slane %v4856_v29, %v11793_v9  ;;  %v12136_v3 = vrot.slane %v4873_v40, %v11793_v9  ;;  %v4907_v54 = vcombine.high %v11872_v48, %v11872_v48  ;;  %v12157_v57 = vrot.slane %v11872_v48, %v11793_v9 }
 0xcba   : > { %v12153_v13 = vrot.slane %v4890_v46, %v11793_v9  ;;  %v4924_v27 = vcombine.high %v11882_v41, %v11882_v41  ;;  %v12168_v58 = vrot.slane %v11882_v41, %v11793_v9  ;;  %v4941_v46 = vcombine.high %v11884_v43, %v11884_v43 }
 0xcbb   : > { %v12164_v29 = vrot.slane %v4907_v54, %v11793_v9  ;;  %v12181_v54 = vrot.slane %v11884_v43, %v11793_v9  ;;  %v4958_v48 = vcombine.high %v11886_v45, %v11886_v45  ;;  %v12198_v43 = vrot.slane %v11886_v45, %v11793_v9 }
 0xcbc   : > { %v12177_v18 = vrot.slane %v4924_v27, %v11793_v9  ;;  %v12188_v6 = vrot.slane %v4941_v46, %v11793_v9  ;;  %v4975_v41 = vcombine.high %v11888_v63, %v11888_v63  ;;  %v12209_v5 = vrot.slane %v11888_v63, %v11793_v9 }
 0xcbd   : > { %v12205_v15 = vrot.slane %v4958_v48, %v11793_v9  ;;  %v4992_v40 = vcombine.high %v11898_v0, %v11898_v0  ;;  %v12220_v25 = vrot.slane %v11898_v0, %v11793_v9  ;;  %v5009_v48 = vcombine.high %v11900_v55, %v11900_v55 }
 0xcbe   : > { %13657 = vst [vmem:[#allocation17_spill] sm:$0xff] %v12209_v5  ;;  %v12216_v27 = vrot.slane %v4975_v41, %v11793_v9  ;;  %v12233_v41 = vrot.slane %v11900_v55, %v11793_v9  ;;  %v5026_v63 = vcombine.high %v11902_v22, %v11902_v22  ;;  %v12250_v46 = vrot.slane %v11902_v22, %v11793_v9 }
 0xcbf   : > { %13656 = vst [vmem:[#allocation16_spill] sm:$0xff] %v12205_v15  ;;  %13659 = vst [vmem:[#allocation18_spill] sm:$0xff] %v12220_v25  ;;  %v12229_v47 = vrot.slane %v4992_v40, %v11793_v9  ;;  %v12240_v19 = vrot.slane %v5009_v48, %v11793_v9  ;;  %v5043_v45 = vcombine.high %v11904_v61, %v11904_v61 }
 0xcc0   : > { %13658 = vst [vmem:[#allocation14_spill] sm:$0xff] %v12216_v27  ;;  %13661 = vst [vmem:[#allocation19_spill] sm:$0xff] %v12233_v41  ;;  %v12257_v0 = vrot.slane %v5026_v63, %v11793_v9  ;;  %v12261_v10 = vrot.slane %v11904_v61, %v11793_v9  ;;  %v5060_v55 = vcombine.high %v11914_v42, %v11914_v42 }
 0xcc1   : > { %13660 = vst [vmem:[#allocation15_spill] sm:$0xff] %v12229_v47  ;;  %13662 = vst [vmem:[#allocation13_spill] sm:$0xff] %v12240_v19  ;;  %v12268_v40 = vrot.slane %v5043_v45, %v11793_v9  ;;  %v12272_v52 = vrot.slane %v11914_v42, %v11793_v9  ;;  %v5077_v63 = vcombine.high %v11916_v37, %v11916_v37 }
 0xcc2   : > { %13663 = vst [vmem:[#allocation12_spill] sm:$0xff] %v12250_v46  ;;  %13664 = vst [vmem:[#allocation20_spill] sm:$0xff] %v12257_v0  ;;  %v12281_v19 = vrot.slane %v5060_v55, %v11793_v9  ;;  %v12285_v45 = vrot.slane %v11916_v37, %v11793_v9  ;;  %v5094_v61 = vcombine.high %v11918_v14, %v11918_v14 }
 0xcc3   : > { %13665 = vst [vmem:[#allocation21_spill] sm:$0xff] %v12261_v10  ;;  %13666 = vst [vmem:[#allocation22_spill] sm:$0xff] %v12268_v40  ;;  %v12292_v46 = vrot.slane %v5077_v63, %v11793_v9  ;;  %v12302_v37 = vrot.slane %v11918_v14, %v11793_v9  ;;  %v5111_v42 = vcombine.high %v11920_v49, %v11920_v49  ;;  %v5325_v63 = vsel %vm5324_vm6, %v11958_v7, -inf }
 0xcc4   : > { %13667 = vst [vmem:[#allocation23_spill] sm:$0xff] %v12272_v52  ;;  %13668 = vst [vmem:[#allocation24_spill] sm:$0xff] %v12281_v19  ;;  %v12309_v22 = vrot.slane %v5094_v61, %v11793_v9  ;;  %v12313_v52 = vrot.slane %v11920_v49, %v11793_v9  ;;  %v5128_v48 = vcombine.high %v11930_v4, %v11930_v4 }
 0xcc5   : > { %13669 = vst [vmem:[#allocation25_spill] sm:$0xff] %v12285_v45  ;;  %13670 = vst [vmem:[#allocation26_spill] sm:$0xff] %v12292_v46  ;;  %v12320_v55 = vrot.slane %v5111_v42, %v11793_v9  ;;  %v12324_v45 = vrot.slane %v11930_v4, %v11793_v9  ;;  %v5145_v61 = vcombine.high %v11932_v44, %v11932_v44 }
 0xcc6   : > { %13671 = vst [vmem:[#allocation27_spill] sm:$0xff] %v12302_v37  ;;  %13672 = vst [vmem:[#allocation28_spill] sm:$0xff] %v12309_v22  ;;  %v12333_v46 = vrot.slane %v5128_v48, %v11793_v9  ;;  %v12337_v42 = vrot.slane %v11932_v44, %v11793_v9  ;;  %v5162_v49 = vcombine.high %v11934_v21, %v11934_v21 }
 0xcc7   : > { %13673 = vst [vmem:[#allocation29_spill] sm:$0xff] %v12313_v52  ;;  %13674 = vst [vmem:[#allocation30_spill] sm:$0xff] %v12320_v55  ;;  %v12344_v37 = vrot.slane %v5145_v61, %v11793_v9  ;;  %v12354_v44 = vrot.slane %v11934_v21, %v11793_v9  ;;  %v5179_v4 = vcombine.high %v11936_v59, %v11936_v59  ;;  %v5339_v55 = vsel %vm5324_vm6, %v11987_v30, -inf }
 0xcc8   : > { %13675 = vst [vmem:[#allocation31_spill] sm:$0xff] %v12324_v45  ;;  %13676 = vst [vmem:[#allocation32_spill] sm:$0xff] %v12333_v46  ;;  %v12361_v14 = vrot.slane %v5162_v49, %v11793_v9  ;;  %v12365_v45 = vrot.slane %v11936_v59, %v11793_v9  ;;  %v13683_v61 = vcombine.high %v11958_v7, %v11958_v7  ;;  %v5340_v21 = vrot.slane %v5339_v55, 4 }
 0xcc9   : > { %13677 = vst [vmem:[#allocation33_spill] sm:$0xff] %v12337_v42  ;;  %13678 = vst [vmem:[#allocation34_spill] sm:$0xff] %v12344_v37  ;;  %v12372_v48 = vrot.slane %v5179_v4, %v11793_v9  ;;  %v5326_v42 = vrot.slane %v5325_v63, 4  ;;  %v13684_v7 = vcombine.high %v11987_v30, %v11987_v30  ;;  %v5353_v37 = vsel %vm5324_vm6, %v11964_v53, -inf }
 0xcca   : > { %13679 = vst [vmem:[#allocation35_spill] sm:$0xff] %v12354_v44  ;;  %13680 = vst [vmem:[#allocation36_spill] sm:$0xff] %v12361_v14  ;;  %v5332_v49 = vsel %vm5324_vm6, %v13683_v61, -inf  ;;  %v13685_v59 = vcombine.high %v11964_v53, %v11964_v53  ;;  %v5341_v22 = vmax.f32 %v5339_v55, %v5340_v21  ;;  %v5354_v9 = vrot.slane %v5353_v37, 4 }
 0xccb   : > { %13681 = vst [vmem:[#allocation37_spill] sm:$0xff] %v12365_v45  ;;  %13682 = vst [vmem:[#allocation38_spill] sm:$0xff] %v12372_v48  ;;  %v5333_v46 = vrot.slane %v5332_v49, 4  ;;  %v5327_v4 = vmax.f32 %v5325_v63, %v5326_v42  ;;  %v5346_v61 = vsel %vm5324_vm6, %v13684_v7, -inf  ;;  %v5367_v30 = vsel %vm5324_vm6, %v11992_v8, -inf }
 0xccc   : > { %v5347_v52 = vrot.slane %v5346_v61, 4  ;;  %v5360_v45 = vsel %vm5324_vm6, %v13685_v59, -inf  ;;  %v5342_v19 = vrot.slane %v5341_v22, 2  ;;  %v5355_v40 = vmax.f32 %v5353_v37, %v5354_v9 }
 0xccd   : > { %v5334_v44 = vmax.f32 %v5332_v49, %v5333_v46  ;;  %v5328_v14 = vrot.slane %v5327_v4, 2  ;;  %v5361_v63 = vrot.slane %v5360_v45, 4  ;;  %v13686_v46 = vcombine.high %v11992_v8, %v11992_v8 }
 0xcce   : > { %v5348_v48 = vmax.f32 %v5346_v61, %v5347_v52  ;;  %v5368_v0 = vrot.slane %v5367_v30, 4  ;;  %v5343_v41 = vmax.f32 %v5341_v22, %v5342_v19  ;;  %v5356_v47 = vrot.slane %v5355_v40, 2 }
 0xccf   : > { %v5335_v42 = vrot.slane %v5334_v44, 2  ;;  %v5374_v49 = vsel %vm5324_vm6, %v13686_v46, -inf  ;;  %v5329_v7 = vmax.f32 %v5327_v4, %v5328_v14  ;;  %v5362_v53 = vmax.f32 %v5360_v45, %v5361_v63 }
 0xcd0   : > { %v5349_v59 = vrot.slane %v5348_v48, 2  ;;  %v5375_v55 = vrot.slane %v5374_v49, 4  ;;  %v5369_v27 = vmax.f32 %v5367_v30, %v5368_v0  ;;  %v5344_v8 = vrot.slane %v5343_v41, 1 }
 0xcd1   : > { %v5336_v10 = vmax.f32 %v5334_v44, %v5335_v42  ;;  %v5330_v21 = vrot.slane %v5329_v7, 1  ;;  %v5363_v52 = vrot.slane %v5362_v53, 2  ;;  %v5357_v46 = vmax.f32 %v5355_v40, %v5356_v47 }
 0xcd2   : > { %v5350_v25 = vmax.f32 %v5348_v48, %v5349_v59  ;;  %v5376_v5 = vmax.f32 %v5374_v49, %v5375_v55  ;;  %v5370_v37 = vrot.slane %v5369_v27, 2  ;;  %v12406_v9 = vmax.f32 %v5343_v41, %v5344_v8 }
 0xcd3   : > { %v5337_v61 = vrot.slane %v5336_v10, 1  ;;  %v12402_v15 = vmax.f32 %v5329_v7, %v5330_v21  ;;  %v5364_v14 = vmax.f32 %v5362_v53, %v5363_v52  ;;  %v5358_v63 = vrot.slane %v5357_v46, 1 }
 0xcd4   : > { %v5351_v45 = vrot.slane %v5350_v25, 1  ;;  %v5377_v44 = vrot.slane %v5376_v5, 2  ;;  %v5381_v22 = vsel %vm5324_vm6, %v11978_v51, -inf  ;;  %v5371_v0 = vmax.f32 %v5369_v27, %v5370_v37 }
 0xcd5   : > { %v12404_v4 = vmax.f32 %v5336_v10, %v5337_v61  ;;  %v5365_v19 = vrot.slane %v5364_v14, 1  ;;  %v5382_v30 = vrot.slane %v5381_v22, 4  ;;  %v12412_v49 = vmax.f32 %v5357_v46, %v5358_v63 }
 0xcd6   : > { %v12410_v48 = vmax.f32 %v5350_v25, %v5351_v45  ;;  %v5378_v42 = vmax.f32 %v5376_v5, %v5377_v44  ;;  %v13690_v10 = vcombine.high %v11978_v51, %v11978_v51  ;;  %v5395_v40 = vsel %vm5324_vm6, %v11997_v1, -inf }
 0xcd7   : > { %13688 = vst [vmem:[#allocation40_spill] sm:$0xff] %v12412_v49  ;;  %v12414_v47 = vmax.f32 %v5364_v14, %v5365_v19  ;;  %v5372_v7 = vrot.slane %v5371_v0, 1  ;;  %v5383_v59 = vmax.f32 %v5381_v22, %v5382_v30  ;;  %v5396_v55 = vrot.slane %v5395_v40, 4 }
 0xcd8   : > { %13687 = vst [vmem:[#allocation39_spill] sm:$0xff] %v12410_v48  ;;  %v5388_v41 = vsel %vm5324_vm6, %v13690_v10, -inf  ;;  %v5379_v53 = vrot.slane %v5378_v42, 1  ;;  %v13691_v5 = vcombine.high %v11997_v1, %v11997_v1  ;;  %v5409_v21 = vsel %vm5324_vm6, %v11984_v17, -inf }
 0xcd9   : > { %13689 = vst [vmem:[#allocation41_spill] sm:$0xff] %v12414_v47  ;;  %v5389_v25 = vrot.slane %v5388_v41, 4  ;;  %v13692_v51 = vcombine.high %v11984_v17, %v11984_v17  ;;  %v12432_v61 = vmax.f32 %v5371_v0, %v5372_v7  ;;  %v5384_v46 = vrot.slane %v5383_v59, 2 }
 0xcda   : > { %v5402_v27 = vsel %vm5324_vm6, %v13691_v5, -inf  ;;  %v12434_v8 = vmax.f32 %v5378_v42, %v5379_v53  ;;  %v5397_v45 = vmax.f32 %v5395_v40, %v5396_v55  ;;  %v5410_v44 = vrot.slane %v5409_v21, 4 }
 0xcdb   : > { %v5416_v52 = vsel %vm5324_vm6, %v13692_v51, -inf  ;;  %13693 = vst [vmem:[#allocation42_spill] sm:$0xff] %v12432_v61  ;;  %v5390_v14 = vmax.f32 %v5388_v41, %v5389_v25  ;;  %v5403_v37 = vrot.slane %v5402_v27, 4  ;;  %v5385_v63 = vmax.f32 %v5383_v59, %v5384_v46 }
 0xcdc   : > { %13694 = vst [vmem:[#allocation43_spill] sm:$0xff] %v12434_v8  ;;  %v5417_v1 = vrot.slane %v5416_v52, 4  ;;  %v5423_v22 = vsel %vm5324_vm6, %v12002_v35, -inf  ;;  %v13695_v17 = vcombine.high %v12002_v35, %v12002_v35  ;;  %v5398_v0 = vrot.slane %v5397_v45, 2 }
 0xcdd   : > { %v5391_v19 = vrot.slane %v5390_v14, 2  ;;  %v5404_v10 = vmax.f32 %v5402_v27, %v5403_v37  ;;  %v5411_v42 = vmax.f32 %v5409_v21, %v5410_v44  ;;  %v5386_v53 = vrot.slane %v5385_v63, 1 }
 0xcde   : > { %v5430_v30 = vsel %vm5324_vm6, %v13695_v17, -inf  ;;  %v5418_v7 = vmax.f32 %v5416_v52, %v5417_v1  ;;  %v5424_v40 = vrot.slane %v5423_v22, 4  ;;  %v5399_v55 = vmax.f32 %v5397_v45, %v5398_v0 }
 0xcdf   : > { %v5392_v41 = vmax.f32 %v5390_v14, %v5391_v19  ;;  %v5431_v25 = vrot.slane %v5430_v30, 4  ;;  %v5405_v5 = vrot.slane %v5404_v10, 2  ;;  %v5412_v59 = vrot.slane %v5411_v42, 2 }
 0xce0   : > { %v5419_v51 = vrot.slane %v5418_v7, 2  ;;  %v12442_v46 = vmax.f32 %v5385_v63, %v5386_v53  ;;  %v5425_v61 = vmax.f32 %v5423_v22, %v5424_v40  ;;  %v5400_v35 = vrot.slane %v5399_v55, 1 }
 0xce1   : > { %v5393_v8 = vrot.slane %v5392_v41, 1  ;;  %v5432_v47 = vmax.f32 %v5430_v30, %v5431_v25  ;;  %v5406_v49 = vmax.f32 %v5404_v10, %v5405_v5  ;;  %v5413_v17 = vmax.f32 %v5411_v42, %v5412_v59 }
 0xce2   : > { %v5420_v48 = vmax.f32 %v5418_v7, %v5419_v51  ;;  %v5426_v21 = vrot.slane %v5425_v61, 2  ;;  %v5437_v14 = vsel %vm5324_vm6, %v12014_v33, -inf  ;;  %v12448_v45 = vmax.f32 %v5399_v55, %v5400_v35 }
 0xce3   : > { %v12444_v27 = vmax.f32 %v5392_v41, %v5393_v8  ;;  %v5433_v52 = vrot.slane %v5432_v47, 2  ;;  %v5407_v37 = vrot.slane %v5406_v49, 1  ;;  %v5414_v44 = vrot.slane %v5413_v17, 1 }
 0xce4   : > { %v5421_v1 = vrot.slane %v5420_v48, 1  ;;  %v5427_v63 = vmax.f32 %v5425_v61, %v5426_v21  ;;  %v5438_v22 = vrot.slane %v5437_v14, 4  ;;  %v13696_v30 = vcombine.high %v12014_v33, %v12014_v33 }
 0xce5   : > { %v5434_v19 = vmax.f32 %v5432_v47, %v5433_v52  ;;  %v12454_v8 = vmax.f32 %v5406_v49, %v5407_v37  ;;  %v12456_v10 = vmax.f32 %v5413_v17, %v5414_v44  ;;  %v5451_v61 = vsel %vm5324_vm6, %v12027_v31, -inf }
 0xce6   : > { %v5444_v0 = vsel %vm5324_vm6, %v13696_v30, -inf  ;;  %v12458_v42 = vmax.f32 %v5420_v48, %v5421_v1  ;;  %v5428_v53 = vrot.slane %v5427_v63, 1  ;;  %v5439_v40 = vmax.f32 %v5437_v14, %v5438_v22 }
 0xce7   : > { %v5445_v7 = vrot.slane %v5444_v0, 4  ;;  %v5435_v41 = vrot.slane %v5434_v19, 1  ;;  %v5452_v25 = vrot.slane %v5451_v61, 4  ;;  %v13698_v33 = vcombine.high %v12027_v31, %v12027_v31 }
 0xce8   : > { %13697 = vst [vmem:[#allocation44_spill] sm:$0xff] %v12458_v42  ;;  %v5465_v49 = vsel %vm5324_vm6, %v12024_v20, -inf  ;;  %v12468_v5 = vmax.f32 %v5427_v63, %v5428_v53  ;;  %v5440_v59 = vrot.slane %v5439_v40, 2  ;;  %v13701_v52 = vcombine.high %v12024_v20, %v12024_v20 }
 0xce9   : > { %v5446_v47 = vmax.f32 %v5444_v0, %v5445_v7  ;;  %v5458_v55 = vsel %vm5324_vm6, %v13698_v33, -inf  ;;  %v12470_v48 = vmax.f32 %v5434_v19, %v5435_v41  ;;  %v5453_v17 = vmax.f32 %v5451_v61, %v5452_v25 }
 0xcea   : > { %13699 = vst [vmem:[#allocation45_spill] sm:$0xff] %v12468_v5  ;;  %v5459_v51 = vrot.slane %v5458_v55, 4  ;;  %v5466_v21 = vrot.slane %v5465_v49, 4  ;;  %v5472_v14 = vsel %vm5324_vm6, %v13701_v52, -inf  ;;  %v5441_v31 = vmax.f32 %v5439_v40, %v5440_v59 }
 0xceb   : > { %13700 = vst [vmem:[#allocation46_spill] sm:$0xff] %v12470_v48  ;;  %v5447_v35 = vrot.slane %v5446_v47, 2  ;;  %v5473_v44 = vrot.slane %v5472_v14, 4  ;;  %v5479_v1 = vsel %vm5324_vm6, %v12038_v32, -inf  ;;  %v5454_v22 = vrot.slane %v5453_v17, 2 }
 0xcec   : > { %v5460_v37 = vmax.f32 %v5458_v55, %v5459_v51  ;;  %v5467_v19 = vmax.f32 %v5465_v49, %v5466_v21  ;;  %v5480_v30 = vrot.slane %v5479_v1, 4  ;;  %v5442_v0 = vrot.slane %v5441_v31, 1 }
 0xced   : > { %v5448_v63 = vmax.f32 %v5446_v47, %v5447_v35  ;;  %v5474_v53 = vmax.f32 %v5472_v14, %v5473_v44  ;;  %v13702_v41 = vcombine.high %v12038_v32, %v12038_v32  ;;  %v5455_v25 = vmax.f32 %v5453_v17, %v5454_v22 }
 0xcee   : > { %v5461_v7 = vrot.slane %v5460_v37, 2  ;;  %v5468_v40 = vrot.slane %v5467_v19, 2  ;;  %v5481_v33 = vmax.f32 %v5479_v1, %v5480_v30  ;;  %v12482_v55 = vmax.f32 %v5441_v31, %v5442_v0 }
 0xcef   : > { %v5486_v20 = vsel %vm5324_vm6, %v13702_v41, -inf  ;;  %v5449_v61 = vrot.slane %v5448_v63, 1  ;;  %v5475_v51 = vrot.slane %v5474_v53, 2  ;;  %v5456_v49 = vrot.slane %v5455_v25, 1 }
 0xcf0   : > { %v5462_v59 = vmax.f32 %v5460_v37, %v5461_v7  ;;  %v5487_v47 = vrot.slane %v5486_v20, 4  ;;  %v5469_v21 = vmax.f32 %v5467_v19, %v5468_v40  ;;  %v5482_v52 = vrot.slane %v5481_v33, 2 }
 0xcf1   : > { %v12484_v35 = vmax.f32 %v5448_v63, %v5449_v61  ;;  %v5476_v44 = vmax.f32 %v5474_v53, %v5475_v51  ;;  %v5493_v32 = vsel %vm5324_vm6, %v12035_v34, -inf  ;;  %v12488_v41 = vmax.f32 %v5455_v25, %v5456_v49 }
 0xcf2   : > { %v5463_v14 = vrot.slane %v5462_v59, 1  ;;  %v5488_v48 = vmax.f32 %v5486_v20, %v5487_v47  ;;  %v5470_v17 = vrot.slane %v5469_v21, 1  ;;  %v5483_v1 = vmax.f32 %v5481_v33, %v5482_v52 }
 0xcf3   : > { %v5494_v31 = vrot.slane %v5493_v32, 4  ;;  %v5477_v37 = vrot.slane %v5476_v44, 1  ;;  %v13703_v63 = vcombine.high %v12035_v34, %v12035_v34  ;;  %v5507_v40 = vsel %vm5324_vm6, %v12051_v60, -inf }
 0xcf4   : > { %v12490_v22 = vmax.f32 %v5462_v59, %v5463_v14  ;;  %v5489_v30 = vrot.slane %v5488_v48, 2  ;;  %v12496_v0 = vmax.f32 %v5469_v21, %v5470_v17  ;;  %v5484_v7 = vrot.slane %v5483_v1, 1 }
 0xcf5   : > { %v5500_v19 = vsel %vm5324_vm6, %v13703_v63, -inf  ;;  %v5495_v53 = vmax.f32 %v5493_v32, %v5494_v31  ;;  %v12498_v61 = vmax.f32 %v5476_v44, %v5477_v37  ;;  %v13706_v33 = vcombine.high %v12051_v60, %v12051_v60 }
 0xcf6   : > { %13704 = vst [vmem:[#allocation47_spill] sm:$0xff] %v12496_v0  ;;  %v5501_v20 = vrot.slane %v5500_v19, 4  ;;  %v5490_v25 = vmax.f32 %v5488_v48, %v5489_v30  ;;  %v12506_v51 = vmax.f32 %v5483_v1, %v5484_v7  ;;  %v5508_v49 = vrot.slane %v5507_v40, 4 }
 0xcf7   : > { %13705 = vst [vmem:[#allocation48_spill] sm:$0xff] %v12498_v61  ;;  %v5514_v59 = vsel %vm5324_vm6, %v13706_v33, -inf  ;;  %v5496_v34 = vrot.slane %v5495_v53, 2  ;;  %v5521_v14 = vsel %vm5324_vm6, %v12046_v56, -inf  ;;  %v13708_v48 = vcombine.high %v12046_v56, %v12046_v56 }
 0xcf8   : > { %13707 = vst [vmem:[#allocation49_spill] sm:$0xff] %v12506_v51  ;;  %v5502_v47 = vmax.f32 %v5500_v19, %v5501_v20  ;;  %v5491_v21 = vrot.slane %v5490_v25, 1  ;;  %v5515_v52 = vrot.slane %v5514_v59, 4  ;;  %v5509_v60 = vmax.f32 %v5507_v40, %v5508_v49 }
 0xcf9   : > { %v5528_v44 = vsel %vm5324_vm6, %v13708_v48, -inf  ;;  %v5497_v32 = vmax.f32 %v5495_v53, %v5496_v34  ;;  %v5522_v31 = vrot.slane %v5521_v14, 4  ;;  %v5535_v63 = vsel %vm5324_vm6, %v12060_v24, -inf }
 0xcfa   : > { %v5503_v17 = vrot.slane %v5502_v47, 2  ;;  %v12514_v37 = vmax.f32 %v5490_v25, %v5491_v21  ;;  %v5516_v1 = vmax.f32 %v5514_v59, %v5515_v52  ;;  %v5529_v30 = vrot.slane %v5528_v44, 4 }
 0xcfb   : > { %v5498_v19 = vrot.slane %v5497_v32, 1  ;;  %v5510_v20 = vrot.slane %v5509_v60, 2  ;;  %v5523_v33 = vmax.f32 %v5521_v14, %v5522_v31  ;;  %v5536_v56 = vrot.slane %v5535_v63, 4 }
 0xcfc   : > { %13709 = vst [vmem:[#allocation50_spill] sm:$0xff] %v12514_v37  ;;  %v5504_v7 = vmax.f32 %v5502_v47, %v5503_v17  ;;  %v5517_v51 = vrot.slane %v5516_v1, 2  ;;  %v5530_v61 = vmax.f32 %v5528_v44, %v5529_v30  ;;  %v13710_v53 = vcombine.high %v12060_v24, %v12060_v24 }
 0xcfd   : > { %v12522_v34 = vmax.f32 %v5497_v32, %v5498_v19  ;;  %v5511_v59 = vmax.f32 %v5509_v60, %v5510_v20  ;;  %v5524_v49 = vrot.slane %v5523_v33, 2  ;;  %v5537_v48 = vmax.f32 %v5535_v63, %v5536_v56 }
 0xcfe   : > { %v5542_v40 = vsel %vm5324_vm6, %v13710_v53, -inf  ;;  %v5505_v25 = vrot.slane %v5504_v7, 1  ;;  %v5518_v21 = vmax.f32 %v5516_v1, %v5517_v51  ;;  %v5531_v52 = vrot.slane %v5530_v61, 2 }
 0xcff   : > { %v5543_v37 = vrot.slane %v5542_v40, 4  ;;  %v5512_v14 = vrot.slane %v5511_v59, 1  ;;  %v5525_v17 = vmax.f32 %v5523_v33, %v5524_v49  ;;  %v5549_v44 = vsel %vm5324_vm6, %v12066_v26, -inf }
 0xd00   : > { %v12524_v47 = vmax.f32 %v5504_v7, %v5505_v25  ;;  %v5519_v31 = vrot.slane %v5518_v21, 1  ;;  %v5532_v24 = vmax.f32 %v5530_v61, %v5531_v52  ;;  %v5538_v30 = vrot.slane %v5537_v48, 2 }
 0xd01   : > { %v5544_v53 = vmax.f32 %v5542_v40, %v5543_v37  ;;  %v12528_v32 = vmax.f32 %v5511_v59, %v5512_v14  ;;  %v5526_v19 = vrot.slane %v5525_v17, 1  ;;  %v5550_v60 = vrot.slane %v5549_v44, 4 }
 0xd02   : > { %v13711_v51 = vcombine.high %v12066_v26, %v12066_v26  ;;  %v12534_v63 = vmax.f32 %v5518_v21, %v5519_v31  ;;  %v5533_v7 = vrot.slane %v5532_v24, 1  ;;  %v5539_v20 = vmax.f32 %v5537_v48, %v5538_v30 }
 0xd03   : > { %v5545_v33 = vrot.slane %v5544_v53, 2  ;;  %v12536_v56 = vmax.f32 %v5525_v17, %v5526_v19  ;;  %v5551_v25 = vmax.f32 %v5549_v44, %v5550_v60  ;;  %v5563_v37 = vsel %vm5324_vm6, %v12071_v28, -inf }
 0xd04   : > { %v5556_v1 = vsel %vm5324_vm6, %v13711_v51, -inf  ;;  %v12540_v40 = vmax.f32 %v5532_v24, %v5533_v7  ;;  %v5540_v59 = vrot.slane %v5539_v20, 1  ;;  %v5564_v52 = vrot.slane %v5563_v37, 4 }
 0xd05   : > { %v5557_v61 = vrot.slane %v5556_v1, 4  ;;  %v5546_v49 = vmax.f32 %v5544_v53, %v5545_v33  ;;  %v5552_v26 = vrot.slane %v5551_v25, 2  ;;  %v13713_v21 = vcombine.high %v12071_v28, %v12071_v28 }
 0xd06   : > { %13712 = vst [vmem:[#allocation51_spill] sm:$0xff] %v12540_v40  ;;  %v5577_v17 = vsel %vm5324_vm6, %v12077_v23, -inf  ;;  %v12548_v44 = vmax.f32 %v5539_v20, %v5540_v59  ;;  %v5565_v30 = vmax.f32 %v5563_v37, %v5564_v52  ;;  %v13715_v53 = vcombine.high %v12077_v23, %v12077_v23 }
 0xd07   : > { %v5558_v14 = vmax.f32 %v5556_v1, %v5557_v61  ;;  %v5570_v48 = vsel %vm5324_vm6, %v13713_v21, -inf  ;;  %v5547_v31 = vrot.slane %v5546_v49, 1  ;;  %v5553_v24 = vmax.f32 %v5551_v25, %v5552_v26 }
 0xd08   : > { %13714 = vst [vmem:[#allocation52_spill] sm:$0xff] %v12548_v44  ;;  %v5571_v19 = vrot.slane %v5570_v48, 4  ;;  %v5578_v51 = vrot.slane %v5577_v17, 4  ;;  %v5584_v1 = vsel %vm5324_vm6, %v13715_v53, -inf  ;;  %v5566_v28 = vrot.slane %v5565_v30, 2 }
 0xd09   : > { %v5559_v60 = vrot.slane %v5558_v14, 2  ;;  %v12554_v7 = vmax.f32 %v5546_v49, %v5547_v31  ;;  %v5585_v61 = vrot.slane %v5584_v1, 4  ;;  %v5554_v21 = vrot.slane %v5553_v24, 1 }
 0xd0a   : > { %v5572_v33 = vmax.f32 %v5570_v48, %v5571_v19  ;;  %v5579_v20 = vmax.f32 %v5577_v17, %v5578_v51  ;;  %v5591_v37 = vsel %vm5324_vm6, %v12092_v50, -inf  ;;  %v5567_v59 = vmax.f32 %v5565_v30, %v5566_v28 }
 0xd0b   : > { %13716 = vst [vmem:[#allocation53_spill] sm:$0xff] %v12554_v7  ;;  %v5560_v40 = vmax.f32 %v5558_v14, %v5559_v60  ;;  %v5586_v52 = vmax.f32 %v5584_v1, %v5585_v61  ;;  %v5592_v26 = vrot.slane %v5591_v37, 4  ;;  %v12558_v44 = vmax.f32 %v5553_v24, %v5554_v21 }
 0xd0c   : > { %v5573_v25 = vrot.slane %v5572_v33, 2  ;;  %v5580_v0 = vrot.slane %v5579_v20, 2  ;;  %v13718_v49 = vcombine.high %v12092_v50, %v12092_v50  ;;  %v5568_v31 = vrot.slane %v5567_v59, 1 }
 0xd0d   : > { %13717 = vst [vmem:[#allocation54_spill] sm:$0xff] %v12558_v44  ;;  %v5561_v23 = vrot.slane %v5560_v40, 1  ;;  %v5587_v14 = vrot.slane %v5586_v52, 2  ;;  %v5593_v17 = vmax.f32 %v5591_v37, %v5592_v26  ;;  %v5605_v53 = vsel %vm5324_vm6, %v12087_v36, -inf }
 0xd0e   : > { %v5598_v48 = vsel %vm5324_vm6, %v13718_v49, -inf  ;;  %v5574_v19 = vmax.f32 %v5572_v33, %v5573_v25  ;;  %v5581_v51 = vmax.f32 %v5579_v20, %v5580_v0  ;;  %v12568_v24 = vmax.f32 %v5567_v59, %v5568_v31 }
 0xd0f   : > { %v12564_v60 = vmax.f32 %v5560_v40, %v5561_v23  ;;  %v5599_v30 = vrot.slane %v5598_v48, 4  ;;  %v5588_v28 = vmax.f32 %v5586_v52, %v5587_v14  ;;  %v5594_v61 = vrot.slane %v5593_v17, 2 }
 0xd10   : > { %v5575_v1 = vrot.slane %v5574_v19, 1  ;;  %v5582_v21 = vrot.slane %v5581_v51, 1  ;;  %v5606_v44 = vrot.slane %v5605_v53, 4  ;;  %v13719_v33 = vcombine.high %v12087_v36, %v12087_v36 }
 0xd11   : > { %v5600_v50 = vmax.f32 %v5598_v48, %v5599_v30  ;;  %v5589_v0 = vrot.slane %v5588_v28, 1  ;;  %v5595_v20 = vmax.f32 %v5593_v17, %v5594_v61  ;;  %v5619_v52 = vsel %vm5324_vm6, %v12099_v11, -inf }
 0xd12   : > { %v5612_v37 = vsel %vm5324_vm6, %v13719_v33, -inf  ;;  %v12574_v40 = vmax.f32 %v5574_v19, %v5575_v1  ;;  %v12576_v26 = vmax.f32 %v5581_v51, %v5582_v21  ;;  %v5607_v23 = vmax.f32 %v5605_v53, %v5606_v44 }
 0xd13   : > { %v5613_v25 = vrot.slane %v5612_v37, 4  ;;  %v5601_v59 = vrot.slane %v5600_v50, 2  ;;  %v12580_v49 = vmax.f32 %v5588_v28, %v5589_v0  ;;  %v5596_v48 = vrot.slane %v5595_v20, 1 }
 0xd14   : > { %13720 = vst [vmem:[#allocation55_spill] sm:$0xff] %v12576_v26  ;;  %v5620_v14 = vrot.slane %v5619_v52, 4  ;;  %v5608_v30 = vrot.slane %v5607_v23, 2  ;;  %v13722_v19 = vcombine.high %v12099_v11, %v12099_v11  ;;  %v5633_v51 = vsel %vm5324_vm6, %v12105_v16, -inf }
 0xd15   : > { %13721 = vst [vmem:[#allocation56_spill] sm:$0xff] %v12580_v49  ;;  %v5614_v31 = vmax.f32 %v5612_v37, %v5613_v25  ;;  %v5602_v36 = vmax.f32 %v5600_v50, %v5601_v59  ;;  %v12588_v1 = vmax.f32 %v5595_v20, %v5596_v48  ;;  %v5634_v33 = vrot.slane %v5633_v51, 4 }
 0xd16   : > { %v5626_v17 = vsel %vm5324_vm6, %v13722_v19, -inf  ;;  %v5621_v53 = vmax.f32 %v5619_v52, %v5620_v14  ;;  %v5609_v21 = vmax.f32 %v5607_v23, %v5608_v30  ;;  %v13724_v50 = vcombine.high %v12105_v16, %v12105_v16 }
 0xd17   : > { %13723 = vst [vmem:[#allocation57_spill] sm:$0xff] %v12588_v1  ;;  %v5615_v44 = vrot.slane %v5614_v31, 2  ;;  %v5627_v61 = vrot.slane %v5626_v17, 4  ;;  %v5603_v28 = vrot.slane %v5602_v36, 1  ;;  %v5635_v20 = vmax.f32 %v5633_v51, %v5634_v33 }
 0xd18   : > { %v5640_v37 = vsel %vm5324_vm6, %v13724_v50, -inf  ;;  %v5622_v11 = vrot.slane %v5621_v53, 2  ;;  %v5610_v49 = vrot.slane %v5609_v21, 1  ;;  %v5647_v52 = vsel %vm5324_vm6, %v12112_v2, -inf }
 0xd19   : > { %v5616_v0 = vmax.f32 %v5614_v31, %v5615_v44  ;;  %v5628_v25 = vmax.f32 %v5626_v17, %v5627_v61  ;;  %v5641_v59 = vrot.slane %v5640_v37, 4  ;;  %v12594_v19 = vmax.f32 %v5602_v36, %v5603_v28 }
 0xd1a   : > { %v5623_v14 = vmax.f32 %v5621_v53, %v5622_v11  ;;  %v12598_v1 = vmax.f32 %v5609_v21, %v5610_v49  ;;  %v5636_v16 = vrot.slane %v5635_v20, 2  ;;  %v5648_v26 = vrot.slane %v5647_v52, 4 }
 0xd1b   : > { %13725 = vst [vmem:[#allocation58_spill] sm:$0xff] %v12594_v19  ;;  %v5617_v48 = vrot.slane %v5616_v0, 1  ;;  %v5629_v23 = vrot.slane %v5628_v25, 2  ;;  %v5642_v30 = vmax.f32 %v5640_v37, %v5641_v59  ;;  %v13726_v31 = vcombine.high %v12112_v2, %v12112_v2 }
 0xd1c   : > { %v5624_v44 = vrot.slane %v5623_v14, 1  ;;  %v5637_v28 = vmax.f32 %v5635_v20, %v5636_v16  ;;  %v5649_v33 = vmax.f32 %v5647_v52, %v5648_v26  ;;  %v5661_v53 = vsel %vm5324_vm6, %v12116_v38, -inf }
 0xd1d   : > { %v5654_v17 = vsel %vm5324_vm6, %v13726_v31, -inf  ;;  %v12604_v36 = vmax.f32 %v5616_v0, %v5617_v48  ;;  %v5630_v51 = vmax.f32 %v5628_v25, %v5629_v23  ;;  %v5643_v61 = vrot.slane %v5642_v30, 2 }
 0xd1e   : > { %v5655_v50 = vrot.slane %v5654_v17, 4  ;;  %v12608_v49 = vmax.f32 %v5623_v14, %v5624_v44  ;;  %v5662_v11 = vrot.slane %v5661_v53, 4  ;;  %v5638_v59 = vrot.slane %v5637_v28, 1 }
 0xd1f   : > { %v5631_v21 = vrot.slane %v5630_v51, 1  ;;  %v5644_v37 = vmax.f32 %v5642_v30, %v5643_v61  ;;  %v5650_v2 = vrot.slane %v5649_v33, 2  ;;  %v13727_v0 = vcombine.high %v12116_v38, %v12116_v38 }
 0xd20   : > { %v5656_v19 = vmax.f32 %v5654_v17, %v5655_v50  ;;  %v5663_v20 = vmax.f32 %v5661_v53, %v5662_v11  ;;  %v12616_v23 = vmax.f32 %v5637_v28, %v5638_v59  ;;  %v5675_v30 = vsel %vm5324_vm6, %v12125_v62, -inf }
 0xd21   : > { %v5668_v25 = vsel %vm5324_vm6, %v13727_v0, -inf  ;;  %v12614_v48 = vmax.f32 %v5630_v51, %v5631_v21  ;;  %v5645_v26 = vrot.slane %v5644_v37, 1  ;;  %v5651_v14 = vmax.f32 %v5649_v33, %v5650_v2 }
 0xd22   : > { %v5669_v52 = vrot.slane %v5668_v25, 4  ;;  %13728 = vst [vmem:[#allocation59_spill] sm:$0xff] %v12616_v23  ;;  %v5657_v16 = vrot.slane %v5656_v19, 2  ;;  %v5664_v17 = vrot.slane %v5663_v20, 2  ;;  %v5676_v61 = vrot.slane %v5675_v30, 4 }
 0xd23   : > { %v12620_v31 = vmax.f32 %v5644_v37, %v5645_v26  ;;  %v5652_v38 = vrot.slane %v5651_v14, 1  ;;  %v13730_v51 = vcombine.high %v12125_v62, %v12125_v62  ;;  %v5689_v28 = vsel %vm5324_vm6, %v12129_v12, -inf }
 0xd24   : > { %v5670_v44 = vmax.f32 %v5668_v25, %v5669_v52  ;;  %v5658_v50 = vmax.f32 %v5656_v19, %v5657_v16  ;;  %v5665_v33 = vmax.f32 %v5663_v20, %v5664_v17  ;;  %v5677_v11 = vmax.f32 %v5675_v30, %v5676_v61 }
 0xd25   : > { %13729 = vst [vmem:[#allocation60_spill] sm:$0xff] %v12620_v31  ;;  %v5682_v53 = vsel %vm5324_vm6, %v13730_v51, -inf  ;;  %v12628_v2 = vmax.f32 %v5651_v14, %v5652_v38  ;;  %v5690_v0 = vrot.slane %v5689_v28, 4  ;;  %v13732_v25 = vcombine.high %v12129_v12, %v12129_v12 }
 0xd26   : > { %v5671_v21 = vrot.slane %v5670_v44, 2  ;;  %v5683_v59 = vrot.slane %v5682_v53, 4  ;;  %v5659_v37 = vrot.slane %v5658_v50, 1  ;;  %v5666_v26 = vrot.slane %v5665_v33, 1 }
 0xd27   : > { %13731 = vst [vmem:[#allocation61_spill] sm:$0xff] %v12628_v2  ;;  %v5696_v19 = vsel %vm5324_vm6, %v13732_v25, -inf  ;;  %v5678_v52 = vrot.slane %v5677_v11, 2  ;;  %v5691_v31 = vmax.f32 %v5689_v28, %v5690_v0  ;;  %v5703_v30 = vsel %vm5324_vm6, %v12136_v3, -inf }
 0xd28   : > { %v5672_v62 = vmax.f32 %v5670_v44, %v5671_v21  ;;  %v5684_v16 = vmax.f32 %v5682_v53, %v5683_v59  ;;  %v12634_v51 = vmax.f32 %v5658_v50, %v5659_v37  ;;  %v5697_v20 = vrot.slane %v5696_v19, 4 }
 0xd29   : > { %v12638_v14 = vmax.f32 %v5665_v33, %v5666_v26  ;;  %v5679_v61 = vmax.f32 %v5677_v11, %v5678_v52  ;;  %v5692_v2 = vrot.slane %v5691_v31, 2  ;;  %v5704_v23 = vrot.slane %v5703_v30, 4 }
 0xd2a   : > { %13733 = vst [vmem:[#allocation62_spill] sm:$0xff] %v12634_v51  ;;  %v5673_v17 = vrot.slane %v5672_v62, 1  ;;  %v5685_v38 = vrot.slane %v5684_v16, 2  ;;  %v5698_v12 = vmax.f32 %v5696_v19, %v5697_v20  ;;  %v13735_v44 = vcombine.high %v12136_v3, %v12136_v3 }
 0xd2b   : > { %13734 = vst [vmem:[#allocation63_spill] sm:$0xff] %v12638_v14  ;;  %v5680_v28 = vrot.slane %v5679_v61, 1  ;;  %v5693_v37 = vmax.f32 %v5691_v31, %v5692_v2  ;;  %v5705_v33 = vmax.f32 %v5703_v30, %v5704_v23  ;;  %v5717_v11 = vsel %vm5324_vm6, %v12146_v39, -inf }
 0xd2c   : > { %v5710_v53 = vsel %vm5324_vm6, %v13735_v44, -inf  ;;  %v12644_v50 = vmax.f32 %v5672_v62, %v5673_v17  ;;  %v5686_v21 = vmax.f32 %v5684_v16, %v5685_v38  ;;  %v5699_v0 = vrot.slane %v5698_v12, 2 }
 0xd2d   : > { %v5711_v59 = vrot.slane %v5710_v53, 4  ;;  %v12648_v25 = vmax.f32 %v5679_v61, %v5680_v28  ;;  %v5718_v52 = vrot.slane %v5717_v11, 4  ;;  %v5694_v20 = vrot.slane %v5693_v37, 1 }
 0xd2e   : > { %v5687_v19 = vrot.slane %v5686_v21, 1  ;;  %v5700_v3 = vmax.f32 %v5698_v12, %v5699_v0  ;;  %v5706_v14 = vrot.slane %v5705_v33, 2  ;;  %v13736_v62 = vcombine.high %v12146_v39, %v12146_v39 }
 0xd2f   : > { %v5712_v26 = vmax.f32 %v5710_v53, %v5711_v59  ;;  %v5719_v23 = vmax.f32 %v5717_v11, %v5718_v52  ;;  %v12656_v30 = vmax.f32 %v5693_v37, %v5694_v20  ;;  %v5731_v44 = vsel %vm5324_vm6, %v12153_v13, -inf }
 0xd30   : > { %v5724_v16 = vsel %vm5324_vm6, %v13736_v62, -inf  ;;  %v12654_v17 = vmax.f32 %v5686_v21, %v5687_v19  ;;  %v5701_v61 = vrot.slane %v5700_v3, 1  ;;  %v5707_v38 = vmax.f32 %v5705_v33, %v5706_v14 }
 0xd31   : > { %v5713_v31 = vrot.slane %v5712_v26, 2  ;;  %v5725_v2 = vrot.slane %v5724_v16, 4  ;;  %13737 = vst [vmem:[#allocation64_spill] sm:$0xff] %v12656_v30  ;;  %v5720_v12 = vrot.slane %v5719_v23, 2  ;;  %v5732_v59 = vrot.slane %v5731_v44, 4 }
 0xd32   : > { %v12660_v0 = vmax.f32 %v5700_v3, %v5701_v61  ;;  %v5708_v39 = vrot.slane %v5707_v38, 1  ;;  %v13739_v21 = vcombine.high %v12153_v13, %v12153_v13  ;;  %v5745_v37 = vsel %vm5324_vm6, %v12157_v57, -inf }
 0xd33   : > { %v5714_v53 = vmax.f32 %v5712_v26, %v5713_v31  ;;  %v5726_v28 = vmax.f32 %v5724_v16, %v5725_v2  ;;  %v5721_v14 = vmax.f32 %v5719_v23, %v5720_v12  ;;  %v5733_v52 = vmax.f32 %v5731_v44, %v5732_v59 }
 0xd34   : > { %13738 = vst [vmem:[#allocation65_spill] sm:$0xff] %v12660_v0  ;;  %v5738_v11 = vsel %vm5324_vm6, %v13739_v21, -inf  ;;  %v12668_v20 = vmax.f32 %v5707_v38, %v5708_v39  ;;  %v5746_v62 = vrot.slane %v5745_v37, 4  ;;  %v13741_v3 = vcombine.high %v12157_v57, %v12157_v57 }
 0xd35   : > { %v5715_v19 = vrot.slane %v5714_v53, 1  ;;  %v5727_v33 = vrot.slane %v5726_v28, 2  ;;  %v5739_v26 = vrot.slane %v5738_v11, 4  ;;  %v5722_v13 = vrot.slane %v5721_v14, 1 }
 0xd36   : > { %13740 = vst [vmem:[#allocation66_spill] sm:$0xff] %v12668_v20  ;;  %v5752_v16 = vsel %vm5324_vm6, %v13741_v3, -inf  ;;  %v5734_v61 = vrot.slane %v5733_v52, 2  ;;  %v5747_v0 = vmax.f32 %v5745_v37, %v5746_v62  ;;  %v5759_v23 = vsel %vm5324_vm6, %v12164_v29, -inf }
 0xd37   : > { %v12674_v31 = vmax.f32 %v5714_v53, %v5715_v19  ;;  %v5728_v2 = vmax.f32 %v5726_v28, %v5727_v33  ;;  %v5740_v21 = vmax.f32 %v5738_v11, %v5739_v26  ;;  %v5753_v30 = vrot.slane %v5752_v16, 4 }
 0xd38   : > { %v12678_v38 = vmax.f32 %v5721_v14, %v5722_v13  ;;  %v5735_v12 = vmax.f32 %v5733_v52, %v5734_v61  ;;  %v5760_v59 = vrot.slane %v5759_v23, 4  ;;  %v5748_v57 = vrot.slane %v5747_v0, 2 }
 0xd39   : > { %13742 = vst [vmem:[#allocation67_spill] sm:$0xff] %v12674_v31  ;;  %v5729_v44 = vrot.slane %v5728_v2, 1  ;;  %v5741_v39 = vrot.slane %v5740_v21, 2  ;;  %v5754_v20 = vmax.f32 %v5752_v16, %v5753_v30  ;;  %v13743_v53 = vcombine.high %v12164_v29, %v12164_v29 }
 0xd3a   : > { %v5736_v11 = vrot.slane %v5735_v12, 1  ;;  %v5761_v37 = vmax.f32 %v5759_v23, %v5760_v59  ;;  %v5749_v62 = vmax.f32 %v5747_v0, %v5748_v57  ;;  %v5773_v52 = vsel %vm5324_vm6, %v12168_v58, -inf }
 0xd3b   : > { %v5766_v28 = vsel %vm5324_vm6, %v13743_v53, -inf  ;;  %v12684_v19 = vmax.f32 %v5728_v2, %v5729_v44  ;;  %v5742_v26 = vmax.f32 %v5740_v21, %v5741_v39  ;;  %v5755_v14 = vrot.slane %v5754_v20, 2 }
 0xd3c   : > { %v5767_v33 = vrot.slane %v5766_v28, 4  ;;  %v12688_v3 = vmax.f32 %v5735_v12, %v5736_v11  ;;  %v5762_v13 = vrot.slane %v5761_v37, 2  ;;  %v5774_v16 = vrot.slane %v5773_v52, 4 }
 0xd3d   : > { %v5743_v61 = vrot.slane %v5742_v26, 1  ;;  %v5750_v29 = vrot.slane %v5749_v62, 1  ;;  %v5756_v31 = vmax.f32 %v5754_v20, %v5755_v14  ;;  %v13744_v2 = vcombine.high %v12168_v58, %v12168_v58 }
 0xd3e   : > { %v5768_v30 = vmax.f32 %v5766_v28, %v5767_v33  ;;  %v5763_v44 = vmax.f32 %v5761_v37, %v5762_v13  ;;  %v5775_v0 = vmax.f32 %v5773_v52, %v5774_v16  ;;  %v5787_v53 = vsel %vm5324_vm6, %v12177_v18, -inf }
 0xd3f   : > { %v5780_v23 = vsel %vm5324_vm6, %v13744_v2, -inf  ;;  %v12694_v39 = vmax.f32 %v5742_v26, %v5743_v61  ;;  %v12696_v57 = vmax.f32 %v5749_v62, %v5750_v29  ;;  %v5757_v12 = vrot.slane %v5756_v31, 1 }
 0xd40   : > { %v5769_v21 = vrot.slane %v5768_v30, 2  ;;  %v5781_v59 = vrot.slane %v5780_v23, 4  ;;  %v5764_v28 = vrot.slane %v5763_v44, 1  ;;  %v5776_v20 = vrot.slane %v5775_v0, 2 }
 0xd41   : > { %13745 = vst [vmem:[#allocation68_spill] sm:$0xff] %v12696_v57  ;;  %v12700_v14 = vmax.f32 %v5756_v31, %v5757_v12  ;;  %v5788_v58 = vrot.slane %v5787_v53, 4  ;;  %v13747_v37 = vcombine.high %v12177_v18, %v12177_v18  ;;  %v5801_v26 = vsel %vm5324_vm6, %v12181_v54, -inf }
 0xd42   : > { %v5770_v11 = vmax.f32 %v5768_v30, %v5769_v21  ;;  %v5782_v33 = vmax.f32 %v5780_v23, %v5781_v59  ;;  %v12708_v62 = vmax.f32 %v5763_v44, %v5764_v28  ;;  %v5777_v16 = vmax.f32 %v5775_v0, %v5776_v20 }
 0xd43   : > { %13746 = vst [vmem:[#allocation69_spill] sm:$0xff] %v12700_v14  ;;  %v5794_v52 = vsel %vm5324_vm6, %v13747_v37, -inf  ;;  %v5789_v29 = vmax.f32 %v5787_v53, %v5788_v58  ;;  %v5802_v2 = vrot.slane %v5801_v26, 4  ;;  %v13749_v31 = vcombine.high %v12181_v54, %v12181_v54 }
 0xd44   : > { %13748 = vst [vmem:[#allocation70_spill] sm:$0xff] %v12708_v62  ;;  %v5771_v13 = vrot.slane %v5770_v11, 1  ;;  %v5783_v61 = vrot.slane %v5782_v33, 2  ;;  %v5795_v30 = vrot.slane %v5794_v52, 4  ;;  %v5778_v18 = vrot.slane %v5777_v16, 1 }
 0xd45   : > { %v5808_v23 = vsel %vm5324_vm6, %v13749_v31, -inf  ;;  %v5790_v37 = vrot.slane %v5789_v29, 2  ;;  %v5803_v44 = vmax.f32 %v5801_v26, %v5802_v2  ;;  %v5815_v0 = vsel %vm5324_vm6, %v12188_v6, -inf }
 0xd46   : > { %v12714_v21 = vmax.f32 %v5770_v11, %v5771_v13  ;;  %v5784_v59 = vmax.f32 %v5782_v33, %v5783_v61  ;;  %v5809_v12 = vrot.slane %v5808_v23, 4  ;;  %v5796_v14 = vmax.f32 %v5794_v52, %v5795_v30 }
 0xd47   : > { %v12718_v28 = vmax.f32 %v5777_v16, %v5778_v18  ;;  %v5816_v58 = vrot.slane %v5815_v0, 4  ;;  %v5791_v62 = vmax.f32 %v5789_v29, %v5790_v37  ;;  %v5804_v57 = vrot.slane %v5803_v44, 2 }
 0xd48   : > { %13750 = vst [vmem:[#allocation71_spill] sm:$0xff] %v12714_v21  ;;  %v5785_v53 = vrot.slane %v5784_v59, 1  ;;  %v5810_v20 = vmax.f32 %v5808_v23, %v5809_v12  ;;  %v5797_v54 = vrot.slane %v5796_v14, 2  ;;  %v13752_v11 = vcombine.high %v12188_v6, %v12188_v6 }
 0xd49   : > { %13751 = vst [vmem:[#allocation72_spill] sm:$0xff] %v12718_v28  ;;  %v5817_v26 = vmax.f32 %v5815_v0, %v5816_v58  ;;  %v5792_v30 = vrot.slane %v5791_v62, 1  ;;  %v5805_v16 = vmax.f32 %v5803_v44, %v5804_v57  ;;  %v5829_v31 = vsel %vm5324_vm6, %v12198_v43, -inf }
 0xd4a   : > { %v5822_v33 = vsel %vm5324_vm6, %v13752_v11, -inf  ;;  %v12724_v13 = vmax.f32 %v5784_v59, %v5785_v53  ;;  %v5811_v52 = vrot.slane %v5810_v20, 2  ;;  %v5798_v2 = vmax.f32 %v5796_v14, %v5797_v54 }
 0xd4b   : > { %v5823_v61 = vrot.slane %v5822_v33, 4  ;;  %v5818_v29 = vrot.slane %v5817_v26, 2  ;;  %v5830_v12 = vrot.slane %v5829_v31, 4  ;;  %v12728_v6 = vmax.f32 %v5791_v62, %v5792_v30 }
 0xd4c   : > { %13753 = vst [vmem:[#allocation73_spill] sm:$0xff] %v12724_v13  ;;  %v5812_v23 = vmax.f32 %v5810_v20, %v5811_v52  ;;  %v5799_v37 = vrot.slane %v5798_v2, 1  ;;  %v5806_v59 = vrot.slane %v5805_v16, 1  ;;  %v13755_v0 = vcombine.high %v12198_v43, %v12198_v43 }
 0xd4d   : > { %v5824_v18 = vmax.f32 %v5822_v33, %v5823_v61  ;;  %13754 = vst [vmem:[#allocation74_spill] sm:$0xff] %v12728_v6  ;;  %v5819_v57 = vmax.f32 %v5817_v26, %v5818_v29  ;;  %v5831_v58 = vmax.f32 %v5829_v31, %v5830_v12  ;;  %v13758_v33 = vld [vmem:[#allocation16_spill] sm:$0xff] }
 0xd4e   : > { %v5836_v53 = vsel %vm5324_vm6, %v13755_v0, -inf  ;;  %v5813_v14 = vrot.slane %v5812_v23, 1  ;;  %v12734_v54 = vmax.f32 %v5798_v2, %v5799_v37  ;;  %v12736_v20 = vmax.f32 %v5805_v16, %v5806_v59 }
 0xd4f   : > { %v5825_v44 = vrot.slane %v5824_v18, 2  ;;  %v5837_v11 = vrot.slane %v5836_v53, 4  ;;  %v5843_v62 = vsel %vm5324_vm6, %v13758_v33, -inf  ;;  %v5820_v43 = vrot.slane %v5819_v57, 1 }
 0xd50   : > { %13756 = vst [vmem:[#allocation75_spill] sm:$0xff] %v12734_v54  ;;  %13757 = vst [vmem:[#allocation76_spill] sm:$0xff] %v12736_v20  ;;  %v12742_v52 = vmax.f32 %v5812_v23, %v5813_v14  ;;  %v5832_v30 = vrot.slane %v5831_v58, 2  ;;  %v5844_v2 = vrot.slane %v5843_v62, 4  ;;  %v13760_v16 = vcombine.high %v13758_v33, %v13758_v33  ;;  %v13761_v23 = vld [vmem:[#allocation17_spill] sm:$0xff] }
 0xd51   : > { %v5826_v61 = vmax.f32 %v5824_v18, %v5825_v44  ;;  %v5838_v26 = vmax.f32 %v5836_v53, %v5837_v11  ;;  %v5857_v29 = vsel %vm5324_vm6, %v13761_v23, -inf  ;;  %v12757_v18 = vmax.f32 %v5819_v57, %v5820_v43 }
 0xd52   : > { %13759 = vst [vmem:[#allocation16_spill] sm:$0xff] %v12742_v52  ;;  %v5850_v31 = vsel %vm5324_vm6, %v13760_v16, -inf  ;;  %v5833_v37 = vmax.f32 %v5831_v58, %v5832_v30 }
 0xd53   : > { %13762 = vst [vmem:[#allocation17_spill] sm:$0xff] %v12757_v18  ;;  %v5827_v12 = vrot.slane %v5826_v61, 1  ;;  %v5851_v59 = vrot.slane %v5850_v31, 4 }
 0xd54   : > { %8363 = shalt.err (!%p8360_p7)
}
 0xd55   : > { %s8364_s23 = scalar_lea.hbm %s12747_s16, 4096  ;;  %s8368_s14 = scalar_lea.hbm %s13434_s6, 8192 }
 0xd56   : > { %p8365_p8 = scmp.ne.s32.totalorder %s12747_s16, %s8364_s23  ;;  %p8369_p1 = scmp.lt.u32.totalorder %s12747_s16, %s13434_s6 }
 0xd57   : > { %p8370_p0 = scmp.lt.u32.totalorder %s8368_s14, %s8364_s23  ;;  %p8372_p6 = scmp.lt.u32.totalorder %s8364_s23, %s12747_s16 }
 0xd58   : > { %p8366_p11 = pnand %p8365_p8, %p13763_p9 }
 0xd59   : > { %p8371_p5 = por %p8370_p0, %p8369_p1 }
 0xd5a   : > { %p8367_p13 = pneg %p8366_p11 }
 0xd5b   : > { %p8373_p10 = por %p8372_p6, %p8371_p5 }
 0xd5d   : > { %p8374_p12 = pnand %p8373_p10, %p8367_p13 }
 0xd5f   : > { %8377 = shalt.err (!%p8374_p12)
}
 0xd60   : > { %s8458_s20 = smov 128   ;;  %s8459_s15 = smov 8   ;;  %v5839_v0 = vrot.slane %v5838_v26, 2  ;;  %v5845_v53 = vmax.f32 %v5843_v62, %v5844_v2  ;;  %v5858_v14 = vrot.slane %v5857_v29, 4  ;;  %v13764_v57 = vcombine.high %v13761_v23, %v13761_v23  ;;  %v13766_v52 = vld [vmem:[#allocation14_spill] sm:$0xff]  ;;  %v13884_v7 = vld [vmem:[#allocation68_spill] sm:$0xff] }
 0xd61   : > { %8245 = dma.vmem_to_hbm [thread:$0]  (%p13763_p9), %s12749_s17, 4096, %s12747_s16, %s6429_s13, %s8458_s20, %s8458_s20, %s8459_s15   ;;  %v12790_v58 = vmax.f32 %v5826_v61, %v5827_v12  ;;  %v5834_v11 = vrot.slane %v5833_v37, 1  ;;  %v5852_v33 = vmax.f32 %v5850_v31, %v5851_v59  ;;  %v5871_v20 = vsel %vm5324_vm6, %v13766_v52, -inf }
 0xd62   : > { %v5864_v44 = vsel %vm5324_vm6, %v13764_v57, -inf  ;;  %v5840_v30 = vmax.f32 %v5838_v26, %v5839_v0  ;;  %v5846_v16 = vrot.slane %v5845_v53, 2  ;;  %v5859_v18 = vmax.f32 %v5857_v29, %v5858_v14  ;;  %v13770_v57 = vld [vmem:[#allocation18_spill] sm:$0xff]  ;;  %s6576_s17 = sshll.u32 %s11829_s29, 6  ;;  %s6783_s13 = sshll.u32 %s8522_s28, 10 }
 0xd63   : > { %13765 = vst [vmem:[#allocation77_spill] sm:$0xff] %v12790_v58  ;;  %v5865_v43 = vrot.slane %v5864_v44, 4  ;;  %v12794_v54 = vmax.f32 %v5833_v37, %v5834_v11  ;;  %v5853_v62 = vrot.slane %v5852_v33, 2  ;;  %v5872_v6 = vrot.slane %v5871_v20, 4  ;;  %s13290_s16 = scalar_lea.vmem [#allocation7], %s6576_s17  ;;  %s13360_s23 = scalar_lea.hbm %s13435_s7, %s6783_s13 }
 0xd64   : > { %v5841_v13 = vrot.slane %v5840_v30, 1  ;;  %v5847_v23 = vmax.f32 %v5845_v53, %v5846_v16  ;;  %v5860_v28 = vrot.slane %v5859_v18, 2  ;;  %v13768_v61 = vcombine.high %v13766_v52, %v13766_v52  ;;  %s6463_s21 = sshll.u32 %s13290_s16, 4  ;;  %s6434_s8 = scalar_lea.sflag [#allocation8], %s11829_s29  ;;  %s13362_s21 = int_to_ptr.vmem [resolvable:$true] %s6463_s21 }
 0xd65   : > { %13767 = vst [vmem:[#allocation14_spill] sm:$0xff] %v12794_v54  ;;  %v5866_v2 = vmax.f32 %v5864_v44, %v5865_v43  ;;  %v5854_v12 = vmax.f32 %v5852_v33, %v5853_v62  ;;  %v5873_v59 = vmax.f32 %v5871_v20, %v5872_v6  ;;  %v5885_v44 = vsel %vm5324_vm6, %v13770_v57, -inf  ;;  %s8378_s9 = scalar_lea.vmem %s13362_s21, 1024  ;;  %s8460_s14 = smov [#allocation7]  }
 0xd66   : > { %v5878_v31 = vsel %vm5324_vm6, %v13768_v61, -inf  ;;  %v12800_v0 = vmax.f32 %v5840_v30, %v5841_v13  ;;  %v5848_v14 = vrot.slane %v5847_v23, 1  ;;  %v5861_v37 = vmax.f32 %v5859_v18, %v5860_v28  ;;  %v13775_v61 = vld [vmem:[#allocation15_spill] sm:$0xff]  ;;  %p8379_p2 = scmp.ne.s32.totalorder %s13362_s21, %s8378_s9  ;;  %s8382_s18 = sshll.u32 %s8460_s14, 4  ;;  %s8383_s18 = int_to_ptr.vmem [resolvable:$false] %s8382_s18 }
 0xd67   : > { %v5867_v26 = vrot.slane %v5866_v2, 2  ;;  %v5879_v29 = vrot.slane %v5878_v31, 4  ;;  %v5855_v11 = vrot.slane %v5854_v12, 1  ;;  %v5874_v53 = vrot.slane %v5873_v59, 2  ;;  %s8384_s19 = scalar_lea.vmem %s8383_s18, 2048  ;;  %p8385_p7 = scmp.lt.s32.totalorder %s13362_s21, %s8383_s18 }
 0xd68   : > { %13769 = vst [vmem:[#allocation78_spill] sm:$0xff] %v12800_v0  ;;  %v12804_v58 = vmax.f32 %v5847_v23, %v5848_v14  ;;  %v5862_v52 = vrot.slane %v5861_v37, 1  ;;  %v5886_v54 = vrot.slane %v5885_v44, 4  ;;  %v13772_v33 = vcombine.high %v13770_v57, %v13770_v57  ;;  %p8380_p3 = pnand %p8379_p2, %p13763_p9  ;;  %p8386_p8 = scmp.lt.s32.totalorder %s8384_s19, %s8378_s9 }
 0xd69   : > { %v5868_v43 = vmax.f32 %v5866_v2, %v5867_v26  ;;  %v5880_v16 = vmax.f32 %v5878_v31, %v5879_v29  ;;  %v12810_v13 = vmax.f32 %v5854_v12, %v5855_v11  ;;  %v5875_v28 = vmax.f32 %v5873_v59, %v5874_v53  ;;  %v13778_v11 = vld [vmem:[#allocation19_spill] sm:$0xff] }
 0xd6a   : > { %13771 = vst [vmem:[#allocation18_spill] sm:$0xff] %v12804_v58  ;;  %v5892_v6 = vsel %vm5324_vm6, %v13772_v33, -inf  ;;  %v12812_v30 = vmax.f32 %v5861_v37, %v5862_v52  ;;  %v5887_v62 = vmax.f32 %v5885_v44, %v5886_v54  ;;  %v5899_v23 = vsel %vm5324_vm6, %v13775_v61, -inf  ;;  %p8381_p4 = pneg %p8380_p3  ;;  %p8387_p11 = por %p8386_p8, %p8385_p7 }
 0xd6b   : > { %13773 = vst [vmem:[#allocation79_spill] sm:$0xff] %v12810_v13  ;;  %v5869_v20 = vrot.slane %v5868_v43, 1  ;;  %v5881_v18 = vrot.slane %v5880_v16, 2  ;;  %v5893_v2 = vrot.slane %v5892_v6, 4  ;;  %v5876_v26 = vrot.slane %v5875_v28, 1 }
 0xd6c   : > { %13774 = vst [vmem:[#allocation80_spill] sm:$0xff] %v12812_v30  ;;  %v5900_v14 = vrot.slane %v5899_v23, 4  ;;  %v5888_v57 = vrot.slane %v5887_v62, 2  ;;  %v13777_v12 = vcombine.high %v13775_v61, %v13775_v61  ;;  %v5913_v37 = vsel %vm5324_vm6, %v13778_v11, -inf  ;;  %p8388_p13 = pnand %p8387_p11, %p8381_p4 }
 0xd6d   : > { %v12816_v31 = vmax.f32 %v5868_v43, %v5869_v20  ;;  %v5882_v29 = vmax.f32 %v5880_v16, %v5881_v18  ;;  %v5894_v58 = vmax.f32 %v5892_v6, %v5893_v2  ;;  %v12824_v54 = vmax.f32 %v5875_v28, %v5876_v26  ;;  %v13782_v26 = vld [vmem:[#allocation13_spill] sm:$0xff] }
 0xd6e   : > { %v5906_v59 = vsel %vm5324_vm6, %v13777_v12, -inf  ;;  %v5901_v53 = vmax.f32 %v5899_v23, %v5900_v14  ;;  %v5889_v43 = vmax.f32 %v5887_v62, %v5888_v57  ;;  %v5914_v20 = vrot.slane %v5913_v37, 4 }
 0xd6f   : > { %13776 = vst [vmem:[#allocation15_spill] sm:$0xff] %v12816_v31  ;;  %13779 = vst [vmem:[#allocation19_spill] sm:$0xff] %v12824_v54  ;;  %v5883_v44 = vrot.slane %v5882_v29, 1  ;;  %v5907_v52 = vrot.slane %v5906_v59, 4  ;;  %v5895_v33 = vrot.slane %v5894_v58, 2  ;;  %v13780_v16 = vcombine.high %v13778_v11, %v13778_v11 }
 0xd70   : > { %v5902_v2 = vrot.slane %v5901_v53, 2  ;;  %v5890_v31 = vrot.slane %v5889_v43, 1  ;;  %v5915_v28 = vmax.f32 %v5913_v37, %v5914_v20  ;;  %v5927_v23 = vsel %vm5324_vm6, %v13782_v26, -inf }
 0xd71   : > { %v5920_v6 = vsel %vm5324_vm6, %v13780_v16, -inf  ;;  %v12830_v18 = vmax.f32 %v5882_v29, %v5883_v44  ;;  %v5908_v61 = vmax.f32 %v5906_v59, %v5907_v52  ;;  %v5896_v30 = vmax.f32 %v5894_v58, %v5895_v33  ;;  %v13786_v16 = vld [vmem:[#allocation12_spill] sm:$0xff] }
 0xd72   : > { %v5921_v12 = vrot.slane %v5920_v6, 4  ;;  %v5903_v14 = vmax.f32 %v5901_v53, %v5902_v2  ;;  %v5928_v54 = vrot.slane %v5927_v23, 4  ;;  %v12834_v13 = vmax.f32 %v5889_v43, %v5890_v31 }
 0xd73   : > { %13781 = vst [vmem:[#allocation81_spill] sm:$0xff] %v12830_v18  ;;  %v5909_v62 = vrot.slane %v5908_v61, 2  ;;  %v5897_v11 = vrot.slane %v5896_v30, 1  ;;  %v5916_v0 = vrot.slane %v5915_v28, 2  ;;  %v13784_v29 = vcombine.high %v13782_v26, %v13782_v26 }
 0xd74   : > { %v5922_v57 = vmax.f32 %v5920_v6, %v5921_v12  ;;  %13783 = vst [vmem:[#allocation13_spill] sm:$0xff] %v12834_v13  ;;  %v5904_v44 = vrot.slane %v5903_v14, 1  ;;  %v5929_v37 = vmax.f32 %v5927_v23, %v5928_v54  ;;  %v5941_v6 = vsel %vm5324_vm6, %v13786_v16, -inf }
 0xd75   : > { %v5934_v59 = vsel %vm5324_vm6, %v13784_v29, -inf  ;;  %v5910_v52 = vmax.f32 %v5908_v61, %v5909_v62  ;;  %v12840_v33 = vmax.f32 %v5896_v30, %v5897_v11  ;;  %v5917_v20 = vmax.f32 %v5915_v28, %v5916_v0  ;;  %v13791_v29 = vld [vmem:[#allocation20_spill] sm:$0xff] }
 0xd76   : > { %v5923_v58 = vrot.slane %v5922_v57, 2  ;;  %v5935_v53 = vrot.slane %v5934_v59, 4  ;;  %v12844_v31 = vmax.f32 %v5903_v14, %v5904_v44  ;;  %v5930_v12 = vrot.slane %v5929_v37, 2 }
 0xd77   : > { %13785 = vst [vmem:[#allocation82_spill] sm:$0xff] %v12840_v33  ;;  %v5911_v43 = vrot.slane %v5910_v52, 1  ;;  %v5918_v13 = vrot.slane %v5917_v20, 1  ;;  %v5942_v18 = vrot.slane %v5941_v6, 4  ;;  %v13788_v61 = vcombine.high %v13786_v16, %v13786_v16 }
 0xd78   : > { %13787 = vst [vmem:[#allocation12_spill] sm:$0xff] %v12844_v31  ;;  %v5924_v2 = vmax.f32 %v5922_v57, %v5923_v58  ;;  %v5936_v26 = vmax.f32 %v5934_v59, %v5935_v53  ;;  %v5931_v28 = vmax.f32 %v5929_v37, %v5930_v12  ;;  %v5955_v57 = vsel %vm5324_vm6, %v13791_v29, -inf }
 0xd79   : > { %v5948_v54 = vsel %vm5324_vm6, %v13788_v61, -inf  ;;  %v12850_v30 = vmax.f32 %v5910_v52, %v5911_v43  ;;  %v12852_v62 = vmax.f32 %v5917_v20, %v5918_v13  ;;  %v5943_v11 = vmax.f32 %v5941_v6, %v5942_v18  ;;  %v13794_v43 = vld [vmem:[#allocation21_spill] sm:$0xff] }
 0xd7a   : > { %v5925_v0 = vrot.slane %v5924_v2, 1  ;;  %v5949_v23 = vrot.slane %v5948_v54, 4  ;;  %v5937_v14 = vrot.slane %v5936_v26, 2  ;;  %v5932_v59 = vrot.slane %v5931_v28, 1 }
 0xd7b   : > { %13789 = vst [vmem:[#allocation83_spill] sm:$0xff] %v12850_v30  ;;  %13790 = vst [vmem:[#allocation84_spill] sm:$0xff] %v12852_v62  ;;  %v5956_v53 = vrot.slane %v5955_v57, 4  ;;  %v5944_v31 = vrot.slane %v5943_v11, 2  ;;  %v13793_v52 = vcombine.high %v13791_v29, %v13791_v29  ;;  %v5969_v13 = vsel %vm5324_vm6, %v13794_v43, -inf }
 0xd7c   : > { %v12856_v44 = vmax.f32 %v5924_v2, %v5925_v0  ;;  %v5950_v58 = vmax.f32 %v5948_v54, %v5949_v23  ;;  %v5938_v16 = vmax.f32 %v5936_v26, %v5937_v14  ;;  %v12864_v20 = vmax.f32 %v5931_v28, %v5932_v59  ;;  %v13798_v59 = vld [vmem:[#allocation22_spill] sm:$0xff] }
 0xd7d   : > { %v5962_v37 = vsel %vm5324_vm6, %v13793_v52, -inf  ;;  %v5957_v6 = vmax.f32 %v5955_v57, %v5956_v53  ;;  %v5945_v61 = vmax.f32 %v5943_v11, %v5944_v31  ;;  %v5970_v0 = vrot.slane %v5969_v13, 4 }
 0xd7e   : > { %13792 = vst [vmem:[#allocation20_spill] sm:$0xff] %v12856_v44  ;;  %13795 = vst [vmem:[#allocation21_spill] sm:$0xff] %v12864_v20  ;;  %v5951_v18 = vrot.slane %v5950_v58, 2  ;;  %v5963_v12 = vrot.slane %v5962_v37, 4  ;;  %v5939_v2 = vrot.slane %v5938_v16, 1  ;;  %v13796_v26 = vcombine.high %v13794_v43, %v13794_v43 }
 0xd7f   : > { %v5958_v14 = vrot.slane %v5957_v6, 2  ;;  %v5946_v62 = vrot.slane %v5945_v61, 1  ;;  %v5971_v28 = vmax.f32 %v5969_v13, %v5970_v0  ;;  %v5983_v57 = vsel %vm5324_vm6, %v13798_v59, -inf }
 0xd80   : > { %v5976_v54 = vsel %vm5324_vm6, %v13796_v26, -inf  ;;  %v5952_v23 = vmax.f32 %v5950_v58, %v5951_v18  ;;  %v5964_v29 = vmax.f32 %v5962_v37, %v5963_v12  ;;  %v12870_v44 = vmax.f32 %v5938_v16, %v5939_v2 }
 0xd81   : > { %v5977_v52 = vrot.slane %v5976_v54, 4  ;;  %v5959_v20 = vmax.f32 %v5957_v6, %v5958_v14  ;;  %v12874_v30 = vmax.f32 %v5945_v61, %v5946_v62  ;;  %v5972_v43 = vrot.slane %v5971_v28, 2  ;;  %v13802_v6 = vld [vmem:[#allocation23_spill] sm:$0xff] }
 0xd82   : > { %13797 = vst [vmem:[#allocation85_spill] sm:$0xff] %v12870_v44  ;;  %v5953_v53 = vrot.slane %v5952_v23, 1  ;;  %v5965_v31 = vrot.slane %v5964_v29, 2  ;;  %v5984_v33 = vrot.slane %v5983_v57, 4  ;;  %v13800_v58 = vcombine.high %v13798_v59, %v13798_v59 }
 0xd83   : > { %v5978_v11 = vmax.f32 %v5976_v54, %v5977_v52  ;;  %13799 = vst [vmem:[#allocation22_spill] sm:$0xff] %v12874_v30  ;;  %v5960_v18 = vrot.slane %v5959_v20, 1  ;;  %v5973_v2 = vmax.f32 %v5971_v28, %v5972_v43  ;;  %v5997_v54 = vsel %vm5324_vm6, %v13802_v6, -inf }
 0xd84   : > { %v5990_v37 = vsel %vm5324_vm6, %v13800_v58, -inf  ;;  %v12880_v16 = vmax.f32 %v5952_v23, %v5953_v53  ;;  %v5966_v13 = vmax.f32 %v5964_v29, %v5965_v31  ;;  %v5985_v0 = vmax.f32 %v5983_v57, %v5984_v33  ;;  %v13807_v58 = vld [vmem:[#allocation24_spill] sm:$0xff] }
 0xd85   : > { %v5979_v12 = vrot.slane %v5978_v11, 2  ;;  %v5991_v26 = vrot.slane %v5990_v37, 4  ;;  %v12884_v62 = vmax.f32 %v5959_v20, %v5960_v18  ;;  %v5998_v52 = vrot.slane %v5997_v54, 4 }
 0xd86   : > { %13801 = vst [vmem:[#allocation86_spill] sm:$0xff] %v12880_v16  ;;  %v5967_v61 = vrot.slane %v5966_v13, 1  ;;  %v5974_v44 = vrot.slane %v5973_v2, 1  ;;  %v5986_v59 = vrot.slane %v5985_v0, 2  ;;  %v13804_v23 = vcombine.high %v13802_v6, %v13802_v6 }
 0xd87   : > { %13803 = vst [vmem:[#allocation23_spill] sm:$0xff] %v12884_v62  ;;  %v5980_v14 = vmax.f32 %v5978_v11, %v5979_v12  ;;  %v5992_v30 = vmax.f32 %v5990_v37, %v5991_v26  ;;  %v5999_v28 = vmax.f32 %v5997_v54, %v5998_v52  ;;  %v6011_v11 = vsel %vm5324_vm6, %v13807_v58, -inf }
 0xd88   : > { %v6004_v29 = vsel %vm5324_vm6, %v13804_v23, -inf  ;;  %v12890_v53 = vmax.f32 %v5966_v13, %v5967_v61  ;;  %v12892_v31 = vmax.f32 %v5973_v2, %v5974_v44  ;;  %v5987_v20 = vmax.f32 %v5985_v0, %v5986_v59  ;;  %v13810_v61 = vld [vmem:[#allocation25_spill] sm:$0xff] }
 0xd89   : > { %v5981_v33 = vrot.slane %v5980_v14, 1  ;;  %v6005_v57 = vrot.slane %v6004_v29, 4  ;;  %v5993_v43 = vrot.slane %v5992_v30, 2  ;;  %v6000_v37 = vrot.slane %v5999_v28, 2 }
 0xd8a   : > { %13805 = vst [vmem:[#allocation87_spill] sm:$0xff] %v12890_v53  ;;  %13806 = vst [vmem:[#allocation88_spill] sm:$0xff] %v12892_v31  ;;  %v6012_v26 = vrot.slane %v6011_v11, 4  ;;  %v5988_v6 = vrot.slane %v5987_v20, 1  ;;  %v13809_v13 = vcombine.high %v13807_v58, %v13807_v58  ;;  %v6025_v44 = vsel %vm5324_vm6, %v13810_v61, -inf }
 0xd8b   : > { %v12896_v18 = vmax.f32 %v5980_v14, %v5981_v33  ;;  %v6006_v12 = vmax.f32 %v6004_v29, %v6005_v57  ;;  %v5994_v62 = vmax.f32 %v5992_v30, %v5993_v43  ;;  %v6001_v2 = vmax.f32 %v5999_v28, %v6000_v37  ;;  %v13814_v37 = vld [vmem:[#allocation26_spill] sm:$0xff] }
 0xd8c   : > { %v6018_v54 = vsel %vm5324_vm6, %v13809_v13, -inf  ;;  %v6013_v52 = vmax.f32 %v6011_v11, %v6012_v26  ;;  %v12904_v23 = vmax.f32 %v5987_v20, %v5988_v6  ;;  %v6026_v33 = vrot.slane %v6025_v44, 4 }
 0xd8d   : > { %13808 = vst [vmem:[#allocation24_spill] sm:$0xff] %v12896_v18  ;;  %v6007_v0 = vrot.slane %v6006_v12, 2  ;;  %v6019_v59 = vrot.slane %v6018_v54, 4  ;;  %v5995_v14 = vrot.slane %v5994_v62, 1  ;;  %v13812_v29 = vcombine.high %v13810_v61, %v13810_v61 }
 0xd8e   : > { %13811 = vst [vmem:[#allocation25_spill] sm:$0xff] %v12904_v23  ;;  %v6002_v57 = vrot.slane %v6001_v2, 1  ;;  %v6014_v58 = vrot.slane %v6013_v52, 2  ;;  %v6027_v31 = vmax.f32 %v6025_v44, %v6026_v33  ;;  %v6039_v11 = vsel %vm5324_vm6, %v13814_v37, -inf }
 0xd8f   : > { %v6032_v30 = vsel %vm5324_vm6, %v13812_v29, -inf  ;;  %v6008_v43 = vmax.f32 %v6006_v12, %v6007_v0  ;;  %v6020_v13 = vmax.f32 %v6018_v54, %v6019_v59  ;;  %v12910_v18 = vmax.f32 %v5994_v62, %v5995_v14  ;;  %v13818_v29 = vld [vmem:[#allocation27_spill] sm:$0xff] }
 0xd90   : > { %v6033_v28 = vrot.slane %v6032_v30, 4  ;;  %v12914_v20 = vmax.f32 %v6001_v2, %v6002_v57  ;;  %v6015_v6 = vmax.f32 %v6013_v52, %v6014_v58  ;;  %v6028_v53 = vrot.slane %v6027_v31, 2 }
 0xd91   : > { %13813 = vst [vmem:[#allocation89_spill] sm:$0xff] %v12910_v18  ;;  %v6009_v26 = vrot.slane %v6008_v43, 1  ;;  %v6021_v23 = vrot.slane %v6020_v13, 2  ;;  %v6040_v16 = vrot.slane %v6039_v11, 4  ;;  %v13816_v12 = vcombine.high %v13814_v37, %v13814_v37 }
 0xd92   : > { %13815 = vst [vmem:[#allocation26_spill] sm:$0xff] %v12914_v20  ;;  %v6034_v61 = vmax.f32 %v6032_v30, %v6033_v28  ;;  %v6016_v44 = vrot.slane %v6015_v6, 1  ;;  %v6029_v14 = vmax.f32 %v6027_v31, %v6028_v53  ;;  %v6053_v52 = vsel %vm5324_vm6, %v13818_v29, -inf }
 0xd93   : > { %v6046_v54 = vsel %vm5324_vm6, %v13816_v12, -inf  ;;  %v12920_v62 = vmax.f32 %v6008_v43, %v6009_v26  ;;  %v6022_v0 = vmax.f32 %v6020_v13, %v6021_v23  ;;  %v6041_v2 = vmax.f32 %v6039_v11, %v6040_v16  ;;  %v13823_v12 = vld [vmem:[#allocation28_spill] sm:$0xff] }
 0xd94   : > { %v6047_v59 = vrot.slane %v6046_v54, 4  ;;  %v6035_v33 = vrot.slane %v6034_v61, 2  ;;  %v12924_v57 = vmax.f32 %v6015_v6, %v6016_v44  ;;  %v6054_v28 = vrot.slane %v6053_v52, 4 }
 0xd95   : > { %13817 = vst [vmem:[#allocation90_spill] sm:$0xff] %v12920_v62  ;;  %v6023_v30 = vrot.slane %v6022_v0, 1  ;;  %v6030_v20 = vrot.slane %v6029_v14, 1  ;;  %v6042_v18 = vrot.slane %v6041_v2, 2  ;;  %v13820_v43 = vcombine.high %v13818_v29, %v13818_v29 }
 0xd96   : > { %13819 = vst [vmem:[#allocation27_spill] sm:$0xff] %v12924_v57  ;;  %v6048_v58 = vmax.f32 %v6046_v54, %v6047_v59  ;;  %v6036_v37 = vmax.f32 %v6034_v61, %v6035_v33  ;;  %v6055_v16 = vmax.f32 %v6053_v52, %v6054_v28  ;;  %v6067_v54 = vsel %vm5324_vm6, %v13823_v12, -inf }
 0xd97   : > { %v6060_v23 = vsel %vm5324_vm6, %v13820_v43, -inf  ;;  %v12930_v13 = vmax.f32 %v6022_v0, %v6023_v30  ;;  %v12932_v11 = vmax.f32 %v6029_v14, %v6030_v20  ;;  %v6043_v6 = vmax.f32 %v6041_v2, %v6042_v18  ;;  %v13826_v30 = vld [vmem:[#allocation29_spill] sm:$0xff] }
 0xd98   : > { %v6049_v53 = vrot.slane %v6048_v58, 2  ;;  %v6061_v31 = vrot.slane %v6060_v23, 4  ;;  %v6037_v26 = vrot.slane %v6036_v37, 1  ;;  %v6056_v61 = vrot.slane %v6055_v16, 2 }
 0xd99   : > { %13821 = vst [vmem:[#allocation91_spill] sm:$0xff] %v12930_v13  ;;  %13822 = vst [vmem:[#allocation92_spill] sm:$0xff] %v12932_v11  ;;  %v6068_v33 = vrot.slane %v6067_v54, 4  ;;  %v6044_v29 = vrot.slane %v6043_v6, 1  ;;  %v13825_v0 = vcombine.high %v13823_v12, %v13823_v12  ;;  %v6081_v20 = vsel %vm5324_vm6, %v13826_v30, -inf }
 0xd9a   : > { %v6050_v44 = vmax.f32 %v6048_v58, %v6049_v53  ;;  %v6062_v59 = vmax.f32 %v6060_v23, %v6061_v31  ;;  %v12936_v57 = vmax.f32 %v6036_v37, %v6037_v26  ;;  %v6057_v18 = vmax.f32 %v6055_v16, %v6056_v61  ;;  %v13830_v16 = vld [vmem:[#allocation30_spill] sm:$0xff] }
 0xd9b   : > { %v6074_v52 = vsel %vm5324_vm6, %v13825_v0, -inf  ;;  %v6069_v28 = vmax.f32 %v6067_v54, %v6068_v33  ;;  %v12944_v43 = vmax.f32 %v6043_v6, %v6044_v29  ;;  %v6082_v23 = vrot.slane %v6081_v20, 4 }
 0xd9c   : > { %13824 = vst [vmem:[#allocation28_spill] sm:$0xff] %v12936_v57  ;;  %v6051_v14 = vrot.slane %v6050_v44, 1  ;;  %v6063_v2 = vrot.slane %v6062_v59, 2  ;;  %v6075_v58 = vrot.slane %v6074_v52, 4  ;;  %v13828_v37 = vcombine.high %v13826_v30, %v13826_v30 }
 0xd9d   : > { %13827 = vst [vmem:[#allocation29_spill] sm:$0xff] %v12944_v43  ;;  %v6058_v26 = vrot.slane %v6057_v18, 1  ;;  %v6070_v0 = vrot.slane %v6069_v28, 2  ;;  %v6083_v11 = vmax.f32 %v6081_v20, %v6082_v23  ;;  %v6095_v54 = vsel %vm5324_vm6, %v13830_v16, -inf }
 0xd9e   : > { %v6088_v53 = vsel %vm5324_vm6, %v13828_v37, -inf  ;;  %v12950_v31 = vmax.f32 %v6050_v44, %v6051_v14  ;;  %v6064_v12 = vmax.f32 %v6062_v59, %v6063_v2  ;;  %v6076_v57 = vmax.f32 %v6074_v52, %v6075_v58  ;;  %v13834_v37 = vld [vmem:[#allocation31_spill] sm:$0xff] }
 0xd9f   : > { %v6089_v13 = vrot.slane %v6088_v53, 4  ;;  %v12954_v6 = vmax.f32 %v6057_v18, %v6058_v26  ;;  %v6071_v33 = vmax.f32 %v6069_v28, %v6070_v0  ;;  %v6096_v29 = vrot.slane %v6095_v54, 4 }
 0xda0   : > { %13829 = vst [vmem:[#allocation93_spill] sm:$0xff] %v12950_v31  ;;  %v6065_v61 = vrot.slane %v6064_v12, 1  ;;  %v6077_v43 = vrot.slane %v6076_v57, 2  ;;  %v6084_v30 = vrot.slane %v6083_v11, 2  ;;  %v13832_v44 = vcombine.high %v13830_v16, %v13830_v16  ;;  %v13930_v42 = vld [vmem:[#allocation91_spill] sm:$0xff] }
 0xda1   : > { %13831 = vst [vmem:[#allocation30_spill] sm:$0xff] %v12954_v6  ;;  %v6090_v62 = vmax.f32 %v6088_v53, %v6089_v13  ;;  %v6072_v52 = vrot.slane %v6071_v33, 1  ;;  %v6097_v20 = vmax.f32 %v6095_v54, %v6096_v29  ;;  %v6109_v28 = vsel %vm5324_vm6, %v13834_v37, -inf }
 0xda2   : > { %v6102_v59 = vsel %vm5324_vm6, %v13832_v44, -inf  ;;  %v12960_v14 = vmax.f32 %v6064_v12, %v6065_v61  ;;  %v6078_v58 = vmax.f32 %v6076_v57, %v6077_v43  ;;  %v6085_v23 = vmax.f32 %v6083_v11, %v6084_v30  ;;  %v13839_v44 = vld [vmem:[#allocation32_spill] sm:$0xff] }
 0xda3   : > { %v6103_v2 = vrot.slane %v6102_v59, 4  ;;  %v6091_v18 = vrot.slane %v6090_v62, 2  ;;  %v12964_v26 = vmax.f32 %v6071_v33, %v6072_v52  ;;  %v6098_v0 = vrot.slane %v6097_v20, 2 }
 0xda4   : > { %13833 = vst [vmem:[#allocation94_spill] sm:$0xff] %v12960_v14  ;;  %v6110_v53 = vrot.slane %v6109_v28, 4  ;;  %v6079_v31 = vrot.slane %v6078_v58, 1  ;;  %v6086_v16 = vrot.slane %v6085_v23, 1  ;;  %v13836_v12 = vcombine.high %v13834_v37, %v13834_v37 }
 0xda5   : > { %13835 = vst [vmem:[#allocation31_spill] sm:$0xff] %v12964_v26  ;;  %v6104_v13 = vmax.f32 %v6102_v59, %v6103_v2  ;;  %v6092_v6 = vmax.f32 %v6090_v62, %v6091_v18  ;;  %v6099_v61 = vmax.f32 %v6097_v20, %v6098_v0  ;;  %v6123_v59 = vsel %vm5324_vm6, %v13839_v44, -inf }
 0xda6   : > { %v6116_v54 = vsel %vm5324_vm6, %v13836_v12, -inf  ;;  %v6111_v11 = vmax.f32 %v6109_v28, %v6110_v53  ;;  %v12970_v29 = vmax.f32 %v6078_v58, %v6079_v31  ;;  %v12972_v30 = vmax.f32 %v6085_v23, %v6086_v16  ;;  %v13842_v31 = vld [vmem:[#allocation33_spill] sm:$0xff] }
 0xda7   : > { %v6105_v57 = vrot.slane %v6104_v13, 2  ;;  %v6117_v43 = vrot.slane %v6116_v54, 4  ;;  %v6093_v33 = vrot.slane %v6092_v6, 1  ;;  %v6100_v52 = vrot.slane %v6099_v61, 1 }
 0xda8   : > { %13837 = vst [vmem:[#allocation95_spill] sm:$0xff] %v12970_v29  ;;  %13838 = vst [vmem:[#allocation96_spill] sm:$0xff] %v12972_v30  ;;  %v6112_v62 = vrot.slane %v6111_v11, 2  ;;  %v6124_v37 = vrot.slane %v6123_v59, 4  ;;  %v13841_v20 = vcombine.high %v13839_v44, %v13839_v44  ;;  %v6137_v58 = vsel %vm5324_vm6, %v13842_v31, -inf }
 0xda9   : > { %v6106_v2 = vmax.f32 %v6104_v13, %v6105_v57  ;;  %v6118_v18 = vmax.f32 %v6116_v54, %v6117_v43  ;;  %v12976_v26 = vmax.f32 %v6092_v6, %v6093_v33  ;;  %v12984_v23 = vmax.f32 %v6099_v61, %v6100_v52  ;;  %v13846_v52 = vld [vmem:[#allocation34_spill] sm:$0xff] }
 0xdaa   : > { %v6130_v28 = vsel %vm5324_vm6, %v13841_v20, -inf  ;;  %v6113_v53 = vmax.f32 %v6111_v11, %v6112_v62  ;;  %v6125_v12 = vmax.f32 %v6123_v59, %v6124_v37  ;;  %v6138_v57 = vrot.slane %v6137_v58, 4 }
 0xdab   : > { %13840 = vst [vmem:[#allocation32_spill] sm:$0xff] %v12976_v26  ;;  %13843 = vst [vmem:[#allocation33_spill] sm:$0xff] %v12984_v23  ;;  %v6107_v0 = vrot.slane %v6106_v2, 1  ;;  %v6119_v16 = vrot.slane %v6118_v18, 2  ;;  %v6131_v13 = vrot.slane %v6130_v28, 4  ;;  %v13844_v6 = vcombine.high %v13842_v31, %v13842_v31 }
 0xdac   : > { %v6114_v33 = vrot.slane %v6113_v53, 1  ;;  %v6126_v26 = vrot.slane %v6125_v12, 2  ;;  %v6139_v61 = vmax.f32 %v6137_v58, %v6138_v57  ;;  %v6151_v11 = vsel %vm5324_vm6, %v13846_v52, -inf }
 0xdad   : > { %v6144_v54 = vsel %vm5324_vm6, %v13844_v6, -inf  ;;  %v12990_v43 = vmax.f32 %v6106_v2, %v6107_v0  ;;  %v6120_v44 = vmax.f32 %v6118_v18, %v6119_v16  ;;  %v6132_v30 = vmax.f32 %v6130_v28, %v6131_v13  ;;  %v13850_v6 = vld [vmem:[#allocation35_spill] sm:$0xff] }
 0xdae   : > { %v6145_v20 = vrot.slane %v6144_v54, 4  ;;  %v12994_v62 = vmax.f32 %v6113_v53, %v6114_v33  ;;  %v6152_v23 = vrot.slane %v6151_v11, 4  ;;  %v6127_v29 = vmax.f32 %v6125_v12, %v6126_v26 }
 0xdaf   : > { %13845 = vst [vmem:[#allocation97_spill] sm:$0xff] %v12990_v43  ;;  %v6121_v59 = vrot.slane %v6120_v44, 1  ;;  %v6133_v31 = vrot.slane %v6132_v30, 2  ;;  %v6140_v14 = vrot.slane %v6139_v61, 2  ;;  %v13848_v2 = vcombine.high %v13846_v52, %v13846_v52 }
 0xdb0   : > { %13847 = vst [vmem:[#allocation34_spill] sm:$0xff] %v12994_v62  ;;  %v6146_v37 = vmax.f32 %v6144_v54, %v6145_v20  ;;  %v6153_v58 = vmax.f32 %v6151_v11, %v6152_v23  ;;  %v6128_v13 = vrot.slane %v6127_v29, 1  ;;  %v6165_v54 = vsel %vm5324_vm6, %v13850_v6, -inf }
 0xdb1   : > { %v6158_v18 = vsel %vm5324_vm6, %v13848_v2, -inf  ;;  %v13000_v0 = vmax.f32 %v6120_v44, %v6121_v59  ;;  %v6134_v57 = vmax.f32 %v6132_v30, %v6133_v31  ;;  %v6141_v53 = vmax.f32 %v6139_v61, %v6140_v14  ;;  %v13855_v2 = vld [vmem:[#allocation36_spill] sm:$0xff] }
 0xdb2   : > { %v6147_v28 = vrot.slane %v6146_v37, 2  ;;  %v6159_v16 = vrot.slane %v6158_v18, 4  ;;  %v6154_v26 = vrot.slane %v6153_v58, 2  ;;  %v6166_v20 = vrot.slane %v6165_v54, 4 }
 0xdb3   : > { %13849 = vst [vmem:[#allocation98_spill] sm:$0xff] %v13000_v0  ;;  %v13004_v62 = vmax.f32 %v6127_v29, %v6128_v13  ;;  %v6135_v52 = vrot.slane %v6134_v57, 1  ;;  %v6142_v43 = vrot.slane %v6141_v53, 1  ;;  %v13852_v44 = vcombine.high %v13850_v6, %v13850_v6 }
 0xdb4   : > { %v6148_v33 = vmax.f32 %v6146_v37, %v6147_v28  ;;  %v6160_v12 = vmax.f32 %v6158_v18, %v6159_v16  ;;  %v6155_v59 = vmax.f32 %v6153_v58, %v6154_v26  ;;  %v6167_v14 = vmax.f32 %v6165_v54, %v6166_v20 }
 0xdb5   : > { %13851 = vst [vmem:[#allocation35_spill] sm:$0xff] %v13004_v62  ;;  %v6172_v23 = vsel %vm5324_vm6, %v13852_v44, -inf  ;;  %v13010_v61 = vmax.f32 %v6134_v57, %v6135_v52  ;;  %v13012_v31 = vmax.f32 %v6141_v53, %v6142_v43  ;;  %v6179_v29 = vsel %vm5324_vm6, %v13855_v2, -inf  ;;  %v13858_v57 = vld [vmem:[#allocation37_spill] sm:$0xff] }
 0xdb6   : > { %v6149_v11 = vrot.slane %v6148_v33, 1  ;;  %v6161_v30 = vrot.slane %v6160_v12, 2  ;;  %v6173_v37 = vrot.slane %v6172_v23, 4  ;;  %v6156_v28 = vrot.slane %v6155_v59, 1 }
 0xdb7   : > { %13853 = vst [vmem:[#allocation99_spill] sm:$0xff] %v13010_v61  ;;  %13854 = vst [vmem:[#allocation100_spill] sm:$0xff] %v13012_v31  ;;  %v6168_v13 = vrot.slane %v6167_v14, 2  ;;  %v6180_v62 = vrot.slane %v6179_v29, 4  ;;  %v13857_v58 = vcombine.high %v13855_v2, %v13855_v2  ;;  %v6193_v43 = vsel %vm5324_vm6, %v13858_v57, -inf }
 0xdb8   : > { %v13016_v18 = vmax.f32 %v6148_v33, %v6149_v11  ;;  %v6162_v16 = vmax.f32 %v6160_v12, %v6161_v30  ;;  %v6174_v6 = vmax.f32 %v6172_v23, %v6173_v37  ;;  %v13024_v53 = vmax.f32 %v6155_v59, %v6156_v28  ;;  %v13861_v28 = vld [vmem:[#allocation38_spill] sm:$0xff] }
 0xdb9   : > { %v6186_v54 = vsel %vm5324_vm6, %v13857_v58, -inf  ;;  %v6169_v20 = vmax.f32 %v6167_v14, %v6168_v13  ;;  %v6181_v44 = vmax.f32 %v6179_v29, %v6180_v62  ;;  %v6194_v11 = vrot.slane %v6193_v43, 4 }
 0xdba   : > { %13856 = vst [vmem:[#allocation36_spill] sm:$0xff] %v13016_v18  ;;  %13859 = vst [vmem:[#allocation37_spill] sm:$0xff] %v13024_v53  ;;  %v6163_v26 = vrot.slane %v6162_v16, 1  ;;  %v6187_v52 = vrot.slane %v6186_v54, 4  ;;  %v6175_v33 = vrot.slane %v6174_v6, 2  ;;  %v13860_v12 = vcombine.high %v13858_v57, %v13858_v57 }
 0xdbb   : > { %v6170_v37 = vrot.slane %v6169_v20, 1  ;;  %v6182_v31 = vrot.slane %v6181_v44, 2  ;;  %v6195_v59 = vmax.f32 %v6193_v43, %v6194_v11  ;;  %v6207_v14 = vsel %vm5324_vm6, %v13861_v28, -inf }
 0xdbc   : > { %v6200_v23 = vsel %vm5324_vm6, %v13860_v12, -inf  ;;  %v13030_v30 = vmax.f32 %v6162_v16, %v6163_v26  ;;  %v6188_v2 = vmax.f32 %v6186_v54, %v6187_v52  ;;  %v6176_v18 = vmax.f32 %v6174_v6, %v6175_v33 }
 0xdbd   : > { %v6201_v58 = vrot.slane %v6200_v23, 4  ;;  %v13034_v13 = vmax.f32 %v6169_v20, %v6170_v37  ;;  %v6208_v53 = vrot.slane %v6207_v14, 4  ;;  %v6183_v57 = vmax.f32 %v6181_v44, %v6182_v31 }
 0xdbe   : > { %v6189_v62 = vrot.slane %v6188_v2, 2  ;;  %v6177_v61 = vrot.slane %v6176_v18, 1  ;;  %v6196_v0 = vrot.slane %v6195_v59, 2  ;;  %v13862_v16 = vcombine.high %v13861_v28, %v13861_v28  ;;  %v13942_v21 = vld [vmem:[#allocation99_spill] sm:$0xff] }
 0xdbf   : > { %v6202_v29 = vmax.f32 %v6200_v23, %v6201_v58  ;;  %v6209_v52 = vmax.f32 %v6207_v14, %v6208_v53  ;;  %v6184_v11 = vrot.slane %v6183_v57, 1  ;;  %vm6349_vm7 = vcmask 1041409  }
 0xdc0   : > { %v6214_v54 = vsel %vm5324_vm6, %v13862_v16, -inf  ;;  %v6190_v26 = vmax.f32 %v6188_v2, %v6189_v62  ;;  %v13040_v33 = vmax.f32 %v6176_v18, %v6177_v61  ;;  %v6197_v20 = vmax.f32 %v6195_v59, %v6196_v0  ;;  %v13863_v62 = vld [vmem:[#allocation39_spill] sm:$0xff]  ;;  %v13875_v16 = vld [vmem:[#allocation54_spill] sm:$0xff]  ;;  %v13885_v2 = vld [vmem:[#allocation64_spill] sm:$0xff] }
 0xdc1   : > { %v6203_v6 = vrot.slane %v6202_v29, 2  ;;  %v6215_v43 = vrot.slane %v6214_v54, 4  ;;  %v6210_v31 = vrot.slane %v6209_v52, 2  ;;  %v13044_v58 = vmax.f32 %v6183_v57, %v6184_v11  ;;  %v13864_v57 = vld [vmem:[#allocation40_spill] sm:$0xff] }
 0xdc2   : > { %v6191_v23 = vrot.slane %v6190_v26, 1  ;;  %v6198_v28 = vrot.slane %v6197_v20, 1  ;;  %vm6351_vm8 = vcmask 1042434   ;;  %v6248_v12 = vmax.f32 %v12654_v17, %v12694_v39  ;;  %v13907_v17 = vld [vmem:[#allocation22_spill] sm:$0xff] }
 0xdc3   : > { %v6204_v37 = vmax.f32 %v6202_v29, %v6203_v6  ;;  %v6216_v44 = vmax.f32 %v6214_v54, %v6215_v43  ;;  %v6211_v0 = vmax.f32 %v6209_v52, %v6210_v31  ;;  %vm6353_vm9 = vcmask 1043459   ;;  %v13886_v29 = vld [vmem:[#allocation69_spill] sm:$0xff]  ;;  %v13909_v39 = vld [vmem:[#allocation86_spill] sm:$0xff]  ;;  %v13929_v52 = vld [vmem:[#allocation95_spill] sm:$0xff] }
 0xdc4   : > { %v13050_v61 = vmax.f32 %v6190_v26, %v6191_v23  ;;  %v13052_v14 = vmax.f32 %v6197_v20, %v6198_v28  ;;  %vm6355_vm10 = vcmask 1044484   ;;  %vm6357_vm11 = vcmask 1045509   ;;  %v13910_v31 = vld [vmem:[#allocation82_spill] sm:$0xff]  ;;  %v13928_v26 = vld [vmem:[#allocation27_spill] sm:$0xff] }
 0xdc5   : > { %v6205_v18 = vrot.slane %v6204_v37, 1  ;;  %v6217_v59 = vrot.slane %v6216_v44, 2  ;;  %v6212_v11 = vrot.slane %v6211_v0, 1  ;;  %vm6359_vm12 = vcmask 1046534   ;;  %v13925_v28 = vld [vmem:[#allocation94_spill] sm:$0xff] }
 0xdc6   : > { %v6262_v20 = vmax.f32 %v13910_v31, %v13909_v39  ;;  %vm6361_vm13 = vcmask 1047559   ;;  %v13923_v31 = vld [vmem:[#allocation30_spill] sm:$0xff]  ;;  %v6280_v51 = vmax.f32 %v13942_v21, %v13050_v61  ;;  %v13948_v61 = vmax.f32 %v12482_v55, %v12522_v34 }
 0xdc7   : > { %v13060_v43 = vmax.f32 %v6204_v37, %v6205_v18  ;;  %v6218_v53 = vmax.f32 %v6216_v44, %v6217_v59  ;;  %v13072_v6 = vmax.f32 %v6211_v0, %v6212_v11  ;;  %v13869_v18 = vld [vmem:[#allocation47_spill] sm:$0xff]  ;;  %v6237_v0 = vmax.f32 %v13875_v16, %v12598_v1  ;;  %v13887_v1 = vld [vmem:[#allocation65_spill] sm:$0xff]  ;;  %v13924_v39 = vld [vmem:[#allocation26_spill] sm:$0xff] }
 0xdc8   : > { %v6238_v44 = vmax.f32 %v12564_v60, %v12604_v36  ;;  %v6239_v59 = vmax.f32 %v12568_v24, %v12608_v49  ;;  %v13883_v60 = vld [vmem:[#allocation63_spill] sm:$0xff]  ;;  %v6246_v36 = vmax.f32 %v12644_v50, %v12684_v19  ;;  %v6247_v49 = vmax.f32 %v12648_v25, %v12688_v3  ;;  %v13908_v3 = vld [vmem:[#allocation13_spill] sm:$0xff]  ;;  %v13932_v19 = vld [vmem:[#allocation92_spill] sm:$0xff] }
 0xdc9   : > { %v6219_v37 = vrot.slane %v6218_v53, 1  ;;  %v6245_v24 = vmax.f32 %v13883_v60, %v12678_v38  ;;  %v6261_v23 = vmax.f32 %v13908_v3, %v13907_v17  ;;  %v6269_v5 = vmax.f32 %v13924_v39, %v13923_v31  ;;  %v13934_v16 = vld [vmem:[#allocation28_spill] sm:$0xff]  ;;  %v13936_v3 = vld [vmem:[#allocation29_spill] sm:$0xff] }
 0xdca   : > { %v6272_v60 = vmax.f32 %v13930_v42, %v13929_v52  ;;  %v13938_v39 = vld [vmem:[#allocation93_spill] sm:$0xff]  ;;  %v13941_v42 = vld [vmem:[#allocation35_spill] sm:$0xff]  ;;  %v13943_v25 = vld [vmem:[#allocation100_spill] sm:$0xff]  ;;  %v13952_v34 = vmax.f32 %v13863_v62, %v12454_v8  ;;  %v13956_v8 = vmax.f32 %v13869_v18, %v12536_v56 }
 0xdcb   : > { %v13086_v11 = vmax.f32 %v6218_v53, %v6219_v37  ;;  %v6249_v53 = vmax.f32 %v13885_v2, %v13884_v7  ;;  %v6250_v37 = vmax.f32 %v13887_v1, %v13886_v29  ;;  %v13926_v7 = vld [vmem:[#allocation90_spill] sm:$0xff]  ;;  %v13927_v1 = vld [vmem:[#allocation31_spill] sm:$0xff]  ;;  %v6279_v52 = vmax.f32 %v13941_v42, %v13044_v58  ;;  %v13944_v17 = vld [vmem:[#allocation36_spill] sm:$0xff] }
 0xdcc   : > { %v6270_v2 = vmax.f32 %v13926_v7, %v13925_v28  ;;  %v6271_v29 = vmax.f32 %v13928_v26, %v13927_v1  ;;  %v13939_v28 = vld [vmem:[#allocation34_spill] sm:$0xff]  ;;  %v6281_v38 = vmax.f32 %v13943_v25, %v13052_v14  ;;  %v6282_v54 = vmax.f32 %v13944_v17, %v13060_v43  ;;  %v13945_v50 = vld [vmem:[#allocation37_spill] sm:$0xff]  ;;  %v13966_v56 = vld [vmem:[#allocation56_spill] sm:$0xff] }
 0xdcd   : > { %v6277_v7 = vmax.f32 %v13939_v28, %v13034_v13  ;;  %v13940_v26 = vld [vmem:[#allocation98_spill] sm:$0xff]  ;;  %v6283_v31 = vmax.f32 %v13945_v50, %v13072_v6  ;;  %v6284_v13 = vmax.f32 %v13030_v30, %v13086_v11  ;;  %v13947_v58 = vmax.f32 %v12404_v4, %v12444_v27  ;;  %v13967_v18 = vld [vmem:[#allocation60_spill] sm:$0xff] }
 0xdce   : > { %v6278_v1 = vmax.f32 %v13940_v26, %v13040_v33  ;;  %v13946_v33 = vmax.f32 %v12402_v15, %v12442_v46  ;;  %v13949_v14 = vmax.f32 %v12484_v35, %v12524_v47  ;;  %v6370_v6 = vsel %vm6349_vm7, %v6238_v44, %v6237_v0 }
 0xdcf   : > { %v6377_v50 = vsel %vm6349_vm7, %v6246_v36, %v6245_v24  ;;  %v13950_v15 = vmax.f32 %v12406_v9, %v12448_v45  ;;  %v13951_v46 = vmax.f32 %v12488_v41, %v12528_v32  ;;  %v6371_v55 = vsel %vm6351_vm8, %v6239_v59, %v6370_v6 }
 0xdd0   : > { %v6350_v21 = vsel %vm6349_vm7, %v13947_v58, %v13946_v33  ;;  %v6363_v43 = vsel %vm6349_vm7, %v13949_v14, %v13948_v61  ;;  %v6378_v35 = vsel %vm6351_vm8, %v6247_v49, %v6377_v50  ;;  %v13953_v44 = vmax.f32 %v12490_v22, %v12534_v63  ;;  %v13957_v22 = vld [vmem:[#allocation55_spill] sm:$0xff]  ;;  %v13961_v49 = vld [vmem:[#allocation44_spill] sm:$0xff]  ;;  %v13969_v58 = vld [vmem:[#allocation42_spill] sm:$0xff] }
 0xdd1   : > { %v6352_v4 = vsel %vm6351_vm8, %v13950_v15, %v6350_v21  ;;  %v6364_v27 = vsel %vm6351_vm8, %v13951_v46, %v6363_v43  ;;  %v13954_v45 = vmax.f32 %v12574_v40, %v12614_v48  ;;  %v6379_v32 = vsel %vm6353_vm9, %v6248_v12, %v6378_v35  ;;  %v13958_v63 = vld [vmem:[#allocation59_spill] sm:$0xff]  ;;  %v13960_v48 = vld [vmem:[#allocation41_spill] sm:$0xff]  ;;  %v13973_v43 = vld [vmem:[#allocation52_spill] sm:$0xff] }
 0xdd2   : > { %v6354_v47 = vsel %vm6353_vm9, %v13952_v34, %v6352_v4  ;;  %v6365_v9 = vsel %vm6353_vm9, %v13953_v44, %v6364_v27  ;;  %v13955_v59 = vmax.f32 %v13864_v57, %v12456_v10  ;;  %v13959_v24 = vmax.f32 %v13957_v22, %v13958_v63  ;;  %v13963_v10 = vld [vmem:[#allocation48_spill] sm:$0xff]  ;;  %v13964_v57 = vld [vmem:[#allocation51_spill] sm:$0xff]  ;;  %v13970_v21 = vld [vmem:[#allocation45_spill] sm:$0xff] }
 0xdd3   : > { %v6372_v41 = vsel %vm6353_vm9, %v13954_v45, %v6371_v55  ;;  %v6366_v62 = vsel %vm6355_vm10, %v13956_v8, %v6365_v9  ;;  %v6380_v40 = vsel %vm6355_vm10, %v6249_v53, %v6379_v32  ;;  %v13962_v12 = vmax.f32 %v13960_v48, %v13961_v49  ;;  %v13972_v14 = vld [vmem:[#allocation49_spill] sm:$0xff]  ;;  %v13978_v55 = vld [vmem:[#allocation66_spill] sm:$0xff]  ;;  %v13993_v49 = vld [vmem:[#allocation72_spill] sm:$0xff] }
 0xdd4   : > { %v6356_v0 = vsel %vm6355_vm10, %v13955_v59, %v6354_v47  ;;  %v6373_v36 = vsel %vm6355_vm10, %v13959_v24, %v6372_v41  ;;  %v13965_v17 = vmax.f32 %v13963_v10, %v13964_v57  ;;  %v13968_v26 = vmax.f32 %v13966_v56, %v13967_v18  ;;  %v13975_v15 = vld [vmem:[#allocation57_spill] sm:$0xff]  ;;  %v13979_v35 = vld [vmem:[#allocation70_spill] sm:$0xff]  ;;  %v13981_v47 = vld [vmem:[#allocation43_spill] sm:$0xff] }
 0xdd5   : > { %v6358_v25 = vsel %vm6357_vm11, %v13962_v12, %v6356_v0  ;;  %v6381_v33 = vsel %vm6357_vm11, %v6250_v37, %v6380_v40  ;;  %v13971_v53 = vmax.f32 %v13969_v58, %v13970_v21  ;;  %v13974_v6 = vmax.f32 %v13972_v14, %v13973_v43  ;;  %v13976_v4 = vld [vmem:[#allocation61_spill] sm:$0xff]  ;;  %v13982_v44 = vld [vmem:[#allocation46_spill] sm:$0xff]  ;;  %v13990_v24 = vld [vmem:[#allocation67_spill] sm:$0xff] }
 0xdd6   : > { %v6367_v28 = vsel %vm6357_vm11, %v13965_v17, %v6366_v62  ;;  %v6374_v42 = vsel %vm6357_vm11, %v13968_v26, %v6373_v36  ;;  %v13977_v46 = vmax.f32 %v13975_v15, %v13976_v4  ;;  %v13980_v34 = vmax.f32 %v13978_v55, %v13979_v35  ;;  %v13984_v41 = vld [vmem:[#allocation50_spill] sm:$0xff]  ;;  %v13985_v32 = vld [vmem:[#allocation53_spill] sm:$0xff]  ;;  %v13991_v36 = vld [vmem:[#allocation71_spill] sm:$0xff] }
 0xdd7   : > { %v6360_v61 = vsel %vm6359_vm12, %v13971_v53, %v6358_v25  ;;  %v6368_v50 = vsel %vm6359_vm12, %v13974_v6, %v6367_v28  ;;  %v13983_v9 = vmax.f32 %v13981_v47, %v13982_v44  ;;  %v13986_v59 = vmax.f32 %v13984_v41, %v13985_v32  ;;  %v13987_v8 = vld [vmem:[#allocation58_spill] sm:$0xff]  ;;  %v13996_v10 = vld [vmem:[#allocation73_spill] sm:$0xff]  ;;  %v14005_v53 = vld [vmem:[#allocation75_spill] sm:$0xff] }
 0xdd8   : > { %v6375_v27 = vsel %vm6359_vm12, %v13977_v46, %v6374_v42  ;;  %v6382_v37 = vsel %vm6359_vm12, %v13980_v34, %v6381_v33  ;;  %v13988_v62 = vld [vmem:[#allocation62_spill] sm:$0xff]  ;;  %v13992_v40 = vmax.f32 %v13990_v24, %v13991_v36  ;;  %v6391_v56 = vsel %vm6349_vm7, %v6262_v20, %v6261_v23  ;;  %v14002_v20 = vld [vmem:[#allocation12_spill] sm:$0xff]  ;;  %v14008_v6 = vld [vmem:[#allocation83_spill] sm:$0xff] }
 0xdd9   : > { %v6362_v45 = vsel %vm6361_vm13, %v13983_v9, %v6360_v61  ;;  %v6369_v0 = vsel %vm6361_vm13, %v13986_v59, %v6368_v50  ;;  %v13989_v22 = vmax.f32 %v13987_v8, %v13988_v62  ;;  %v13994_v12 = vld [vmem:[#allocation14_spill] sm:$0xff]  ;;  %v6398_v18 = vsel %vm6349_vm7, %v6270_v2, %v6269_v5  ;;  %v14003_v5 = vld [vmem:[#allocation23_spill] sm:$0xff]  ;;  %v14011_v55 = vld [vmem:[#allocation76_spill] sm:$0xff] }
 0xdda   : > { %v6383_v48 = vsel %vm6361_vm13, %v13992_v40, %v6382_v37  ;;  %v13995_v25 = vmax.f32 %v13993_v49, %v13994_v12  ;;  %v13997_v57 = vld [vmem:[#allocation78_spill] sm:$0xff]  ;;  %v6405_v26 = vsel %vm6349_vm7, %v6278_v1, %v6277_v7  ;;  %6420 = vst [vmem:[%s13290_s16] sm:$0xff] %v6362_v45  ;;  %6421 = vst [vmem:[%s13290_s16 + $0x8] sm:$0xff] %v6369_v0  ;;  %v14006_v61 = vld [vmem:[#allocation79_spill] sm:$0xff] }
 0xddb   : > { %v6376_v63 = vsel %vm6361_vm13, %v13989_v22, %v6375_v27  ;;  %v13998_v17 = vmax.f32 %v13996_v10, %v13997_v57  ;;  %6423 = vst [vmem:[%s13290_s16 + $0x18] sm:$0xff] %v6383_v48  ;;  %v13999_v42 = vld [vmem:[#allocation74_spill] sm:$0xff]  ;;  %v14004_v2 = vmax.f32 %v14002_v20, %v14003_v5  ;;  %v6399_v1 = vsel %vm6351_vm8, %v6271_v29, %v6398_v18  ;;  %v14009_v50 = vld [vmem:[#allocation87_spill] sm:$0xff]  ;;  %v14012_v29 = vld [vmem:[#allocation80_spill] sm:$0xff] }
 0xddc   : > { %6422 = vst [vmem:[%s13290_s16 + $0x10] sm:$0xff] %v6376_v63  ;;  %v14000_v33 = vld [vmem:[#allocation18_spill] sm:$0xff]  ;;  %v6406_v21 = vsel %vm6351_vm8, %v6279_v52, %v6405_v26  ;;  %v14007_v14 = vmax.f32 %v14005_v53, %v14006_v61  ;;  %v14010_v15 = vmax.f32 %v14008_v6, %v14009_v50  ;;  %v6400_v46 = vsel %vm6353_vm9, %v6272_v60, %v6399_v1  ;;  %v14014_v34 = vld [vmem:[#allocation84_spill] sm:$0xff]  ;;  %v14020_v32 = vld [vmem:[#allocation15_spill] sm:$0xff] }
 0xddd   : > { %v6384_v28 = vsel %vm6349_vm7, %v13998_v17, %v13995_v25  ;;  %v14001_v58 = vmax.f32 %v13999_v42, %v14000_v33  ;;  %v6392_v7 = vsel %vm6351_vm8, %v14004_v2, %v6391_v56  ;;  %v6407_v27 = vsel %vm6353_vm9, %v6280_v51, %v6406_v21  ;;  %v14015_v37 = vld [vmem:[#allocation88_spill] sm:$0xff]  ;;  %v14027_v40 = vld [vmem:[#allocation17_spill] sm:$0xff]  ;;  %v14028_v48 = vld [vmem:[#allocation19_spill] sm:$0xff] }
 0xdde   : > { %v6393_v4 = vsel %vm6353_vm9, %v14010_v15, %v6392_v7  ;;  %v14013_v35 = vmax.f32 %v14011_v55, %v14012_v29  ;;  %v14016_v47 = vmax.f32 %v14014_v34, %v14015_v37  ;;  %v14017_v9 = vld [vmem:[#allocation96_spill] sm:$0xff]  ;;  %v6408_v51 = vsel %vm6355_vm10, %v6281_v38, %v6407_v27  ;;  %v14030_v25 = vld [vmem:[#allocation21_spill] sm:$0xff] }
 0xddf   : > { %v6385_v23 = vsel %vm6351_vm8, %v14001_v58, %v6384_v28  ;;  %v14018_v45 = vmax.f32 %v13932_v19, %v14017_v9  ;;  %v14019_v60 = vld [vmem:[#allocation16_spill] sm:$0xff]  ;;  %v6409_v38 = vsel %vm6357_vm11, %v6282_v54, %v6408_v51  ;;  %v14029_v49 = vmax.f32 %v14027_v40, %v14028_v48  ;;  %v14031_v10 = vld [vmem:[#allocation25_spill] sm:$0xff] }
 0xde0   : > { %v6386_v43 = vsel %vm6353_vm9, %v14007_v14, %v6385_v23  ;;  %v6394_v44 = vsel %vm6355_vm10, %v14016_v47, %v6393_v4  ;;  %v14021_v59 = vmax.f32 %v14019_v60, %v14020_v32  ;;  %v14022_v8 = vld [vmem:[#allocation20_spill] sm:$0xff]  ;;  %v14032_v57 = vmax.f32 %v14030_v25, %v14031_v10  ;;  %v14033_v28 = vld [vmem:[#allocation33_spill] sm:$0xff] }
 0xde1   : > { %v6387_v52 = vsel %vm6355_vm10, %v14013_v35, %v6386_v43  ;;  %v6401_v41 = vsel %vm6355_vm10, %v14018_v45, %v6400_v46  ;;  %v14023_v62 = vld [vmem:[#allocation24_spill] sm:$0xff]  ;;  %v14034_v56 = vmax.f32 %v13936_v3, %v14033_v28  ;;  %v6410_v18 = vsel %vm6359_vm12, %v6283_v31, %v6409_v38  ;;  %v14035_v54 = vld [vmem:[#allocation77_spill] sm:$0xff] }
 0xde2   : > { %v6388_v0 = vsel %vm6357_vm11, %v14021_v59, %v6387_v52  ;;  %v14024_v22 = vmax.f32 %v14022_v8, %v14023_v62  ;;  %v14025_v24 = vld [vmem:[#allocation32_spill] sm:$0xff]  ;;  %v14036_v26 = vld [vmem:[#allocation81_spill] sm:$0xff]  ;;  %v6411_v7 = vsel %vm6361_vm13, %v6284_v13, %v6410_v18 }
 0xde3   : > { %v14026_v19 = vmax.f32 %v13934_v16, %v14025_v24  ;;  %v6389_v12 = vsel %vm6359_vm12, %v14029_v49, %v6388_v0  ;;  %v14037_v42 = vmax.f32 %v14035_v54, %v14036_v26  ;;  %v14038_v3 = vld [vmem:[#allocation85_spill] sm:$0xff]  ;;  %6427 = vst [vmem:[%s13290_s16 + $0x38] sm:$0xff] %v6411_v7 }
 0xde4   : > { %v6395_v63 = vsel %vm6357_vm11, %v14024_v22, %v6394_v44  ;;  %v14039_v58 = vld [vmem:[#allocation89_spill] sm:$0xff] }
 0xde5   : > { %v6402_v36 = vsel %vm6357_vm11, %v14026_v19, %v6401_v41  ;;  %v6396_v17 = vsel %vm6359_vm12, %v14032_v57, %v6395_v63  ;;  %v6390_v33 = vsel %vm6361_vm13, %v14037_v42, %v6389_v12  ;;  %v14040_v23 = vmax.f32 %v14038_v3, %v14039_v58  ;;  %v14041_v31 = vld [vmem:[#allocation97_spill] sm:$0xff] }
 0xde6   : > { %v6403_v16 = vsel %vm6359_vm12, %v14034_v56, %v6402_v36  ;;  %v14042_v5 = vmax.f32 %v13938_v39, %v14041_v31  ;;  %6424 = vst [vmem:[%s13290_s16 + $0x20] sm:$0xff] %v6390_v33 }
 0xde7   : > { %v6397_v20 = vsel %vm6361_vm13, %v14040_v23, %v6396_v17 }
 0xde8   : > { %v6404_v2 = vsel %vm6361_vm13, %v14042_v5, %v6403_v16  ;;  %6425 = vst [vmem:[%s13290_s16 + $0x28] sm:$0xff] %v6397_v20 }
 0xde9   : > { %6426 = vst [vmem:[%s13290_s16 + $0x30] sm:$0xff] %v6404_v2 }
 0xdea   : > { %8391 = shalt.err (!%p8388_p13)
}
 0xdeb   : > { %s8392_s17 = scalar_lea.hbm %s13360_s23, 1024  ;;  %s8396_s28 = scalar_lea.hbm %s13435_s7, 2048 }
 0xdec   : > { %p8393_p1 = scmp.ne.s32.totalorder %s13360_s23, %s8392_s17  ;;  %p8397_p6 = scmp.lt.u32.totalorder %s13360_s23, %s13435_s7 }
 0xded   : > { %p8398_p10 = scmp.lt.u32.totalorder %s8396_s28, %s8392_s17  ;;  %p8400_p2 = scmp.lt.u32.totalorder %s8392_s17, %s13360_s23 }
 0xdee   : > { %p8394_p0 = pnand %p8393_p1, %p13763_p9 }
 0xdef   : > { %p8399_p12 = por %p8398_p10, %p8397_p6 }
 0xdf0   : > { %p8395_p5 = pneg %p8394_p0 }
 0xdf1   : > { %p8401_p3 = por %p8400_p2, %p8399_p12 }
 0xdf3   : > { %p8402_p4 = pnand %p8401_p3, %p8395_p5 }
 0xdf5   : > { %8405 = shalt.err (!%p8402_p4)
}
 0xdf6   : > { %8246 = dma.vmem_to_hbm [thread:$0]  (%p13763_p9), %s13362_s21, 1024, %s13360_s23, %s6434_s8, %s8458_s20, %s8458_s20, %s8459_s15  }
 0xdf7 PF: > { %p8262_p7 = scmp.ge.s32.totalorder %s8448_s27, 2  ;;  %s6478_s9 = sand.u32 1, %s8436_s24  }
 0xdf8   : > { %p14043_p8 = scmp.ne.s32.totalorder %s13593_s12, 0  ;;  %s6479_s18 = scalar_lea.sflag [#allocation5], %s6478_s9 }
 0xdfa   : > { %p8254_p11 = pnand %p8262_p7, %p14043_p8 }
 0xdfc   : > { %8427 = dma.done.wait (!%p8254_p11), %s6479_s18, 4096  }
 0xdfd   : > { %8429 = vsyncadd (!%p8254_p11), %s6479_s18, 4294963200  ;;  %s6488_s11 = scalar_lea.sflag [#allocation8], %s6478_s9 }
 0xdfe   : > { %8431 = dma.done.wait (!%p8254_p11), %s6488_s11, 1024  }
 0xdff   : > { %8433 = vsyncadd (!%p8254_p11), %s6488_s11, 4294966272  ;;  %p22_p9 = scmp.ge.s32.totalorder %s8526_s30, 4   ;;  %s14044_s24 = smov %s8440_s25 }
 0xe00   : > { %s14045_s25 = smov %s8444_s26  ;;  %s14046_s26 = smov %s8537_s10 }
 0xe01   : > { %s14047_s27 = smov %s8526_s30  ;;  %24 = sbr.rel (!%p22_p9) target bundleno = 6 (0x6), region = 105 }
 0xe08   :  { %6493 = vsyncpa [#allocation4], 1 }
 0xe09   :  { %6495 = vsyncpa [#allocation4 + $0x1], 1 }
 0xe0a   :  { %6496 = vsyncpa [#allocation5], 1 }
 0xe0b   :  { %6498 = vsyncpa [#allocation5 + $0x1], 1 }
 0xe0c   :  { %6499 = vsyncpa [#allocation8], 1 }
 0xe0d   :  { %6501 = vsyncpa [#allocation8 + $0x1], 1 }

</bundles_post_ra>
